<compile_context>
chip_gen: v7x
topology: tpu7x:2x2x1
jax: 0.10.0
libtpu: 0.0.40
codegen_flags: <defaults>
</compile_context>

<pallas_src>
import jax
import jax.numpy as jnp
from jax.experimental import pallas as pl
from jax.experimental.pallas import tpu as pltpu

_H = 32                  # spatial size required by the original Net (fc1 expects 16*5*5)
_HW = _H * _H            # 1024 lanes per example
_PAD = 384               # lane zero-padding, >= max shift (264), multiple of 128
_CONV_SPLIT = 13 * 8     # 104 rows: taps [0,13) | [13,25); both <=128 (v5e MXU depth)
_VMEM = pl.BlockSpec(memory_space=pltpu.MemorySpace.VMEM)


# ------------------------------ Pallas kernel -------------------------------

def _lenet_kernel(x_ref, w1_ref, b1_ref, w2_ref, b2_ref, sel_ref,
                  w1f_ref, b1f_ref, w2f_ref, b2f_ref, w3f_ref, b3f_ref,
                  o_ref,
                  s1_ref, s2_ref, ya_ref, yb_ref, yc_ref, fcin_ref):
    f32 = jnp.float32
    bf16 = jnp.bfloat16
    n_batch = o_ref.shape[0]
    nl = n_batch * _HW

    # Zero padded staging buffers once: zero lane halo + zero rows that are
    # multiplied by zero weight columns (must be finite -> make them 0).
    ya_ref[...] = jnp.zeros_like(ya_ref)
    yb_ref[...] = jnp.zeros_like(yb_ref)
    yc_ref[...] = jnp.zeros_like(yc_ref)

    # ---- conv1 (3->6, 5x5, valid) + ReLU: stacked-tap fused matmul ----------
    for t in range(25):
        d = (t // 5) * _H + (t % 5)                       # lane shift of tap (i, j)
        s1_ref[t * 8:(t + 1) * 8, :] = x_ref[:, d:d + nl]  # 8 rows: 3 channels + 5 zeros
    acc1 = (jnp.dot(w1_ref[:, 0:_CONV_SPLIT], s1_ref[0:_CONV_SPLIT, :],
                    preferred_element_type=f32)
            + jnp.dot(w1_ref[:, _CONV_SPLIT:200], s1_ref[_CONV_SPLIT:200, :],
                      preferred_element_type=f32))
    ya_ref[:, 0:nl] = jnp.maximum(acc1 + b1_ref[...], 0.0)   # valid where h, w < 28

    # ---- maxpool 2x2 stride 2: result on the stride-2 lane grid -------------
    p1 = jnp.maximum(
        jnp.maximum(ya_ref[:, 0:nl], ya_ref[:, 1:1 + nl]),
        jnp.maximum(ya_ref[:, _H:_H + nl], ya_ref[:, _H + 1:_H + 1 + nl]))
    yb_ref[0:6, 0:nl] = p1.astype(bf16)                   # rows 6,7 stay zero

    # ---- conv2 (6->16, 5x5 on the pooled stride-2 grid) + ReLU --------------
    for t in range(25):
        d = (t // 5) * 2 * _H + (t % 5) * 2               # pooled grid: stride-2 lanes
        s2_ref[t * 8:(t + 1) * 8, :] = yb_ref[:, d:d + nl]
    acc2 = (jnp.dot(w2_ref[:, 0:_CONV_SPLIT], s2_ref[0:_CONV_SPLIT, :],
                    preferred_element_type=f32)
            + jnp.dot(w2_ref[:, _CONV_SPLIT:200], s2_ref[_CONV_SPLIT:200, :],
                      preferred_element_type=f32))
    yc_ref[:, 0:nl] = jnp.maximum(acc2 + b2_ref[...], 0.0)   # 10x10 map, stride-2 lanes

    # ---- maxpool 2x2 again: 5x5 map on the stride-4 lane grid ---------------
    p2 = jnp.maximum(
        jnp.maximum(yc_ref[:, 0:nl], yc_ref[:, 2:2 + nl]),
        jnp.maximum(yc_ref[:, 2 * _H:2 * _H + nl],
                    yc_ref[:, 2 * _H + 2:2 * _H + 2 + nl]))

    # ---- gather the 16x5x5 valid values per example into a (N, 400) row -----
    # sel is a constant 0/1 (1024, 25) matrix: column e*5+f picks lane 128e+4f.
    for n in range(n_batch):
        t_n = jnp.dot(p2[:, n * _HW:(n + 1) * _HW].astype(bf16), sel_ref[...],
                      preferred_element_type=f32)         # (16, 25)
        for c in range(16):                               # flatten as c*25 + e*5 + f
            fcin_ref[n:n + 1, c * 25:(c + 1) * 25] = t_n[c:c + 1, :]

    # ---- fc1 (400->120) + ReLU, fc2 (120->84) + ReLU, fc3 (84->10) ----------
    h = jnp.maximum(jnp.dot(fcin_ref[...].astype(bf16), w1f_ref[...],
                            preferred_element_type=f32) + b1f_ref[...], 0.0)
    h = jnp.maximum(jnp.dot(h.astype(bf16), w2f_ref[...],
                            preferred_element_type=f32) + b2f_ref[...], 0.0)
    o_ref[...] = (jnp.dot(h.astype(bf16), w3f_ref[...],
                          preferred_element_type=f32) + b3f_ref[...])


# ------------------------------ host-side prep ------------------------------

def init_params(key):
    ks = jax.random.split(key, 10)

    def u(k, shape, fan_in):
        bound = 1.0 / jnp.sqrt(fan_in)
        return jax.random.uniform(k, shape, jnp.float32, -bound, bound)

    return {
        "conv1_w": u(ks[0], (6, 3, 5, 5), 3 * 5 * 5),
        "conv1_b": u(ks[1], (6,), 3 * 5 * 5),
        "conv2_w": u(ks[2], (16, 6, 5, 5), 6 * 5 * 5),
        "conv2_b": u(ks[3], (16,), 6 * 5 * 5),
        "fc1_w": u(ks[4], (120, 400), 400),
        "fc1_b": u(ks[5], (120,), 400),
        "fc2_w": u(ks[6], (84, 120), 120),
        "fc2_b": u(ks[7], (84,), 120),
        "fc3_w": u(ks[8], (10, 84), 84),
        "fc3_b": u(ks[9], (10,), 84),
    }


def prepare_params(params):
    """One-time repack of PyTorch-layout params into the kernel's layouts."""
    def conv_pack(w):
        # (Cout, Cin, 5, 5) -> (Cout, 25*8) bf16, tap-major, Cin padded to 8
        # rows so every stacked tap block is an aligned 8-row store in-kernel.
        co, ci = w.shape[0], w.shape[1]
        w = jnp.transpose(w, (0, 2, 3, 1)).reshape(co, 25, ci)
        w = jnp.pad(w, ((0, 0), (0, 0), (0, 8 - ci)))
        return w.reshape(co, 200).astype(jnp.bfloat16)

    # Batch-independent 0/1 gather: column e*5+f picks lane 4e*H + 4f within
    # one example's 1024 lanes (the valid pooled 5x5 positions).
    rows = jnp.array([4 * e * _H + 4 * f for e in range(5) for f in range(5)])
    sel = jnp.zeros((_HW, 25), jnp.float32).at[rows, jnp.arange(25)].set(1.0)

    return {
        "w1": conv_pack(params["conv1_w"]),
        "b1": params["conv1_b"].reshape(6, 1),
        "w2": conv_pack(params["conv2_w"]),
        "b2": params["conv2_b"].reshape(16, 1),
        "sel": sel.astype(jnp.bfloat16),                       # (1024, 25) ~50 KB
        "w1fc": params["fc1_w"].T.astype(jnp.bfloat16),        # (400, 120)
        "b1fc": params["fc1_b"].reshape(1, 120),
        "w2fc": params["fc2_w"].T.astype(jnp.bfloat16),        # (120, 84)
        "b2fc": params["fc2_b"].reshape(1, 84),
        "w3fc": params["fc3_w"].T.astype(jnp.bfloat16),        # (84, 10)
        "b3fc": params["fc3_b"].reshape(1, 10),
    }


# --------------------------------- forward ----------------------------------

@jax.jit
def net_forward(prep, x_nchw):
    n = x_nchw.shape[0]
    assert x_nchw.shape[1:] == (3, _H, _H), "Net requires (N, 3, 32, 32) input"
    nl = n * _HW
    nlp = nl + _PAD

    # (N, 3, 32, 32) -> (3, N*H*W) bf16, pre-padded to 8 channel rows (rows 3..7
    # zero) and nlp lanes (zero halo) so the kernel never concatenates.
    xr = jnp.transpose(x_nchw, (1, 0, 2, 3)).reshape(3, nl).astype(jnp.bfloat16)
    xp = jnp.zeros((8, nlp), jnp.bfloat16).at[:3, :nl].set(xr)

    return pl.pallas_call(
        _lenet_kernel,
        out_shape=jax.ShapeDtypeStruct((n, 10), jnp.float32),
        in_specs=[_VMEM] * 12,
        out_specs=_VMEM,
        scratch_shapes=[
            pltpu.VMEM((200, nl), jnp.bfloat16),   # s1: conv1 stacked taps (25 x 8 rows)
            pltpu.VMEM((200, nl), jnp.bfloat16),   # s2: conv2 stacked taps
            pltpu.VMEM((6, nlp), jnp.float32),     # ya: padded conv1+ReLU output
            pltpu.VMEM((8, nlp), jnp.bfloat16),    # yb: padded pool1 (rows 6,7 zero)
            pltpu.VMEM((16, nlp), jnp.float32),    # yc: padded conv2+ReLU output
            pltpu.VMEM((n, 400), jnp.float32),     # fcin: flattened fc1 input
        ],
    )(xp, prep["w1"], prep["b1"], prep["w2"], prep["b2"], prep["sel"],
      prep["w1fc"], prep["b1fc"], prep["w2fc"], prep["b2fc"],
      prep["w3fc"], prep["b3fc"])


if __name__ == "__main__":
    key = jax.random.PRNGKey(0)
    k_params, k_x = jax.random.split(key)
    params = init_params(k_params)
    prep = prepare_params(params)
    x = jax.random.normal(k_x, (2, 3, 32, 32), dtype=jnp.float32)

    out = net_forward(prep, x)
    out = jax.block_until_ready(out)
    assert out.shape == (2, 10) and out.dtype == jnp.float32
    print("KERNEL_OK")
</pallas_src>

<mosaic_0001>
module attributes {stable_mosaic.version = 11 : i64} {
  func.func @_lenet_kernel(%arg0: memref<8x2432xbf16, #tpu.memory_space<vmem>>, %arg1: memref<6x200xbf16, #tpu.memory_space<vmem>>, %arg2: memref<6x1xf32, #tpu.memory_space<vmem>>, %arg3: memref<16x200xbf16, #tpu.memory_space<vmem>>, %arg4: memref<16x1xf32, #tpu.memory_space<vmem>>, %arg5: memref<1024x25xbf16, #tpu.memory_space<vmem>>, %arg6: memref<400x120xbf16, #tpu.memory_space<vmem>>, %arg7: memref<1x120xf32, #tpu.memory_space<vmem>>, %arg8: memref<120x84xbf16, #tpu.memory_space<vmem>>, %arg9: memref<1x84xf32, #tpu.memory_space<vmem>>, %arg10: memref<84x10xbf16, #tpu.memory_space<vmem>>, %arg11: memref<1x10xf32, #tpu.memory_space<vmem>>, %arg12: memref<2x10xf32, #tpu.memory_space<vmem>>, %arg13: memref<200x2048xbf16, #tpu.memory_space<vmem>>, %arg14: memref<200x2048xbf16, #tpu.memory_space<vmem>>, %arg15: memref<6x2432xf32, #tpu.memory_space<vmem>>, %arg16: memref<8x2432xbf16, #tpu.memory_space<vmem>>, %arg17: memref<16x2432xf32, #tpu.memory_space<vmem>>, %arg18: memref<2x400xf32, #tpu.memory_space<vmem>>) attributes {dimension_semantics = [], scalar_prefetch = 0 : i64, scratch_operands = 6 : i64, tpu.core_type = #tpu.core_type<tc>} {
    %cst = arith.constant 0.000000e+00 : f32
    %0 = vector.broadcast %cst : f32 to vector<6x2432xf32>
    %c0 = arith.constant 0 : index
    %c0_0 = arith.constant 0 : index
    %1 = vector.load %arg15[%c0, %c0_0] : memref<6x2432xf32, #tpu.memory_space<vmem>>, vector<6x2432xf32>
    tpu.vector_store %arg15[%c0, %c0_0], %0 {strides = array<i32>} : memref<6x2432xf32, #tpu.memory_space<vmem>>, vector<6x2432xf32>,
    %cst_1 = arith.constant 0.000000e+00 : bf16
    %2 = vector.broadcast %cst_1 : bf16 to vector<8x2432xbf16>
    %c0_2 = arith.constant 0 : index
    %c0_3 = arith.constant 0 : index
    %3 = vector.load %arg16[%c0_2, %c0_3] : memref<8x2432xbf16, #tpu.memory_space<vmem>>, vector<8x2432xbf16>
    tpu.vector_store %arg16[%c0_2, %c0_3], %2 {strides = array<i32>} : memref<8x2432xbf16, #tpu.memory_space<vmem>>, vector<8x2432xbf16>,
    %cst_4 = arith.constant 0.000000e+00 : f32
    %4 = vector.broadcast %cst_4 : f32 to vector<16x2432xf32>
    %c0_5 = arith.constant 0 : index
    %c0_6 = arith.constant 0 : index
    %5 = vector.load %arg17[%c0_5, %c0_6] : memref<16x2432xf32, #tpu.memory_space<vmem>>, vector<16x2432xf32>
    tpu.vector_store %arg17[%c0_5, %c0_6], %4 {strides = array<i32>} : memref<16x2432xf32, #tpu.memory_space<vmem>>, vector<16x2432xf32>,
    %c0_7 = arith.constant 0 : index
    %c0_8 = arith.constant 0 : index
    %6 = vector.load %arg0[%c0_7, %c0_8] : memref<8x2432xbf16, #tpu.memory_space<vmem>>, vector<8x2048xbf16>
    %c0_9 = arith.constant 0 : index
    %c0_10 = arith.constant 0 : index
    %7 = vector.load %arg13[%c0_9, %c0_10] : memref<200x2048xbf16, #tpu.memory_space<vmem>>, vector<8x2048xbf16>
    tpu.vector_store %arg13[%c0_9, %c0_10], %6 {strides = array<i32>} : memref<200x2048xbf16, #tpu.memory_space<vmem>>, vector<8x2048xbf16>,
    %c0_11 = arith.constant 0 : index
    %c1 = arith.constant 1 : index
    %8 = vector.load %arg0[%c0_11, %c1] : memref<8x2432xbf16, #tpu.memory_space<vmem>>, vector<8x2048xbf16>
    %c8 = arith.constant 8 : index
    %c0_12 = arith.constant 0 : index
    %9 = vector.load %arg13[%c8, %c0_12] : memref<200x2048xbf16, #tpu.memory_space<vmem>>, vector<8x2048xbf16>
    tpu.vector_store %arg13[%c8, %c0_12], %8 {strides = array<i32>} : memref<200x2048xbf16, #tpu.memory_space<vmem>>, vector<8x2048xbf16>,
    %c0_13 = arith.constant 0 : index
    %c2 = arith.constant 2 : index
    %10 = vector.load %arg0[%c0_13, %c2] : memref<8x2432xbf16, #tpu.memory_space<vmem>>, vector<8x2048xbf16>
    %c16 = arith.constant 16 : index
    %c0_14 = arith.constant 0 : index
    %11 = vector.load %arg13[%c16, %c0_14] : memref<200x2048xbf16, #tpu.memory_space<vmem>>, vector<8x2048xbf16>
    tpu.vector_store %arg13[%c16, %c0_14], %10 {strides = array<i32>} : memref<200x2048xbf16, #tpu.memory_space<vmem>>, vector<8x2048xbf16>,
    %c0_15 = arith.constant 0 : index
    %c3 = arith.constant 3 : index
    %12 = vector.load %arg0[%c0_15, %c3] : memref<8x2432xbf16, #tpu.memory_space<vmem>>, vector<8x2048xbf16>
    %c24 = arith.constant 24 : index
    %c0_16 = arith.constant 0 : index
    %13 = vector.load %arg13[%c24, %c0_16] : memref<200x2048xbf16, #tpu.memory_space<vmem>>, vector<8x2048xbf16>
    tpu.vector_store %arg13[%c24, %c0_16], %12 {strides = array<i32>} : memref<200x2048xbf16, #tpu.memory_space<vmem>>, vector<8x2048xbf16>,
    %c0_17 = arith.constant 0 : index
    %c4 = arith.constant 4 : index
    %14 = vector.load %arg0[%c0_17, %c4] : memref<8x2432xbf16, #tpu.memory_space<vmem>>, vector<8x2048xbf16>
    %c32 = arith.constant 32 : index
    %c0_18 = arith.constant 0 : index
    %15 = vector.load %arg13[%c32, %c0_18] : memref<200x2048xbf16, #tpu.memory_space<vmem>>, vector<8x2048xbf16>
    tpu.vector_store %arg13[%c32, %c0_18], %14 {strides = array<i32>} : memref<200x2048xbf16, #tpu.memory_space<vmem>>, vector<8x2048xbf16>,
    %c0_19 = arith.constant 0 : index
    %c32_20 = arith.constant 32 : index
    %16 = vector.load %arg0[%c0_19, %c32_20] : memref<8x2432xbf16, #tpu.memory_space<vmem>>, vector<8x2048xbf16>
    %c40 = arith.constant 40 : index
    %c0_21 = arith.constant 0 : index
    %17 = vector.load %arg13[%c40, %c0_21] : memref<200x2048xbf16, #tpu.memory_space<vmem>>, vector<8x2048xbf16>
    tpu.vector_store %arg13[%c40, %c0_21], %16 {strides = array<i32>} : memref<200x2048xbf16, #tpu.memory_space<vmem>>, vector<8x2048xbf16>,
    %c0_22 = arith.constant 0 : index
    %c33 = arith.constant 33 : index
    %18 = vector.load %arg0[%c0_22, %c33] : memref<8x2432xbf16, #tpu.memory_space<vmem>>, vector<8x2048xbf16>
    %c48 = arith.constant 48 : index
    %c0_23 = arith.constant 0 : index
    %19 = vector.load %arg13[%c48, %c0_23] : memref<200x2048xbf16, #tpu.memory_space<vmem>>, vector<8x2048xbf16>
    tpu.vector_store %arg13[%c48, %c0_23], %18 {strides = array<i32>} : memref<200x2048xbf16, #tpu.memory_space<vmem>>, vector<8x2048xbf16>,
    %c0_24 = arith.constant 0 : index
    %c34 = arith.constant 34 : index
    %20 = vector.load %arg0[%c0_24, %c34] : memref<8x2432xbf16, #tpu.memory_space<vmem>>, vector<8x2048xbf16>
    %c56 = arith.constant 56 : index
    %c0_25 = arith.constant 0 : index
    %21 = vector.load %arg13[%c56, %c0_25] : memref<200x2048xbf16, #tpu.memory_space<vmem>>, vector<8x2048xbf16>
    tpu.vector_store %arg13[%c56, %c0_25], %20 {strides = array<i32>} : memref<200x2048xbf16, #tpu.memory_space<vmem>>, vector<8x2048xbf16>,
    %c0_26 = arith.constant 0 : index
    %c35 = arith.constant 35 : index
    %22 = vector.load %arg0[%c0_26, %c35] : memref<8x2432xbf16, #tpu.memory_space<vmem>>, vector<8x2048xbf16>
    %c64 = arith.constant 64 : index
    %c0_27 = arith.constant 0 : index
    %23 = vector.load %arg13[%c64, %c0_27] : memref<200x2048xbf16, #tpu.memory_space<vmem>>, vector<8x2048xbf16>
    tpu.vector_store %arg13[%c64, %c0_27], %22 {strides = array<i32>} : memref<200x2048xbf16, #tpu.memory_space<vmem>>, vector<8x2048xbf16>,
    %c0_28 = arith.constant 0 : index
    %c36 = arith.constant 36 : index
    %24 = vector.load %arg0[%c0_28, %c36] : memref<8x2432xbf16, #tpu.memory_space<vmem>>, vector<8x2048xbf16>
    %c72 = arith.constant 72 : index
    %c0_29 = arith.constant 0 : index
    %25 = vector.load %arg13[%c72, %c0_29] : memref<200x2048xbf16, #tpu.memory_space<vmem>>, vector<8x2048xbf16>
    tpu.vector_store %arg13[%c72, %c0_29], %24 {strides = array<i32>} : memref<200x2048xbf16, #tpu.memory_space<vmem>>, vector<8x2048xbf16>,
    %c0_30 = arith.constant 0 : index
    %c64_31 = arith.constant 64 : index
    %26 = vector.load %arg0[%c0_30, %c64_31] : memref<8x2432xbf16, #tpu.memory_space<vmem>>, vector<8x2048xbf16>
    %c80 = arith.constant 80 : index
    %c0_32 = arith.constant 0 : index
    %27 = vector.load %arg13[%c80, %c0_32] : memref<200x2048xbf16, #tpu.memory_space<vmem>>, vector<8x2048xbf16>
    tpu.vector_store %arg13[%c80, %c0_32], %26 {strides = array<i32>} : memref<200x2048xbf16, #tpu.memory_space<vmem>>, vector<8x2048xbf16>,
    %c0_33 = arith.constant 0 : index
    %c65 = arith.constant 65 : index
    %28 = vector.load %arg0[%c0_33, %c65] : memref<8x2432xbf16, #tpu.memory_space<vmem>>, vector<8x2048xbf16>
    %c88 = arith.constant 88 : index
    %c0_34 = arith.constant 0 : index
    %29 = vector.load %arg13[%c88, %c0_34] : memref<200x2048xbf16, #tpu.memory_space<vmem>>, vector<8x2048xbf16>
    tpu.vector_store %arg13[%c88, %c0_34], %28 {strides = array<i32>} : memref<200x2048xbf16, #tpu.memory_space<vmem>>, vector<8x2048xbf16>,
    %c0_35 = arith.constant 0 : index
    %c66 = arith.constant 66 : index
    %30 = vector.load %arg0[%c0_35, %c66] : memref<8x2432xbf16, #tpu.memory_space<vmem>>, vector<8x2048xbf16>
    %c96 = arith.constant 96 : index
    %c0_36 = arith.constant 0 : index
    %31 = vector.load %arg13[%c96, %c0_36] : memref<200x2048xbf16, #tpu.memory_space<vmem>>, vector<8x2048xbf16>
    tpu.vector_store %arg13[%c96, %c0_36], %30 {strides = array<i32>} : memref<200x2048xbf16, #tpu.memory_space<vmem>>, vector<8x2048xbf16>,
    %c0_37 = arith.constant 0 : index
    %c67 = arith.constant 67 : index
    %32 = vector.load %arg0[%c0_37, %c67] : memref<8x2432xbf16, #tpu.memory_space<vmem>>, vector<8x2048xbf16>
    %c104 = arith.constant 104 : index
    %c0_38 = arith.constant 0 : index
    %33 = vector.load %arg13[%c104, %c0_38] : memref<200x2048xbf16, #tpu.memory_space<vmem>>, vector<8x2048xbf16>
    tpu.vector_store %arg13[%c104, %c0_38], %32 {strides = array<i32>} : memref<200x2048xbf16, #tpu.memory_space<vmem>>, vector<8x2048xbf16>,
    %c0_39 = arith.constant 0 : index
    %c68 = arith.constant 68 : index
    %34 = vector.load %arg0[%c0_39, %c68] : memref<8x2432xbf16, #tpu.memory_space<vmem>>, vector<8x2048xbf16>
    %c112 = arith.constant 112 : index
    %c0_40 = arith.constant 0 : index
    %35 = vector.load %arg13[%c112, %c0_40] : memref<200x2048xbf16, #tpu.memory_space<vmem>>, vector<8x2048xbf16>
    tpu.vector_store %arg13[%c112, %c0_40], %34 {strides = array<i32>} : memref<200x2048xbf16, #tpu.memory_space<vmem>>, vector<8x2048xbf16>,
    %c0_41 = arith.constant 0 : index
    %c96_42 = arith.constant 96 : index
    %36 = vector.load %arg0[%c0_41, %c96_42] : memref<8x2432xbf16, #tpu.memory_space<vmem>>, vector<8x2048xbf16>
    %c120 = arith.constant 120 : index
    %c0_43 = arith.constant 0 : index
    %37 = vector.load %arg13[%c120, %c0_43] : memref<200x2048xbf16, #tpu.memory_space<vmem>>, vector<8x2048xbf16>
    tpu.vector_store %arg13[%c120, %c0_43], %36 {strides = array<i32>} : memref<200x2048xbf16, #tpu.memory_space<vmem>>, vector<8x2048xbf16>,
    %c0_44 = arith.constant 0 : index
    %c97 = arith.constant 97 : index
    %38 = vector.load %arg0[%c0_44, %c97] : memref<8x2432xbf16, #tpu.memory_space<vmem>>, vector<8x2048xbf16>
    %c128 = arith.constant 128 : index
    %c0_45 = arith.constant 0 : index
    %39 = vector.load %arg13[%c128, %c0_45] : memref<200x2048xbf16, #tpu.memory_space<vmem>>, vector<8x2048xbf16>
    tpu.vector_store %arg13[%c128, %c0_45], %38 {strides = array<i32>} : memref<200x2048xbf16, #tpu.memory_space<vmem>>, vector<8x2048xbf16>,
    %c0_46 = arith.constant 0 : index
    %c98 = arith.constant 98 : index
    %40 = vector.load %arg0[%c0_46, %c98] : memref<8x2432xbf16, #tpu.memory_space<vmem>>, vector<8x2048xbf16>
    %c136 = arith.constant 136 : index
    %c0_47 = arith.constant 0 : index
    %41 = vector.load %arg13[%c136, %c0_47] : memref<200x2048xbf16, #tpu.memory_space<vmem>>, vector<8x2048xbf16>
    tpu.vector_store %arg13[%c136, %c0_47], %40 {strides = array<i32>} : memref<200x2048xbf16, #tpu.memory_space<vmem>>, vector<8x2048xbf16>,
    %c0_48 = arith.constant 0 : index
    %c99 = arith.constant 99 : index
    %42 = vector.load %arg0[%c0_48, %c99] : memref<8x2432xbf16, #tpu.memory_space<vmem>>, vector<8x2048xbf16>
    %c144 = arith.constant 144 : index
    %c0_49 = arith.constant 0 : index
    %43 = vector.load %arg13[%c144, %c0_49] : memref<200x2048xbf16, #tpu.memory_space<vmem>>, vector<8x2048xbf16>
    tpu.vector_store %arg13[%c144, %c0_49], %42 {strides = array<i32>} : memref<200x2048xbf16, #tpu.memory_space<vmem>>, vector<8x2048xbf16>,
    %c0_50 = arith.constant 0 : index
    %c100 = arith.constant 100 : index
    %44 = vector.load %arg0[%c0_50, %c100] : memref<8x2432xbf16, #tpu.memory_space<vmem>>, vector<8x2048xbf16>
    %c152 = arith.constant 152 : index
    %c0_51 = arith.constant 0 : index
    %45 = vector.load %arg13[%c152, %c0_51] : memref<200x2048xbf16, #tpu.memory_space<vmem>>, vector<8x2048xbf16>
    tpu.vector_store %arg13[%c152, %c0_51], %44 {strides = array<i32>} : memref<200x2048xbf16, #tpu.memory_space<vmem>>, vector<8x2048xbf16>,
    %c0_52 = arith.constant 0 : index
    %c128_53 = arith.constant 128 : index
    %46 = vector.load %arg0[%c0_52, %c128_53] : memref<8x2432xbf16, #tpu.memory_space<vmem>>, vector<8x2048xbf16>
    %c160 = arith.constant 160 : index
    %c0_54 = arith.constant 0 : index
    %47 = vector.load %arg13[%c160, %c0_54] : memref<200x2048xbf16, #tpu.memory_space<vmem>>, vector<8x2048xbf16>
    tpu.vector_store %arg13[%c160, %c0_54], %46 {strides = array<i32>} : memref<200x2048xbf16, #tpu.memory_space<vmem>>, vector<8x2048xbf16>,
    %c0_55 = arith.constant 0 : index
    %c129 = arith.constant 129 : index
    %48 = vector.load %arg0[%c0_55, %c129] : memref<8x2432xbf16, #tpu.memory_space<vmem>>, vector<8x2048xbf16>
    %c168 = arith.constant 168 : index
    %c0_56 = arith.constant 0 : index
    %49 = vector.load %arg13[%c168, %c0_56] : memref<200x2048xbf16, #tpu.memory_space<vmem>>, vector<8x2048xbf16>
    tpu.vector_store %arg13[%c168, %c0_56], %48 {strides = array<i32>} : memref<200x2048xbf16, #tpu.memory_space<vmem>>, vector<8x2048xbf16>,
    %c0_57 = arith.constant 0 : index
    %c130 = arith.constant 130 : index
    %50 = vector.load %arg0[%c0_57, %c130] : memref<8x2432xbf16, #tpu.memory_space<vmem>>, vector<8x2048xbf16>
    %c176 = arith.constant 176 : index
    %c0_58 = arith.constant 0 : index
    %51 = vector.load %arg13[%c176, %c0_58] : memref<200x2048xbf16, #tpu.memory_space<vmem>>, vector<8x2048xbf16>
    tpu.vector_store %arg13[%c176, %c0_58], %50 {strides = array<i32>} : memref<200x2048xbf16, #tpu.memory_space<vmem>>, vector<8x2048xbf16>,
    %c0_59 = arith.constant 0 : index
    %c131 = arith.constant 131 : index
    %52 = vector.load %arg0[%c0_59, %c131] : memref<8x2432xbf16, #tpu.memory_space<vmem>>, vector<8x2048xbf16>
    %c184 = arith.constant 184 : index
    %c0_60 = arith.constant 0 : index
    %53 = vector.load %arg13[%c184, %c0_60] : memref<200x2048xbf16, #tpu.memory_space<vmem>>, vector<8x2048xbf16>
    tpu.vector_store %arg13[%c184, %c0_60], %52 {strides = array<i32>} : memref<200x2048xbf16, #tpu.memory_space<vmem>>, vector<8x2048xbf16>,
    %c0_61 = arith.constant 0 : index
    %c132 = arith.constant 132 : index
    %54 = vector.load %arg0[%c0_61, %c132] : memref<8x2432xbf16, #tpu.memory_space<vmem>>, vector<8x2048xbf16>
    %c192 = arith.constant 192 : index
    %c0_62 = arith.constant 0 : index
    %55 = vector.load %arg13[%c192, %c0_62] : memref<200x2048xbf16, #tpu.memory_space<vmem>>, vector<8x2048xbf16>
    tpu.vector_store %arg13[%c192, %c0_62], %54 {strides = array<i32>} : memref<200x2048xbf16, #tpu.memory_space<vmem>>, vector<8x2048xbf16>,
    %c0_63 = arith.constant 0 : index
    %c0_64 = arith.constant 0 : index
    %56 = vector.load %arg1[%c0_63, %c0_64] : memref<6x200xbf16, #tpu.memory_space<vmem>>, vector<6x104xbf16>
    %c0_65 = arith.constant 0 : index
    %c0_66 = arith.constant 0 : index
    %57 = vector.load %arg13[%c0_65, %c0_66] : memref<200x2048xbf16, #tpu.memory_space<vmem>>, vector<104x2048xbf16>
    %cst_67 = arith.constant dense<0.000000e+00> : vector<6x2048xf32>
    %58 = tpu.matmul %56, %57, %cst_67 {dimension_numbers = #tpu.dot_dimension_numbers<[1], [0], [0], [1], [0, 0, 1, 1], [], []>} : vector<6x104xbf16>, vector<104x2048xbf16>, vector<6x2048xf32> -> vector<6x2048xf32>
    %c0_68 = arith.constant 0 : index
    %c104_69 = arith.constant 104 : index
    %59 = vector.load %arg1[%c0_68, %c104_69] : memref<6x200xbf16, #tpu.memory_space<vmem>>, vector<6x96xbf16>
    %c104_70 = arith.constant 104 : index
    %c0_71 = arith.constant 0 : index
    %60 = vector.load %arg13[%c104_70, %c0_71] : memref<200x2048xbf16, #tpu.memory_space<vmem>>, vector<96x2048xbf16>
    %cst_72 = arith.constant dense<0.000000e+00> : vector<6x2048xf32>
    %61 = tpu.matmul %59, %60, %cst_72 {dimension_numbers = #tpu.dot_dimension_numbers<[1], [0], [0], [1], [0, 0, 1, 1], [], []>} : vector<6x96xbf16>, vector<96x2048xbf16>, vector<6x2048xf32> -> vector<6x2048xf32>
    %62 = arith.addf %58, %61 : vector<6x2048xf32>
    %c0_73 = arith.constant 0 : index
    %c0_74 = arith.constant 0 : index
    %63 = vector.load %arg2[%c0_73, %c0_74] : memref<6x1xf32, #tpu.memory_space<vmem>>, vector<6x1xf32>
    %64 = vector.broadcast %63 : vector<6x1xf32> to vector<6x2048xf32>
    %65 = arith.addf %62, %64 : vector<6x2048xf32>
    %cst_75 = arith.constant 0.000000e+00 : f32
    %66 = vector.broadcast %cst_75 : f32 to vector<6x2048xf32>
    %67 = arith.maximumf %65, %66 : vector<6x2048xf32>
    %c0_76 = arith.constant 0 : index
    %c0_77 = arith.constant 0 : index
    %68 = vector.load %arg15[%c0_76, %c0_77] : memref<6x2432xf32, #tpu.memory_space<vmem>>, vector<6x2048xf32>
    tpu.vector_store %arg15[%c0_76, %c0_77], %67 {strides = array<i32>} : memref<6x2432xf32, #tpu.memory_space<vmem>>, vector<6x2048xf32>,
    %c0_78 = arith.constant 0 : index
    %c0_79 = arith.constant 0 : index
    %69 = vector.load %arg15[%c0_78, %c0_79] : memref<6x2432xf32, #tpu.memory_space<vmem>>, vector<6x2048xf32>
    %c0_80 = arith.constant 0 : index
    %c1_81 = arith.constant 1 : index
    %70 = vector.load %arg15[%c0_80, %c1_81] : memref<6x2432xf32, #tpu.memory_space<vmem>>, vector<6x2048xf32>
    %71 = arith.maximumf %69, %70 : vector<6x2048xf32>
    %c0_82 = arith.constant 0 : index
    %c32_83 = arith.constant 32 : index
    %72 = vector.load %arg15[%c0_82, %c32_83] : memref<6x2432xf32, #tpu.memory_space<vmem>>, vector<6x2048xf32>
    %c0_84 = arith.constant 0 : index
    %c33_85 = arith.constant 33 : index
    %73 = vector.load %arg15[%c0_84, %c33_85] : memref<6x2432xf32, #tpu.memory_space<vmem>>, vector<6x2048xf32>
    %74 = arith.maximumf %72, %73 : vector<6x2048xf32>
    %75 = arith.maximumf %71, %74 : vector<6x2048xf32>
    %76 = arith.truncf %75 : vector<6x2048xf32> to vector<6x2048xbf16>
    %c0_86 = arith.constant 0 : index
    %c0_87 = arith.constant 0 : index
    %77 = vector.load %arg16[%c0_86, %c0_87] : memref<8x2432xbf16, #tpu.memory_space<vmem>>, vector<6x2048xbf16>
    tpu.vector_store %arg16[%c0_86, %c0_87], %76 {strides = array<i32>} : memref<8x2432xbf16, #tpu.memory_space<vmem>>, vector<6x2048xbf16>,
    %c0_88 = arith.constant 0 : index
    %c0_89 = arith.constant 0 : index
    %78 = vector.load %arg16[%c0_88, %c0_89] : memref<8x2432xbf16, #tpu.memory_space<vmem>>, vector<8x2048xbf16>
    %c0_90 = arith.constant 0 : index
    %c0_91 = arith.constant 0 : index
    %79 = vector.load %arg14[%c0_90, %c0_91] : memref<200x2048xbf16, #tpu.memory_space<vmem>>, vector<8x2048xbf16>
    tpu.vector_store %arg14[%c0_90, %c0_91], %78 {strides = array<i32>} : memref<200x2048xbf16, #tpu.memory_space<vmem>>, vector<8x2048xbf16>,
    %c0_92 = arith.constant 0 : index
    %c2_93 = arith.constant 2 : index
    %80 = vector.load %arg16[%c0_92, %c2_93] : memref<8x2432xbf16, #tpu.memory_space<vmem>>, vector<8x2048xbf16>
    %c8_94 = arith.constant 8 : index
    %c0_95 = arith.constant 0 : index
    %81 = vector.load %arg14[%c8_94, %c0_95] : memref<200x2048xbf16, #tpu.memory_space<vmem>>, vector<8x2048xbf16>
    tpu.vector_store %arg14[%c8_94, %c0_95], %80 {strides = array<i32>} : memref<200x2048xbf16, #tpu.memory_space<vmem>>, vector<8x2048xbf16>,
    %c0_96 = arith.constant 0 : index
    %c4_97 = arith.constant 4 : index
    %82 = vector.load %arg16[%c0_96, %c4_97] : memref<8x2432xbf16, #tpu.memory_space<vmem>>, vector<8x2048xbf16>
    %c16_98 = arith.constant 16 : index
    %c0_99 = arith.constant 0 : index
    %83 = vector.load %arg14[%c16_98, %c0_99] : memref<200x2048xbf16, #tpu.memory_space<vmem>>, vector<8x2048xbf16>
    tpu.vector_store %arg14[%c16_98, %c0_99], %82 {strides = array<i32>} : memref<200x2048xbf16, #tpu.memory_space<vmem>>, vector<8x2048xbf16>,
    %c0_100 = arith.constant 0 : index
    %c6 = arith.constant 6 : index
    %84 = vector.load %arg16[%c0_100, %c6] : memref<8x2432xbf16, #tpu.memory_space<vmem>>, vector<8x2048xbf16>
    %c24_101 = arith.constant 24 : index
    %c0_102 = arith.constant 0 : index
    %85 = vector.load %arg14[%c24_101, %c0_102] : memref<200x2048xbf16, #tpu.memory_space<vmem>>, vector<8x2048xbf16>
    tpu.vector_store %arg14[%c24_101, %c0_102], %84 {strides = array<i32>} : memref<200x2048xbf16, #tpu.memory_space<vmem>>, vector<8x2048xbf16>,
    %c0_103 = arith.constant 0 : index
    %c8_104 = arith.constant 8 : index
    %86 = vector.load %arg16[%c0_103, %c8_104] : memref<8x2432xbf16, #tpu.memory_space<vmem>>, vector<8x2048xbf16>
    %c32_105 = arith.constant 32 : index
    %c0_106 = arith.constant 0 : index
    %87 = vector.load %arg14[%c32_105, %c0_106] : memref<200x2048xbf16, #tpu.memory_space<vmem>>, vector<8x2048xbf16>
    tpu.vector_store %arg14[%c32_105, %c0_106], %86 {strides = array<i32>} : memref<200x2048xbf16, #tpu.memory_space<vmem>>, vector<8x2048xbf16>,
    %c0_107 = arith.constant 0 : index
    %c64_108 = arith.constant 64 : index
    %88 = vector.load %arg16[%c0_107, %c64_108] : memref<8x2432xbf16, #tpu.memory_space<vmem>>, vector<8x2048xbf16>
    %c40_109 = arith.constant 40 : index
    %c0_110 = arith.constant 0 : index
    %89 = vector.load %arg14[%c40_109, %c0_110] : memref<200x2048xbf16, #tpu.memory_space<vmem>>, vector<8x2048xbf16>
    tpu.vector_store %arg14[%c40_109, %c0_110], %88 {strides = array<i32>} : memref<200x2048xbf16, #tpu.memory_space<vmem>>, vector<8x2048xbf16>,
    %c0_111 = arith.constant 0 : index
    %c66_112 = arith.constant 66 : index
    %90 = vector.load %arg16[%c0_111, %c66_112] : memref<8x2432xbf16, #tpu.memory_space<vmem>>, vector<8x2048xbf16>
    %c48_113 = arith.constant 48 : index
    %c0_114 = arith.constant 0 : index
    %91 = vector.load %arg14[%c48_113, %c0_114] : memref<200x2048xbf16, #tpu.memory_space<vmem>>, vector<8x2048xbf16>
    tpu.vector_store %arg14[%c48_113, %c0_114], %90 {strides = array<i32>} : memref<200x2048xbf16, #tpu.memory_space<vmem>>, vector<8x2048xbf16>,
    %c0_115 = arith.constant 0 : index
    %c68_116 = arith.constant 68 : index
    %92 = vector.load %arg16[%c0_115, %c68_116] : memref<8x2432xbf16, #tpu.memory_space<vmem>>, vector<8x2048xbf16>
    %c56_117 = arith.constant 56 : index
    %c0_118 = arith.constant 0 : index
    %93 = vector.load %arg14[%c56_117, %c0_118] : memref<200x2048xbf16, #tpu.memory_space<vmem>>, vector<8x2048xbf16>
    tpu.vector_store %arg14[%c56_117, %c0_118], %92 {strides = array<i32>} : memref<200x2048xbf16, #tpu.memory_space<vmem>>, vector<8x2048xbf16>,
    %c0_119 = arith.constant 0 : index
    %c70 = arith.constant 70 : index
    %94 = vector.load %arg16[%c0_119, %c70] : memref<8x2432xbf16, #tpu.memory_space<vmem>>, vector<8x2048xbf16>
    %c64_120 = arith.constant 64 : index
    %c0_121 = arith.constant 0 : index
    %95 = vector.load %arg14[%c64_120, %c0_121] : memref<200x2048xbf16, #tpu.memory_space<vmem>>, vector<8x2048xbf16>
    tpu.vector_store %arg14[%c64_120, %c0_121], %94 {strides = array<i32>} : memref<200x2048xbf16, #tpu.memory_space<vmem>>, vector<8x2048xbf16>,
    %c0_122 = arith.constant 0 : index
    %c72_123 = arith.constant 72 : index
    %96 = vector.load %arg16[%c0_122, %c72_123] : memref<8x2432xbf16, #tpu.memory_space<vmem>>, vector<8x2048xbf16>
    %c72_124 = arith.constant 72 : index
    %c0_125 = arith.constant 0 : index
    %97 = vector.load %arg14[%c72_124, %c0_125] : memref<200x2048xbf16, #tpu.memory_space<vmem>>, vector<8x2048xbf16>
    tpu.vector_store %arg14[%c72_124, %c0_125], %96 {strides = array<i32>} : memref<200x2048xbf16, #tpu.memory_space<vmem>>, vector<8x2048xbf16>,
    %c0_126 = arith.constant 0 : index
    %c128_127 = arith.constant 128 : index
    %98 = vector.load %arg16[%c0_126, %c128_127] : memref<8x2432xbf16, #tpu.memory_space<vmem>>, vector<8x2048xbf16>
    %c80_128 = arith.constant 80 : index
    %c0_129 = arith.constant 0 : index
    %99 = vector.load %arg14[%c80_128, %c0_129] : memref<200x2048xbf16, #tpu.memory_space<vmem>>, vector<8x2048xbf16>
    tpu.vector_store %arg14[%c80_128, %c0_129], %98 {strides = array<i32>} : memref<200x2048xbf16, #tpu.memory_space<vmem>>, vector<8x2048xbf16>,
    %c0_130 = arith.constant 0 : index
    %c130_131 = arith.constant 130 : index
    %100 = vector.load %arg16[%c0_130, %c130_131] : memref<8x2432xbf16, #tpu.memory_space<vmem>>, vector<8x2048xbf16>
    %c88_132 = arith.constant 88 : index
    %c0_133 = arith.constant 0 : index
    %101 = vector.load %arg14[%c88_132, %c0_133] : memref<200x2048xbf16, #tpu.memory_space<vmem>>, vector<8x2048xbf16>
    tpu.vector_store %arg14[%c88_132, %c0_133], %100 {strides = array<i32>} : memref<200x2048xbf16, #tpu.memory_space<vmem>>, vector<8x2048xbf16>,
    %c0_134 = arith.constant 0 : index
    %c132_135 = arith.constant 132 : index
    %102 = vector.load %arg16[%c0_134, %c132_135] : memref<8x2432xbf16, #tpu.memory_space<vmem>>, vector<8x2048xbf16>
    %c96_136 = arith.constant 96 : index
    %c0_137 = arith.constant 0 : index
    %103 = vector.load %arg14[%c96_136, %c0_137] : memref<200x2048xbf16, #tpu.memory_space<vmem>>, vector<8x2048xbf16>
    tpu.vector_store %arg14[%c96_136, %c0_137], %102 {strides = array<i32>} : memref<200x2048xbf16, #tpu.memory_space<vmem>>, vector<8x2048xbf16>,
    %c0_138 = arith.constant 0 : index
    %c134 = arith.constant 134 : index
    %104 = vector.load %arg16[%c0_138, %c134] : memref<8x2432xbf16, #tpu.memory_space<vmem>>, vector<8x2048xbf16>
    %c104_139 = arith.constant 104 : index
    %c0_140 = arith.constant 0 : index
    %105 = vector.load %arg14[%c104_139, %c0_140] : memref<200x2048xbf16, #tpu.memory_space<vmem>>, vector<8x2048xbf16>
    tpu.vector_store %arg14[%c104_139, %c0_140], %104 {strides = array<i32>} : memref<200x2048xbf16, #tpu.memory_space<vmem>>, vector<8x2048xbf16>,
    %c0_141 = arith.constant 0 : index
    %c136_142 = arith.constant 136 : index
    %106 = vector.load %arg16[%c0_141, %c136_142] : memref<8x2432xbf16, #tpu.memory_space<vmem>>, vector<8x2048xbf16>
    %c112_143 = arith.constant 112 : index
    %c0_144 = arith.constant 0 : index
    %107 = vector.load %arg14[%c112_143, %c0_144] : memref<200x2048xbf16, #tpu.memory_space<vmem>>, vector<8x2048xbf16>
    tpu.vector_store %arg14[%c112_143, %c0_144], %106 {strides = array<i32>} : memref<200x2048xbf16, #tpu.memory_space<vmem>>, vector<8x2048xbf16>,
    %c0_145 = arith.constant 0 : index
    %c192_146 = arith.constant 192 : index
    %108 = vector.load %arg16[%c0_145, %c192_146] : memref<8x2432xbf16, #tpu.memory_space<vmem>>, vector<8x2048xbf16>
    %c120_147 = arith.constant 120 : index
    %c0_148 = arith.constant 0 : index
    %109 = vector.load %arg14[%c120_147, %c0_148] : memref<200x2048xbf16, #tpu.memory_space<vmem>>, vector<8x2048xbf16>
    tpu.vector_store %arg14[%c120_147, %c0_148], %108 {strides = array<i32>} : memref<200x2048xbf16, #tpu.memory_space<vmem>>, vector<8x2048xbf16>,
    %c0_149 = arith.constant 0 : index
    %c194 = arith.constant 194 : index
    %110 = vector.load %arg16[%c0_149, %c194] : memref<8x2432xbf16, #tpu.memory_space<vmem>>, vector<8x2048xbf16>
    %c128_150 = arith.constant 128 : index
    %c0_151 = arith.constant 0 : index
    %111 = vector.load %arg14[%c128_150, %c0_151] : memref<200x2048xbf16, #tpu.memory_space<vmem>>, vector<8x2048xbf16>
    tpu.vector_store %arg14[%c128_150, %c0_151], %110 {strides = array<i32>} : memref<200x2048xbf16, #tpu.memory_space<vmem>>, vector<8x2048xbf16>,
    %c0_152 = arith.constant 0 : index
    %c196 = arith.constant 196 : index
    %112 = vector.load %arg16[%c0_152, %c196] : memref<8x2432xbf16, #tpu.memory_space<vmem>>, vector<8x2048xbf16>
    %c136_153 = arith.constant 136 : index
    %c0_154 = arith.constant 0 : index
    %113 = vector.load %arg14[%c136_153, %c0_154] : memref<200x2048xbf16, #tpu.memory_space<vmem>>, vector<8x2048xbf16>
    tpu.vector_store %arg14[%c136_153, %c0_154], %112 {strides = array<i32>} : memref<200x2048xbf16, #tpu.memory_space<vmem>>, vector<8x2048xbf16>,
    %c0_155 = arith.constant 0 : index
    %c198 = arith.constant 198 : index
    %114 = vector.load %arg16[%c0_155, %c198] : memref<8x2432xbf16, #tpu.memory_space<vmem>>, vector<8x2048xbf16>
    %c144_156 = arith.constant 144 : index
    %c0_157 = arith.constant 0 : index
    %115 = vector.load %arg14[%c144_156, %c0_157] : memref<200x2048xbf16, #tpu.memory_space<vmem>>, vector<8x2048xbf16>
    tpu.vector_store %arg14[%c144_156, %c0_157], %114 {strides = array<i32>} : memref<200x2048xbf16, #tpu.memory_space<vmem>>, vector<8x2048xbf16>,
    %c0_158 = arith.constant 0 : index
    %c200 = arith.constant 200 : index
    %116 = vector.load %arg16[%c0_158, %c200] : memref<8x2432xbf16, #tpu.memory_space<vmem>>, vector<8x2048xbf16>
    %c152_159 = arith.constant 152 : index
    %c0_160 = arith.constant 0 : index
    %117 = vector.load %arg14[%c152_159, %c0_160] : memref<200x2048xbf16, #tpu.memory_space<vmem>>, vector<8x2048xbf16>
    tpu.vector_store %arg14[%c152_159, %c0_160], %116 {strides = array<i32>} : memref<200x2048xbf16, #tpu.memory_space<vmem>>, vector<8x2048xbf16>,
    %c0_161 = arith.constant 0 : index
    %c256 = arith.constant 256 : index
    %118 = vector.load %arg16[%c0_161, %c256] : memref<8x2432xbf16, #tpu.memory_space<vmem>>, vector<8x2048xbf16>
    %c160_162 = arith.constant 160 : index
    %c0_163 = arith.constant 0 : index
    %119 = vector.load %arg14[%c160_162, %c0_163] : memref<200x2048xbf16, #tpu.memory_space<vmem>>, vector<8x2048xbf16>
    tpu.vector_store %arg14[%c160_162, %c0_163], %118 {strides = array<i32>} : memref<200x2048xbf16, #tpu.memory_space<vmem>>, vector<8x2048xbf16>,
    %c0_164 = arith.constant 0 : index
    %c258 = arith.constant 258 : index
    %120 = vector.load %arg16[%c0_164, %c258] : memref<8x2432xbf16, #tpu.memory_space<vmem>>, vector<8x2048xbf16>
    %c168_165 = arith.constant 168 : index
    %c0_166 = arith.constant 0 : index
    %121 = vector.load %arg14[%c168_165, %c0_166] : memref<200x2048xbf16, #tpu.memory_space<vmem>>, vector<8x2048xbf16>
    tpu.vector_store %arg14[%c168_165, %c0_166], %120 {strides = array<i32>} : memref<200x2048xbf16, #tpu.memory_space<vmem>>, vector<8x2048xbf16>,
    %c0_167 = arith.constant 0 : index
    %c260 = arith.constant 260 : index
    %122 = vector.load %arg16[%c0_167, %c260] : memref<8x2432xbf16, #tpu.memory_space<vmem>>, vector<8x2048xbf16>
    %c176_168 = arith.constant 176 : index
    %c0_169 = arith.constant 0 : index
    %123 = vector.load %arg14[%c176_168, %c0_169] : memref<200x2048xbf16, #tpu.memory_space<vmem>>, vector<8x2048xbf16>
    tpu.vector_store %arg14[%c176_168, %c0_169], %122 {strides = array<i32>} : memref<200x2048xbf16, #tpu.memory_space<vmem>>, vector<8x2048xbf16>,
    %c0_170 = arith.constant 0 : index
    %c262 = arith.constant 262 : index
    %124 = vector.load %arg16[%c0_170, %c262] : memref<8x2432xbf16, #tpu.memory_space<vmem>>, vector<8x2048xbf16>
    %c184_171 = arith.constant 184 : index
    %c0_172 = arith.constant 0 : index
    %125 = vector.load %arg14[%c184_171, %c0_172] : memref<200x2048xbf16, #tpu.memory_space<vmem>>, vector<8x2048xbf16>
    tpu.vector_store %arg14[%c184_171, %c0_172], %124 {strides = array<i32>} : memref<200x2048xbf16, #tpu.memory_space<vmem>>, vector<8x2048xbf16>,
    %c0_173 = arith.constant 0 : index
    %c264 = arith.constant 264 : index
    %126 = vector.load %arg16[%c0_173, %c264] : memref<8x2432xbf16, #tpu.memory_space<vmem>>, vector<8x2048xbf16>
    %c192_174 = arith.constant 192 : index
    %c0_175 = arith.constant 0 : index
    %127 = vector.load %arg14[%c192_174, %c0_175] : memref<200x2048xbf16, #tpu.memory_space<vmem>>, vector<8x2048xbf16>
    tpu.vector_store %arg14[%c192_174, %c0_175], %126 {strides = array<i32>} : memref<200x2048xbf16, #tpu.memory_space<vmem>>, vector<8x2048xbf16>,
    %c0_176 = arith.constant 0 : index
    %c0_177 = arith.constant 0 : index
    %128 = vector.load %arg3[%c0_176, %c0_177] : memref<16x200xbf16, #tpu.memory_space<vmem>>, vector<16x104xbf16>
    %c0_178 = arith.constant 0 : index
    %c0_179 = arith.constant 0 : index
    %129 = vector.load %arg14[%c0_178, %c0_179] : memref<200x2048xbf16, #tpu.memory_space<vmem>>, vector<104x2048xbf16>
    %cst_180 = arith.constant dense<0.000000e+00> : vector<16x2048xf32>
    %130 = tpu.matmul %128, %129, %cst_180 {dimension_numbers = #tpu.dot_dimension_numbers<[1], [0], [0], [1], [0, 0, 1, 1], [], []>} : vector<16x104xbf16>, vector<104x2048xbf16>, vector<16x2048xf32> -> vector<16x2048xf32>
    %c0_181 = arith.constant 0 : index
    %c104_182 = arith.constant 104 : index
    %131 = vector.load %arg3[%c0_181, %c104_182] : memref<16x200xbf16, #tpu.memory_space<vmem>>, vector<16x96xbf16>
    %c104_183 = arith.constant 104 : index
    %c0_184 = arith.constant 0 : index
    %132 = vector.load %arg14[%c104_183, %c0_184] : memref<200x2048xbf16, #tpu.memory_space<vmem>>, vector<96x2048xbf16>
    %cst_185 = arith.constant dense<0.000000e+00> : vector<16x2048xf32>
    %133 = tpu.matmul %131, %132, %cst_185 {dimension_numbers = #tpu.dot_dimension_numbers<[1], [0], [0], [1], [0, 0, 1, 1], [], []>} : vector<16x96xbf16>, vector<96x2048xbf16>, vector<16x2048xf32> -> vector<16x2048xf32>
    %134 = arith.addf %130, %133 : vector<16x2048xf32>
    %c0_186 = arith.constant 0 : index
    %c0_187 = arith.constant 0 : index
    %135 = vector.load %arg4[%c0_186, %c0_187] : memref<16x1xf32, #tpu.memory_space<vmem>>, vector<16x1xf32>
    %136 = vector.broadcast %135 : vector<16x1xf32> to vector<16x2048xf32>
    %137 = arith.addf %134, %136 : vector<16x2048xf32>
    %cst_188 = arith.constant 0.000000e+00 : f32
    %138 = vector.broadcast %cst_188 : f32 to vector<16x2048xf32>
    %139 = arith.maximumf %137, %138 : vector<16x2048xf32>
    %c0_189 = arith.constant 0 : index
    %c0_190 = arith.constant 0 : index
    %140 = vector.load %arg17[%c0_189, %c0_190] : memref<16x2432xf32, #tpu.memory_space<vmem>>, vector<16x2048xf32>
    tpu.vector_store %arg17[%c0_189, %c0_190], %139 {strides = array<i32>} : memref<16x2432xf32, #tpu.memory_space<vmem>>, vector<16x2048xf32>,
    %c0_191 = arith.constant 0 : index
    %c0_192 = arith.constant 0 : index
    %141 = vector.load %arg17[%c0_191, %c0_192] : memref<16x2432xf32, #tpu.memory_space<vmem>>, vector<16x2048xf32>
    %c0_193 = arith.constant 0 : index
    %c2_194 = arith.constant 2 : index
    %142 = vector.load %arg17[%c0_193, %c2_194] : memref<16x2432xf32, #tpu.memory_space<vmem>>, vector<16x2048xf32>
    %143 = arith.maximumf %141, %142 : vector<16x2048xf32>
    %c0_195 = arith.constant 0 : index
    %c64_196 = arith.constant 64 : index
    %144 = vector.load %arg17[%c0_195, %c64_196] : memref<16x2432xf32, #tpu.memory_space<vmem>>, vector<16x2048xf32>
    %c0_197 = arith.constant 0 : index
    %c66_198 = arith.constant 66 : index
    %145 = vector.load %arg17[%c0_197, %c66_198] : memref<16x2432xf32, #tpu.memory_space<vmem>>, vector<16x2048xf32>
    %146 = arith.maximumf %144, %145 : vector<16x2048xf32>
    %147 = arith.maximumf %143, %146 : vector<16x2048xf32>
    %148 = vector.extract_strided_slice %147 {offsets = [0, 0], sizes = [16, 1024], strides = [1, 1]} : vector<16x2048xf32> to vector<16x1024xf32>
    %149 = arith.truncf %148 : vector<16x1024xf32> to vector<16x1024xbf16>
    %c0_199 = arith.constant 0 : index
    %c0_200 = arith.constant 0 : index
    %150 = vector.load %arg5[%c0_199, %c0_200] : memref<1024x25xbf16, #tpu.memory_space<vmem>>, vector<1024x25xbf16>
    %cst_201 = arith.constant dense<0.000000e+00> : vector<16x25xf32>
    %151 = tpu.matmul %149, %150, %cst_201 {dimension_numbers = #tpu.dot_dimension_numbers<[1], [0], [0], [1], [0, 0, 1, 1], [], []>} : vector<16x1024xbf16>, vector<1024x25xbf16>, vector<16x25xf32> -> vector<16x25xf32>
    %152 = vector.extract_strided_slice %151 {offsets = [0, 0], sizes = [1, 25], strides = [1, 1]} : vector<16x25xf32> to vector<1x25xf32>
    %c0_202 = arith.constant 0 : index
    %c0_203 = arith.constant 0 : index
    %153 = vector.load %arg18[%c0_202, %c0_203] : memref<2x400xf32, #tpu.memory_space<vmem>>, vector<1x25xf32>
    tpu.vector_store %arg18[%c0_202, %c0_203], %152 {strides = array<i32>} : memref<2x400xf32, #tpu.memory_space<vmem>>, vector<1x25xf32>,
    %154 = vector.extract_strided_slice %151 {offsets = [1, 0], sizes = [1, 25], strides = [1, 1]} : vector<16x25xf32> to vector<1x25xf32>
    %c0_204 = arith.constant 0 : index
    %c25 = arith.constant 25 : index
    %155 = vector.load %arg18[%c0_204, %c25] : memref<2x400xf32, #tpu.memory_space<vmem>>, vector<1x25xf32>
    tpu.vector_store %arg18[%c0_204, %c25], %154 {strides = array<i32>} : memref<2x400xf32, #tpu.memory_space<vmem>>, vector<1x25xf32>,
    %156 = vector.extract_strided_slice %151 {offsets = [2, 0], sizes = [1, 25], strides = [1, 1]} : vector<16x25xf32> to vector<1x25xf32>
    %c0_205 = arith.constant 0 : index
    %c50 = arith.constant 50 : index
    %157 = vector.load %arg18[%c0_205, %c50] : memref<2x400xf32, #tpu.memory_space<vmem>>, vector<1x25xf32>
    tpu.vector_store %arg18[%c0_205, %c50], %156 {strides = array<i32>} : memref<2x400xf32, #tpu.memory_space<vmem>>, vector<1x25xf32>,
    %158 = vector.extract_strided_slice %151 {offsets = [3, 0], sizes = [1, 25], strides = [1, 1]} : vector<16x25xf32> to vector<1x25xf32>
    %c0_206 = arith.constant 0 : index
    %c75 = arith.constant 75 : index
    %159 = vector.load %arg18[%c0_206, %c75] : memref<2x400xf32, #tpu.memory_space<vmem>>, vector<1x25xf32>
    tpu.vector_store %arg18[%c0_206, %c75], %158 {strides = array<i32>} : memref<2x400xf32, #tpu.memory_space<vmem>>, vector<1x25xf32>,
    %160 = vector.extract_strided_slice %151 {offsets = [4, 0], sizes = [1, 25], strides = [1, 1]} : vector<16x25xf32> to vector<1x25xf32>
    %c0_207 = arith.constant 0 : index
    %c100_208 = arith.constant 100 : index
    %161 = vector.load %arg18[%c0_207, %c100_208] : memref<2x400xf32, #tpu.memory_space<vmem>>, vector<1x25xf32>
    tpu.vector_store %arg18[%c0_207, %c100_208], %160 {strides = array<i32>} : memref<2x400xf32, #tpu.memory_space<vmem>>, vector<1x25xf32>,
    %162 = vector.extract_strided_slice %151 {offsets = [5, 0], sizes = [1, 25], strides = [1, 1]} : vector<16x25xf32> to vector<1x25xf32>
    %c0_209 = arith.constant 0 : index
    %c125 = arith.constant 125 : index
    %163 = vector.load %arg18[%c0_209, %c125] : memref<2x400xf32, #tpu.memory_space<vmem>>, vector<1x25xf32>
    tpu.vector_store %arg18[%c0_209, %c125], %162 {strides = array<i32>} : memref<2x400xf32, #tpu.memory_space<vmem>>, vector<1x25xf32>,
    %164 = vector.extract_strided_slice %151 {offsets = [6, 0], sizes = [1, 25], strides = [1, 1]} : vector<16x25xf32> to vector<1x25xf32>
    %c0_210 = arith.constant 0 : index
    %c150 = arith.constant 150 : index
    %165 = vector.load %arg18[%c0_210, %c150] : memref<2x400xf32, #tpu.memory_space<vmem>>, vector<1x25xf32>
    tpu.vector_store %arg18[%c0_210, %c150], %164 {strides = array<i32>} : memref<2x400xf32, #tpu.memory_space<vmem>>, vector<1x25xf32>,
    %166 = vector.extract_strided_slice %151 {offsets = [7, 0], sizes = [1, 25], strides = [1, 1]} : vector<16x25xf32> to vector<1x25xf32>
    %c0_211 = arith.constant 0 : index
    %c175 = arith.constant 175 : index
    %167 = vector.load %arg18[%c0_211, %c175] : memref<2x400xf32, #tpu.memory_space<vmem>>, vector<1x25xf32>
    tpu.vector_store %arg18[%c0_211, %c175], %166 {strides = array<i32>} : memref<2x400xf32, #tpu.memory_space<vmem>>, vector<1x25xf32>,
    %168 = vector.extract_strided_slice %151 {offsets = [8, 0], sizes = [1, 25], strides = [1, 1]} : vector<16x25xf32> to vector<1x25xf32>
    %c0_212 = arith.constant 0 : index
    %c200_213 = arith.constant 200 : index
    %169 = vector.load %arg18[%c0_212, %c200_213] : memref<2x400xf32, #tpu.memory_space<vmem>>, vector<1x25xf32>
    tpu.vector_store %arg18[%c0_212, %c200_213], %168 {strides = array<i32>} : memref<2x400xf32, #tpu.memory_space<vmem>>, vector<1x25xf32>,
    %170 = vector.extract_strided_slice %151 {offsets = [9, 0], sizes = [1, 25], strides = [1, 1]} : vector<16x25xf32> to vector<1x25xf32>
    %c0_214 = arith.constant 0 : index
    %c225 = arith.constant 225 : index
    %171 = vector.load %arg18[%c0_214, %c225] : memref<2x400xf32, #tpu.memory_space<vmem>>, vector<1x25xf32>
    tpu.vector_store %arg18[%c0_214, %c225], %170 {strides = array<i32>} : memref<2x400xf32, #tpu.memory_space<vmem>>, vector<1x25xf32>,
    %172 = vector.extract_strided_slice %151 {offsets = [10, 0], sizes = [1, 25], strides = [1, 1]} : vector<16x25xf32> to vector<1x25xf32>
    %c0_215 = arith.constant 0 : index
    %c250 = arith.constant 250 : index
    %173 = vector.load %arg18[%c0_215, %c250] : memref<2x400xf32, #tpu.memory_space<vmem>>, vector<1x25xf32>
    tpu.vector_store %arg18[%c0_215, %c250], %172 {strides = array<i32>} : memref<2x400xf32, #tpu.memory_space<vmem>>, vector<1x25xf32>,
    %174 = vector.extract_strided_slice %151 {offsets = [11, 0], sizes = [1, 25], strides = [1, 1]} : vector<16x25xf32> to vector<1x25xf32>
    %c0_216 = arith.constant 0 : index
    %c275 = arith.constant 275 : index
    %175 = vector.load %arg18[%c0_216, %c275] : memref<2x400xf32, #tpu.memory_space<vmem>>, vector<1x25xf32>
    tpu.vector_store %arg18[%c0_216, %c275], %174 {strides = array<i32>} : memref<2x400xf32, #tpu.memory_space<vmem>>, vector<1x25xf32>,
    %176 = vector.extract_strided_slice %151 {offsets = [12, 0], sizes = [1, 25], strides = [1, 1]} : vector<16x25xf32> to vector<1x25xf32>
    %c0_217 = arith.constant 0 : index
    %c300 = arith.constant 300 : index
    %177 = vector.load %arg18[%c0_217, %c300] : memref<2x400xf32, #tpu.memory_space<vmem>>, vector<1x25xf32>
    tpu.vector_store %arg18[%c0_217, %c300], %176 {strides = array<i32>} : memref<2x400xf32, #tpu.memory_space<vmem>>, vector<1x25xf32>,
    %178 = vector.extract_strided_slice %151 {offsets = [13, 0], sizes = [1, 25], strides = [1, 1]} : vector<16x25xf32> to vector<1x25xf32>
    %c0_218 = arith.constant 0 : index
    %c325 = arith.constant 325 : index
    %179 = vector.load %arg18[%c0_218, %c325] : memref<2x400xf32, #tpu.memory_space<vmem>>, vector<1x25xf32>
    tpu.vector_store %arg18[%c0_218, %c325], %178 {strides = array<i32>} : memref<2x400xf32, #tpu.memory_space<vmem>>, vector<1x25xf32>,
    %180 = vector.extract_strided_slice %151 {offsets = [14, 0], sizes = [1, 25], strides = [1, 1]} : vector<16x25xf32> to vector<1x25xf32>
    %c0_219 = arith.constant 0 : index
    %c350 = arith.constant 350 : index
    %181 = vector.load %arg18[%c0_219, %c350] : memref<2x400xf32, #tpu.memory_space<vmem>>, vector<1x25xf32>
    tpu.vector_store %arg18[%c0_219, %c350], %180 {strides = array<i32>} : memref<2x400xf32, #tpu.memory_space<vmem>>, vector<1x25xf32>,
    %182 = vector.extract_strided_slice %151 {offsets = [15, 0], sizes = [1, 25], strides = [1, 1]} : vector<16x25xf32> to vector<1x25xf32>
    %c0_220 = arith.constant 0 : index
    %c375 = arith.constant 375 : index
    %183 = vector.load %arg18[%c0_220, %c375] : memref<2x400xf32, #tpu.memory_space<vmem>>, vector<1x25xf32>
    tpu.vector_store %arg18[%c0_220, %c375], %182 {strides = array<i32>} : memref<2x400xf32, #tpu.memory_space<vmem>>, vector<1x25xf32>,
    %184 = vector.extract_strided_slice %147 {offsets = [0, 1024], sizes = [16, 1024], strides = [1, 1]} : vector<16x2048xf32> to vector<16x1024xf32>
    %185 = arith.truncf %184 : vector<16x1024xf32> to vector<16x1024xbf16>
    %c0_221 = arith.constant 0 : index
    %c0_222 = arith.constant 0 : index
    %186 = vector.load %arg5[%c0_221, %c0_222] : memref<1024x25xbf16, #tpu.memory_space<vmem>>, vector<1024x25xbf16>
    %cst_223 = arith.constant dense<0.000000e+00> : vector<16x25xf32>
    %187 = tpu.matmul %185, %186, %cst_223 {dimension_numbers = #tpu.dot_dimension_numbers<[1], [0], [0], [1], [0, 0, 1, 1], [], []>} : vector<16x1024xbf16>, vector<1024x25xbf16>, vector<16x25xf32> -> vector<16x25xf32>
    %188 = vector.extract_strided_slice %187 {offsets = [0, 0], sizes = [1, 25], strides = [1, 1]} : vector<16x25xf32> to vector<1x25xf32>
    %c1_224 = arith.constant 1 : index
    %c0_225 = arith.constant 0 : index
    %189 = vector.load %arg18[%c1_224, %c0_225] : memref<2x400xf32, #tpu.memory_space<vmem>>, vector<1x25xf32>
    tpu.vector_store %arg18[%c1_224, %c0_225], %188 {strides = array<i32>} : memref<2x400xf32, #tpu.memory_space<vmem>>, vector<1x25xf32>,
    %190 = vector.extract_strided_slice %187 {offsets = [1, 0], sizes = [1, 25], strides = [1, 1]} : vector<16x25xf32> to vector<1x25xf32>
    %c1_226 = arith.constant 1 : index
    %c25_227 = arith.constant 25 : index
    %191 = vector.load %arg18[%c1_226, %c25_227] : memref<2x400xf32, #tpu.memory_space<vmem>>, vector<1x25xf32>
    tpu.vector_store %arg18[%c1_226, %c25_227], %190 {strides = array<i32>} : memref<2x400xf32, #tpu.memory_space<vmem>>, vector<1x25xf32>,
    %192 = vector.extract_strided_slice %187 {offsets = [2, 0], sizes = [1, 25], strides = [1, 1]} : vector<16x25xf32> to vector<1x25xf32>
    %c1_228 = arith.constant 1 : index
    %c50_229 = arith.constant 50 : index
    %193 = vector.load %arg18[%c1_228, %c50_229] : memref<2x400xf32, #tpu.memory_space<vmem>>, vector<1x25xf32>
    tpu.vector_store %arg18[%c1_228, %c50_229], %192 {strides = array<i32>} : memref<2x400xf32, #tpu.memory_space<vmem>>, vector<1x25xf32>,
    %194 = vector.extract_strided_slice %187 {offsets = [3, 0], sizes = [1, 25], strides = [1, 1]} : vector<16x25xf32> to vector<1x25xf32>
    %c1_230 = arith.constant 1 : index
    %c75_231 = arith.constant 75 : index
    %195 = vector.load %arg18[%c1_230, %c75_231] : memref<2x400xf32, #tpu.memory_space<vmem>>, vector<1x25xf32>
    tpu.vector_store %arg18[%c1_230, %c75_231], %194 {strides = array<i32>} : memref<2x400xf32, #tpu.memory_space<vmem>>, vector<1x25xf32>,
    %196 = vector.extract_strided_slice %187 {offsets = [4, 0], sizes = [1, 25], strides = [1, 1]} : vector<16x25xf32> to vector<1x25xf32>
    %c1_232 = arith.constant 1 : index
    %c100_233 = arith.constant 100 : index
    %197 = vector.load %arg18[%c1_232, %c100_233] : memref<2x400xf32, #tpu.memory_space<vmem>>, vector<1x25xf32>
    tpu.vector_store %arg18[%c1_232, %c100_233], %196 {strides = array<i32>} : memref<2x400xf32, #tpu.memory_space<vmem>>, vector<1x25xf32>,
    %198 = vector.extract_strided_slice %187 {offsets = [5, 0], sizes = [1, 25], strides = [1, 1]} : vector<16x25xf32> to vector<1x25xf32>
    %c1_234 = arith.constant 1 : index
    %c125_235 = arith.constant 125 : index
    %199 = vector.load %arg18[%c1_234, %c125_235] : memref<2x400xf32, #tpu.memory_space<vmem>>, vector<1x25xf32>
    tpu.vector_store %arg18[%c1_234, %c125_235], %198 {strides = array<i32>} : memref<2x400xf32, #tpu.memory_space<vmem>>, vector<1x25xf32>,
    %200 = vector.extract_strided_slice %187 {offsets = [6, 0], sizes = [1, 25], strides = [1, 1]} : vector<16x25xf32> to vector<1x25xf32>
    %c1_236 = arith.constant 1 : index
    %c150_237 = arith.constant 150 : index
    %201 = vector.load %arg18[%c1_236, %c150_237] : memref<2x400xf32, #tpu.memory_space<vmem>>, vector<1x25xf32>
    tpu.vector_store %arg18[%c1_236, %c150_237], %200 {strides = array<i32>} : memref<2x400xf32, #tpu.memory_space<vmem>>, vector<1x25xf32>,
    %202 = vector.extract_strided_slice %187 {offsets = [7, 0], sizes = [1, 25], strides = [1, 1]} : vector<16x25xf32> to vector<1x25xf32>
    %c1_238 = arith.constant 1 : index
    %c175_239 = arith.constant 175 : index
    %203 = vector.load %arg18[%c1_238, %c175_239] : memref<2x400xf32, #tpu.memory_space<vmem>>, vector<1x25xf32>
    tpu.vector_store %arg18[%c1_238, %c175_239], %202 {strides = array<i32>} : memref<2x400xf32, #tpu.memory_space<vmem>>, vector<1x25xf32>,
    %204 = vector.extract_strided_slice %187 {offsets = [8, 0], sizes = [1, 25], strides = [1, 1]} : vector<16x25xf32> to vector<1x25xf32>
    %c1_240 = arith.constant 1 : index
    %c200_241 = arith.constant 200 : index
    %205 = vector.load %arg18[%c1_240, %c200_241] : memref<2x400xf32, #tpu.memory_space<vmem>>, vector<1x25xf32>
    tpu.vector_store %arg18[%c1_240, %c200_241], %204 {strides = array<i32>} : memref<2x400xf32, #tpu.memory_space<vmem>>, vector<1x25xf32>,
    %206 = vector.extract_strided_slice %187 {offsets = [9, 0], sizes = [1, 25], strides = [1, 1]} : vector<16x25xf32> to vector<1x25xf32>
    %c1_242 = arith.constant 1 : index
    %c225_243 = arith.constant 225 : index
    %207 = vector.load %arg18[%c1_242, %c225_243] : memref<2x400xf32, #tpu.memory_space<vmem>>, vector<1x25xf32>
    tpu.vector_store %arg18[%c1_242, %c225_243], %206 {strides = array<i32>} : memref<2x400xf32, #tpu.memory_space<vmem>>, vector<1x25xf32>,
    %208 = vector.extract_strided_slice %187 {offsets = [10, 0], sizes = [1, 25], strides = [1, 1]} : vector<16x25xf32> to vector<1x25xf32>
    %c1_244 = arith.constant 1 : index
    %c250_245 = arith.constant 250 : index
    %209 = vector.load %arg18[%c1_244, %c250_245] : memref<2x400xf32, #tpu.memory_space<vmem>>, vector<1x25xf32>
    tpu.vector_store %arg18[%c1_244, %c250_245], %208 {strides = array<i32>} : memref<2x400xf32, #tpu.memory_space<vmem>>, vector<1x25xf32>,
    %210 = vector.extract_strided_slice %187 {offsets = [11, 0], sizes = [1, 25], strides = [1, 1]} : vector<16x25xf32> to vector<1x25xf32>
    %c1_246 = arith.constant 1 : index
    %c275_247 = arith.constant 275 : index
    %211 = vector.load %arg18[%c1_246, %c275_247] : memref<2x400xf32, #tpu.memory_space<vmem>>, vector<1x25xf32>
    tpu.vector_store %arg18[%c1_246, %c275_247], %210 {strides = array<i32>} : memref<2x400xf32, #tpu.memory_space<vmem>>, vector<1x25xf32>,
    %212 = vector.extract_strided_slice %187 {offsets = [12, 0], sizes = [1, 25], strides = [1, 1]} : vector<16x25xf32> to vector<1x25xf32>
    %c1_248 = arith.constant 1 : index
    %c300_249 = arith.constant 300 : index
    %213 = vector.load %arg18[%c1_248, %c300_249] : memref<2x400xf32, #tpu.memory_space<vmem>>, vector<1x25xf32>
    tpu.vector_store %arg18[%c1_248, %c300_249], %212 {strides = array<i32>} : memref<2x400xf32, #tpu.memory_space<vmem>>, vector<1x25xf32>,
    %214 = vector.extract_strided_slice %187 {offsets = [13, 0], sizes = [1, 25], strides = [1, 1]} : vector<16x25xf32> to vector<1x25xf32>
    %c1_250 = arith.constant 1 : index
    %c325_251 = arith.constant 325 : index
    %215 = vector.load %arg18[%c1_250, %c325_251] : memref<2x400xf32, #tpu.memory_space<vmem>>, vector<1x25xf32>
    tpu.vector_store %arg18[%c1_250, %c325_251], %214 {strides = array<i32>} : memref<2x400xf32, #tpu.memory_space<vmem>>, vector<1x25xf32>,
    %216 = vector.extract_strided_slice %187 {offsets = [14, 0], sizes = [1, 25], strides = [1, 1]} : vector<16x25xf32> to vector<1x25xf32>
    %c1_252 = arith.constant 1 : index
    %c350_253 = arith.constant 350 : index
    %217 = vector.load %arg18[%c1_252, %c350_253] : memref<2x400xf32, #tpu.memory_space<vmem>>, vector<1x25xf32>
    tpu.vector_store %arg18[%c1_252, %c350_253], %216 {strides = array<i32>} : memref<2x400xf32, #tpu.memory_space<vmem>>, vector<1x25xf32>,
    %218 = vector.extract_strided_slice %187 {offsets = [15, 0], sizes = [1, 25], strides = [1, 1]} : vector<16x25xf32> to vector<1x25xf32>
    %c1_254 = arith.constant 1 : index
    %c375_255 = arith.constant 375 : index
    %219 = vector.load %arg18[%c1_254, %c375_255] : memref<2x400xf32, #tpu.memory_space<vmem>>, vector<1x25xf32>
    tpu.vector_store %arg18[%c1_254, %c375_255], %218 {strides = array<i32>} : memref<2x400xf32, #tpu.memory_space<vmem>>, vector<1x25xf32>,
    %c0_256 = arith.constant 0 : index
    %c0_257 = arith.constant 0 : index
    %220 = vector.load %arg18[%c0_256, %c0_257] : memref<2x400xf32, #tpu.memory_space<vmem>>, vector<2x400xf32>
    %221 = arith.truncf %220 : vector<2x400xf32> to vector<2x400xbf16>
    %c0_258 = arith.constant 0 : index
    %c0_259 = arith.constant 0 : index
    %222 = vector.load %arg6[%c0_258, %c0_259] : memref<400x120xbf16, #tpu.memory_space<vmem>>, vector<400x120xbf16>
    %cst_260 = arith.constant dense<0.000000e+00> : vector<2x120xf32>
    %223 = tpu.matmul %221, %222, %cst_260 {dimension_numbers = #tpu.dot_dimension_numbers<[1], [0], [0], [1], [0, 0, 1, 1], [], []>} : vector<2x400xbf16>, vector<400x120xbf16>, vector<2x120xf32> -> vector<2x120xf32>
    %c0_261 = arith.constant 0 : index
    %c0_262 = arith.constant 0 : index
    %224 = vector.load %arg7[%c0_261, %c0_262] : memref<1x120xf32, #tpu.memory_space<vmem>>, vector<1x120xf32>
    %225 = vector.broadcast %224 : vector<1x120xf32> to vector<2x120xf32>
    %226 = arith.addf %223, %225 : vector<2x120xf32>
    %cst_263 = arith.constant 0.000000e+00 : f32
    %227 = vector.broadcast %cst_263 : f32 to vector<2x120xf32>
    %228 = arith.maximumf %226, %227 : vector<2x120xf32>
    %229 = arith.truncf %228 : vector<2x120xf32> to vector<2x120xbf16>
    %c0_264 = arith.constant 0 : index
    %c0_265 = arith.constant 0 : index
    %230 = vector.load %arg8[%c0_264, %c0_265] : memref<120x84xbf16, #tpu.memory_space<vmem>>, vector<120x84xbf16>
    %cst_266 = arith.constant dense<0.000000e+00> : vector<2x84xf32>
    %231 = tpu.matmul %229, %230, %cst_266 {dimension_numbers = #tpu.dot_dimension_numbers<[1], [0], [0], [1], [0, 0, 1, 1], [], []>} : vector<2x120xbf16>, vector<120x84xbf16>, vector<2x84xf32> -> vector<2x84xf32>
    %c0_267 = arith.constant 0 : index
    %c0_268 = arith.constant 0 : index
    %232 = vector.load %arg9[%c0_267, %c0_268] : memref<1x84xf32, #tpu.memory_space<vmem>>, vector<1x84xf32>
    %233 = vector.broadcast %232 : vector<1x84xf32> to vector<2x84xf32>
    %234 = arith.addf %231, %233 : vector<2x84xf32>
    %cst_269 = arith.constant 0.000000e+00 : f32
    %235 = vector.broadcast %cst_269 : f32 to vector<2x84xf32>
    %236 = arith.maximumf %234, %235 : vector<2x84xf32>
    %237 = arith.truncf %236 : vector<2x84xf32> to vector<2x84xbf16>
    %c0_270 = arith.constant 0 : index
    %c0_271 = arith.constant 0 : index
    %238 = vector.load %arg10[%c0_270, %c0_271] : memref<84x10xbf16, #tpu.memory_space<vmem>>, vector<84x10xbf16>
    %cst_272 = arith.constant dense<0.000000e+00> : vector<2x10xf32>
    %239 = tpu.matmul %237, %238, %cst_272 {dimension_numbers = #tpu.dot_dimension_numbers<[1], [0], [0], [1], [0, 0, 1, 1], [], []>} : vector<2x84xbf16>, vector<84x10xbf16>, vector<2x10xf32> -> vector<2x10xf32>
    %c0_273 = arith.constant 0 : index
    %c0_274 = arith.constant 0 : index
    %240 = vector.load %arg11[%c0_273, %c0_274] : memref<1x10xf32, #tpu.memory_space<vmem>>, vector<1x10xf32>
    %241 = vector.broadcast %240 : vector<1x10xf32> to vector<2x10xf32>
    %242 = arith.addf %239, %241 : vector<2x10xf32>
    %c0_275 = arith.constant 0 : index
    %c0_276 = arith.constant 0 : index
    %243 = vector.load %arg12[%c0_275, %c0_276] : memref<2x10xf32, #tpu.memory_space<vmem>>, vector<2x10xf32>
    tpu.vector_store %arg12[%c0_275, %c0_276], %242 {strides = array<i32>} : memref<2x10xf32, #tpu.memory_space<vmem>>, vector<2x10xf32>,
    return
  }
}

</mosaic_0001>

<bundles_post_ra>
// kernel: net_forward.1
= control target key start
LH: loop header
LB: loop body
LE: loop exit
PB: predicated region body
PF: predicated region fallthrough
CT: control target
= control target key end

     0   :  { %s12119_s25 = smov 61   ;;  %s12120_s28 = smov 60   ;;  %v12130_v9 = vmov 0   ;;  %vm17251_vm0 = vcmask 1043456   ;;  %vm1109_vm1 = vcmask 498688   ;;  %vm1187_vm2 = vcmask 490496   ;;  %s17170_s0 = inlined_call_operand.vmem [shape: bf16[8,2432], index: 0, kind: input, shape index: {}]   ;;  %s17171_s1 = inlined_call_operand.vmem [shape: bf16[6,200], index: 1, kind: input, shape index: {}]   ;;  %s17172_s2 = inlined_call_operand.vmem [shape: f32[6,1], index: 2, kind: input, shape index: {}]   ;;  %s17173_s3 = inlined_call_operand.vmem [shape: bf16[16,200], index: 3, kind: input, shape index: {}]   ;;  %s17174_s4 = inlined_call_operand.vmem [shape: f32[16,1], index: 4, kind: input, shape index: {}]   ;;  %s17175_s5 = inlined_call_operand.vmem [shape: bf16[1024,25], index: 5, kind: input, shape index: {}]   ;;  %s17176_s6 = inlined_call_operand.vmem [shape: bf16[400,120], index: 6, kind: input, shape index: {}]   ;;  %s17177_s7 = inlined_call_operand.vmem [shape: f32[1,120], index: 7, kind: input, shape index: {}]   ;;  %s17178_s8 = inlined_call_operand.vmem [shape: bf16[120,84], index: 8, kind: input, shape index: {}]   ;;  %s17179_s9 = inlined_call_operand.vmem [shape: f32[1,84], index: 9, kind: input, shape index: {}]   ;;  %s17180_s10 = inlined_call_operand.vmem [shape: bf16[84,10], index: 10, kind: input, shape index: {}]   ;;  %s17181_s11 = inlined_call_operand.vmem [shape: f32[1,10], index: 11, kind: input, shape index: {}]   ;;  %s17182_s12 = inlined_call_operand.hbm [shape: f32[2,10], index: 12, kind: output, shape index: {}]  }
   0x1   :  { %v1065_v0 = vld [vmem:[%s17170_s0 + $0x10] sm:$0xff]  ;;  %v1063_v1 = vld [vmem:[%s17170_s0] sm:$0xff]  ;;  %v1064_v2 = vld [vmem:[%s17170_s0 + $0x8] sm:$0xff]  ;;  %s12121_s29 = smov 32   ;;  %s12122_s30 = smov 31   ;;  %62 = vst [vmem:[#allocation5] sm:$0xff] %v12130_v9  ;;  %2662 = vmatprep.mubr.bf16.mxu0 %v12130_v9  ;;  %2703 = vmatprep.mubr.bf16.mxu1 %v12130_v9 }
   0x2   :  { %1085 = vrot.lane.b32.xlu1 %v1065_v0, %s12119_s25  ;;  %1081 = vrot.lane.b32.xlu0 %v1063_v1, %s12119_s25  ;;  %s12123_s13 = smov 30   ;;  %s12124_s14 = smov 29   ;;  %v12255_v3 = vld [vmem:[%s17170_s0 + $0x4] sm:$0xff]  ;;  %v12262_v4 = vld [vmem:[%s17170_s0 + $0xc] sm:$0xff]  ;;  %63 = vst [vmem:[#allocation5 + $0x8] sm:$0xff] %v12130_v9  ;;  %64 = vst [vmem:[#allocation5 + $0x10] sm:$0xff] %v12130_v9 }
   0x3   :  { %s12125_s17 = smov 28   ;;  %v1627_v5 = vld [vmem:[%s17170_s0 + $0x14] sm:$0xff]  ;;  %s12126_s22 = smov 127   ;;  %v1067_v7 = vld [vmem:[%s17170_s0 + $0x20] sm:$0xff]  ;;  %65 = vst [vmem:[#allocation5 + $0x18] sm:$0xff] %v12130_v9  ;;  %66 = vst [vmem:[#allocation5 + $0x20] sm:$0xff] %v12130_v9  ;;  %11636 = vset.pattern.permute.xlu1 %v12130_v9  ;;  %11737 = vset.pattern.permute.xlu0 %v12130_v9 }
   0x4   :  { %s12127_s23 = smov 126   ;;  %s12128_s24 = smov 125   ;;  %v1066_v6 = vld [vmem:[%s17170_s0 + $0x18] sm:$0xff]  ;;  %v2038_v8 = vld [vmem:[%s17171_s1] sm:$0x77]  ;;  %67 = vst [vmem:[#allocation5 + $0x28] sm:$0xff] %v12130_v9 }
   0x5   :  { %s12129_s15 = smov 124   ;;  %68 = vst [vmem:[#allocation5 + $0x30] sm:$0xff] %v12130_v9  ;;  %69 = vst [vmem:[#allocation5 + $0x38] sm:$0xff] %v12130_v9  ;;  %v10639_v10 = vcombine.low %v2038_v8, %v2038_v8  ;;  %s12131_s21 = smov 24   ;;  %v10640_v11 = vcombine.high %v2038_v8, %v2038_v8  ;;  %v12329_v12 = vld [vmem:[%s17170_s0 + $0x1c] sm:$0xff]  ;;  %v1629_v13 = vld [vmem:[%s17170_s0 + $0x24] sm:$0xff] }
   0x6   :  { %1159 = vrot.lane.b32.xlu1 %v1063_v1, %s12120_s28  ;;  %1083 = vrot.lane.b32.xlu0 %v1064_v2, %s12119_s25  ;;  %70 = vst [vmem:[#allocation5 + $0x40] sm:$0xff] %v12130_v9  ;;  %71 = vst [vmem:[#allocation5 + $0x48] sm:$0xf] %v12130_v9  ;;  %v12346_v14 = vld [vmem:[%s17170_s0 + $0x28] sm:$0xff]  ;;  %v12354_v15 = vld [vmem:[%s17170_s0 + $0x30] sm:$0xff]  ;;  %vm1265_vm3 = vcmask 261120  }
   0x7   :  { %vm1343_vm4 = vcmask 252928   ;;  %v12407_v53 = vld [vmem:[%s17170_s0 + $0x2c] sm:$0xff] }
   0xa   :  { %1163 = vrot.lane.b32.xlu1 %v1065_v0, %s12120_s28  ;;  %1161 = vrot.lane.b32.xlu0 %v1064_v2, %s12120_s28 }
   0xe   :  { %1239 = vrot.lane.b32.xlu1 %v1064_v2, %s12121_s29  ;;  %1237 = vrot.lane.b32.xlu0 %v1063_v1, %s12121_s29 }
  0x12   :  { %1315 = vrot.lane.b32.xlu1 %v1063_v1, %s12122_s30  ;;  %1241 = vrot.lane.b32.xlu0 %v1065_v0, %s12121_s29 }
  0x16   :  { %1319 = vrot.lane.b32.xlu1 %v1065_v0, %s12122_s30  ;;  %1317 = vrot.lane.b32.xlu0 %v1064_v2, %s12122_s30 }
  0x1a   :  { %1395 = vrot.lane.b32.xlu1 %v1064_v2, %s12123_s13  ;;  %1393 = vrot.lane.b32.xlu0 %v1063_v1, %s12123_s13 }
  0x1e   :  { %1471 = vrot.lane.b32.xlu1 %v1063_v1, %s12124_s14  ;;  %1397 = vrot.lane.b32.xlu0 %v1065_v0, %s12123_s13 }
  0x22   :  { %1475 = vrot.lane.b32.xlu1 %v1065_v0, %s12124_s14  ;;  %1473 = vrot.lane.b32.xlu0 %v1064_v2, %s12124_s14 }
  0x26   :  { %1551 = vrot.lane.b32.xlu1 %v1064_v2, %s12125_s17  ;;  %1549 = vrot.lane.b32.xlu0 %v1063_v1, %s12125_s17 }
  0x2a   :  { %1553 = vrot.lane.b32.xlu0 %v1065_v0, %s12125_s17  ;;  %1643 = vrot.lane.b32.xlu1 %v12255_v3, %s12126_s22 }
  0x2e   :  { %1645 = vrot.lane.b32.xlu0 %v12262_v4, %s12126_s22  ;;  %1647 = vrot.lane.b32.xlu1 %v1627_v5, %s12126_s22 }
  0x32   :  { %1720 = vrot.lane.b32.xlu0 %v12255_v3, %s12127_s23  ;;  %1722 = vrot.lane.b32.xlu1 %v12262_v4, %s12127_s23 }
  0x36   :  { %1724 = vrot.lane.b32.xlu0 %v1627_v5, %s12127_s23  ;;  %1797 = vrot.lane.b32.xlu1 %v12255_v3, %s12128_s24 }
  0x3a   :  { %1799 = vrot.lane.b32.xlu0 %v12262_v4, %s12128_s24  ;;  %1801 = vrot.lane.b32.xlu1 %v1627_v5, %s12128_s24 }
  0x3e   :  { %1874 = vrot.lane.b32.xlu0 %v12255_v3, %s12129_s15  ;;  %1876 = vrot.lane.b32.xlu1 %v12262_v4, %s12129_s15 }
  0x42   :  { %1878 = vrot.lane.b32.xlu0 %v1627_v5, %s12129_s15  ;;  %1087 = vrot.lane.b32.xlu1 %v1066_v6, %s12119_s25 }
  0x46   :  { %1089 = vrot.lane.b32.xlu0 %v1067_v7, %s12119_s25  ;;  %1165 = vrot.lane.b32.xlu1 %v1066_v6, %s12120_s28 }
  0x4a   :  { %1167 = vrot.lane.b32.xlu0 %v1067_v7, %s12120_s28  ;;  %1243 = vrot.lane.b32.xlu1 %v1066_v6, %s12121_s29 }
  0x4e   :  { %1245 = vrot.lane.b32.xlu0 %v1067_v7, %s12121_s29  ;;  %1321 = vrot.lane.b32.xlu1 %v1066_v6, %s12122_s30 }
  0x52   :  { %1323 = vrot.lane.b32.xlu0 %v1067_v7, %s12122_s30  ;;  %2140 = vrot.lane.b32.xlu1 %v10639_v10, %s12131_s21 }
  0x56   :  { %2142 = vrot.lane.b32.xlu0 %v10640_v11, %s12131_s21  ;;  %1399 = vrot.lane.b32.xlu1 %v1066_v6, %s12123_s13 }
  0x5a   :  { %1401 = vrot.lane.b32.xlu0 %v1067_v7, %s12123_s13  ;;  %1477 = vrot.lane.b32.xlu1 %v1066_v6, %s12124_s14 }
  0x5e   :  { %1479 = vrot.lane.b32.xlu0 %v1067_v7, %s12124_s14  ;;  %1555 = vrot.lane.b32.xlu1 %v1066_v6, %s12125_s17 }
  0x62   :  { %1557 = vrot.lane.b32.xlu0 %v1067_v7, %s12125_s17  ;;  %1649 = vrot.lane.b32.xlu1 %v12329_v12, %s12126_s22 }
  0x66   :  { %1651 = vrot.lane.b32.xlu0 %v1629_v13, %s12126_s22  ;;  %1726 = vrot.lane.b32.xlu1 %v12329_v12, %s12127_s23 }
  0x6a   :  { %1728 = vrot.lane.b32.xlu0 %v1629_v13, %s12127_s23  ;;  %1803 = vrot.lane.b32.xlu1 %v12329_v12, %s12128_s24 }
  0x6e   :  { %1805 = vrot.lane.b32.xlu0 %v1629_v13, %s12128_s24  ;;  %1880 = vrot.lane.b32.xlu1 %v12329_v12, %s12129_s15 }
  0x72   :  { %1882 = vrot.lane.b32.xlu0 %v1629_v13, %s12129_s15  ;;  %1091 = vrot.lane.b32.xlu1 %v12346_v14, %s12119_s25 }
  0x74   :  { %v12359_v16 = vpop.permute.xlu1 %1085  ;;  %v1082_v17 = vpop.permute.xlu0 %1081 }
  0x75   :  { %v1099_v18 = vrot.slane %v1082_v17, 4  ;;  %v1101_v22 = vrot.slane %v12359_v16, 4 }
  0x76   :  { %1093 = vrot.lane.b32.xlu0 %v12354_v15, %s12119_s25  ;;  %1169 = vrot.lane.b32.xlu1 %v12346_v14, %s12120_s28 }
  0x78   :  { %v1160_v19 = vpop.permute.xlu1 %1159  ;;  %v1084_v20 = vpop.permute.xlu0 %1083 }
  0x79   :  { %v1100_v21 = vrot.slane %v1084_v20, 4  ;;  %v1177_v23 = vrot.slane %v1160_v19, 4 }
  0x7a   :  { %1171 = vrot.lane.b32.xlu0 %v12354_v15, %s12120_s28  ;;  %1247 = vrot.lane.b32.xlu1 %v12346_v14, %s12121_s29 }
  0x7b   :  { %v1108_v24 = vsel %vm17251_vm0, %v1099_v18, %v1100_v21  ;;  %v1111_v29 = vsel %vm17251_vm0, %v1100_v21, %v1101_v22 }
  0x7c   :  { %v12371_v25 = vpop.permute.xlu1 %1163  ;;  %v1162_v26 = vpop.permute.xlu0 %1161  ;;  %v1110_v30 = vsel %vm1109_vm1, %v1082_v17, %v1108_v24  ;;  %v1112_v36 = vsel %vm1109_vm1, %v1084_v20, %v1111_v29 }
  0x7d   :  { %v1179_v27 = vrot.slane %v12371_v25, 4  ;;  %v1178_v28 = vrot.slane %v1162_v26, 4 }
  0x7e   :  { %1249 = vrot.lane.b32.xlu0 %v12354_v15, %s12121_s29  ;;  %1325 = vrot.lane.b32.xlu1 %v12346_v14, %s12122_s30 }
  0x7f   :  { %v1186_v31 = vsel %vm17251_vm0, %v1177_v23, %v1178_v28  ;;  %v1189_v32 = vsel %vm17251_vm0, %v1178_v28, %v1179_v27 }
  0x80   :  { %v1240_v33 = vpop.permute.xlu1 %1239  ;;  %v1238_v34 = vpop.permute.xlu0 %1237  ;;  %v1188_v35 = vsel %vm1187_vm2, %v1160_v19, %v1186_v31  ;;  %v1190_v37 = vsel %vm1187_vm2, %v1162_v26, %v1189_v32 }
  0x81   :  { %v10642_v38 = vcombine.high %v1110_v30, %v1188_v35  ;;  %v10644_v39 = vcombine.high %v1112_v36, %v1190_v37  ;;  %v1256_v40 = vrot.slane %v1240_v33, 4  ;;  %v10641_v41 = vcombine.low %v1110_v30, %v1188_v35 }
  0x82   :  { %1327 = vrot.lane.b32.xlu0 %v12354_v15, %s12122_s30  ;;  %1403 = vrot.lane.b32.xlu1 %v12346_v14, %s12123_s13  ;;  %v10643_v42 = vcombine.low %v1112_v36, %v1190_v37  ;;  %v1255_v45 = vrot.slane %v1238_v34, 4 }
  0x83   :  { %2630 = vmatprep.subr.bf16.mxu0 %v10642_v38  ;;  %2671 = vmatprep.subr.bf16.mxu1 %v10644_v39 }
  0x84   :  { %v1316_v43 = vpop.permute.xlu1 %1315  ;;  %v12393_v44 = vpop.permute.xlu0 %1241  ;;  %2631 = vmatpush1.bf16.msra.mxu0 %v10641_v41  ;;  %2672 = vmatpush1.bf16.msra.mxu1 %v10643_v42  ;;  %v1264_v50 = vsel %vm17251_vm0, %v1255_v45, %v1256_v40 }
  0x85   :  { %v1257_v46 = vrot.slane %v12393_v44, 4  ;;  %v1333_v47 = vrot.slane %v1316_v43, 4  ;;  %v1266_v57 = vsel %vm1265_vm3, %v1238_v34, %v1264_v50 }
  0x86   :  { %1405 = vrot.lane.b32.xlu0 %v12354_v15, %s12123_s13  ;;  %1481 = vrot.lane.b32.xlu1 %v12346_v14, %s12124_s14 }
  0x87   :  { %v1267_v54 = vsel %vm17251_vm0, %v1256_v40, %v1257_v46 }
  0x88   :  { %v12400_v48 = vpop.permute.xlu1 %1319  ;;  %v1318_v49 = vpop.permute.xlu0 %1317  ;;  %v1268_v62 = vsel %vm1265_vm3, %v1240_v33, %v1267_v54 }
  0x89   :  { %v1335_v51 = vrot.slane %v12400_v48, 4  ;;  %v1334_v52 = vrot.slane %v1318_v49, 4 }
  0x8a   :  { %1483 = vrot.lane.b32.xlu0 %v12354_v15, %s12124_s14  ;;  %1559 = vrot.lane.b32.xlu1 %v12346_v14, %s12125_s17 }
  0x8b   :  { %v1345_v55 = vsel %vm17251_vm0, %v1334_v52, %v1335_v51  ;;  %v1342_v56 = vsel %vm17251_vm0, %v1333_v47, %v1334_v52 }
  0x8c   :  { %v1346_v58 = vsel %vm1343_vm4, %v1318_v49, %v1345_v55  ;;  %v1396_v59 = vpop.permute.xlu1 %1395  ;;  %v1394_v60 = vpop.permute.xlu0 %1393  ;;  %v1344_v61 = vsel %vm1343_vm4, %v1316_v43, %v1342_v56 }
  0x8d   :  { %v10658_v63 = vcombine.high %v1266_v57, %v1344_v61  ;;  %v10660_v0 = vcombine.high %v1268_v62, %v1346_v58  ;;  %v10657_v1 = vcombine.low %v1266_v57, %v1344_v61  ;;  %v10659_v2 = vcombine.low %v1268_v62, %v1346_v58 }
  0x8e   :  { %1561 = vrot.lane.b32.xlu0 %v12354_v15, %s12125_s17  ;;  %1653 = vrot.lane.b32.xlu1 %v12407_v53, %s12126_s22 }
  0x8f   :  { %17 = vsyncpa [#allocation9], 0  ;;  %2632 = vmatprep.subr.bf16.mxu0 %v10658_v63  ;;  %2673 = vmatprep.subr.bf16.mxu1 %v10660_v0  ;;  %v1631_v5 = vld [vmem:[%s17170_s0 + $0x34] sm:$0xff]  ;;  %v1412_v6 = vrot.slane %v1396_v59, 4  ;;  %v1411_v7 = vrot.slane %v1394_v60, 4  ;;  %vm1421_vm5 = vcmask 244736  }
  0x90   :  { %v1472_v8 = vpop.permute.xlu1 %1471  ;;  %v12431_v10 = vpop.permute.xlu0 %1397  ;;  %2633 = vmatpush1.bf16.msra.mxu0 %v10657_v1  ;;  %2674 = vmatpush1.bf16.msra.mxu1 %v10659_v2  ;;  %vm1499_vm6 = vcmask 236544   ;;  %vm1577_vm7 = vcmask 228352   ;;  %v12462_v39 = vld [vmem:[%s17170_s0 + $0x38] sm:$0xff]  ;;  %v1071_v49 = vld [vmem:[%s17170_s0 + $0x40] sm:$0xf]  ;;  %vm173_vm8 = vcmask 1039360  }
  0x91   :  { %v1413_v11 = vrot.slane %v12431_v10, 4  ;;  %v1420_v13 = vsel %vm17251_vm0, %v1411_v7, %v1412_v6  ;;  %v1489_v17 = vrot.slane %v1472_v8, 4  ;;  %vm251_vm9 = vcmask 1031168   ;;  %v1227_v1 = vld [vmem:[%s17170_s0 + $0x40] sm:$0xf]  ;;  %s12133_s26 = smov 95  }
  0x92   :  { %1655 = vrot.lane.b32.xlu0 %v1631_v5, %s12126_s22  ;;  %1730 = vrot.lane.b32.xlu1 %v12407_v53, %s12127_s23  ;;  %v1422_v24 = vsel %vm1421_vm5, %v1394_v60, %v1420_v13  ;;  %vm329_vm10 = vcmask 1022976   ;;  %vm407_vm11 = vcmask 1014784   ;;  %vm2144_vm12 = vcmask 195584   ;;  %s12135_s27 = smov 93   ;;  %s12137_s18 = smov 64  }
  0x93   :  { %v1423_v20 = vsel %vm17251_vm0, %v1412_v6, %v1413_v11  ;;  %vm485_vm13 = vcmask 785408   ;;  %s12139_s19 = smov 62   ;;  %vm563_vm14 = vcmask 777216   ;;  %vm641_vm15 = vcmask 769024  }
  0x94   :  { %v12438_v14 = vpop.permute.xlu1 %1475  ;;  %v1474_v15 = vpop.permute.xlu0 %1473  ;;  %v1424_v31 = vsel %vm1421_vm5, %v1396_v59, %v1423_v20  ;;  %v1149_v59 = vld [vmem:[%s17170_s0 + $0x40] sm:$0xf] }
  0x95   :  { %v1491_v18 = vrot.slane %v12438_v14, 4  ;;  %v1490_v19 = vrot.slane %v1474_v15, 4  ;;  %v1305_v20 = vld [vmem:[%s17170_s0 + $0x40] sm:$0xf] }
  0x96   :  { %1732 = vrot.lane.b32.xlu0 %v1631_v5, %s12127_s23  ;;  %1807 = vrot.lane.b32.xlu1 %v12407_v53, %s12128_s24 }
  0x97   :  { %v1501_v21 = vsel %vm17251_vm0, %v1490_v19, %v1491_v18  ;;  %v1498_v23 = vsel %vm17251_vm0, %v1489_v17, %v1490_v19 }
  0x98   :  { %v1502_v26 = vsel %vm1499_vm6, %v1474_v15, %v1501_v21  ;;  %v1552_v28 = vpop.permute.xlu1 %1551  ;;  %v1550_v29 = vpop.permute.xlu0 %1549  ;;  %v1500_v30 = vsel %vm1499_vm6, %v1472_v8, %v1498_v23 }
  0x99   :  { %v1568_v32 = vrot.slane %v1552_v28, 4  ;;  %v1567_v33 = vrot.slane %v1550_v29, 4  ;;  %v10674_v34 = vcombine.high %v1422_v24, %v1500_v30  ;;  %v10676_v35 = vcombine.high %v1424_v31, %v1502_v26 }
  0x9a   :  { %1809 = vrot.lane.b32.xlu0 %v1631_v5, %s12128_s24  ;;  %1884 = vrot.lane.b32.xlu1 %v12407_v53, %s12129_s15  ;;  %v10673_v36 = vcombine.low %v1422_v24, %v1500_v30  ;;  %v10675_v37 = vcombine.low %v1424_v31, %v1502_v26 }
  0x9b   :  { %v1576_v38 = vsel %vm17251_vm0, %v1567_v33, %v1568_v32  ;;  %2634 = vmatprep.subr.bf16.mxu0 %v10674_v34  ;;  %2675 = vmatprep.subr.bf16.mxu1 %v10676_v35  ;;  %v1383_v33 = vld [vmem:[%s17170_s0 + $0x40] sm:$0xf] }
  0x9c   :  { %v1578_v40 = vsel %vm1577_vm7, %v1550_v29, %v1576_v38  ;;  %v12465_v41 = vpop.permute.xlu0 %1553  ;;  %2635 = vmatpush1.bf16.msra.mxu0 %v10673_v36  ;;  %2676 = vmatpush1.bf16.msra.mxu1 %v10675_v37  ;;  %v1644_v42 = vpop.permute.xlu1 %1643 }
  0x9d   :  { %v1569_v43 = vrot.slane %v12465_v41, 4  ;;  %v10690_v45 = vcombine.high %v1578_v40, %v12255_v3  ;;  %v10689_v47 = vcombine.low %v1578_v40, %v12255_v3  ;;  %v1661_v58 = vrot.slane %v1644_v42, 4 }
  0x9e   :  { %1886 = vrot.lane.b32.xlu0 %v1631_v5, %s12129_s15  ;;  %1095 = vrot.lane.b32.xlu1 %v12462_v39, %s12119_s25 }
  0x9f   :  { %2636 = vmatprep.subr.bf16.mxu0 %v10690_v45  ;;  %v1579_v50 = vsel %vm17251_vm0, %v1568_v32, %v1569_v43 }
  0xa0   :  { %2637 = vmatpush1.bf16.msra.mxu0 %v10689_v47  ;;  %v1646_v52 = vpop.permute.xlu0 %1645  ;;  %v12479_v54 = vpop.permute.xlu1 %1647  ;;  %v1580_v3 = vsel %vm1577_vm7, %v1552_v28, %v1579_v50 }
  0xa1   :  { %v1662_v55 = vrot.slane %v1646_v52, 4  ;;  %v10692_v56 = vcombine.high %v1580_v3, %v12262_v4  ;;  %v10691_v57 = vcombine.low %v1580_v3, %v12262_v4  ;;  %v1663_v62 = vrot.slane %v12479_v54, 4 }
  0xa2   :  { %1097 = vrot.lane.b32.xlu0 %v1071_v49, %s12119_s25  ;;  %1173 = vrot.lane.b32.xlu1 %v12462_v39, %s12120_s28  ;;  %s12132_s25 = smov 96  }
  0xa3   :  { %2677 = vmatprep.subr.bf16.mxu1 %v10692_v56  ;;  %v1670_v0 = vsel %vm17251_vm0, %v1661_v58, %v1662_v55  ;;  %v1672_v19 = vsel %vm17251_vm0, %v1662_v55, %v1663_v62 }
  0xa4   :  { %2678 = vmatpush1.bf16.msra.mxu1 %v10691_v57  ;;  %v1721_v60 = vpop.permute.xlu0 %1720  ;;  %v1723_v61 = vpop.permute.xlu1 %1722  ;;  %v1671_v7 = vsel %vm173_vm8, %v1644_v42, %v1670_v0  ;;  %v1673_v26 = vsel %vm173_vm8, %v1646_v52, %v1672_v19  ;;  %v1461_v42 = vld [vmem:[%s17170_s0 + $0x40] sm:$0xf] }
  0xa5   :  { %v1738_v63 = vrot.slane %v1721_v60, 4  ;;  %v1739_v4 = vrot.slane %v1723_v61, 4 }
  0xa6   :  { %1175 = vrot.lane.b32.xlu0 %v1149_v59, %s12120_s28  ;;  %1251 = vrot.lane.b32.xlu1 %v12462_v39, %s12121_s29  ;;  %v1539_v59 = vld [vmem:[%s17170_s0 + $0x40] sm:$0xf] }
  0xa7   :  { %v1747_v2 = vsel %vm17251_vm0, %v1738_v63, %v1739_v4 }
  0xa8   :  { %v12499_v5 = vpop.permute.xlu0 %1724  ;;  %v1798_v6 = vpop.permute.xlu1 %1797  ;;  %v1748_v8 = vsel %vm251_vm9, %v1721_v60, %v1747_v2  ;;  %v1632_v60 = vld [vmem:[%s17170_s0 + $0x3c] sm:$0xff] }
  0xa9   :  { %v1740_v13 = vrot.slane %v12499_v5, 4  ;;  %v10706_v15 = vcombine.high %v1671_v7, %v1748_v8  ;;  %v10705_v17 = vcombine.low %v1671_v7, %v1748_v8  ;;  %v1815_v32 = vrot.slane %v1798_v6, 4 }
  0xaa   :  { %1253 = vrot.lane.b32.xlu0 %v1227_v1, %s12121_s29  ;;  %1329 = vrot.lane.b32.xlu1 %v12462_v39, %s12122_s30  ;;  %s12150_s29 = smov 72  }
  0xab   :  { %2638 = vmatprep.subr.bf16.mxu0 %v10706_v15  ;;  %v1749_v21 = vsel %vm17251_vm0, %v1739_v4, %v1740_v13  ;;  %v1633_v15 = vld [vmem:[%s17170_s0 + $0x44] sm:$0xf] }
  0xac   :  { %v1800_v23 = vpop.permute.xlu0 %1799  ;;  %2639 = vmatpush1.bf16.msra.mxu0 %v10705_v17  ;;  %v12516_v24 = vpop.permute.xlu1 %1801  ;;  %v1750_v28 = vsel %vm251_vm9, %v1723_v61, %v1749_v21 }
  0xad   :  { %v1816_v29 = vrot.slane %v1800_v23, 4  ;;  %v10708_v30 = vcombine.high %v1673_v26, %v1750_v28  ;;  %v10707_v31 = vcombine.low %v1673_v26, %v1750_v28  ;;  %v1817_v34 = vrot.slane %v12516_v24, 4 }
  0xae   :  { %1331 = vrot.lane.b32.xlu0 %v1305_v20, %s12122_s30  ;;  %1407 = vrot.lane.b32.xlu1 %v12462_v39, %s12123_s13  ;;  %s12138_s30 = smov 63  }
  0xaf   :  { %2679 = vmatprep.subr.bf16.mxu1 %v10708_v30  ;;  %v1824_v40 = vsel %vm17251_vm0, %v1815_v32, %v1816_v29  ;;  %v1826_v3 = vsel %vm17251_vm0, %v1816_v29, %v1817_v34 }
  0xb0   :  { %v1875_v35 = vpop.permute.xlu0 %1874  ;;  %2680 = vmatpush1.bf16.msra.mxu1 %v10707_v31  ;;  %v1877_v36 = vpop.permute.xlu1 %1876  ;;  %v1825_v50 = vsel %vm329_vm10, %v1798_v6, %v1824_v40  ;;  %v1827_v0 = vsel %vm329_vm10, %v1800_v23, %v1826_v3 }
  0xb1   :  { %v1892_v37 = vrot.slane %v1875_v35, 4  ;;  %v1893_v38 = vrot.slane %v1877_v36, 4 }
  0xb2   :  { %1409 = vrot.lane.b32.xlu0 %v1383_v33, %s12123_s13  ;;  %1485 = vrot.lane.b32.xlu1 %v12462_v39, %s12124_s14 }
  0xb3   :  { %v1901_v45 = vsel %vm17251_vm0, %v1892_v37, %v1893_v38  ;;  %v1787_v37 = vld [vmem:[%s17170_s0 + $0x44] sm:$0xf] }
  0xb4   :  { %v12535_v47 = vpop.permute.xlu0 %1878  ;;  %v1088_v49 = vpop.permute.xlu1 %1087  ;;  %v1902_v52 = vsel %vm407_vm11, %v1875_v35, %v1901_v45 }
  0xb5   :  { %v1894_v55 = vrot.slane %v12535_v47, 4  ;;  %v1102_v56 = vrot.slane %v1088_v49, 4  ;;  %v10722_v57 = vcombine.high %v1825_v50, %v1902_v52  ;;  %v10721_v58 = vcombine.low %v1825_v50, %v1902_v52  ;;  %v1864_v50 = vld [vmem:[%s17170_s0 + $0x44] sm:$0xf] }
  0xb6   :  { %1487 = vrot.lane.b32.xlu0 %v1461_v42, %s12124_s14  ;;  %1563 = vrot.lane.b32.xlu1 %v12462_v39, %s12125_s17  ;;  %s12134_s14 = smov 94  }
  0xb7   :  { %2640 = vmatprep.subr.bf16.mxu0 %v10722_v57  ;;  %v1903_v61 = vsel %vm17251_vm0, %v1893_v38, %v1894_v55  ;;  %v1113_v1 = vsel %vm17251_vm0, %v1101_v22, %v1102_v56 }
  0xb8   :  { %v12555_v63 = vpop.permute.xlu0 %1089  ;;  %2641 = vmatpush1.bf16.msra.mxu0 %v10721_v58  ;;  %v1166_v4 = vpop.permute.xlu1 %1165  ;;  %v1904_v39 = vsel %vm407_vm11, %v1877_v36, %v1903_v61  ;;  %v1114_v20 = vsel %vm1109_vm1, %v12359_v16, %v1113_v1 }
  0xb9   :  { %v1103_v2 = vrot.slane %v12555_v63, 4  ;;  %v1180_v6 = vrot.slane %v1166_v4, 4  ;;  %v10724_v7 = vcombine.high %v1827_v0, %v1904_v39  ;;  %v10723_v8 = vcombine.low %v1827_v0, %v1904_v39  ;;  %v12082_v39 = vld [vmem:[%s17170_s0] sm:$0xff] }
  0xba   :  { %1565 = vrot.lane.b32.xlu0 %v1539_v59, %s12125_s17  ;;  %1657 = vrot.lane.b32.xlu1 %v1632_v60, %s12126_s22  ;;  %s12136_s17 = smov 92  }
  0xbb   :  { %2681 = vmatprep.subr.bf16.mxu1 %v10724_v7  ;;  %v1191_v17 = vsel %vm17251_vm0, %v1179_v27, %v1180_v6  ;;  %v1115_v28 = vsel %vm17251_vm0, %v1102_v56, %v1103_v2  ;;  %v1710_v27 = vld [vmem:[%s17170_s0 + $0x44] sm:$0xf] }
  0xbc   :  { %v12571_v19 = vpop.permute.xlu0 %1167  ;;  %2682 = vmatpush1.bf16.msra.mxu1 %v10723_v8  ;;  %v1244_v22 = vpop.permute.xlu1 %1243  ;;  %v1192_v21 = vsel %vm1187_vm2, %v12371_v25, %v1191_v17  ;;  %v1116_v30 = vsel %vm1109_vm1, %v1088_v49, %v1115_v28 }
  0xbd   :  { %v1181_v23 = vrot.slane %v12571_v19, 4  ;;  %v10646_v26 = vcombine.high %v1114_v20, %v1192_v21  ;;  %v1258_v36 = vrot.slane %v1244_v22, 4 }
  0xbe   :  { %1659 = vrot.lane.b32.xlu0 %v1633_v15, %s12126_s22  ;;  %1734 = vrot.lane.b32.xlu1 %v1632_v60, %s12127_s23 }
  0xbf   :  { %2712 = vmatprep.subr.bf16.mxu0 %v10646_v26  ;;  %v1193_v16 = vsel %vm17251_vm0, %v1180_v6, %v1181_v23  ;;  %v1269_v52 = vsel %vm17251_vm0, %v1257_v46, %v1258_v36  ;;  %v10645_v46 = vcombine.low %v1114_v20, %v1192_v21  ;;  %v12083_v20 = vld [vmem:[%s17170_s0 + $0x8] sm:$0xff]  ;;  %v12084_v21 = vld [vmem:[%s17170_s0 + $0x10] sm:$0xff] }
  0xc0   :  { %v12589_v25 = vpop.permute.xlu0 %1245  ;;  %v1322_v29 = vpop.permute.xlu1 %1321  ;;  %v1194_v31 = vsel %vm1187_vm2, %v1166_v4, %v1193_v16 }
  0xc1   :  { %v1259_v32 = vrot.slane %v12589_v25, 4  ;;  %v1336_v33 = vrot.slane %v1322_v29, 4  ;;  %v10648_v35 = vcombine.high %v1116_v30, %v1194_v31  ;;  %v10647_v0 = vcombine.low %v1116_v30, %v1194_v31 }
  0xc2   :  { %1736 = vrot.lane.b32.xlu0 %v1710_v27, %s12127_s23  ;;  %1811 = vrot.lane.b32.xlu1 %v1632_v60, %s12128_s24 }
  0xc3   :  { %2753 = vmatprep.subr.bf16.mxu1 %v10648_v35  ;;  %v1347_v45 = vsel %vm17251_vm0, %v1335_v51, %v1336_v33  ;;  %v1271_v49 = vsel %vm17251_vm0, %v1258_v36, %v1259_v32 }
  0xc4   :  { %v12599_v38 = vpop.permute.xlu0 %1323  ;;  %v2141_v40 = vpop.permute.xlu1 %2140  ;;  %v1348_v57 = vsel %vm1343_vm4, %v12400_v48, %v1347_v45  ;;  %v1272_v58 = vsel %vm1265_vm3, %v1244_v22, %v1271_v49  ;;  %v1270_v48 = vsel %vm1265_vm3, %v12393_v44, %v1269_v52 }
  0xc5   :  { %v1337_v42 = vrot.slane %v12599_v38, 4  ;;  %v10662_v1 = vcombine.high %v1270_v48, %v1348_v57  ;;  %v10661_v17 = vcombine.low %v1270_v48, %v1348_v57 }
  0xc6   :  { %1813 = vrot.lane.b32.xlu0 %v1787_v37, %s12128_s24  ;;  %1888 = vrot.lane.b32.xlu1 %v1632_v60, %s12129_s15 }
  0xc7   :  { %v1349_v51 = vsel %vm17251_vm0, %v1336_v33, %v1337_v42 }
  0xc8   :  { %v2143_v3 = vpop.permute.xlu0 %2142  ;;  %v1400_v56 = vpop.permute.xlu1 %1399  ;;  %v1350_v59 = vsel %vm1343_vm4, %v1322_v29, %v1349_v51 }
  0xc9   :  { %v12624_v60 = vsel %vm2144_vm12, %v2141_v40, %v2143_v3  ;;  %v1414_v61 = vrot.slane %v1400_v56, 4  ;;  %v10664_v4 = vcombine.high %v1272_v58, %v1350_v59  ;;  %v10663_v22 = vcombine.low %v1272_v58, %v1350_v59 }
  0xca   :  { %1890 = vrot.lane.b32.xlu0 %v1864_v50, %s12129_s15  ;;  %144 = vrot.lane.b32.xlu1 %v12082_v39, %s12126_s22 }
  0xcb   :  { %10737 = vmatmul.mubr.msk.bf16.vlgmr.msra.gmra.mrb[0].mxu0 %vm485_vm13, %v12624_v60  ;;  %10738 = vmatmul.mubr.msk.bf16.vlgmr.msra.gmra.mrb[0].mxu1 %vm485_vm13, %v12624_v60  ;;  %v1425_v44 = vsel %vm17251_vm0, %v1413_v11, %v1414_v61 }
  0xcc   :  { %2713 = vmatpush1.bf16.msra.mxu0 %v10645_v46  ;;  %2754 = vmatpush1.bf16.msra.mxu1 %v10647_v0  ;;  %v12637_v6 = vpop.permute.xlu0 %1401  ;;  %v1478_v7 = vpop.permute.xlu1 %1477  ;;  %v1426_v27 = vsel %vm1421_vm5, %v12431_v10, %v1425_v44 }
  0xcd   :  { %2714 = vmatprep.subr.bf16.mxu0 %v10662_v1  ;;  %2755 = vmatprep.subr.bf16.mxu1 %v10664_v4  ;;  %v1415_v8 = vrot.slane %v12637_v6, 4  ;;  %v1492_v15 = vrot.slane %v1478_v7, 4 }
  0xce   :  { %146 = vrot.lane.b32.xlu0 %v12083_v20, %s12126_s22  ;;  %148 = vrot.lane.b32.xlu1 %v12084_v21, %s12126_s22 }
  0xcf   :  { %v1503_v26 = vsel %vm17251_vm0, %v1491_v18, %v1492_v15  ;;  %2744 = vmatprep.mubr.bf16.mxu0 %v12130_v9  ;;  %2785 = vmatprep.mubr.bf16.mxu1 %v12130_v9  ;;  %v1427_v29 = vsel %vm17251_vm0, %v1414_v61, %v1415_v8 }
  0xd0   :  { %2715 = vmatpush1.bf16.msra.mxu0 %v10661_v17  ;;  %2756 = vmatpush1.bf16.msra.mxu1 %v10663_v22  ;;  %v12656_v11 = vpop.permute.xlu0 %1479  ;;  %v1556_v28 = vpop.permute.xlu1 %1555  ;;  %v1504_v16 = vsel %vm1499_vm6, %v12438_v14, %v1503_v26  ;;  %v1428_v37 = vsel %vm1421_vm5, %v1400_v56, %v1427_v29 }
  0xd1   :  { %v1493_v18 = vrot.slane %v12656_v11, 4  ;;  %v1570_v30 = vrot.slane %v1556_v28, 4  ;;  %v10677_v31 = vcombine.low %v1426_v27, %v1504_v16  ;;  %v10678_v9 = vcombine.high %v1426_v27, %v1504_v16 }
  0xd2   :  { %223 = vrot.lane.b32.xlu0 %v12082_v39, %s12127_s23  ;;  %225 = vrot.lane.b32.xlu1 %v12083_v20, %s12127_s23 }
  0xd3   :  { %2716 = vmatprep.subr.bf16.mxu0 %v10678_v9  ;;  %v1581_v10 = vsel %vm17251_vm0, %v1569_v43, %v1570_v30  ;;  %v1505_v14 = vsel %vm17251_vm0, %v1492_v15, %v1493_v18  ;;  %v12085_v43 = vld [vmem:[%s17170_s0 + $0x14] sm:$0xff] }
  0xd4   :  { %v12674_v33 = vpop.permute.xlu0 %1557  ;;  %v1650_v35 = vpop.permute.xlu1 %1649  ;;  %2717 = vmatpush1.bf16.msra.mxu0 %v10677_v31  ;;  %v1582_v36 = vsel %vm1577_vm7, %v12465_v41, %v1581_v10  ;;  %v1506_v40 = vsel %vm1499_vm6, %v1478_v7, %v1505_v14 }
  0xd5   :  { %v1571_v45 = vrot.slane %v12674_v33, 4  ;;  %v1664_v49 = vrot.slane %v1650_v35, 4  ;;  %v10693_v50 = vcombine.low %v1582_v36, %v12085_v43  ;;  %v10694_v52 = vcombine.high %v1582_v36, %v12085_v43 }
  0xd6   :  { %227 = vrot.lane.b32.xlu0 %v12084_v21, %s12127_s23  ;;  %301 = vrot.lane.b32.xlu1 %v12082_v39, %s12128_s24  ;;  %v10679_v51 = vcombine.low %v1428_v37, %v1506_v40  ;;  %v10680_v3 = vcombine.high %v1428_v37, %v1506_v40  ;;  %v12703_v39 = vld [vmem:[%s17170_s0] sm:$0xff] }
  0xd7   :  { %2718 = vmatprep.subr.bf16.mxu0 %v10694_v52  ;;  %v1583_v41 = vsel %vm17251_vm0, %v1570_v30, %v1571_v45  ;;  %v1674_v59 = vsel %vm17251_vm0, %v1663_v62, %v1664_v49  ;;  %v12708_v62 = vld [vmem:[%s17170_s0 + $0x8] sm:$0xff] }
  0xd8   :  { %2757 = vmatprep.subr.bf16.mxu1 %v10680_v3  ;;  %v12689_v56 = vpop.permute.xlu0 %1651  ;;  %v1727_v57 = vpop.permute.xlu1 %1726  ;;  %2719 = vmatpush1.bf16.msra.mxu0 %v10693_v50  ;;  %v1584_v58 = vsel %vm1577_vm7, %v1556_v28, %v1583_v41  ;;  %v1675_v7 = vsel %vm173_vm8, %v12479_v54, %v1674_v59  ;;  %v12730_v54 = vld [vmem:[%s17170_s0 + $0x10] sm:$0xff] }
  0xd9   :  { %v1665_v61 = vrot.slane %v12689_v56, 4  ;;  %v1741_v4 = vrot.slane %v1727_v57, 4  ;;  %2758 = vmatpush1.bf16.msra.mxu1 %v10679_v51  ;;  %v10695_v46 = vcombine.low %v1584_v58, %v12329_v12  ;;  %v10696_v0 = vcombine.high %v1584_v58, %v12329_v12 }
  0xda   :  { %303 = vrot.lane.b32.xlu0 %v12083_v20, %s12128_s24  ;;  %305 = vrot.lane.b32.xlu1 %v12084_v21, %s12128_s24 }
  0xdb   :  { %2759 = vmatprep.subr.bf16.mxu1 %v10696_v0  ;;  %v1751_v48 = vsel %vm17251_vm0, %v1740_v13, %v1741_v4  ;;  %v1676_v44 = vsel %vm17251_vm0, %v1664_v49, %v1665_v61 }
  0xdc   :  { %v12713_v12 = vpop.permute.xlu0 %1728  ;;  %v1804_v1 = vpop.permute.xlu1 %1803  ;;  %v1752_v15 = vsel %vm251_vm9, %v12499_v5, %v1751_v48  ;;  %v1677_v28 = vsel %vm173_vm8, %v1650_v35, %v1676_v44 }
  0xdd   :  { %v1742_v17 = vrot.slane %v12713_v12, 4  ;;  %v1818_v22 = vrot.slane %v1804_v1, 4  ;;  %2760 = vmatpush1.bf16.msra.mxu1 %v10695_v46  ;;  %v10709_v20 = vcombine.low %v1675_v7, %v1752_v15  ;;  %v10710_v21 = vcombine.high %v1675_v7, %v1752_v15  ;;  %v12793_v7 = vld [vmem:[#allocation5] sm:$0xff] }
  0xde   :  { %379 = vrot.lane.b32.xlu0 %v12703_v39, %s12129_s15  ;;  %381 = vrot.lane.b32.xlu1 %v12708_v62, %s12129_s15 }
  0xdf   :  { %2720 = vmatprep.subr.bf16.mxu0 %v10710_v21  ;;  %v1753_v5 = vsel %vm17251_vm0, %v1741_v4, %v1742_v17  ;;  %v1828_v16 = vsel %vm17251_vm0, %v1817_v34, %v1818_v22 }
  0xe0   :  { %v12735_v13 = vpop.permute.xlu0 %1805  ;;  %v1881_v26 = vpop.permute.xlu1 %1880  ;;  %2721 = vmatpush1.bf16.msra.mxu0 %v10709_v20  ;;  %v1754_v27 = vsel %vm251_vm9, %v1727_v57, %v1753_v5  ;;  %v1829_v35 = vsel %vm329_vm10, %v12516_v24, %v1828_v16 }
  0xe1   :  { %v1819_v29 = vrot.slane %v12735_v13, 4  ;;  %v1895_v30 = vrot.slane %v1881_v26, 4  ;;  %v10711_v31 = vcombine.low %v1677_v28, %v1754_v27  ;;  %v10712_v9 = vcombine.high %v1677_v28, %v1754_v27 }
  0xe2   :  { %383 = vrot.lane.b32.xlu0 %v12730_v54, %s12129_s15  ;;  %457 = vrot.lane.b32.xlu1 %v12703_v39, %s12132_s25 }
  0xe3   :  { %2761 = vmatprep.subr.bf16.mxu1 %v10712_v9  ;;  %v1905_v10 = vsel %vm17251_vm0, %v1894_v55, %v1895_v30  ;;  %v1830_v37 = vsel %vm17251_vm0, %v1818_v22, %v1819_v29 }
  0xe4   :  { %v12750_v14 = vpop.permute.xlu0 %1882  ;;  %v1092_v34 = vpop.permute.xlu1 %1091  ;;  %2762 = vmatpush1.bf16.msra.mxu1 %v10711_v31  ;;  %v1906_v36 = vsel %vm407_vm11, %v12535_v47, %v1905_v10  ;;  %v1831_v52 = vsel %vm329_vm10, %v1804_v1, %v1830_v37 }
  0xe5   :  { %v1896_v40 = vrot.slane %v12750_v14, 4  ;;  %v1104_v49 = vrot.slane %v1092_v34, 4  ;;  %v10725_v43 = vcombine.low %v1829_v35, %v1906_v36  ;;  %v10726_v50 = vcombine.high %v1829_v35, %v1906_v36 }
  0xe6   :  { %459 = vrot.lane.b32.xlu0 %v12708_v62, %s12132_s25  ;;  %461 = vrot.lane.b32.xlu1 %v12730_v54, %s12132_s25 }
  0xe7   :  { %2722 = vmatprep.subr.bf16.mxu0 %v10726_v50  ;;  %v1907_v24 = vsel %vm17251_vm0, %v1895_v30, %v1896_v40  ;;  %v1117_v3 = vsel %vm17251_vm0, %v1103_v2, %v1104_v49 }
  0xe8   :  { %v12767_v47 = vpop.permute.xlu0 %1093  ;;  %v1170_v55 = vpop.permute.xlu1 %1169  ;;  %2723 = vmatpush1.bf16.msra.mxu0 %v10725_v43  ;;  %v1908_v51 = vsel %vm407_vm11, %v1881_v26, %v1907_v24  ;;  %v1118_v0 = vsel %vm1109_vm1, %v12555_v63, %v1117_v3 }
  0xe9   :  { %v1105_v41 = vrot.slane %v12767_v47, 4  ;;  %v1182_v57 = vrot.slane %v1170_v55, 4  ;;  %v10727_v58 = vcombine.low %v1831_v52, %v1908_v51  ;;  %v10728_v59 = vcombine.high %v1831_v52, %v1908_v51 }
  0xea   :  { %535 = vrot.lane.b32.xlu0 %v12703_v39, %s12133_s26  ;;  %537 = vrot.lane.b32.xlu1 %v12708_v62, %s12133_s26 }
  0xeb   :  { %10739 = vmatmul.mubr.msk.bf16.vlgmr.msra.gmra.mrb[4].mxu0 %vm485_vm13, %v12624_v60  ;;  %2763 = vmatprep.subr.bf16.mxu1 %v10728_v59  ;;  %v1195_v2 = vsel %vm17251_vm0, %v1181_v23, %v1182_v57  ;;  %v1119_v1 = vsel %vm17251_vm0, %v1104_v49, %v1105_v41 }
  0xec   :  { %v12784_v4 = vpop.permute.xlu0 %1171  ;;  %v1248_v46 = vpop.permute.xlu1 %1247  ;;  %2764 = vmatpush1.bf16.msra.mxu1 %v10727_v58  ;;  %v1196_v48 = vsel %vm1187_vm2, %v12571_v19, %v1195_v2  ;;  %2826 = vmatprep.mubr.bf16.mxu0 %v12793_v7  ;;  %v1120_v21 = vsel %vm1109_vm1, %v1092_v34, %v1119_v1 }
  0xed   :  { %v1183_v23 = vrot.slane %v12784_v4, 4  ;;  %v1260_v15 = vrot.slane %v1248_v46, 4  ;;  %v10649_v44 = vcombine.low %v1118_v0, %v1196_v48  ;;  %v10650_v22 = vcombine.high %v1118_v0, %v1196_v48 }
  0xee   :  { %539 = vrot.lane.b32.xlu0 %v12730_v54, %s12133_s26  ;;  %613 = vrot.lane.b32.xlu1 %v12703_v39, %s12134_s14 }
  0xef   :  { %10740 = vmatmul.mubr.msk.bf16.vlgmr.msra.gmra.mrb[4].mxu1 %vm485_vm13, %v12624_v60  ;;  %2794 = vmatprep.subr.bf16.mxu0 %v10650_v22  ;;  %v1197_v63 = vsel %vm17251_vm0, %v1182_v57, %v1183_v23  ;;  %v1273_v26 = vsel %vm17251_vm0, %v1259_v32, %v1260_v15 }
  0xf0   :  { %v12806_v19 = vpop.permute.xlu0 %1249  ;;  %v1326_v20 = vpop.permute.xlu1 %1325  ;;  %2795 = vmatpush1.bf16.msra.mxu0 %v10649_v44  ;;  %v1198_v5 = vsel %vm1187_vm2, %v1170_v55, %v1197_v63  ;;  %2867 = vmatprep.mubr.bf16.mxu1 %v12793_v7  ;;  %v1274_v10 = vsel %vm1265_vm3, %v12589_v25, %v1273_v26 }
  0xf1   :  { %v1261_v28 = vrot.slane %v12806_v19, 4  ;;  %v1338_v27 = vrot.slane %v1326_v20, 4  ;;  %v10651_v16 = vcombine.low %v1120_v21, %v1198_v5  ;;  %v10652_v30 = vcombine.high %v1120_v21, %v1198_v5 }
  0xf2   :  { %615 = vrot.lane.b32.xlu0 %v12708_v62, %s12134_s14  ;;  %617 = vrot.lane.b32.xlu1 %v12730_v54, %s12134_s14 }
  0xf3   :  { %2835 = vmatprep.subr.bf16.mxu1 %v10652_v30  ;;  %v1351_v31 = vsel %vm17251_vm0, %v1337_v42, %v1338_v27  ;;  %v1275_v35 = vsel %vm17251_vm0, %v1260_v15, %v1261_v28 }
  0xf4   :  { %v12822_v9 = vpop.permute.xlu0 %1327  ;;  %v1404_v32 = vpop.permute.xlu1 %1403  ;;  %2836 = vmatpush1.bf16.msra.mxu1 %v10651_v16  ;;  %v1352_v34 = vsel %vm1343_vm4, %v12599_v38, %v1351_v31  ;;  %v1276_v50 = vsel %vm1265_vm3, %v1248_v46, %v1275_v35 }
  0xf5   :  { %v1339_v36 = vrot.slane %v12822_v9, 4  ;;  %v1416_v37 = vrot.slane %v1404_v32, 4  ;;  %v10665_v49 = vcombine.low %v1274_v10, %v1352_v34  ;;  %v10666_v43 = vcombine.high %v1274_v10, %v1352_v34 }
  0xf6   :  { %691 = vrot.lane.b32.xlu0 %v12703_v39, %s12135_s27  ;;  %693 = vrot.lane.b32.xlu1 %v12708_v62, %s12135_s27 }
  0xf7   :  { %2796 = vmatprep.subr.bf16.mxu0 %v10666_v43  ;;  %v1353_v25 = vsel %vm17251_vm0, %v1338_v27, %v1339_v36  ;;  %v1429_v55 = vsel %vm17251_vm0, %v1415_v8, %v1416_v37 }
  0xf8   :  { %v12839_v38 = vpop.permute.xlu0 %1405  ;;  %v1482_v42 = vpop.permute.xlu1 %1481  ;;  %2797 = vmatpush1.bf16.msra.mxu0 %v10665_v49  ;;  %v1354_v24 = vsel %vm1343_vm4, %v1326_v20, %v1353_v25  ;;  %v1430_v2 = vsel %vm1421_vm5, %v12637_v6, %v1429_v55  ;;  %v1613_v6 = vld [vmem:[%s17170_s0 + $0x24] sm:$0xff] }
  0xf9   :  { %v1417_v52 = vrot.slane %v12839_v38, 4  ;;  %v1494_v51 = vrot.slane %v1482_v42, 4  ;;  %v10667_v3 = vcombine.low %v1276_v50, %v1354_v24  ;;  %v10668_v57 = vcombine.high %v1276_v50, %v1354_v24 }
  0xfa   :  { %695 = vrot.lane.b32.xlu0 %v12730_v54, %s12135_s27  ;;  %769 = vrot.lane.b32.xlu1 %v12703_v39, %s12136_s17 }
  0xfb   :  { %2837 = vmatprep.subr.bf16.mxu1 %v10668_v57  ;;  %v1507_v58 = vsel %vm17251_vm0, %v1493_v18, %v1494_v51  ;;  %v1431_v0 = vsel %vm17251_vm0, %v1416_v37, %v1417_v52 }
  0xfc   :  { %v12854_v59 = vpop.permute.xlu0 %1483  ;;  %v1560_v8 = vpop.permute.xlu1 %1559  ;;  %2838 = vmatpush1.bf16.msra.mxu1 %v10667_v3  ;;  %v1508_v46 = vsel %vm1499_vm6, %v12656_v11, %v1507_v58  ;;  %v1432_v21 = vsel %vm1421_vm5, %v1404_v32, %v1431_v0 }
  0xfd   :  { %v1495_v48 = vrot.slane %v12854_v59, 4  ;;  %v1572_v1 = vrot.slane %v1560_v8, 4  ;;  %v10681_v15 = vcombine.low %v1430_v2, %v1508_v46  ;;  %v10682_v44 = vcombine.high %v1430_v2, %v1508_v46 }
  0xfe   :  { %771 = vrot.lane.b32.xlu0 %v12708_v62, %s12136_s17  ;;  %773 = vrot.lane.b32.xlu1 %v12730_v54, %s12136_s17 }
  0xff   :  { %2798 = vmatprep.subr.bf16.mxu0 %v10682_v44  ;;  %v1585_v11 = vsel %vm17251_vm0, %v1571_v45, %v1572_v1  ;;  %v1509_v18 = vsel %vm17251_vm0, %v1494_v51, %v1495_v48 }
 0x100   :  { %v12877_v22 = vpop.permute.xlu0 %1561  ;;  %v1654_v63 = vpop.permute.xlu1 %1653  ;;  %2799 = vmatpush1.bf16.msra.mxu0 %v10681_v15  ;;  %v1586_v20 = vsel %vm1577_vm7, %v12674_v33, %v1585_v11  ;;  %v1510_v5 = vsel %vm1499_vm6, %v1482_v42, %v1509_v18 }
 0x101   :  { %v1573_v26 = vrot.slane %v12877_v22, 4  ;;  %v1666_v27 = vrot.slane %v1654_v63, 4  ;;  %v10697_v16 = vcombine.low %v1586_v20, %v1613_v6  ;;  %v10698_v45 = vcombine.high %v1586_v20, %v1613_v6  ;;  %v12939_v6 = vld [vmem:[%s17170_s0 + $0x18] sm:$0xff] }
 0x102   :  { %847 = vrot.lane.b32.xlu0 %v12703_v39, %s12137_s18  ;;  %849 = vrot.lane.b32.xlu1 %v12708_v62, %s12137_s18  ;;  %v10683_v30 = vcombine.low %v1432_v21, %v1510_v5  ;;  %v10684_v31 = vcombine.high %v1432_v21, %v1510_v5 }
 0x103   :  { %2800 = vmatprep.subr.bf16.mxu0 %v10698_v45  ;;  %v1587_v33 = vsel %vm17251_vm0, %v1572_v1, %v1573_v26  ;;  %v1678_v35 = vsel %vm17251_vm0, %v1665_v61, %v1666_v27 }
 0x104   :  { %2839 = vmatprep.subr.bf16.mxu1 %v10684_v31  ;;  %v12891_v32 = vpop.permute.xlu0 %1655  ;;  %v1731_v10 = vpop.permute.xlu1 %1730  ;;  %2801 = vmatpush1.bf16.msra.mxu0 %v10697_v16  ;;  %v1588_v34 = vsel %vm1577_vm7, %v1560_v8, %v1587_v33  ;;  %v1679_v24 = vsel %vm173_vm8, %v12689_v56, %v1678_v35 }
 0x105   :  { %v1667_v37 = vrot.slane %v12891_v32, 4  ;;  %v1743_v49 = vrot.slane %v1731_v10, 4  ;;  %2840 = vmatpush1.bf16.msra.mxu1 %v10683_v30  ;;  %v10699_v43 = vcombine.low %v1588_v34, %v12407_v53  ;;  %v10700_v25 = vcombine.high %v1588_v34, %v12407_v53 }
 0x106   :  { %851 = vrot.lane.b32.xlu0 %v12730_v54, %s12137_s18  ;;  %925 = vrot.lane.b32.xlu1 %v12703_v39, %s12138_s30 }
 0x107   :  { %2841 = vmatprep.subr.bf16.mxu1 %v10700_v25  ;;  %v1755_v61 = vsel %vm17251_vm0, %v1742_v17, %v1743_v49  ;;  %v1680_v55 = vsel %vm17251_vm0, %v1666_v27, %v1667_v37 }
 0x108   :  { %v12907_v42 = vpop.permute.xlu0 %1732  ;;  %v1808_v50 = vpop.permute.xlu1 %1807  ;;  %v1756_v53 = vsel %vm251_vm9, %v12713_v12, %v1755_v61  ;;  %v1681_v8 = vsel %vm173_vm8, %v1654_v63, %v1680_v55 }
 0x109   :  { %v1744_v51 = vrot.slane %v12907_v42, 4  ;;  %v1820_v3 = vrot.slane %v1808_v50, 4  ;;  %2842 = vmatpush1.bf16.msra.mxu1 %v10699_v43  ;;  %v10713_v57 = vcombine.low %v1679_v24, %v1756_v53  ;;  %v10714_v58 = vcombine.high %v1679_v24, %v1756_v53 }
 0x10a   :  { %927 = vrot.lane.b32.xlu0 %v12708_v62, %s12138_s30  ;;  %929 = vrot.lane.b32.xlu1 %v12730_v54, %s12138_s30 }
 0x10b   :  { %2802 = vmatprep.subr.bf16.mxu0 %v10714_v58  ;;  %v1757_v56 = vsel %vm17251_vm0, %v1743_v49, %v1744_v51  ;;  %v1832_v46 = vsel %vm17251_vm0, %v1819_v29, %v1820_v3 }
 0x10c   :  { %v12924_v12 = vpop.permute.xlu0 %1809  ;;  %v1885_v17 = vpop.permute.xlu1 %1884  ;;  %2803 = vmatpush1.bf16.msra.mxu0 %v10713_v57  ;;  %v1758_v2 = vsel %vm251_vm9, %v1731_v10, %v1757_v56  ;;  %v1833_v63 = vsel %vm329_vm10, %v12735_v13, %v1832_v46  ;;  %v12961_v13 = vld [vmem:[%s17170_s0 + $0x20] sm:$0xff] }
 0x10d   :  { %v1821_v0 = vrot.slane %v12924_v12, 4  ;;  %v1897_v1 = vrot.slane %v1885_v17, 4  ;;  %v10715_v15 = vcombine.low %v1681_v8, %v1758_v2  ;;  %v10716_v44 = vcombine.high %v1681_v8, %v1758_v2 }
 0x10e   :  { %1003 = vrot.lane.b32.xlu0 %v12703_v39, %s12139_s19  ;;  %1005 = vrot.lane.b32.xlu1 %v12708_v62, %s12139_s19 }
 0x10f   :  { %2843 = vmatprep.subr.bf16.mxu1 %v10716_v44  ;;  %v1909_v29 = vsel %vm17251_vm0, %v1896_v40, %v1897_v1  ;;  %v1834_v21 = vsel %vm17251_vm0, %v1820_v3, %v1821_v0 }
 0x110   :  { %v12944_v11 = vpop.permute.xlu0 %1886  ;;  %v1096_v18 = vpop.permute.xlu1 %1095  ;;  %2844 = vmatpush1.bf16.msra.mxu1 %v10715_v15  ;;  %v1910_v20 = vsel %vm407_vm11, %v12750_v14, %v1909_v29  ;;  %v1835_v31 = vsel %vm329_vm10, %v1808_v50, %v1834_v21 }
 0x111   :  { %v1898_v5 = vrot.slane %v12944_v11, 4  ;;  %v1106_v27 = vrot.slane %v1096_v18, 4  ;;  %v10729_v16 = vcombine.low %v1833_v63, %v1910_v20  ;;  %v10730_v45 = vcombine.high %v1833_v63, %v1910_v20 }
 0x112   :  { %1007 = vrot.lane.b32.xlu0 %v12730_v54, %s12139_s19  ;;  %150 = vrot.lane.b32.xlu1 %v12939_v6, %s12126_s22 }
 0x113   :  { %2804 = vmatprep.subr.bf16.mxu0 %v10730_v45  ;;  %v1911_v14 = vsel %vm17251_vm0, %v1897_v1, %v1898_v5  ;;  %v1121_v33 = vsel %vm17251_vm0, %v1105_v41, %v1106_v27 }
 0x114   :  { %v1098_v40 = vpop.permute.xlu0 %1097  ;;  %v1174_v30 = vpop.permute.xlu1 %1173  ;;  %2805 = vmatpush1.bf16.msra.mxu0 %v10729_v16  ;;  %v1912_v54 = vsel %vm407_vm11, %v1885_v17, %v1911_v14  ;;  %v1122_v50 = vsel %vm1109_vm1, %v12767_v47, %v1121_v33 }
 0x115   :  { %v1107_v10 = vrot.slane %v1098_v40, 4  ;;  %v1184_v34 = vrot.slane %v1174_v30, 4  ;;  %v10731_v35 = vcombine.low %v1835_v31, %v1912_v54  ;;  %v10732_v49 = vcombine.high %v1835_v31, %v1912_v54 }
 0x116   :  { %152 = vrot.lane.b32.xlu0 %v12961_v13, %s12126_s22  ;;  %229 = vrot.lane.b32.xlu1 %v12939_v6, %s12127_s23 }
 0x117   :  { %10741 = vmatmul.mubr.msk.bf16.vlgmr.msra.gmra.mrb[8].mxu0 %vm485_vm13, %v12624_v60  ;;  %2845 = vmatprep.subr.bf16.mxu1 %v10732_v49  ;;  %v1199_v43 = vsel %vm17251_vm0, %v1183_v23, %v1184_v34  ;;  %v1123_v41 = vsel %vm17251_vm0, %v1106_v27, %v1107_v10 }
 0x118   :  { %v1176_v25 = vpop.permute.xlu0 %1175  ;;  %v1252_v61 = vpop.permute.xlu1 %1251  ;;  %2846 = vmatpush1.bf16.msra.mxu1 %v10731_v35  ;;  %v1200_v24 = vsel %vm1187_vm2, %v12784_v4, %v1199_v43  ;;  %2908 = vmatprep.mubr.bf16.mxu0 %v12793_v7  ;;  %v1124_v58 = vsel %vm1109_vm1, %v1096_v18, %v1123_v41  ;;  %vm719_vm1 = vcmask 760832  }
 0x119   :  { %v1185_v53 = vrot.slane %v1176_v25, 4  ;;  %v1262_v55 = vrot.slane %v1252_v61, 4  ;;  %v10653_v3 = vcombine.low %v1122_v50, %v1200_v24  ;;  %v10654_v57 = vcombine.high %v1122_v50, %v1200_v24 }
 0x11a   :  { %231 = vrot.lane.b32.xlu0 %v12961_v13, %s12127_s23  ;;  %307 = vrot.lane.b32.xlu1 %v12939_v6, %s12128_s24 }
 0x11b   :  { %v1201_v23 = vsel %vm17251_vm0, %v1184_v34, %v1185_v53  ;;  %10742 = vmatmul.mubr.msk.bf16.vlgmr.msra.gmra.mrb[8].mxu1 %vm485_vm13, %v12624_v60  ;;  %2876 = vmatprep.subr.bf16.mxu0 %v10654_v57  ;;  %v1277_v17 = vsel %vm17251_vm0, %v1261_v28, %v1262_v55 }
 0x11c   :  { %v1254_v47 = vpop.permute.xlu0 %1253  ;;  %v1330_v4 = vpop.permute.xlu1 %1329  ;;  %2877 = vmatpush1.bf16.msra.mxu0 %v10653_v3  ;;  %v1202_v56 = vsel %vm1187_vm2, %v1174_v30, %v1201_v23  ;;  %2949 = vmatprep.mubr.bf16.mxu1 %v12793_v7  ;;  %v1278_v18 = vsel %vm1265_vm3, %v12806_v19, %v1277_v17 }
 0x11d   :  { %v1263_v8 = vrot.slane %v1254_v47, 4  ;;  %v1340_v2 = vrot.slane %v1330_v4, 4  ;;  %v10655_v46 = vcombine.low %v1124_v58, %v1202_v56  ;;  %v10656_v1 = vcombine.high %v1124_v58, %v1202_v56 }
 0x11e   :  { %309 = vrot.lane.b32.xlu0 %v12961_v13, %s12128_s24  ;;  %385 = vrot.lane.b32.xlu1 %v12939_v6, %s12129_s15 }
 0x11f   :  { %2917 = vmatprep.subr.bf16.mxu1 %v10656_v1  ;;  %v1355_v15 = vsel %vm17251_vm0, %v1339_v36, %v1340_v2  ;;  %v1279_v44 = vsel %vm17251_vm0, %v1262_v55, %v1263_v8 }
 0x120   :  { %v1332_v28 = vpop.permute.xlu0 %1331  ;;  %v1408_v29 = vpop.permute.xlu1 %1407  ;;  %2918 = vmatpush1.bf16.msra.mxu1 %v10655_v46  ;;  %v1356_v63 = vsel %vm1343_vm4, %v12822_v9, %v1355_v15  ;;  %v1280_v19 = vsel %vm1265_vm3, %v1252_v61, %v1279_v44  ;;  %vm797_vm3 = vcmask 752640  }
 0x121   :  { %v1341_v20 = vrot.slane %v1332_v28, 4  ;;  %v1418_v21 = vrot.slane %v1408_v29, 4  ;;  %v10669_v27 = vcombine.low %v1278_v18, %v1356_v63  ;;  %v10670_v16 = vcombine.high %v1278_v18, %v1356_v63 }
 0x122   :  { %387 = vrot.lane.b32.xlu0 %v12961_v13, %s12129_s15  ;;  %463 = vrot.lane.b32.xlu1 %v12939_v6, %s12132_s25 }
 0x123   :  { %v1357_v36 = vsel %vm17251_vm0, %v1340_v2, %v1341_v20  ;;  %2878 = vmatprep.subr.bf16.mxu0 %v10670_v16  ;;  %v1433_v40 = vsel %vm17251_vm0, %v1417_v52, %v1418_v21 }
 0x124   :  { %v1410_v45 = vpop.permute.xlu0 %1409  ;;  %v1486_v14 = vpop.permute.xlu1 %1485  ;;  %2879 = vmatpush1.bf16.msra.mxu0 %v10669_v27  ;;  %v1358_v9 = vsel %vm1343_vm4, %v1330_v4, %v1357_v36  ;;  %v1434_v52 = vsel %vm1421_vm5, %v12839_v38, %v1433_v40  ;;  %vm875_vm4 = vcmask 523264  }
 0x125   :  { %v1419_v30 = vrot.slane %v1410_v45, 4  ;;  %v1496_v31 = vrot.slane %v1486_v14, 4  ;;  %v10671_v54 = vcombine.low %v1280_v19, %v1358_v9  ;;  %v10672_v33 = vcombine.high %v1280_v19, %v1358_v9 }
 0x126   :  { %465 = vrot.lane.b32.xlu0 %v12961_v13, %s12132_s25  ;;  %541 = vrot.lane.b32.xlu1 %v12939_v6, %s12133_s26 }
 0x127   :  { %2919 = vmatprep.subr.bf16.mxu1 %v10672_v33  ;;  %v1511_v10 = vsel %vm17251_vm0, %v1495_v48, %v1496_v31  ;;  %v1435_v34 = vsel %vm17251_vm0, %v1418_v21, %v1419_v30  ;;  %v1615_v48 = vld [vmem:[%s17170_s0 + $0x34] sm:$0xff] }
 0x128   :  { %v1488_v35 = vpop.permute.xlu0 %1487  ;;  %v1564_v49 = vpop.permute.xlu1 %1563  ;;  %2920 = vmatpush1.bf16.msra.mxu1 %v10671_v54  ;;  %v1512_v43 = vsel %vm1499_vm6, %v12854_v59, %v1511_v10  ;;  %v1436_v3 = vsel %vm1421_vm5, %v1408_v29, %v1435_v34  ;;  %vm953_vm5 = vcmask 515072  }
 0x129   :  { %v1497_v41 = vrot.slane %v1488_v35, 4  ;;  %v1574_v25 = vrot.slane %v1564_v49, 4  ;;  %v10685_v61 = vcombine.low %v1434_v52, %v1512_v43  ;;  %v10686_v50 = vcombine.high %v1434_v52, %v1512_v43 }
 0x12a   :  { %543 = vrot.lane.b32.xlu0 %v12961_v13, %s12133_s26  ;;  %619 = vrot.lane.b32.xlu1 %v12939_v6, %s12134_s14 }
 0x12b   :  { %v1513_v24 = vsel %vm17251_vm0, %v1496_v31, %v1497_v41  ;;  %2880 = vmatprep.subr.bf16.mxu0 %v10686_v50  ;;  %v1589_v38 = vsel %vm17251_vm0, %v1573_v26, %v1574_v25 }
 0x12c   :  { %v1566_v59 = vpop.permute.xlu0 %1565  ;;  %v1658_v53 = vpop.permute.xlu1 %1657  ;;  %2881 = vmatpush1.bf16.msra.mxu0 %v10685_v61  ;;  %v1590_v55 = vsel %vm1577_vm7, %v12877_v22, %v1589_v38  ;;  %v1514_v57 = vsel %vm1499_vm6, %v1486_v14, %v1513_v24  ;;  %v1616_v22 = vld [vmem:[%s17170_s0 + $0x3c] sm:$0xff]  ;;  %vm1031_vm6 = vcmask 506880  }
 0x12d   :  { %v1575_v23 = vrot.slane %v1566_v59, 4  ;;  %v1668_v47 = vrot.slane %v1658_v53, 4  ;;  %v10701_v4 = vcombine.low %v1590_v55, %v1615_v48  ;;  %v10702_v58 = vcombine.high %v1590_v55, %v1615_v48 }
 0x12e   :  { %621 = vrot.lane.b32.xlu0 %v12961_v13, %s12134_s14  ;;  %697 = vrot.lane.b32.xlu1 %v12939_v6, %s12135_s27  ;;  %v10687_v26 = vcombine.low %v1436_v3, %v1514_v57  ;;  %v10688_v56 = vcombine.high %v1436_v3, %v1514_v57  ;;  %v13118_v3 = vld [vmem:[%s17170_s0 + $0x30] sm:$0xff] }
 0x12f   :  { %v1591_v17 = vsel %vm17251_vm0, %v1574_v25, %v1575_v23  ;;  %2882 = vmatprep.subr.bf16.mxu0 %v10702_v58  ;;  %v1682_v1 = vsel %vm17251_vm0, %v1667_v37, %v1668_v47 }
 0x130   :  { %2921 = vmatprep.subr.bf16.mxu1 %v10688_v56  ;;  %v1660_v8 = vpop.permute.xlu0 %1659  ;;  %v1735_v2 = vpop.permute.xlu1 %1734  ;;  %2883 = vmatpush1.bf16.msra.mxu0 %v10701_v4  ;;  %v1592_v46 = vsel %vm1577_vm7, %v1564_v49, %v1591_v17  ;;  %v1683_v21 = vsel %vm173_vm8, %v12891_v32, %v1682_v1  ;;  %vm3478_vm7 = vcmask 850944  }
 0x131   :  { %v1669_v15 = vrot.slane %v1660_v8, 4  ;;  %v1745_v44 = vrot.slane %v1735_v2, 4  ;;  %2922 = vmatpush1.bf16.msra.mxu1 %v10687_v26  ;;  %v10703_v28 = vcombine.low %v1592_v46, %v1616_v22  ;;  %v10704_v29 = vcombine.high %v1592_v46, %v1616_v22 }
 0x132   :  { %699 = vrot.lane.b32.xlu0 %v12961_v13, %s12135_s27  ;;  %775 = vrot.lane.b32.xlu1 %v12939_v6, %s12136_s17 }
 0x133   :  { %2923 = vmatprep.subr.bf16.mxu1 %v10704_v29  ;;  %v1759_v18 = vsel %vm17251_vm0, %v1744_v51, %v1745_v44  ;;  %v1684_v63 = vsel %vm17251_vm0, %v1668_v47, %v1669_v15 }
 0x134   :  { %v1737_v20 = vpop.permute.xlu0 %1736  ;;  %v1812_v37 = vpop.permute.xlu1 %1811  ;;  %v1760_v27 = vsel %vm251_vm9, %v12907_v42, %v1759_v18  ;;  %v1685_v32 = vsel %vm173_vm8, %v1658_v53, %v1684_v63 }
 0x135   :  { %v1746_v16 = vrot.slane %v1737_v20, 4  ;;  %v1822_v36 = vrot.slane %v1812_v37, 4  ;;  %2924 = vmatpush1.bf16.msra.mxu1 %v10703_v28  ;;  %v10717_v45 = vcombine.low %v1683_v21, %v1760_v27  ;;  %v10718_v14 = vcombine.high %v1683_v21, %v1760_v27 }
 0x136   :  { %777 = vrot.lane.b32.xlu0 %v12961_v13, %s12136_s17  ;;  %853 = vrot.lane.b32.xlu1 %v12939_v6, %s12137_s18 }
 0x137   :  { %v1761_v51 = vsel %vm17251_vm0, %v1745_v44, %v1746_v16  ;;  %2884 = vmatprep.subr.bf16.mxu0 %v10718_v14  ;;  %v1836_v40 = vsel %vm17251_vm0, %v1821_v0, %v1822_v36 }
 0x138   :  { %v1814_v19 = vpop.permute.xlu0 %1813  ;;  %v1889_v9 = vpop.permute.xlu1 %1888  ;;  %2885 = vmatpush1.bf16.msra.mxu0 %v10717_v45  ;;  %v1762_v42 = vsel %vm251_vm9, %v1735_v2, %v1761_v51  ;;  %v1837_v0 = vsel %vm329_vm10, %v12924_v12, %v1836_v40  ;;  %v13102_v12 = vld [vmem:[%s17170_s0 + $0x28] sm:$0xff] }
 0x139   :  { %v1823_v30 = vrot.slane %v1814_v19, 4  ;;  %v1899_v31 = vrot.slane %v1889_v9, 4  ;;  %v10719_v54 = vcombine.low %v1685_v32, %v1762_v42  ;;  %v10720_v33 = vcombine.high %v1685_v32, %v1762_v42 }
 0x13a   :  { %855 = vrot.lane.b32.xlu0 %v12961_v13, %s12137_s18  ;;  %931 = vrot.lane.b32.xlu1 %v12939_v6, %s12138_s30 }
 0x13b   :  { %2925 = vmatprep.subr.bf16.mxu1 %v10720_v33  ;;  %v1913_v10 = vsel %vm17251_vm0, %v1898_v5, %v1899_v31  ;;  %v1838_v52 = vsel %vm17251_vm0, %v1822_v36, %v1823_v30  ;;  %v17183_v30 = vmov 0.0  }
 0x13c   :  { %v1891_v34 = vpop.permute.xlu0 %1890  ;;  %v145_v35 = vpop.permute.xlu1 %144  ;;  %2926 = vmatpush1.bf16.msra.mxu1 %v10719_v54  ;;  %v1914_v49 = vsel %vm407_vm11, %v12944_v11, %v1913_v10  ;;  %v1839_v48 = vsel %vm329_vm10, %v1812_v37, %v1838_v52  ;;  %59 = vst [vmem:[#allocation4 + $0x80] sm:$0x3f] %v17183_v30  ;;  %43 = vst [vmem:[#allocation4] sm:$0x3f] %v17183_v30 }
 0x13d   :  { %v1900_v43 = vrot.slane %v1891_v34, 4  ;;  %v10733_v41 = vcombine.low %v1837_v0, %v1914_v49  ;;  %v10734_v25 = vcombine.high %v1837_v0, %v1914_v49  ;;  %v162_v11 = vrot.slane %v145_v35, 4  ;;  %44 = vst [vmem:[#allocation4 + $0x8] sm:$0x3f] %v17183_v30  ;;  %45 = vst [vmem:[#allocation4 + $0x10] sm:$0x3f] %v17183_v30 }
 0x13e   :  { %933 = vrot.lane.b32.xlu0 %v12961_v13, %s12138_s30  ;;  %1009 = vrot.lane.b32.xlu1 %v12939_v6, %s12139_s19  ;;  %46 = vst [vmem:[#allocation4 + $0x18] sm:$0x3f] %v17183_v30  ;;  %47 = vst [vmem:[#allocation4 + $0x20] sm:$0x3f] %v17183_v30 }
 0x13f   :  { %v1915_v5 = vsel %vm17251_vm0, %v1899_v31, %v1900_v43  ;;  %2886 = vmatprep.subr.bf16.mxu0 %v10734_v25  ;;  %48 = vst [vmem:[#allocation4 + $0x28] sm:$0x3f] %v17183_v30  ;;  %49 = vst [vmem:[#allocation4 + $0x30] sm:$0x3f] %v17183_v30 }
 0x140   :  { %v147_v61 = vpop.permute.xlu0 %146  ;;  %v13104_v50 = vpop.permute.xlu1 %148  ;;  %2887 = vmatpush1.bf16.msra.mxu0 %v10733_v41  ;;  %v1916_v24 = vsel %vm407_vm11, %v1889_v9, %v1915_v5  ;;  %50 = vst [vmem:[#allocation4 + $0x38] sm:$0x3f] %v17183_v30  ;;  %51 = vst [vmem:[#allocation4 + $0x40] sm:$0x3f] %v17183_v30 }
 0x141   :  { %v163_v38 = vrot.slane %v147_v61, 4  ;;  %v164_v59 = vrot.slane %v13104_v50, 4  ;;  %v10735_v53 = vcombine.low %v1839_v48, %v1916_v24  ;;  %v10736_v55 = vcombine.high %v1839_v48, %v1916_v24  ;;  %52 = vst [vmem:[#allocation4 + $0x48] sm:$0x3f] %v17183_v30  ;;  %53 = vst [vmem:[#allocation4 + $0x50] sm:$0x3f] %v17183_v30 }
 0x142   :  { %1011 = vrot.lane.b32.xlu0 %v12961_v13, %s12139_s19  ;;  %154 = vrot.lane.b32.xlu1 %v13102_v12, %s12126_s22  ;;  %54 = vst [vmem:[#allocation4 + $0x58] sm:$0x3f] %v17183_v30  ;;  %55 = vst [vmem:[#allocation4 + $0x60] sm:$0x3f] %v17183_v30 }
 0x143   :  { %10743 = vmatmul.mubr.msk.bf16.vlgmr.msra.gmra.mrb[12].mxu0 %vm485_vm13, %v12624_v60  ;;  %2927 = vmatprep.subr.bf16.mxu1 %v10736_v55  ;;  %v172_v57 = vsel %vm17251_vm0, %v162_v11, %v163_v38  ;;  %v175_v23 = vsel %vm17251_vm0, %v163_v38, %v164_v59  ;;  %56 = vst [vmem:[#allocation4 + $0x68] sm:$0x3f] %v17183_v30  ;;  %57 = vst [vmem:[#allocation4 + $0x70] sm:$0x3f] %v17183_v30 }
 0x144   :  { %v224_v47 = vpop.permute.xlu0 %223  ;;  %v226_v13 = vpop.permute.xlu1 %225  ;;  %2928 = vmatpush1.bf16.msra.mxu1 %v10735_v53  ;;  %v174_v4 = vsel %vm173_vm8, %v145_v35, %v172_v57  ;;  %v176_v58 = vsel %vm173_vm8, %v147_v61, %v175_v23  ;;  %3563 = vmatprep.mubr.bf16.mxu0 %v12793_v7  ;;  %58 = vst [vmem:[#allocation4 + $0x78] sm:$0x3f] %v17183_v30 }
 0x145   :  { %v10745_v26 = vcombine.low %v12703_v39, %v174_v4  ;;  %v10746_v56 = vcombine.high %v12703_v39, %v174_v4  ;;  %v10747_v22 = vcombine.low %v12708_v62, %v176_v58  ;;  %v10748_v17 = vcombine.high %v12708_v62, %v176_v58 }
 0x146   :  { %156 = vrot.lane.b32.xlu0 %v13118_v3, %s12126_s22  ;;  %233 = vrot.lane.b32.xlu1 %v13102_v12, %s12127_s23  ;;  %v241_v39 = vrot.slane %v224_v47, 4  ;;  %v242_v46 = vrot.slane %v226_v13, 4 }
 0x147   :  { %10744 = vmatmul.mubr.msk.bf16.vlgmr.msra.gmra.mrb[12].mxu1 %vm485_vm13, %v12624_v60  ;;  %3531 = vmatprep.subr.bf16.mxu0 %v10746_v56 }
 0x148   :  { %3572 = vmatprep.subr.bf16.mxu1 %v10748_v17  ;;  %v13137_v8 = vpop.permute.xlu0 %227  ;;  %v302_v2 = vpop.permute.xlu1 %301  ;;  %3532 = vmatpush1.bf16.msra.mxu0 %v10745_v26  ;;  %v250_v29 = vsel %vm17251_vm0, %v241_v39, %v242_v46 }
 0x149   :  { %3573 = vmatpush1.bf16.msra.mxu1 %v10747_v22  ;;  %3604 = vmatprep.mubr.bf16.mxu1 %v12793_v7  ;;  %v243_v1 = vrot.slane %v13137_v8, 4  ;;  %v319_v15 = vrot.slane %v302_v2, 4  ;;  %v252_v21 = vsel %vm251_vm9, %v224_v47, %v250_v29 }
 0x14a   :  { %235 = vrot.lane.b32.xlu0 %v13118_v3, %s12127_s23  ;;  %311 = vrot.lane.b32.xlu1 %v13102_v12, %s12128_s24 }
 0x14b   :  { %v253_v7 = vsel %vm17251_vm0, %v242_v46, %v243_v1 }
 0x14c   :  { %v304_v60 = vpop.permute.xlu0 %303  ;;  %v13145_v62 = vpop.permute.xlu1 %305  ;;  %v254_v14 = vsel %vm251_vm9, %v226_v13, %v253_v7 }
 0x14d   :  { %v320_v44 = vrot.slane %v304_v60, 4  ;;  %v321_v28 = vrot.slane %v13145_v62, 4 }
 0x14e   :  { %313 = vrot.lane.b32.xlu0 %v13118_v3, %s12128_s24  ;;  %389 = vrot.lane.b32.xlu1 %v13102_v12, %s12129_s15 }
 0x14f   :  { %v328_v18 = vsel %vm17251_vm0, %v319_v15, %v320_v44  ;;  %v331_v63 = vsel %vm17251_vm0, %v320_v44, %v321_v28 }
 0x150   :  { %v380_v20 = vpop.permute.xlu0 %379  ;;  %v382_v37 = vpop.permute.xlu1 %381  ;;  %v330_v27 = vsel %vm329_vm10, %v302_v2, %v328_v18  ;;  %v332_v16 = vsel %vm329_vm10, %v304_v60, %v331_v63 }
 0x151   :  { %v10761_v36 = vcombine.low %v252_v21, %v330_v27  ;;  %v10762_v45 = vcombine.high %v252_v21, %v330_v27  ;;  %v10763_v51 = vcombine.low %v254_v14, %v332_v16  ;;  %v10764_v19 = vcombine.high %v254_v14, %v332_v16 }
 0x152   :  { %391 = vrot.lane.b32.xlu0 %v13118_v3, %s12129_s15  ;;  %467 = vrot.lane.b32.xlu1 %v13102_v12, %s12132_s25  ;;  %v397_v42 = vrot.slane %v380_v20, 4  ;;  %v398_v40 = vrot.slane %v382_v37, 4 }
 0x153   :  { %3533 = vmatprep.subr.bf16.mxu0 %v10762_v45  ;;  %3574 = vmatprep.subr.bf16.mxu1 %v10764_v19  ;;  %v13255_v19 = vld [vmem:[%s17170_s0 + $0x38] sm:$0xff] }
 0x154   :  { %v13168_v9 = vpop.permute.xlu0 %383  ;;  %v458_v32 = vpop.permute.xlu1 %457  ;;  %3534 = vmatpush1.bf16.msra.mxu0 %v10761_v36  ;;  %3575 = vmatpush1.bf16.msra.mxu1 %v10763_v51  ;;  %v406_v0 = vsel %vm17251_vm0, %v397_v42, %v398_v40 }
 0x155   :  { %v399_v31 = vrot.slane %v13168_v9, 4  ;;  %v475_v10 = vrot.slane %v458_v32, 4  ;;  %v408_v5 = vsel %vm407_vm11, %v380_v20, %v406_v0 }
 0x156   :  { %469 = vrot.lane.b32.xlu0 %v13118_v3, %s12132_s25  ;;  %545 = vrot.lane.b32.xlu1 %v13102_v12, %s12133_s26 }
 0x157   :  { %v409_v49 = vsel %vm17251_vm0, %v398_v40, %v399_v31 }
 0x158   :  { %v460_v54 = vpop.permute.xlu0 %459  ;;  %v13192_v33 = vpop.permute.xlu1 %461  ;;  %v410_v38 = vsel %vm407_vm11, %v382_v37, %v409_v49  ;;  %v134_v49 = vld [vmem:[%s17170_s0 + $0x40] sm:$0xf] }
 0x159   :  { %v476_v34 = vrot.slane %v460_v54, 4  ;;  %v477_v35 = vrot.slane %v13192_v33, 4 }
 0x15a   :  { %547 = vrot.lane.b32.xlu0 %v13118_v3, %s12133_s26  ;;  %623 = vrot.lane.b32.xlu1 %v13102_v12, %s12134_s14 }
 0x15b   :  { %v484_v52 = vsel %vm17251_vm0, %v475_v10, %v476_v34  ;;  %v487_v43 = vsel %vm17251_vm0, %v476_v34, %v477_v35 }
 0x15c   :  { %v536_v41 = vpop.permute.xlu0 %535  ;;  %v538_v25 = vpop.permute.xlu1 %537  ;;  %v486_v11 = vsel %vm485_vm13, %v458_v32, %v484_v52  ;;  %v488_v61 = vsel %vm485_vm13, %v460_v54, %v487_v43 }
 0x15d   :  { %v10777_v48 = vcombine.low %v408_v5, %v486_v11  ;;  %v10778_v24 = vcombine.high %v408_v5, %v486_v11  ;;  %v10779_v53 = vcombine.low %v410_v38, %v488_v61  ;;  %v10780_v55 = vcombine.high %v410_v38, %v488_v61 }
 0x15e   :  { %625 = vrot.lane.b32.xlu0 %v13118_v3, %s12134_s14  ;;  %701 = vrot.lane.b32.xlu1 %v13102_v12, %s12135_s27  ;;  %v553_v47 = vrot.slane %v536_v41, 4  ;;  %v554_v13 = vrot.slane %v538_v25, 4 }
 0x15f   :  { %3535 = vmatprep.subr.bf16.mxu0 %v10778_v24  ;;  %3576 = vmatprep.subr.bf16.mxu1 %v10780_v55  ;;  %v213_v55 = vld [vmem:[%s17170_s0 + $0x40] sm:$0xf] }
 0x160   :  { %v13215_v57 = vpop.permute.xlu0 %539  ;;  %v614_v23 = vpop.permute.xlu1 %613  ;;  %3536 = vmatpush1.bf16.msra.mxu0 %v10777_v48  ;;  %3577 = vmatpush1.bf16.msra.mxu1 %v10779_v53  ;;  %v562_v2 = vsel %vm17251_vm0, %v553_v47, %v554_v13 }
 0x161   :  { %v555_v4 = vrot.slane %v13215_v57, 4  ;;  %v631_v56 = vrot.slane %v614_v23, 4  ;;  %v564_v29 = vsel %vm563_vm14, %v536_v41, %v562_v2 }
 0x162   :  { %703 = vrot.lane.b32.xlu0 %v13118_v3, %s12135_s27  ;;  %779 = vrot.lane.b32.xlu1 %v13102_v12, %s12136_s17 }
 0x163   :  { %v565_v39 = vsel %vm17251_vm0, %v554_v13, %v555_v4 }
 0x164   :  { %v616_v58 = vpop.permute.xlu0 %615  ;;  %v13222_v26 = vpop.permute.xlu1 %617  ;;  %v566_v37 = vsel %vm563_vm14, %v538_v25, %v565_v39 }
 0x165   :  { %v632_v22 = vrot.slane %v616_v58, 4  ;;  %v633_v17 = vrot.slane %v13222_v26, 4 }
 0x166   :  { %781 = vrot.lane.b32.xlu0 %v13118_v3, %s12136_s17  ;;  %857 = vrot.lane.b32.xlu1 %v13102_v12, %s12137_s18 }
 0x167   :  { %v640_v46 = vsel %vm17251_vm0, %v631_v56, %v632_v22  ;;  %v643_v60 = vsel %vm17251_vm0, %v632_v22, %v633_v17  ;;  %v291_v22 = vld [vmem:[%s17170_s0 + $0x40] sm:$0xf] }
 0x168   :  { %v692_v15 = vpop.permute.xlu0 %691  ;;  %v694_v44 = vpop.permute.xlu1 %693  ;;  %v642_v7 = vsel %vm641_vm15, %v614_v23, %v640_v46  ;;  %v644_v18 = vsel %vm641_vm15, %v616_v58, %v643_v60 }
 0x169   :  { %v10793_v63 = vcombine.low %v564_v29, %v642_v7  ;;  %v10794_v20 = vcombine.high %v564_v29, %v642_v7  ;;  %v10795_v21 = vcombine.low %v566_v37, %v644_v18  ;;  %v10796_v27 = vcombine.high %v566_v37, %v644_v18  ;;  %v369_v7 = vld [vmem:[%s17170_s0 + $0x40] sm:$0xf] }
 0x16a   :  { %859 = vrot.lane.b32.xlu0 %v13118_v3, %s12137_s18  ;;  %935 = vrot.lane.b32.xlu1 %v13102_v12, %s12138_s30  ;;  %v709_v45 = vrot.slane %v692_v15, 4  ;;  %v710_v14 = vrot.slane %v694_v44, 4 }
 0x16b   :  { %3537 = vmatprep.subr.bf16.mxu0 %v10794_v20  ;;  %3578 = vmatprep.subr.bf16.mxu1 %v10796_v27 }
 0x16c   :  { %v13245_v16 = vpop.permute.xlu0 %695  ;;  %v770_v36 = vpop.permute.xlu1 %769  ;;  %3538 = vmatpush1.bf16.msra.mxu0 %v10793_v63  ;;  %3579 = vmatpush1.bf16.msra.mxu1 %v10795_v21  ;;  %v718_v34 = vsel %vm17251_vm0, %v709_v45, %v710_v14 }
 0x16d   :  { %v711_v51 = vrot.slane %v13245_v16, 4  ;;  %v787_v40 = vrot.slane %v770_v36, 4 }
 0x16e   :  { %937 = vrot.lane.b32.xlu0 %v13118_v3, %s12138_s30  ;;  %1013 = vrot.lane.b32.xlu1 %v13102_v12, %s12139_s19 }
 0x16f   :  { %v721_v0 = vsel %vm17251_vm0, %v710_v14, %v711_v51 }
 0x170   :  { %v772_v32 = vpop.permute.xlu0 %771  ;;  %v13257_v42 = vpop.permute.xlu1 %773  ;;  %v722_v24 = vsel %vm719_vm1, %v694_v44, %v721_v0 }
 0x171   :  { %v788_v54 = vrot.slane %v772_v32, 4  ;;  %v789_v10 = vrot.slane %v13257_v42, 4 }
 0x172   :  { %1015 = vrot.lane.b32.xlu0 %v13118_v3, %s12139_s19  ;;  %158 = vrot.lane.b32.xlu1 %v13255_v19, %s12126_s22  ;;  %v720_v3 = vsel %vm719_vm1, %v692_v15, %v718_v34 }
 0x173   :  { %v796_v52 = vsel %vm17251_vm0, %v787_v40, %v788_v54  ;;  %v799_v43 = vsel %vm17251_vm0, %v788_v54, %v789_v10 }
 0x174   :  { %v848_v41 = vpop.permute.xlu0 %847  ;;  %v850_v25 = vpop.permute.xlu1 %849  ;;  %v798_v5 = vsel %vm797_vm3, %v770_v36, %v796_v52  ;;  %v800_v11 = vsel %vm797_vm3, %v772_v32, %v799_v43  ;;  %v447_v52 = vld [vmem:[%s17170_s0 + $0x40] sm:$0xf] }
 0x175   :  { %v10809_v61 = vcombine.low %v720_v3, %v798_v5  ;;  %v10810_v48 = vcombine.high %v720_v3, %v798_v5  ;;  %v10811_v38 = vcombine.low %v722_v24, %v800_v11  ;;  %v10812_v53 = vcombine.high %v722_v24, %v800_v11 }
 0x176   :  { %160 = vrot.lane.b32.xlu0 %v134_v49, %s12126_s22  ;;  %237 = vrot.lane.b32.xlu1 %v13255_v19, %s12127_s23  ;;  %v865_v23 = vrot.slane %v848_v41, 4  ;;  %v866_v47 = vrot.slane %v850_v25, 4 }
 0x177   :  { %3539 = vmatprep.subr.bf16.mxu0 %v10810_v48  ;;  %3580 = vmatprep.subr.bf16.mxu1 %v10812_v53  ;;  %v112_v48 = vld [vmem:[%s17170_s0 + $0x10] sm:$0xff]  ;;  %v525_v53 = vld [vmem:[%s17170_s0 + $0x40] sm:$0xf] }
 0x178   :  { %v13285_v13 = vpop.permute.xlu0 %851  ;;  %v926_v58 = vpop.permute.xlu1 %925  ;;  %3540 = vmatpush1.bf16.msra.mxu0 %v10809_v61  ;;  %3581 = vmatpush1.bf16.msra.mxu1 %v10811_v38  ;;  %v874_v46 = vsel %vm17251_vm0, %v865_v23, %v866_v47 }
 0x179   :  { %v867_v56 = vrot.slane %v13285_v13, 4  ;;  %v943_v60 = vrot.slane %v926_v58, 4  ;;  %v876_v21 = vsel %vm875_vm4, %v848_v41, %v874_v46 }
 0x17a   :  { %239 = vrot.lane.b32.xlu0 %v213_v55, %s12127_s23  ;;  %315 = vrot.lane.b32.xlu1 %v13255_v19, %s12128_s24 }
 0x17b   :  { %v877_v29 = vsel %vm17251_vm0, %v866_v47, %v867_v56 }
 0x17c   :  { %v928_v2 = vpop.permute.xlu0 %927  ;;  %v13294_v39 = vpop.permute.xlu1 %929  ;;  %v878_v36 = vsel %vm875_vm4, %v850_v25, %v877_v29 }
 0x17d   :  { %v944_v15 = vrot.slane %v928_v2, 4  ;;  %v945_v44 = vrot.slane %v13294_v39, 4 }
 0x17e   :  { %317 = vrot.lane.b32.xlu0 %v291_v22, %s12128_s24  ;;  %393 = vrot.lane.b32.xlu1 %v13255_v19, %s12129_s15 }
 0x17f   :  { %v952_v18 = vsel %vm17251_vm0, %v943_v60, %v944_v15  ;;  %v955_v63 = vsel %vm17251_vm0, %v944_v15, %v945_v44 }
 0x180   :  { %v1004_v20 = vpop.permute.xlu0 %1003  ;;  %v1006_v37 = vpop.permute.xlu1 %1005  ;;  %v954_v27 = vsel %vm953_vm5, %v926_v58, %v952_v18  ;;  %v956_v45 = vsel %vm953_vm5, %v928_v2, %v955_v63  ;;  %v13348_v58 = vld [vmem:[%s17171_s1] sm:$0x7] }
 0x181   :  { %v1021_v14 = vrot.slane %v1004_v20, 4  ;;  %v1022_v32 = vrot.slane %v1006_v37, 4  ;;  %v10825_v40 = vcombine.low %v876_v21, %v954_v27  ;;  %v10826_v54 = vcombine.high %v876_v21, %v954_v27 }
 0x182   :  { %395 = vrot.lane.b32.xlu0 %v369_v7, %s12129_s15  ;;  %471 = vrot.lane.b32.xlu1 %v13255_v19, %s12132_s25  ;;  %v10827_v34 = vcombine.low %v878_v36, %v956_v45  ;;  %v10828_v0 = vcombine.high %v878_v36, %v956_v45  ;;  %v13373_v36 = vld [vmem:[#allocation5] sm:$0xff] }
 0x183   :  { %v1030_v49 = vsel %vm17251_vm0, %v1021_v14, %v1022_v32  ;;  %3541 = vmatprep.subr.bf16.mxu0 %v10826_v54 }
 0x184   :  { %3582 = vmatprep.subr.bf16.mxu1 %v10828_v0  ;;  %v13322_v43 = vpop.permute.xlu0 %1007  ;;  %v151_v41 = vpop.permute.xlu1 %150  ;;  %3542 = vmatpush1.bf16.msra.mxu0 %v10825_v40  ;;  %v1032_v25 = vsel %vm1031_vm6, %v1004_v20, %v1030_v49 }
 0x185   :  { %v1023_v3 = vrot.slane %v13322_v43, 4  ;;  %v165_v5 = vrot.slane %v151_v41, 4  ;;  %3583 = vmatpush1.bf16.msra.mxu1 %v10827_v34  ;;  %v10842_v11 = vcombine.high %v1032_v25, %v1032_v25  ;;  %v10841_v61 = vcombine.low %v1032_v25, %v1032_v25 }
 0x186   :  { %473 = vrot.lane.b32.xlu0 %v447_v52, %s12132_s25  ;;  %549 = vrot.lane.b32.xlu1 %v13255_v19, %s12133_s26 }
 0x187   :  { %v1033_v24 = vsel %vm17251_vm0, %v1022_v32, %v1023_v3  ;;  %10857 = vmatprep.subr.msk.bf16.mxu0 %vm17251_vm0, %v10842_v11  ;;  %v3484_v38 = vsel %vm17251_vm0, %v10841_v61, 0  ;;  %v177_v55 = vsel %vm17251_vm0, %v164_v59, %v165_v5 }
 0x188   :  { %v13343_v23 = vpop.permute.xlu0 %152  ;;  %v230_v47 = vpop.permute.xlu1 %229  ;;  %3544 = vmatpush1.bf16.msra.mxu0 %v3484_v38  ;;  %v1034_v22 = vsel %vm1031_vm6, %v1006_v37, %v1033_v24  ;;  %v178_v2 = vsel %vm173_vm8, %v13104_v50, %v177_v55  ;;  %v603_v50 = vld [vmem:[%s17170_s0 + $0x40] sm:$0xf] }
 0x189   :  { %v166_v46 = vrot.slane %v13343_v23, 4  ;;  %v244_v60 = vrot.slane %v230_v47, 4  ;;  %v10844_v15 = vcombine.high %v1034_v22, %v1034_v22  ;;  %v10749_v59 = vcombine.low %v112_v48, %v178_v2 }
 0x18a   :  { %551 = vrot.lane.b32.xlu0 %v525_v53, %s12133_s26  ;;  %627 = vrot.lane.b32.xlu1 %v13255_v19, %s12134_s14  ;;  %v10750_v29 = vcombine.high %v112_v48, %v178_v2  ;;  %v10843_v7 = vcombine.low %v1034_v22, %v1034_v22 }
 0x18b   :  { %10858 = vmatmul.mubr.msk.bf16.vlgmr.msra.gmra.mrb[16].mxu0 %vm3478_vm7, %v13348_v58  ;;  %10859 = vmatprep.subr.msk.bf16.mxu1 %vm17251_vm0, %v10844_v15  ;;  %v179_v18 = vsel %vm17251_vm0, %v165_v5, %v166_v46  ;;  %v255_v27 = vsel %vm17251_vm0, %v243_v1, %v244_v60  ;;  %v681_v1 = vld [vmem:[%s17170_s0 + $0x40] sm:$0xf] }
 0x18c   :  { %3613 = vmatprep.subr.bf16.mxu0 %v10750_v29  ;;  %v13366_v63 = vpop.permute.xlu0 %231  ;;  %v308_v20 = vpop.permute.xlu1 %307  ;;  %v3490_v37 = vsel %vm17251_vm0, %v10843_v7, 0  ;;  %v180_v21 = vsel %vm173_vm8, %v151_v41, %v179_v18  ;;  %3645 = vmatprep.mubr.bf16.mxu0 %v13373_v36  ;;  %v256_v0 = vsel %vm251_vm9, %v13137_v8, %v255_v27  ;;  %v759_v8 = vld [vmem:[%s17170_s0 + $0x40] sm:$0xf] }
 0x18d   :  { %v245_v45 = vrot.slane %v13366_v63, 4  ;;  %v322_v14 = vrot.slane %v308_v20, 4  ;;  %3585 = vmatpush1.bf16.msra.mxu1 %v3490_v37  ;;  %3614 = vmatpush1.bf16.msra.mxu0 %v10749_v59  ;;  %v10751_v32 = vcombine.low %v12939_v6, %v180_v21  ;;  %v10752_v40 = vcombine.high %v12939_v6, %v180_v21 }
 0x18e   :  { %629 = vrot.lane.b32.xlu0 %v603_v50, %s12134_s14  ;;  %705 = vrot.lane.b32.xlu1 %v13255_v19, %s12135_s27 }
 0x18f   :  { %3654 = vmatprep.subr.bf16.mxu1 %v10752_v40  ;;  %v333_v54 = vsel %vm17251_vm0, %v321_v28, %v322_v14  ;;  %v257_v52 = vsel %vm17251_vm0, %v244_v60, %v245_v45 }
 0x190   :  { %10860 = vmatmul.mubr.msk.bf16.vlgmr.msra.gmra.mrb[16].mxu1 %vm3478_vm7, %v13348_v58  ;;  %v13390_v34 = vpop.permute.xlu0 %309  ;;  %v386_v6 = vpop.permute.xlu1 %385  ;;  %v334_v49 = vsel %vm329_vm10, %v13145_v62, %v333_v54  ;;  %v258_v48 = vsel %vm251_vm9, %v230_v47, %v257_v52  ;;  %v837_v47 = vld [vmem:[%s17170_s0 + $0x40] sm:$0xf] }
 0x191   :  { %v323_v41 = vrot.slane %v13390_v34, 4  ;;  %v400_v25 = vrot.slane %v386_v6, 4  ;;  %3655 = vmatpush1.bf16.msra.mxu1 %v10751_v32  ;;  %v10765_v28 = vcombine.low %v256_v0, %v334_v49  ;;  %v10766_v5 = vcombine.high %v256_v0, %v334_v49  ;;  %3686 = vmatprep.mubr.bf16.mxu1 %v13373_v36 }
 0x192   :  { %707 = vrot.lane.b32.xlu0 %v681_v1, %s12135_s27  ;;  %783 = vrot.lane.b32.xlu1 %v13255_v19, %s12136_s17  ;;  %s12141_s27 = smov 56  }
 0x193   :  { %3615 = vmatprep.subr.bf16.mxu0 %v10766_v5  ;;  %v335_v62 = vsel %vm17251_vm0, %v322_v14, %v323_v41  ;;  %v411_v38 = vsel %vm17251_vm0, %v399_v31, %v400_v25  ;;  %v3859_v5 = vld [vmem:[%s17172_s2] sm:$0x3f]  ;;  %s12148_s2 = smov 100  }
 0x194   :  { %v13410_v11 = vpop.permute.xlu0 %387  ;;  %v464_v61 = vpop.permute.xlu1 %463  ;;  %3616 = vmatpush1.bf16.msra.mxu0 %v10765_v28  ;;  %v336_v24 = vsel %vm329_vm10, %v308_v20, %v335_v62  ;;  %v412_v59 = vsel %vm407_vm11, %v13168_v9, %v411_v38  ;;  %v915_v9 = vld [vmem:[%s17170_s0 + $0x40] sm:$0xf] }
 0x195   :  { %v401_v53 = vrot.slane %v13410_v11, 4  ;;  %v478_v55 = vrot.slane %v464_v61, 4  ;;  %v10767_v22 = vcombine.low %v258_v48, %v336_v24  ;;  %v10768_v2 = vcombine.high %v258_v48, %v336_v24 }
 0x196   :  { %785 = vrot.lane.b32.xlu0 %v759_v8, %s12136_s17  ;;  %861 = vrot.lane.b32.xlu1 %v13255_v19, %s12137_s18  ;;  %s12151_s17 = smov 75  }
 0x197   :  { %3656 = vmatprep.subr.bf16.mxu1 %v10768_v2  ;;  %v489_v60 = vsel %vm17251_vm0, %v477_v35, %v478_v55  ;;  %v413_v7 = vsel %vm17251_vm0, %v400_v25, %v401_v53 }
 0x198   :  { %v13427_v31 = vpop.permute.xlu0 %465  ;;  %v542_v15 = vpop.permute.xlu1 %541  ;;  %3657 = vmatpush1.bf16.msra.mxu1 %v10767_v22  ;;  %v490_v29 = vsel %vm485_vm13, %v13192_v33, %v489_v60  ;;  %v414_v27 = vsel %vm407_vm11, %v386_v6, %v413_v7 }
 0x199   :  { %v479_v50 = vrot.slane %v13427_v31, 4  ;;  %v556_v18 = vrot.slane %v542_v15, 4  ;;  %v10781_v20 = vcombine.low %v412_v59, %v490_v29  ;;  %v10782_v37 = vcombine.high %v412_v59, %v490_v29 }
 0x19a   :  { %863 = vrot.lane.b32.xlu0 %v837_v47, %s12137_s18  ;;  %939 = vrot.lane.b32.xlu1 %v13255_v19, %s12138_s30 }
 0x19b   :  { %3617 = vmatprep.subr.bf16.mxu0 %v10782_v37  ;;  %v491_v33 = vsel %vm17251_vm0, %v478_v55, %v479_v50  ;;  %v567_v54 = vsel %vm17251_vm0, %v555_v4, %v556_v18  ;;  %v993_v4 = vld [vmem:[%s17170_s0 + $0x40] sm:$0xf] }
 0x19c   :  { %v13446_v35 = vpop.permute.xlu0 %543  ;;  %v620_v21 = vpop.permute.xlu1 %619  ;;  %3618 = vmatpush1.bf16.msra.mxu0 %v10781_v20  ;;  %v492_v14 = vsel %vm485_vm13, %v464_v61, %v491_v33 }
 0x19d   :  { %v634_v32 = vrot.slane %v620_v21, 4  ;;  %v10783_v40 = vcombine.low %v414_v27, %v492_v14  ;;  %v10784_v1 = vcombine.high %v414_v27, %v492_v14  ;;  %v557_v0 = vrot.slane %v13446_v35, 4  ;;  %v11912_v14 = vld [vmem:[%s17173_s3] ss:$8 sps:$4 sm:$0xff]  }
 0x19e   :  { %v13454_v49 = vpop.f32.mrb[0].mxu0  ;;  %v13456_v52 = vpop.f32.mrb[0].mxu1  ;;  %941 = vrot.lane.b32.xlu0 %v915_v9, %s12138_s30  ;;  %1017 = vrot.lane.b32.xlu1 %v13255_v19, %s12139_s19  ;;  %v568_v19 = vsel %vm563_vm14, %v13215_v57, %v567_v54  ;;  %v13485_v57 = vld [vmem:[#allocation4 + $0x80] sm:$0x3f]  ;;  %s12149_s30 = smov 119  }
 0x19f   :  { %v13461_v6 = vpop.f32.mrb[1].mxu0  ;;  %v13463_v25 = vpop.f32.mrb[1].mxu1  ;;  %3658 = vmatprep.subr.bf16.mxu1 %v10784_v1  ;;  %v645_v28 = vsel %vm17251_vm0, %v633_v17, %v634_v32  ;;  %v569_v60 = vsel %vm17251_vm0, %v556_v18, %v557_v0 }
 0x1a0   :  { %v2668_v8 = vpop.f32.mrb[2].mxu0  ;;  %v2709_v62 = vpop.f32.mrb[2].mxu1  ;;  %3659 = vmatpush1.bf16.msra.mxu1 %v10783_v40  ;;  %v646_v61 = vsel %vm641_vm15, %v13222_v26, %v645_v28  ;;  %v570_v7 = vsel %vm563_vm14, %v542_v15, %v569_v60 }
 0x1a1   :  { %v13478_v48 = vpop.permute.xlu0 %621  ;;  %v698_v24 = vpop.permute.xlu1 %697  ;;  %v10797_v38 = vcombine.low %v568_v19, %v646_v61  ;;  %v10798_v55 = vcombine.high %v568_v19, %v646_v61 }
 0x1a2   :  { %v635_v17 = vrot.slane %v13478_v48, 4  ;;  %v712_v22 = vrot.slane %v698_v24, 4  ;;  %v2669_v2 = vpop.f32.mrb[3].mxu0  ;;  %v2710_v47 = vpop.f32.mrb[3].mxu1  ;;  %1019 = vrot.lane.b32.xlu0 %v993_v4, %s12139_s19  ;;  %3862 = vperm.xlu1 %11636, %v3859_v5  }
 0x1a3   :  { %3619 = vmatprep.subr.bf16.mxu0 %v10798_v55 }
 0x1a4   :  { %3620 = vmatpush1.bf16.msra.mxu0 %v10797_v38  ;;  %v647_v26 = vsel %vm17251_vm0, %v634_v32, %v635_v17  ;;  %v723_v18 = vsel %vm17251_vm0, %v711_v51, %v712_v22 }
 0x1a5   :  { %v13490_v59 = vpop.permute.xlu0 %699  ;;  %v776_v29 = vpop.permute.xlu1 %775  ;;  %v648_v20 = vsel %vm641_vm15, %v620_v21, %v647_v26  ;;  %v724_v32 = vsel %vm719_vm1, %v13245_v16, %v723_v18 }
 0x1a6   :  { %v713_v37 = vrot.slane %v13490_v59, 4  ;;  %v790_v9 = vrot.slane %v776_v29, 4  ;;  %v10799_v33 = vcombine.low %v570_v7, %v648_v20  ;;  %v10800_v27 = vcombine.high %v570_v7, %v648_v20  ;;  %3979 = vrot.lane.b32.xlu0 %v13485_v57, %s12126_s22 }
 0x1a8   :  { %3660 = vmatprep.subr.bf16.mxu1 %v10800_v27  ;;  %v801_v15 = vsel %vm17251_vm0, %v789_v10, %v790_v9  ;;  %v725_v1 = vsel %vm17251_vm0, %v712_v22, %v713_v37 }
 0x1a9   :  { %v13506_v21 = vpop.permute.xlu0 %777  ;;  %v854_v51 = vpop.permute.xlu1 %853  ;;  %3661 = vmatpush1.bf16.msra.mxu1 %v10799_v33  ;;  %v802_v40 = vsel %vm797_vm3, %v13257_v42, %v801_v15  ;;  %v726_v42 = vsel %vm719_vm1, %v698_v24, %v725_v1 }
 0x1aa   :  { %v791_v54 = vrot.slane %v13506_v21, 4  ;;  %v868_v4 = vrot.slane %v854_v51, 4  ;;  %v10813_v28 = vcombine.low %v724_v32, %v802_v40  ;;  %v10814_v5 = vcombine.high %v724_v32, %v802_v40  ;;  %6161 = vrot.lane.b32.xlu0 %v11912_v14, %s12131_s21 }
 0x1ac   :  { %3621 = vmatprep.subr.bf16.mxu0 %v10814_v5  ;;  %v803_v10 = vsel %vm17251_vm0, %v790_v9, %v791_v54  ;;  %v879_v19 = vsel %vm17251_vm0, %v867_v56, %v868_v4 }
 0x1ad   :  { %v13520_v16 = vpop.permute.xlu0 %855  ;;  %v932_v8 = vpop.permute.xlu1 %931  ;;  %3622 = vmatpush1.bf16.msra.mxu0 %v10813_v28  ;;  %v804_v62 = vsel %vm797_vm3, %v776_v29, %v803_v10  ;;  %v880_v24 = vsel %vm875_vm4, %v13285_v13, %v879_v19  ;;  %v114_v28 = vld [vmem:[%s17170_s0 + $0x20] sm:$0xff] }
 0x1ae   :  { %v869_v61 = vrot.slane %v13520_v16, 4  ;;  %v946_v38 = vrot.slane %v932_v8, 4  ;;  %v10815_v55 = vcombine.low %v726_v42, %v804_v62  ;;  %v10816_v22 = vcombine.high %v726_v42, %v804_v62 }
 0x1b0   :  { %3662 = vmatprep.subr.bf16.mxu1 %v10816_v22  ;;  %v957_v2 = vsel %vm17251_vm0, %v945_v44, %v946_v38  ;;  %v881_v26 = vsel %vm17251_vm0, %v868_v4, %v869_v61 }
 0x1b1   :  { %v13531_v47 = vpop.permute.xlu0 %933  ;;  %v1010_v60 = vpop.permute.xlu1 %1009  ;;  %3663 = vmatpush1.bf16.msra.mxu1 %v10815_v55  ;;  %v958_v56 = vsel %vm953_vm5, %v13294_v39, %v957_v2  ;;  %v882_v27 = vsel %vm875_vm4, %v854_v51, %v881_v26 }
 0x1b2   :  { %v947_v29 = vrot.slane %v13531_v47, 4  ;;  %v1024_v7 = vrot.slane %v1010_v60, 4  ;;  %v10829_v20 = vcombine.low %v880_v24, %v958_v56  ;;  %v10830_v18 = vcombine.high %v880_v24, %v958_v56 }
 0x1b4   :  { %v1035_v44 = vsel %vm17251_vm0, %v1023_v3, %v1024_v7  ;;  %3623 = vmatprep.subr.bf16.mxu0 %v10830_v18  ;;  %v959_v13 = vsel %vm17251_vm0, %v946_v38, %v947_v29 }
 0x1b5   :  { %v13547_v9 = vpop.permute.xlu0 %1011  ;;  %v155_v39 = vpop.permute.xlu1 %154  ;;  %3624 = vmatpush1.bf16.msra.mxu0 %v10829_v20  ;;  %v1036_v33 = vsel %vm1031_vm6, %v13322_v43, %v1035_v44  ;;  %v960_v14 = vsel %vm953_vm5, %v932_v8, %v959_v13 }
 0x1b6   :  { %v1025_v15 = vrot.slane %v13547_v9, 4  ;;  %v167_v32 = vrot.slane %v155_v39, 4  ;;  %v10846_v3 = vcombine.high %v1036_v33, %v1036_v33  ;;  %v10831_v40 = vcombine.low %v882_v27, %v960_v14 }
 0x1b7   :  { %v10832_v1 = vcombine.high %v882_v27, %v960_v14  ;;  %v10845_v4 = vcombine.low %v1036_v33, %v1036_v33 }
 0x1b8   :  { %v1037_v5 = vsel %vm17251_vm0, %v1024_v7, %v1025_v15  ;;  %10861 = vmatprep.subr.msk.bf16.mxu0 %vm17251_vm0, %v10846_v3  ;;  %v181_v43 = vsel %vm17251_vm0, %v166_v46, %v167_v32 }
 0x1b9   :  { %3664 = vmatprep.subr.bf16.mxu1 %v10832_v1  ;;  %v13564_v51 = vpop.permute.xlu0 %156  ;;  %v234_v10 = vpop.permute.xlu1 %233  ;;  %v3496_v8 = vsel %vm17251_vm0, %v10845_v4, 0  ;;  %v1038_v42 = vsel %vm1031_vm6, %v1010_v60, %v1037_v5  ;;  %v182_v62 = vsel %vm173_vm8, %v13343_v23, %v181_v43 }
 0x1ba   :  { %v168_v19 = vrot.slane %v13564_v51, 4  ;;  %v246_v38 = vrot.slane %v234_v10, 4  ;;  %3626 = vmatpush1.bf16.msra.mxu0 %v3496_v8  ;;  %3665 = vmatpush1.bf16.msra.mxu1 %v10831_v40  ;;  %v10848_v55 = vcombine.high %v1038_v42, %v1038_v42  ;;  %v10753_v22 = vcombine.low %v114_v28, %v182_v62 }
 0x1bb   :  { %v10754_v2 = vcombine.high %v114_v28, %v182_v62  ;;  %v10847_v46 = vcombine.low %v1038_v42, %v1038_v42 }
 0x1bc   :  { %10863 = vmatprep.subr.msk.bf16.mxu1 %vm17251_vm0, %v10848_v55  ;;  %v183_v24 = vsel %vm17251_vm0, %v167_v32, %v168_v19  ;;  %v259_v7 = vsel %vm17251_vm0, %v245_v45, %v246_v38 }
 0x1bd   :  { %10862 = vmatmul.mubr.msk.bf16.vlgmr.msra.gmra.mrb[20].mxu0 %vm3478_vm7, %v13348_v58  ;;  %3695 = vmatprep.subr.bf16.mxu0 %v10754_v2  ;;  %v13577_v23 = vpop.permute.xlu0 %235  ;;  %v312_v60 = vpop.permute.xlu1 %311  ;;  %v3502_v56 = vsel %vm17251_vm0, %v10847_v46, 0  ;;  %v184_v26 = vsel %vm173_vm8, %v155_v39, %v183_v24  ;;  %v260_v3 = vsel %vm251_vm9, %v13366_v63, %v259_v7 }
 0x1be   :  { %v247_v20 = vrot.slane %v13577_v23, 4  ;;  %v324_v18 = vrot.slane %v312_v60, 4  ;;  %3667 = vmatpush1.bf16.msra.mxu1 %v3502_v56  ;;  %3696 = vmatpush1.bf16.msra.mxu0 %v10753_v22  ;;  %v13585_v44 = vpop.f32.mrb[4].mxu0  ;;  %v10755_v13 = vcombine.low %v13102_v12, %v184_v26  ;;  %v10756_v33 = vcombine.high %v13102_v12, %v184_v26 }
 0x1bf   :  { %v13589_v27 = vpop.f32.mrb[5].mxu0  ;;  %3727 = vmatprep.mubr.bf16.mxu0 %v13373_v36 }
 0x1c0   :  { %3736 = vmatprep.subr.bf16.mxu1 %v10756_v33  ;;  %v2750_v39 = vpop.f32.mrb[6].mxu0  ;;  %v337_v45 = vsel %vm17251_vm0, %v323_v41, %v324_v18  ;;  %v261_v40 = vsel %vm17251_vm0, %v246_v38, %v247_v20 }
 0x1c1   :  { %10864 = vmatmul.mubr.msk.bf16.vlgmr.msra.gmra.mrb[20].mxu1 %vm3478_vm7, %v13348_v58  ;;  %v13597_v14 = vpop.permute.xlu0 %313  ;;  %v390_v32 = vpop.permute.xlu1 %389  ;;  %v338_v12 = vsel %vm329_vm10, %v13390_v34, %v337_v45  ;;  %v262_v38 = vsel %vm251_vm9, %v234_v10, %v261_v40 }
 0x1c2   :  { %v325_v1 = vrot.slane %v13597_v14, 4  ;;  %v402_v4 = vrot.slane %v390_v32, 4  ;;  %3737 = vmatpush1.bf16.msra.mxu1 %v10755_v13  ;;  %v2751_v41 = vpop.f32.mrb[7].mxu0  ;;  %v13607_v28 = vpop.f32.mrb[4].mxu1  ;;  %v10769_v5 = vcombine.low %v260_v3, %v338_v12  ;;  %v10770_v43 = vcombine.high %v260_v3, %v338_v12  ;;  %3768 = vmatprep.mubr.bf16.mxu1 %v13373_v36 }
 0x1c3   :  { %v13610_v8 = vpop.f32.mrb[5].mxu1 }
 0x1c4   :  { %3697 = vmatprep.subr.bf16.mxu0 %v10770_v43  ;;  %v2791_v63 = vpop.f32.mrb[6].mxu1  ;;  %v339_v34 = vsel %vm17251_vm0, %v324_v18, %v325_v1  ;;  %v415_v22 = vsel %vm17251_vm0, %v401_v53, %v402_v4 }
 0x1c5   :  { %v13615_v42 = vpop.permute.xlu0 %391  ;;  %v468_v62 = vpop.permute.xlu1 %467  ;;  %3698 = vmatpush1.bf16.msra.mxu0 %v10769_v5  ;;  %v340_v55 = vsel %vm329_vm10, %v312_v60, %v339_v34  ;;  %v416_v60 = vsel %vm407_vm11, %v13410_v11, %v415_v22 }
 0x1c6   :  { %v403_v2 = vrot.slane %v13615_v42, 4  ;;  %v480_v46 = vrot.slane %v468_v62, 4  ;;  %v2792_v24 = vpop.f32.mrb[7].mxu1  ;;  %v10771_v56 = vcombine.low %v262_v38, %v340_v55  ;;  %v10772_v26 = vcombine.high %v262_v38, %v340_v55 }
 0x1c8   :  { %3738 = vmatprep.subr.bf16.mxu1 %v10772_v26  ;;  %v493_v7 = vsel %vm17251_vm0, %v479_v50, %v480_v46  ;;  %v417_v13 = vsel %vm17251_vm0, %v402_v4, %v403_v2 }
 0x1c9   :  { %v13626_v18 = vpop.permute.xlu0 %469  ;;  %v546_v10 = vpop.permute.xlu1 %545  ;;  %3739 = vmatpush1.bf16.msra.mxu1 %v10771_v56  ;;  %v494_v53 = vsel %vm485_vm13, %v13427_v31, %v493_v7  ;;  %v418_v31 = vsel %vm407_vm11, %v390_v32, %v417_v13 }
 0x1ca   :  { %v481_v33 = vrot.slane %v13626_v18, 4  ;;  %v558_v39 = vrot.slane %v546_v10, 4  ;;  %v10785_v45 = vcombine.low %v416_v60, %v494_v53  ;;  %v10786_v3 = vcombine.high %v416_v60, %v494_v53 }
 0x1cc   :  { %3699 = vmatprep.subr.bf16.mxu0 %v10786_v3  ;;  %v495_v50 = vsel %vm17251_vm0, %v480_v46, %v481_v33  ;;  %v571_v4 = vsel %vm17251_vm0, %v557_v0, %v558_v39 }
 0x1cd   :  { %v13639_v12 = vpop.permute.xlu0 %547  ;;  %v624_v11 = vpop.permute.xlu1 %623  ;;  %3700 = vmatpush1.bf16.msra.mxu0 %v10785_v45  ;;  %v496_v40 = vsel %vm485_vm13, %v468_v62, %v495_v50  ;;  %v572_v32 = vsel %vm563_vm14, %v13446_v35, %v571_v4 }
 0x1ce   :  { %v559_v41 = vrot.slane %v13639_v12, 4  ;;  %v636_v5 = vrot.slane %v624_v11, 4  ;;  %v10787_v43 = vcombine.low %v418_v31, %v496_v40  ;;  %v10788_v63 = vcombine.high %v418_v31, %v496_v40 }
 0x1d0   :  { %3740 = vmatprep.subr.bf16.mxu1 %v10788_v63  ;;  %v649_v34 = vsel %vm17251_vm0, %v635_v17, %v636_v5  ;;  %v573_v62 = vsel %vm17251_vm0, %v558_v39, %v559_v41 }
 0x1d1   :  { %v13650_v38 = vpop.permute.xlu0 %625  ;;  %v702_v55 = vpop.permute.xlu1 %701  ;;  %3741 = vmatpush1.bf16.msra.mxu1 %v10787_v43  ;;  %v650_v0 = vsel %vm641_vm15, %v13478_v48, %v649_v34  ;;  %v574_v48 = vsel %vm563_vm14, %v546_v10, %v573_v62 }
 0x1d2   :  { %v637_v22 = vrot.slane %v13650_v38, 4  ;;  %v714_v46 = vrot.slane %v702_v55, 4  ;;  %v10801_v24 = vcombine.low %v572_v32, %v650_v0  ;;  %v10802_v56 = vcombine.high %v572_v32, %v650_v0 }
 0x1d4   :  { %3701 = vmatprep.subr.bf16.mxu0 %v10802_v56  ;;  %v651_v17 = vsel %vm17251_vm0, %v636_v5, %v637_v22  ;;  %v727_v60 = vsel %vm17251_vm0, %v713_v37, %v714_v46 }
 0x1d5   :  { %v13663_v26 = vpop.permute.xlu0 %703  ;;  %v780_v35 = vpop.permute.xlu1 %779  ;;  %3702 = vmatpush1.bf16.msra.mxu0 %v10801_v24  ;;  %v652_v7 = vsel %vm641_vm15, %v624_v11, %v651_v17  ;;  %v728_v10 = vsel %vm719_vm1, %v13490_v59, %v727_v60  ;;  %v5248_v17 = vld [vmem:[#allocation5 + $0x44] sm:$0xf] }
 0x1d6   :  { %v715_v53 = vrot.slane %v13663_v26, 4  ;;  %v792_v13 = vrot.slane %v780_v35, 4  ;;  %v10803_v39 = vcombine.low %v574_v48, %v652_v7  ;;  %v10804_v45 = vcombine.high %v574_v48, %v652_v7  ;;  %5274 = vrot.lane.b32.xlu0 %v5248_v17, %s12137_s18  ;;  %v5556_v17 = vld [vmem:[#allocation5 + $0x44] sm:$0xf] }
 0x1d8   :  { %3742 = vmatprep.subr.bf16.mxu1 %v10804_v45  ;;  %v805_v3 = vsel %vm17251_vm0, %v791_v54, %v792_v13  ;;  %v729_v11 = vsel %vm17251_vm0, %v714_v46, %v715_v53 }
 0x1d9   :  { %v13674_v50 = vpop.permute.xlu0 %781  ;;  %v858_v31 = vpop.permute.xlu1 %857  ;;  %3743 = vmatpush1.bf16.msra.mxu1 %v10803_v39  ;;  %v806_v37 = vsel %vm797_vm3, %v13506_v21, %v805_v3  ;;  %v730_v21 = vsel %vm719_vm1, %v702_v55, %v729_v11 }
 0x1da   :  { %v793_v40 = vrot.slane %v13674_v50, 4  ;;  %v870_v4 = vrot.slane %v858_v31, 4  ;;  %v10817_v5 = vcombine.low %v728_v10, %v806_v37  ;;  %v10818_v43 = vcombine.high %v728_v10, %v806_v37 }
 0x1dc   :  { %3703 = vmatprep.subr.bf16.mxu0 %v10818_v43  ;;  %v807_v54 = vsel %vm17251_vm0, %v792_v13, %v793_v40  ;;  %v883_v32 = vsel %vm17251_vm0, %v869_v61, %v870_v4 }
 0x1dd   :  { %v13687_v63 = vpop.permute.xlu0 %859  ;;  %v936_v59 = vpop.permute.xlu1 %935  ;;  %3704 = vmatpush1.bf16.msra.mxu0 %v10817_v5  ;;  %v808_v34 = vsel %vm797_vm3, %v780_v35, %v807_v54  ;;  %v884_v35 = vsel %vm875_vm4, %v13520_v16, %v883_v32  ;;  %v116_v32 = vld [vmem:[%s17170_s0 + $0x30] sm:$0xff] }
 0x1de   :  { %v871_v0 = vrot.slane %v13687_v63, 4  ;;  %v948_v62 = vrot.slane %v936_v59, 4  ;;  %v10819_v46 = vcombine.low %v730_v21, %v808_v34  ;;  %v10820_v24 = vcombine.high %v730_v21, %v808_v34 }
 0x1e0   :  { %3744 = vmatprep.subr.bf16.mxu1 %v10820_v24  ;;  %v961_v56 = vsel %vm17251_vm0, %v947_v29, %v948_v62  ;;  %v885_v7 = vsel %vm17251_vm0, %v870_v4, %v871_v0  ;;  %v5402_v4 = vld [vmem:[#allocation5 + $0x44] sm:$0xf] }
 0x1e1   :  { %v13698_v48 = vpop.permute.xlu0 %937  ;;  %v1014_v55 = vpop.permute.xlu1 %1013  ;;  %3745 = vmatpush1.bf16.msra.mxu1 %v10819_v46  ;;  %v962_v61 = vsel %vm953_vm5, %v13531_v47, %v961_v56  ;;  %v886_v37 = vsel %vm875_vm4, %v858_v31, %v885_v7  ;;  %5428 = vrot.lane.b32.xlu0 %v5402_v4, %s12120_s28 }
 0x1e2   :  { %v949_v60 = vrot.slane %v13698_v48, 4  ;;  %v1026_v29 = vrot.slane %v1014_v55, 4  ;;  %v10833_v13 = vcombine.low %v884_v35, %v962_v61  ;;  %v10834_v39 = vcombine.high %v884_v35, %v962_v61 }
 0x1e4   :  { %v1039_v45 = vsel %vm17251_vm0, %v1025_v15, %v1026_v29  ;;  %3705 = vmatprep.subr.bf16.mxu0 %v10834_v39  ;;  %v963_v16 = vsel %vm17251_vm0, %v948_v62, %v949_v60 }
 0x1e5   :  { %v13715_v47 = vpop.permute.xlu0 %1015  ;;  %v159_v3 = vpop.permute.xlu1 %158  ;;  %3706 = vmatpush1.bf16.msra.mxu0 %v10833_v13  ;;  %v1040_v10 = vsel %vm1031_vm6, %v13547_v9, %v1039_v45  ;;  %v964_v11 = vsel %vm953_vm5, %v936_v59, %v963_v16  ;;  %5582 = vrot.lane.b32.xlu0 %v5556_v17, %s12141_s27 }
 0x1e6   :  { %v1027_v5 = vrot.slane %v13715_v47, 4  ;;  %v169_v15 = vrot.slane %v159_v3, 4  ;;  %v10850_v43 = vcombine.high %v1040_v10, %v1040_v10  ;;  %v10835_v54 = vcombine.low %v886_v37, %v964_v11 }
 0x1e7   :  { %v10836_v21 = vcombine.high %v886_v37, %v964_v11  ;;  %v10849_v34 = vcombine.low %v1040_v10, %v1040_v10  ;;  %v5880_v10 = vld [vmem:[#allocation5 + $0x48] sm:$0xf] }
 0x1e8   :  { %v1041_v9 = vsel %vm17251_vm0, %v1026_v29, %v1027_v5  ;;  %10865 = vmatprep.subr.msk.bf16.mxu0 %vm17251_vm0, %v10850_v43  ;;  %v185_v31 = vsel %vm17251_vm0, %v168_v19, %v169_v15 }
 0x1e9   :  { %3746 = vmatprep.subr.bf16.mxu1 %v10836_v21  ;;  %v161_v59 = vpop.permute.xlu0 %160  ;;  %v238_v62 = vpop.permute.xlu1 %237  ;;  %v3508_v46 = vsel %vm17251_vm0, %v10849_v34, 0  ;;  %v1042_v24 = vsel %vm1031_vm6, %v1014_v55, %v1041_v9  ;;  %v186_v56 = vsel %vm173_vm8, %v13564_v51, %v185_v31  ;;  %v117_v55 = vld [vmem:[%s17170_s0 + $0x38] sm:$0xff]  ;;  %s12142_s0 = smov 120  }
 0x1ea   :  { %v170_v35 = vrot.slane %v161_v59, 4  ;;  %v248_v61 = vrot.slane %v238_v62, 4  ;;  %3708 = vmatpush1.bf16.msra.mxu0 %v3508_v46  ;;  %3747 = vmatpush1.bf16.msra.mxu1 %v10835_v54  ;;  %v13737_v7 = vpop.f32.mrb[8].mxu0  ;;  %v10852_v29 = vcombine.high %v1042_v24, %v1042_v24  ;;  %v10757_v13 = vcombine.low %v116_v32, %v186_v56 }
 0x1eb   :  { %v13739_v19 = vpop.f32.mrb[9].mxu0  ;;  %v10758_v39 = vcombine.high %v116_v32, %v186_v56  ;;  %v10851_v45 = vcombine.low %v1042_v24, %v1042_v24  ;;  %5906 = vrot.lane.b32.xlu0 %v5880_v10, %s12142_s0 }
 0x1ec   :  { %v187_v51 = vsel %vm17251_vm0, %v169_v15, %v170_v35  ;;  %10867 = vmatprep.subr.msk.bf16.mxu1 %vm17251_vm0, %v10852_v29  ;;  %v2832_v16 = vpop.f32.mrb[10].mxu0  ;;  %v263_v43 = vsel %vm17251_vm0, %v247_v20, %v248_v61 }
 0x1ed   :  { %10866 = vmatmul.mubr.msk.bf16.vlgmr.msra.gmra.mrb[24].mxu0 %vm3478_vm7, %v13348_v58  ;;  %3777 = vmatprep.subr.bf16.mxu0 %v10758_v39  ;;  %v240_v37 = vpop.permute.xlu0 %239  ;;  %v316_v11 = vpop.permute.xlu1 %315  ;;  %v3514_v4 = vsel %vm17251_vm0, %v10851_v45, 0  ;;  %v188_v54 = vsel %vm173_vm8, %v159_v3, %v187_v51  ;;  %v264_v17 = vsel %vm251_vm9, %v13577_v23, %v263_v43 }
 0x1ee   :  { %v249_v21 = vrot.slane %v240_v37, 4  ;;  %v326_v15 = vrot.slane %v316_v11, 4  ;;  %3749 = vmatpush1.bf16.msra.mxu1 %v3514_v4  ;;  %3778 = vmatpush1.bf16.msra.mxu0 %v10757_v13  ;;  %v2833_v34 = vpop.f32.mrb[11].mxu0  ;;  %v13754_v32 = vpop.f32.mrb[8].mxu1  ;;  %v10759_v9 = vcombine.low %v117_v55, %v188_v54  ;;  %v10760_v31 = vcombine.high %v117_v55, %v188_v54 }
 0x1ef   :  { %v13756_v59 = vpop.f32.mrb[9].mxu1  ;;  %3809 = vmatprep.mubr.bf16.mxu0 %v13373_v36 }
 0x1f0   :  { %v265_v20 = vsel %vm17251_vm0, %v248_v61, %v249_v21  ;;  %v2873_v46 = vpop.f32.mrb[10].mxu1  ;;  %v341_v3 = vsel %vm17251_vm0, %v325_v1, %v326_v15  ;;  %3818 = vmatprep.subr.bf16.mxu1 %v10760_v31 }
 0x1f1   :  { %10868 = vmatmul.mubr.msk.bf16.vlgmr.msra.gmra.mrb[24].mxu1 %vm3478_vm7, %v13348_v58  ;;  %v318_v24 = vpop.permute.xlu0 %317  ;;  %v394_v56 = vpop.permute.xlu1 %393  ;;  %v342_v35 = vsel %vm329_vm10, %v13597_v14, %v341_v3  ;;  %v266_v1 = vsel %vm251_vm9, %v238_v62, %v265_v20 }
 0x1f2   :  { %v327_v29 = vrot.slane %v318_v24, 4  ;;  %v404_v13 = vrot.slane %v394_v56, 4  ;;  %v2874_v61 = vpop.f32.mrb[11].mxu1  ;;  %v10773_v39 = vcombine.low %v264_v17, %v342_v35  ;;  %v10774_v45 = vcombine.high %v264_v17, %v342_v35  ;;  %3819 = vmatpush1.bf16.msra.mxu1 %v10759_v9  ;;  %3850 = vmatprep.mubr.bf16.mxu1 %v13373_v36 }
 0x1f4   :  { %v343_v58 = vsel %vm17251_vm0, %v326_v15, %v327_v29  ;;  %3779 = vmatprep.subr.bf16.mxu0 %v10774_v45  ;;  %v419_v23 = vsel %vm17251_vm0, %v403_v2, %v404_v13 }
 0x1f5   :  { %v396_v55 = vpop.permute.xlu0 %395  ;;  %v472_v51 = vpop.permute.xlu1 %471  ;;  %3780 = vmatpush1.bf16.msra.mxu0 %v10773_v39  ;;  %v344_v14 = vsel %vm329_vm10, %v316_v11, %v343_v58  ;;  %v420_v21 = vsel %vm407_vm11, %v13615_v42, %v419_v23 }
 0x1f6   :  { %v405_v16 = vrot.slane %v396_v55, 4  ;;  %v482_v10 = vrot.slane %v472_v51, 4  ;;  %v10775_v37 = vcombine.low %v266_v1, %v344_v14  ;;  %v10776_v4 = vcombine.high %v266_v1, %v344_v14 }
 0x1f8   :  { %v421_v36 = vsel %vm17251_vm0, %v404_v13, %v405_v16  ;;  %v497_v62 = vsel %vm17251_vm0, %v481_v33, %v482_v10  ;;  %3820 = vmatprep.subr.bf16.mxu1 %v10776_v4 }
 0x1f9   :  { %v474_v43 = vpop.permute.xlu0 %473  ;;  %v550_v54 = vpop.permute.xlu1 %549  ;;  %v498_v2 = vsel %vm485_vm13, %v13626_v18, %v497_v62  ;;  %3821 = vmatpush1.bf16.msra.mxu1 %v10775_v37  ;;  %v422_v31 = vsel %vm407_vm11, %v394_v56, %v421_v36 }
 0x1fa   :  { %v483_v11 = vrot.slane %v474_v43, 4  ;;  %v560_v15 = vrot.slane %v550_v54, 4  ;;  %v10789_v34 = vcombine.low %v420_v21, %v498_v2  ;;  %v10790_v9 = vcombine.high %v420_v21, %v498_v2 }
 0x1fc   :  { %v499_v20 = vsel %vm17251_vm0, %v482_v10, %v483_v11  ;;  %3781 = vmatprep.subr.bf16.mxu0 %v10790_v9  ;;  %v575_v42 = vsel %vm17251_vm0, %v559_v41, %v560_v15 }
 0x1fd   :  { %v552_v33 = vpop.permute.xlu0 %551  ;;  %v628_v46 = vpop.permute.xlu1 %627  ;;  %3782 = vmatpush1.bf16.msra.mxu0 %v10789_v34  ;;  %v500_v3 = vsel %vm485_vm13, %v472_v51, %v499_v20  ;;  %v576_v39 = vsel %vm563_vm14, %v13639_v12, %v575_v42 }
 0x1fe   :  { %v561_v18 = vrot.slane %v552_v33, 4  ;;  %v638_v24 = vrot.slane %v628_v46, 4  ;;  %v10791_v17 = vcombine.low %v422_v31, %v500_v3  ;;  %v10792_v35 = vcombine.high %v422_v31, %v500_v3 }
 0x200   :  { %v577_v29 = vsel %vm17251_vm0, %v560_v15, %v561_v18  ;;  %v653_v56 = vsel %vm17251_vm0, %v637_v22, %v638_v24  ;;  %3822 = vmatprep.subr.bf16.mxu1 %v10792_v35 }
 0x201   :  { %v630_v13 = vpop.permute.xlu0 %629  ;;  %v706_v61 = vpop.permute.xlu1 %705  ;;  %v654_v41 = vsel %vm641_vm15, %v13650_v38, %v653_v56  ;;  %3823 = vmatpush1.bf16.msra.mxu1 %v10791_v17  ;;  %v578_v51 = vsel %vm563_vm14, %v550_v54, %v577_v29  ;;  %vm17250_vm14 = vcmask 982016  }
 0x202   :  { %v639_v45 = vrot.slane %v630_v13, 4  ;;  %v716_v1 = vrot.slane %v706_v61, 4  ;;  %v10805_v58 = vcombine.low %v576_v39, %v654_v41  ;;  %v10806_v55 = vcombine.high %v576_v39, %v654_v41 }
 0x204   :  { %v655_v23 = vsel %vm17251_vm0, %v638_v24, %v639_v45  ;;  %3783 = vmatprep.subr.bf16.mxu0 %v10806_v55  ;;  %v731_v12 = vsel %vm17251_vm0, %v715_v53, %v716_v1 }
 0x205   :  { %v708_v22 = vpop.permute.xlu0 %707  ;;  %v784_v14 = vpop.permute.xlu1 %783  ;;  %3784 = vmatpush1.bf16.msra.mxu0 %v10805_v58  ;;  %v656_v16 = vsel %vm641_vm15, %v628_v46, %v655_v23  ;;  %v732_v21 = vsel %vm719_vm1, %v13663_v26, %v731_v12  ;;  %vm4806_vm15 = vcmask 474112  }
 0x206   :  { %v717_v38 = vrot.slane %v708_v22, 4  ;;  %v794_v10 = vrot.slane %v784_v14, 4  ;;  %v10807_v37 = vcombine.low %v578_v51, %v656_v16  ;;  %v10808_v4 = vcombine.high %v578_v51, %v656_v16 }
 0x208   :  { %v733_v36 = vsel %vm17251_vm0, %v716_v1, %v717_v38  ;;  %v809_v62 = vsel %vm17251_vm0, %v793_v40, %v794_v10  ;;  %3824 = vmatprep.subr.bf16.mxu1 %v10808_v4 }
 0x209   :  { %v786_v43 = vpop.permute.xlu0 %785  ;;  %v862_v54 = vpop.permute.xlu1 %861  ;;  %v810_v53 = vsel %vm797_vm3, %v13674_v50, %v809_v62  ;;  %3825 = vmatpush1.bf16.msra.mxu1 %v10807_v37  ;;  %v734_v9 = vsel %vm719_vm1, %v706_v61, %v733_v36  ;;  %vm4884_vm1 = vcmask 457728  }
 0x20a   :  { %v795_v2 = vrot.slane %v786_v43, 4  ;;  %v872_v11 = vrot.slane %v862_v54, 4  ;;  %v10821_v15 = vcombine.low %v732_v21, %v810_v53  ;;  %v10822_v34 = vcombine.high %v732_v21, %v810_v53 }
 0x20c   :  { %v811_v31 = vsel %vm17251_vm0, %v794_v10, %v795_v2  ;;  %3785 = vmatprep.subr.bf16.mxu0 %v10822_v34  ;;  %v887_v26 = vsel %vm17251_vm0, %v871_v0, %v872_v11  ;;  %v11910_v2 = vld [vmem:[%s17173_s3 + $0x4] ss:$8 sps:$4 sm:$0xff]  }
 0x20d   :  { %v864_v40 = vpop.permute.xlu0 %863  ;;  %v940_v20 = vpop.permute.xlu1 %939  ;;  %3786 = vmatpush1.bf16.msra.mxu0 %v10821_v15  ;;  %v812_v33 = vsel %vm797_vm3, %v784_v14, %v811_v31  ;;  %v888_v29 = vsel %vm875_vm4, %v13687_v63, %v887_v26  ;;  %v5649_v15 = vld [vmem:[#allocation5 + $0x48] sm:$0xf]  ;;  %v12089_v34 = vld [vmem:[#allocation5] sm:$0xff]  ;;  %vm9169_vm3 = vcmask 811608  }
 0x20e   :  { %v873_v50 = vrot.slane %v864_v40, 4  ;;  %v950_v46 = vrot.slane %v940_v20, 4  ;;  %v10823_v42 = vcombine.low %v734_v9, %v812_v33  ;;  %v10824_v3 = vcombine.high %v734_v9, %v812_v33  ;;  %v5726_v31 = vld [vmem:[#allocation5 + $0x48] sm:$0xf]  ;;  %v5171_v33 = vld [vmem:[#allocation5 + $0x44] sm:$0xf] }
 0x20f   :  { %v11637_v9 = vpack.i.bf16 %v5649_v15, %v12089_v34  ;;  %v11642_v40 = vpack.i.bf16 %v5726_v31, %v12089_v34 }
 0x210   :  { %v889_v18 = vsel %vm17251_vm0, %v872_v11, %v873_v50  ;;  %v965_v24 = vsel %vm17251_vm0, %v949_v60, %v950_v46  ;;  %3826 = vmatprep.subr.bf16.mxu1 %v10824_v3  ;;  %v12088_v11 = vld [vmem:[%s17171_s1] sm:$0x7]  ;;  %s12143_s1 = smov 122   ;;  %v11652_v50 = vpack.i.bf16 %v5171_v33, %v12089_v34  ;;  %v5803_v3 = vld [vmem:[#allocation5 + $0x48] sm:$0xf] }
 0x211   :  { %v942_v17 = vpop.permute.xlu0 %941  ;;  %v1018_v35 = vpop.permute.xlu1 %1017  ;;  %v966_v0 = vsel %vm953_vm5, %v13698_v48, %v965_v24  ;;  %3827 = vmatpush1.bf16.msra.mxu1 %v10823_v42  ;;  %v890_v41 = vsel %vm875_vm4, %v862_v54, %v889_v18  ;;  %v5479_v42 = vld [vmem:[#allocation5 + $0x44] sm:$0xf] }
 0x212   :  { %v951_v56 = vrot.slane %v942_v17, 4  ;;  %v1028_v13 = vrot.slane %v1018_v35, 4  ;;  %v10837_v61 = vcombine.low %v888_v29, %v966_v0  ;;  %v10838_v39 = vcombine.high %v888_v29, %v966_v0 }
 0x214   :  { %v967_v45 = vsel %vm17251_vm0, %v950_v46, %v951_v56  ;;  %v1043_v60 = vsel %vm17251_vm0, %v1027_v5, %v1028_v13  ;;  %3787 = vmatprep.subr.bf16.mxu0 %v10838_v39  ;;  %v5325_v46 = vld [vmem:[#allocation5 + $0x44] sm:$0xf] }
 0x215   :  { %v1020_v1 = vpop.permute.xlu0 %1019  ;;  %3788 = vmatpush1.bf16.msra.mxu0 %v10837_v61  ;;  %v1044_v63 = vsel %vm1031_vm6, %v13715_v47, %v1043_v60  ;;  %v968_v48 = vsel %vm953_vm5, %v940_v20, %v967_v45  ;;  %v5094_v20 = vld [vmem:[#allocation5 + $0x44] sm:$0xf] }
 0x216   :  { %v1029_v58 = vrot.slane %v1020_v1, 4  ;;  %v13835_v55 = vpop.f32.mrb[12].mxu0  ;;  %v10854_v51 = vcombine.high %v1044_v63, %v1044_v63  ;;  %v10839_v23 = vcombine.low %v890_v41, %v968_v48  ;;  %v10840_v22 = vcombine.high %v890_v41, %v968_v48 }
 0x217   :  { %v13837_v14 = vpop.f32.mrb[13].mxu0  ;;  %v10853_v12 = vcombine.low %v1044_v63, %v1044_v63  ;;  %v11647_v26 = vpack.i.bf16 %v5094_v20, %v12089_v34 }
 0x218   :  { %v1045_v16 = vsel %vm17251_vm0, %v1028_v13, %v1029_v58  ;;  %10869 = vmatprep.subr.msk.bf16.mxu0 %vm17251_vm0, %v10854_v51  ;;  %3828 = vmatprep.subr.bf16.mxu1 %v10840_v22  ;;  %v2914_v5 = vpop.f32.mrb[14].mxu0 }
 0x219   :  { %v3520_v38 = vsel %vm17251_vm0, %v10853_v12, 0  ;;  %3829 = vmatpush1.bf16.msra.mxu1 %v10839_v23  ;;  %v2915_v47 = vpop.f32.mrb[15].mxu0  ;;  %v1046_v10 = vsel %vm1031_vm6, %v1018_v35, %v1045_v16  ;;  %v13843_v37 = vpop.permute.xlu0 %3979 }
 0x21a   :  { %3790 = vmatpush1.bf16.msra.mxu0 %v3520_v38  ;;  %v13845_v4 = vpop.f32.mrb[12].mxu1  ;;  %v10856_v36 = vcombine.high %v1046_v10, %v1046_v10  ;;  %v10855_v62 = vcombine.low %v1046_v10, %v1046_v10  ;;  %v4031_v43 = vmax.f32 %v13485_v57, %v13843_v37 }
 0x21b   :  { %v13849_v54 = vpop.f32.mrb[13].mxu1 }
 0x21c   :  { %10871 = vmatprep.subr.msk.bf16.mxu1 %vm17251_vm0, %v10856_v36  ;;  %v2955_v21 = vpop.f32.mrb[14].mxu1  ;;  %v3526_v53 = vsel %vm17251_vm0, %v10855_v62, 0  ;;  %4081 = vrot.lane.b32.xlu1 %v4031_v43, %s12132_s25 }
 0x21d   :  { %10870 = vmatmul.mubr.msk.bf16.vlgmr.msra.gmra.mrb[28].mxu0 %vm3478_vm7, %v12088_v11  ;;  %3831 = vmatpush1.bf16.msra.mxu1 %v3526_v53  ;;  %v2956_v57 = vpop.f32.mrb[15].mxu1 }
 0x21e   :  { %6681 = vmatprep.mubr.bf16.mxu0 %v12089_v34 }
 0x220   :  { %10872 = vmatmul.mubr.msk.bf16.vlgmr.msra.gmra.mrb[28].mxu1 %vm3478_vm7, %v12088_v11  ;;  %6163 = vrot.lane.b32.xlu1 %v11910_v2, %s12131_s21  ;;  %s12144_s21 = smov 58  }
 0x221   :  { %6724 = vmatprep.mubr.bf16.mxu1 %v12089_v34  ;;  %v13870_v24 = vpop.permute.xlu1 %3862 }
 0x224   :  { %11638 = vrot.lane.b32.xlu1 %v11637_v9, %s12127_s23 }
 0x228   :  { %11643 = vrot.lane.b32.xlu1 %v11642_v40, %s12129_s15 }
 0x22c   :  { %11648 = vrot.lane.b32.xlu1 %v11647_v26, %s12143_s1 }
 0x230   :  { %11653 = vrot.lane.b32.xlu1 %v11652_v50, %s12142_s0 }
 0x234   :  { %5351 = vrot.lane.b32.xlu1 %v5325_v46, %s12139_s19 }
 0x238   :  { %5505 = vrot.lane.b32.xlu1 %v5479_v42, %s12144_s21 }
 0x23c   :  { %5829 = vrot.lane.b32.xlu1 %v5803_v3, %s12143_s1 }
 0x25e   :  { %v3565_v18 = vpop.f32.mrb[16].mxu0 }
 0x25f   :  { %v3566_v17 = vadd.f32 %v3565_v18, %v13454_v49  ;;  %v3567_v35 = vpop.f32.mrb[17].mxu0 }
 0x260   :  { %v3568_v29 = vadd.f32 %v3567_v35, %v13461_v6  ;;  %v3569_v0 = vpop.f32.mrb[18].mxu0 }
 0x261   :  { %v3865_v56 = vadd.f32 %v13870_v24, %v3566_v17  ;;  %v3570_v13 = vpop.f32.mrb[19].mxu0 }
 0x262   :  { %v3866_v61 = vadd.f32 %v13870_v24, %v3568_v29 }
 0x263   :  { %v3606_v39 = vpop.f32.mrb[16].mxu1  ;;  %v3881_v41 = vmax.f32 %v3865_v56, 0.0 }
 0x264   :  { %v3607_v45 = vadd.f32 %v3606_v39, %v13456_v52  ;;  %v3608_v60 = vpop.f32.mrb[17].mxu1  ;;  %v3882_v1 = vmax.f32 %v3866_v61, 0.0 }
 0x265   :  { %v3609_v63 = vadd.f32 %v3608_v60, %v13463_v25  ;;  %3897 = vst [vmem:[#allocation4] sm:$0x3f] %v3881_v41  ;;  %v3610_v48 = vpop.f32.mrb[18].mxu1 }
 0x266   :  { %v3867_v49 = vadd.f32 %v13870_v24, %v3607_v45  ;;  %3898 = vst [vmem:[#allocation4 + $0x8] sm:$0x3f] %v3882_v1  ;;  %v3611_v6 = vpop.f32.mrb[19].mxu1 }
 0x267   :  { %v3868_v58 = vadd.f32 %v13870_v24, %v3609_v63 }
 0x268   :  { %v3883_v51 = vmax.f32 %v3867_v49, 0.0 }
 0x269   :  { %v3884_v23 = vmax.f32 %v3868_v58, 0.0 }
 0x26a   :  { %3899 = vst [vmem:[#allocation4 + $0x10] sm:$0x3f] %v3883_v51 }
 0x26b   :  { %3900 = vst [vmem:[#allocation4 + $0x18] sm:$0x3f] %v3884_v23 }
 0x26c   :  { %v13880_v22 = vld [vmem:[#allocation4] sm:$0x3f] }
 0x26d   :  { %v13882_v12 = vld [vmem:[#allocation4 + $0x8] sm:$0x3f] }
 0x26e   :  { %v11657_v52 = vpack.i.bf16 %v13882_v12, %v13880_v22 }
 0x270   :  { %11658 = vrot.lane.b32.xlu0 %v11657_v52, %s12126_s22 }
 0x271   :  { %v13887_v25 = vld [vmem:[#allocation4 + $0x10] sm:$0x3f] }
 0x272   :  { %v13889_v16 = vld [vmem:[#allocation4 + $0x18] sm:$0x3f] }
 0x273   :  { %v11662_v5 = vpack.i.bf16 %v13889_v16, %v13887_v25 }
 0x275   :  { %11663 = vrot.lane.b32.xlu1 %v11662_v5, %s12126_s22 }
 0x28e   :  { %v13916_v18 = vpop.permute.xlu1 %4081 }
 0x290   :  { %v3647_v38 = vpop.f32.mrb[20].mxu0 }
 0x291   :  { %v3648_v47 = vadd.f32 %v3647_v38, %v13585_v44  ;;  %v3649_v10 = vpop.f32.mrb[21].mxu0 }
 0x292   :  { %v3650_v36 = vadd.f32 %v3649_v10, %v13589_v27  ;;  %v3651_v62 = vpop.f32.mrb[22].mxu0  ;;  %v13924_v48 = vpop.permute.xlu1 %6163 }
 0x293   :  { %v3869_v43 = vadd.f32 %v13870_v24, %v3648_v47  ;;  %v3652_v21 = vpop.f32.mrb[23].mxu0  ;;  %v13948_v62 = vpop.permute.xlu0 %6161 }
 0x294   :  { %v3870_v53 = vadd.f32 %v13870_v24, %v3650_v36  ;;  %v3688_v2 = vpop.f32.mrb[20].mxu1 }
 0x295   :  { %v3885_v11 = vmax.f32 %v3869_v43, 0.0  ;;  %v3689_v57 = vadd.f32 %v3688_v2, %v13607_v28  ;;  %v3690_v15 = vpop.f32.mrb[21].mxu1 }
 0x296   :  { %v3886_v34 = vmax.f32 %v3870_v53, 0.0  ;;  %v3691_v9 = vadd.f32 %v3690_v15, %v13610_v8  ;;  %v3692_v31 = vpop.f32.mrb[22].mxu1  ;;  %v13928_v23 = vpop.permute.xlu1 %11638 }
 0x297   :  { %3901 = vst [vmem:[#allocation4 + $0x20] sm:$0x3f] %v3885_v11  ;;  %v3871_v44 = vadd.f32 %v13870_v24, %v3689_v57  ;;  %v3693_v40 = vpop.f32.mrb[23].mxu1  ;;  %v13952_v21 = vpop.permute.xlu0 %5274 }
 0x298   :  { %3902 = vst [vmem:[#allocation4 + $0x28] sm:$0x3f] %v3886_v34  ;;  %v3872_v27 = vadd.f32 %v13870_v24, %v3691_v9 }
 0x299   :  { %v3887_v20 = vmax.f32 %v3871_v44, 0.0 }
 0x29a   :  { %v3888_v26 = vmax.f32 %v3872_v27, 0.0  ;;  %v13936_v5 = vpop.permute.xlu1 %11643 }
 0x29b   :  { %3903 = vst [vmem:[#allocation4 + $0x30] sm:$0x3f] %v3887_v20  ;;  %v13956_v2 = vpop.permute.xlu0 %5428 }
 0x29c   :  { %3904 = vst [vmem:[#allocation4 + $0x38] sm:$0x3f] %v3888_v26 }
 0x29e   :  { %v13902_v33 = vld [vmem:[#allocation4 + $0x20] sm:$0x3f]  ;;  %v13946_v36 = vpop.permute.xlu1 %11648 }
 0x29f   :  { %v13904_v50 = vld [vmem:[#allocation4 + $0x28] sm:$0x3f]  ;;  %v13960_v57 = vpop.permute.xlu0 %5582 }
 0x2a0   :  { %v11667_v28 = vpack.i.bf16 %v13904_v50, %v13902_v33 }
 0x2a2   :  { %11668 = vrot.lane.b32.xlu0 %v11667_v28, %s12126_s22  ;;  %v13909_v8 = vld [vmem:[#allocation4 + $0x30] sm:$0x3f]  ;;  %v13950_v43 = vpop.permute.xlu1 %11653 }
 0x2a3   :  { %v13911_v46 = vld [vmem:[#allocation4 + $0x38] sm:$0x3f]  ;;  %v13965_v44 = vpop.permute.xlu0 %5906 }
 0x2a4   :  { %v11672_v42 = vpack.i.bf16 %v13911_v46, %v13909_v8 }
 0x2a6   :  { %11673 = vrot.lane.b32.xlu1 %v11672_v42, %s12126_s22  ;;  %v13954_v53 = vpop.permute.xlu1 %5351 }
 0x2aa   :  { %v13958_v11 = vpop.permute.xlu1 %5505 }
 0x2ae   :  { %v13962_v15 = vpop.permute.xlu1 %5829 }
 0x2c0   :  { %v3729_v3 = vpop.f32.mrb[24].mxu0 }
 0x2c1   :  { %v3730_v17 = vadd.f32 %v3729_v3, %v13737_v7  ;;  %v3731_v35 = vpop.f32.mrb[25].mxu0 }
 0x2c2   :  { %v3732_v29 = vadd.f32 %v3731_v35, %v13739_v19  ;;  %v3733_v0 = vpop.f32.mrb[26].mxu0 }
 0x2c3   :  { %v3873_v56 = vadd.f32 %v13870_v24, %v3730_v17  ;;  %v3734_v13 = vpop.f32.mrb[27].mxu0 }
 0x2c4   :  { %v3874_v61 = vadd.f32 %v13870_v24, %v3732_v29  ;;  %v3770_v39 = vpop.f32.mrb[24].mxu1 }
 0x2c5   :  { %v3889_v41 = vmax.f32 %v3873_v56, 0.0  ;;  %v3771_v45 = vadd.f32 %v3770_v39, %v13754_v32  ;;  %v3772_v60 = vpop.f32.mrb[25].mxu1 }
 0x2c6   :  { %v3890_v1 = vmax.f32 %v3874_v61, 0.0  ;;  %v3773_v63 = vadd.f32 %v3772_v60, %v13756_v59  ;;  %v3774_v7 = vpop.f32.mrb[26].mxu1 }
 0x2c7   :  { %3905 = vst [vmem:[#allocation4 + $0x40] sm:$0x3f] %v3889_v41  ;;  %v3875_v19 = vadd.f32 %v13870_v24, %v3771_v45  ;;  %v3775_v49 = vpop.f32.mrb[27].mxu1 }
 0x2c8   :  { %3906 = vst [vmem:[#allocation4 + $0x48] sm:$0x3f] %v3890_v1  ;;  %v3876_v6 = vadd.f32 %v13870_v24, %v3773_v63 }
 0x2c9   :  { %v3891_v58 = vmax.f32 %v3875_v19, 0.0 }
 0x2ca   :  { %v3892_v51 = vmax.f32 %v3876_v6, 0.0 }
 0x2cb   :  { %3907 = vst [vmem:[#allocation4 + $0x50] sm:$0x3f] %v3891_v58 }
 0x2cc   :  { %3908 = vst [vmem:[#allocation4 + $0x58] sm:$0x3f] %v3892_v51 }
 0x2ce   :  { %v13930_v32 = vld [vmem:[#allocation4 + $0x40] sm:$0x3f] }
 0x2cf   :  { %v13932_v52 = vld [vmem:[#allocation4 + $0x48] sm:$0x3f] }
 0x2d0   :  { %v11677_v59 = vpack.i.bf16 %v13932_v52, %v13930_v32 }
 0x2d2   :  { %11678 = vrot.lane.b32.xlu0 %v11677_v59, %s12126_s22  ;;  %v13939_v38 = vld [vmem:[#allocation4 + $0x50] sm:$0x3f] }
 0x2d3   :  { %v13941_v47 = vld [vmem:[#allocation4 + $0x58] sm:$0x3f] }
 0x2d4   :  { %v11682_v10 = vpack.i.bf16 %v13941_v47, %v13939_v38 }
 0x2d6   :  { %11683 = vrot.lane.b32.xlu1 %v11682_v10, %s12126_s22 }
 0x2e2   :  { %v11659_v39 = vpop.permute.xlu0 %11658 }
 0x2e3   :  { %v11660_v1 = vunpack.i.l.bf16 %v11659_v39 }
 0x2f0   :  { %v3811_v34 = vpop.f32.mrb[28].mxu0 }
 0x2f1   :  { %v3812_v9 = vadd.f32 %v3811_v34, %v13835_v55  ;;  %v3813_v31 = vpop.f32.mrb[29].mxu0  ;;  %v11664_v55 = vpop.permute.xlu1 %11663 }
 0x2f2   :  { %v3814_v40 = vadd.f32 %v3813_v31, %v13837_v14  ;;  %v3815_v27 = vpop.f32.mrb[30].mxu0  ;;  %v11665_v45 = vunpack.i.l.bf16 %v11664_v55 }
 0x2f3   :  { %v3877_v20 = vadd.f32 %v13870_v24, %v3812_v9  ;;  %v3852_v26 = vpop.f32.mrb[28].mxu1  ;;  %v3816_v28 = vpop.f32.mrb[31].mxu0 }
 0x2f4   :  { %v3878_v42 = vadd.f32 %v13870_v24, %v3814_v40  ;;  %v3853_v3 = vadd.f32 %v3852_v26, %v13845_v4  ;;  %v3854_v17 = vpop.f32.mrb[29].mxu1  ;;  %v11661_v4 = vunpack.i.h.bf16 %v11659_v39 }
 0x2f5   :  { %v3893_v35 = vmax.f32 %v3877_v20, 0.0  ;;  %v3855_v29 = vadd.f32 %v3854_v17, %v13849_v54  ;;  %v3856_v0 = vpop.f32.mrb[30].mxu1 }
 0x2f6   :  { %v3894_v56 = vmax.f32 %v3878_v42, 0.0  ;;  %v3879_v13 = vadd.f32 %v13870_v24, %v3853_v3  ;;  %v3857_v61 = vpop.f32.mrb[31].mxu1  ;;  %v3983_v54 = vsel %vm173_vm8, %v11661_v4, %v11665_v45  ;;  %v3982_v7 = vsel %vm173_vm8, %v11660_v1, %v11661_v4 }
 0x2f7   :  { %3909 = vst [vmem:[#allocation4 + $0x60] sm:$0x3f] %v3893_v35  ;;  %v3880_v14 = vadd.f32 %v13870_v24, %v3855_v29  ;;  %v13981_v49 = vmax.f32 %v13882_v12, %v3983_v54  ;;  %v13988_v58 = vmax.f32 %v13880_v22, %v3982_v7  ;;  %v11666_v12 = vunpack.i.h.bf16 %v11664_v55 }
 0x2f8   :  { %3910 = vst [vmem:[#allocation4 + $0x68] sm:$0x3f] %v3894_v56  ;;  %v3895_v41 = vmax.f32 %v3879_v13, 0.0 }
 0x2f9   :  { %v3896_v60 = vmax.f32 %v3880_v14, 0.0  ;;  %v11697_v10 = vpack.i.bf16 %v13981_v49, %v13988_v58  ;;  %v3984_v9 = vsel %vm173_vm8, %v11665_v45, %v11666_v12 }
 0x2fa   :  { %3911 = vst [vmem:[#allocation4 + $0x70] sm:$0x3f] %v3895_v41  ;;  %v13999_v27 = vmax.f32 %v13887_v25, %v3984_v9 }
 0x2fb   :  { %3912 = vst [vmem:[#allocation4 + $0x78] sm:$0x3f] %v3896_v60 }
 0x2fe   :  { %v13975_v63 = vld [vmem:[#allocation4 + $0x60] sm:$0x3f] }
 0x2ff   :  { %v13978_v19 = vld [vmem:[#allocation4 + $0x68] sm:$0x3f] }
 0x300   :  { %v11687_v24 = vpack.i.bf16 %v13978_v19, %v13975_v63 }
 0x301   :  { %v13985_v6 = vld [vmem:[#allocation4 + $0x70] sm:$0x3f] }
 0x302   :  { %11688 = vrot.lane.b32.xlu0 %v11687_v24, %s12126_s22  ;;  %v3928_v51 = vld [vmem:[#allocation4 + $0x78] sm:$0x3f] }
 0x303   :  { %v11692_v59 = vpack.i.bf16 %v3928_v51, %v13985_v6 }
 0x305   :  { %11693 = vrot.lane.b32.xlu1 %v11692_v59, %s12126_s22  ;;  %s12154_s22 = smov 44  }
 0x306   :  { %11698 = vrot.lane.b32.xlu0 %v11697_v10, %s12132_s25 }
 0x314   :  { %v11669_v34 = vpop.permute.xlu0 %11668 }
 0x315   :  { %v11671_v31 = vunpack.i.h.bf16 %v11669_v34  ;;  %v11670_v40 = vunpack.i.l.bf16 %v11669_v34 }
 0x317   :  { %v3985_v22 = vsel %vm173_vm8, %v11666_v12, %v11670_v40  ;;  %v3986_v28 = vsel %vm173_vm8, %v11670_v40, %v11671_v31 }
 0x318   :  { %v14002_v20 = vmax.f32 %v13889_v16, %v3985_v22  ;;  %v11674_v26 = vpop.permute.xlu1 %11673  ;;  %v14009_v35 = vmax.f32 %v13902_v33, %v3986_v28 }
 0x319   :  { %v11675_v42 = vunpack.i.l.bf16 %v11674_v26  ;;  %v11676_v16 = vunpack.i.h.bf16 %v11674_v26 }
 0x31a   :  { %v11702_v3 = vpack.i.bf16 %v14002_v20, %v13999_v27 }
 0x31b   :  { %v3987_v17 = vsel %vm173_vm8, %v11671_v31, %v11675_v42  ;;  %v3988_v55 = vsel %vm173_vm8, %v11675_v42, %v11676_v16 }
 0x31c   :  { %v14012_v29 = vmax.f32 %v13904_v50, %v3987_v17  ;;  %11703 = vrot.lane.b32.xlu1 %v11702_v3, %s12132_s25  ;;  %v14021_v33 = vmax.f32 %v13909_v8, %v3988_v55 }
 0x31e   :  { %v11707_v25 = vpack.i.bf16 %v14012_v29, %v14009_v35 }
 0x320   :  { %11708 = vrot.lane.b32.xlu0 %v11707_v25, %s12132_s25 }
 0x344   :  { %v11679_v0 = vpop.permute.xlu0 %11678 }
 0x345   :  { %v11681_v56 = vunpack.i.h.bf16 %v11679_v0  ;;  %v11680_v13 = vunpack.i.l.bf16 %v11679_v0 }
 0x347   :  { %v3989_v61 = vsel %vm173_vm8, %v11676_v16, %v11680_v13  ;;  %v3990_v39 = vsel %vm173_vm8, %v11680_v13, %v11681_v56 }
 0x348   :  { %v14024_v50 = vmax.f32 %v13911_v46, %v3989_v61  ;;  %v11684_v14 = vpop.permute.xlu1 %11683  ;;  %v14031_v4 = vmax.f32 %v13930_v32, %v3990_v39 }
 0x349   :  { %v11685_v41 = vunpack.i.l.bf16 %v11684_v14  ;;  %v11686_v46 = vunpack.i.h.bf16 %v11684_v14 }
 0x34a   :  { %v11712_v45 = vpack.i.bf16 %v14024_v50, %v14021_v33 }
 0x34b   :  { %v3991_v60 = vsel %vm173_vm8, %v11681_v56, %v11685_v41  ;;  %v3992_v54 = vsel %vm173_vm8, %v11685_v41, %v11686_v46 }
 0x34c   :  { %v14034_v1 = vmax.f32 %v13932_v52, %v3991_v60  ;;  %11713 = vrot.lane.b32.xlu1 %v11712_v45, %s12132_s25  ;;  %v14042_v10 = vmax.f32 %v13939_v38, %v3992_v54 }
 0x34e   :  { %v11717_v8 = vpack.i.bf16 %v14034_v1, %v14031_v4 }
 0x350   :  { %11718 = vrot.lane.b32.xlu1 %v11717_v8, %s12132_s25 }
 0x374   :  { %v11689_v7 = vpop.permute.xlu0 %11688 }
 0x375   :  { %v11691_v24 = vunpack.i.h.bf16 %v11689_v7  ;;  %v11690_v59 = vunpack.i.l.bf16 %v11689_v7 }
 0x377   :  { %v3993_v32 = vsel %vm173_vm8, %v11686_v46, %v11690_v59  ;;  %v11694_v52 = vpop.permute.xlu1 %11693  ;;  %v3994_v12 = vsel %vm173_vm8, %v11690_v59, %v11691_v24 }
 0x378   :  { %v14047_v34 = vmax.f32 %v13941_v47, %v3993_v32  ;;  %v11696_v9 = vunpack.i.h.bf16 %v11694_v52  ;;  %v11695_v31 = vunpack.i.l.bf16 %v11694_v52  ;;  %v14056_v28 = vmax.f32 %v13975_v63, %v3994_v12  ;;  %v11699_v63 = vpop.permute.xlu0 %11698 }
 0x379   :  { %v11700_v25 = vunpack.i.l.bf16 %v11699_v63 }
 0x37a   :  { %v3997_v40 = vsel %vm173_vm8, %v11696_v9, %v13843_v37  ;;  %v3995_v22 = vsel %vm173_vm8, %v11691_v24, %v11695_v31  ;;  %v3996_v26 = vsel %vm173_vm8, %v11695_v31, %v11696_v9  ;;  %v11722_v38 = vpack.i.bf16 %v14047_v34, %v14042_v10 }
 0x37b   :  { %v14058_v42 = vmax.f32 %v3928_v51, %v3997_v40  ;;  %v14061_v47 = vmax.f32 %v13978_v19, %v3995_v22  ;;  %v14064_v3 = vmax.f32 %v13985_v6, %v3996_v26  ;;  %v11701_v51 = vunpack.i.h.bf16 %v11699_v63 }
 0x37c   :  { %11723 = vrot.lane.b32.xlu0 %v11722_v38, %s12132_s25  ;;  %vm17255_vm8 = vcmask 998400  }
 0x37d   :  { %v11727_v37 = vpack.i.bf16 %v14061_v47, %v14056_v28  ;;  %v11732_v17 = vpack.i.bf16 %v14058_v42, %v14064_v3  ;;  %v4083_v16 = vsel %vm485_vm13, %v11700_v25, %v11701_v51 }
 0x37e   :  { %v4115_v56 = vmax.f32 %v13988_v58, %v4083_v16 }
 0x37f   :  { %11728 = vrot.lane.b32.xlu1 %v11727_v37, %s12132_s25 }
 0x380   :  { %11733 = vrot.lane.b32.xlu0 %v11732_v17, %s12132_s25 }
 0x38e   :  { %v11704_v19 = vpop.permute.xlu1 %11703 }
 0x38f   :  { %v11706_v6 = vunpack.i.h.bf16 %v11704_v19  ;;  %v11705_v0 = vunpack.i.l.bf16 %v11704_v19 }
 0x391   :  { %v4084_v55 = vsel %vm485_vm13, %v11701_v51, %v11705_v0  ;;  %v4085_v14 = vsel %vm485_vm13, %v11705_v0, %v11706_v6 }
 0x392   :  { %v4116_v13 = vmax.f32 %v13981_v49, %v4084_v55  ;;  %v11709_v61 = vpop.permute.xlu0 %11708  ;;  %v4117_v60 = vmax.f32 %v13999_v27, %v4085_v14 }
 0x393   :  { %v11710_v39 = vunpack.i.l.bf16 %v11709_v61  ;;  %v11711_v58 = vunpack.i.h.bf16 %v11709_v61 }
 0x394   :  { %v11305_v41 = vpack.c.bf16 %v4116_v13, %v4115_v56 }
 0x395   :  { %v4086_v45 = vsel %vm485_vm13, %v11706_v6, %v11710_v39 }
 0x396   :  { %4195 = vst [vmem:[#allocation5] sm:$0x77] %v11305_v41  ;;  %v4118_v8 = vmax.f32 %v14002_v20, %v4086_v45  ;;  %v4087_v20 = vsel %vm485_vm13, %v11710_v39, %v11711_v58 }
 0x397   :  { %v4119_v32 = vmax.f32 %v14009_v35, %v4087_v20 }
 0x398   :  { %v11306_v46 = vpack.c.bf16 %v4118_v8, %v4117_v60 }
 0x39a   :  { %4196 = vst [vmem:[#allocation5 + $0x8] sm:$0x77] %v11306_v46 }
 0x39d   :  { %v4760_v54 = vld [vmem:[#allocation5] sm:$0xff] }
 0x39e   :  { %4778 = vrot.lane.b32.xlu1 %v4760_v54, %s12144_s21  ;;  %4237 = vrot.lane.b32.xlu0 %v4760_v54, %s12127_s23 }
 0x3a1   :  { %v14085_v49 = vld [vmem:[#allocation5 + $0x4] sm:$0xff] }
 0x3a2   :  { %4856 = vrot.lane.b32.xlu1 %v4760_v54, %s12141_s27  ;;  %4314 = vrot.lane.b32.xlu0 %v4760_v54, %s12129_s15 }
 0x3a6   :  { %5104 = vrot.lane.b32.xlu1 %v14085_v49, %s12143_s1  ;;  %4391 = vrot.lane.b32.xlu0 %v4760_v54, %s12143_s1 }
 0x3aa   :  { %5181 = vrot.lane.b32.xlu1 %v14085_v49, %s12142_s0  ;;  %4469 = vrot.lane.b32.xlu0 %v4760_v54, %s12142_s0 }
 0x3ae   :  { %4547 = vrot.lane.b32.xlu0 %v4760_v54, %s12137_s18 }
 0x3b2   :  { %4624 = vrot.lane.b32.xlu0 %v4760_v54, %s12139_s19 }
 0x3b6   :  { %4701 = vrot.lane.b32.xlu0 %v4760_v54, %s12120_s28 }
 0x3be   :  { %v11714_v27 = vpop.permute.xlu1 %11713 }
 0x3bf   :  { %v11716_v7 = vunpack.i.h.bf16 %v11714_v27  ;;  %v11715_v24 = vunpack.i.l.bf16 %v11714_v27 }
 0x3c1   :  { %v4088_v59 = vsel %vm485_vm13, %v11711_v58, %v11715_v24  ;;  %v4089_v9 = vsel %vm485_vm13, %v11715_v24, %v11716_v7 }
 0x3c2   :  { %v4120_v52 = vmax.f32 %v14012_v29, %v4088_v59  ;;  %v11719_v12 = vpop.permute.xlu1 %11718  ;;  %v4121_v26 = vmax.f32 %v14021_v33, %v4089_v9  ;;  %v14136_v29 = vld [vmem:[#allocation5 + $0x8] sm:$0xff] }
 0x3c3   :  { %v11720_v31 = vunpack.i.l.bf16 %v11719_v12  ;;  %v11721_v33 = vunpack.i.h.bf16 %v11719_v12 }
 0x3c4   :  { %v11307_v40 = vpack.c.bf16 %v4120_v52, %v4119_v32 }
 0x3c5   :  { %v4090_v22 = vsel %vm485_vm13, %v11716_v7, %v11720_v31  ;;  %v4091_v63 = vsel %vm485_vm13, %v11720_v31, %v11721_v33 }
 0x3c6   :  { %4197 = vst [vmem:[#allocation5 + $0x10] sm:$0x77] %v11307_v40  ;;  %v4122_v38 = vmax.f32 %v14024_v50, %v4090_v22  ;;  %v4123_v0 = vmax.f32 %v14031_v4, %v4091_v63 }
 0x3c8   :  { %v11308_v37 = vpack.c.bf16 %v4122_v38, %v4121_v26 }
 0x3ca   :  { %4198 = vst [vmem:[#allocation5 + $0x18] sm:$0x77] %v11308_v37 }
 0x3cd   :  { %v14104_v17 = vld [vmem:[#allocation5 + $0xc] sm:$0xff] }
 0x3ce   :  { %5260 = vrot.lane.b32.xlu1 %v14104_v17, %s12137_s18  ;;  %5106 = vrot.lane.b32.xlu0 %v14104_v17, %s12143_s1  ;;  %v14126_v35 = vld [vmem:[#allocation5 + $0x10] sm:$0xff] }
 0x3d1   :  { %v14225_v24 = vld [vmem:[#allocation5 + $0x18] sm:$0xff] }
 0x3d2   :  { %5337 = vrot.lane.b32.xlu1 %v14104_v17, %s12139_s19  ;;  %5183 = vrot.lane.b32.xlu0 %v14104_v17, %s12142_s0 }
 0x3d6   :  { %5414 = vrot.lane.b32.xlu1 %v14104_v17, %s12120_s28  ;;  %5258 = vrot.lane.b32.xlu0 %v14085_v49, %s12137_s18 }
 0x3da   :  { %5491 = vrot.lane.b32.xlu1 %v14104_v17, %s12144_s21  ;;  %5335 = vrot.lane.b32.xlu0 %v14085_v49, %s12139_s19 }
 0x3de   :  { %5568 = vrot.lane.b32.xlu1 %v14104_v17, %s12141_s27  ;;  %5412 = vrot.lane.b32.xlu0 %v14085_v49, %s12120_s28 }
 0x3e2   :  { %5661 = vrot.lane.b32.xlu1 %v14126_v35, %s12127_s23  ;;  %5489 = vrot.lane.b32.xlu0 %v14085_v49, %s12144_s21 }
 0x3e6   :  { %5738 = vrot.lane.b32.xlu1 %v14126_v35, %s12129_s15  ;;  %5566 = vrot.lane.b32.xlu0 %v14085_v49, %s12141_s27 }
 0x3ea   :  { %5815 = vrot.lane.b32.xlu1 %v14126_v35, %s12143_s1  ;;  %5659 = vrot.lane.b32.xlu0 %v14136_v29, %s12127_s23 }
 0x3ee   :  { %v11724_v50 = vpop.permute.xlu0 %11723  ;;  %5892 = vrot.lane.b32.xlu1 %v14126_v35, %s12142_s0  ;;  %5736 = vrot.lane.b32.xlu0 %v14136_v29, %s12129_s15 }
 0x3ef   :  { %v11726_v51 = vunpack.i.h.bf16 %v11724_v50  ;;  %v11725_v25 = vunpack.i.l.bf16 %v11724_v50 }
 0x3f1   :  { %v4092_v19 = vsel %vm485_vm13, %v11721_v33, %v11725_v25  ;;  %v4093_v16 = vsel %vm485_vm13, %v11725_v25, %v11726_v51  ;;  %v11729_v6 = vpop.permute.xlu1 %11728 }
 0x3f2   :  { %v4124_v55 = vmax.f32 %v14034_v1, %v4092_v19  ;;  %v11731_v56 = vunpack.i.h.bf16 %v11729_v6  ;;  %v11730_v13 = vunpack.i.l.bf16 %v11729_v6  ;;  %v11734_v61 = vpop.permute.xlu0 %11733  ;;  %4239 = vrot.lane.b32.xlu1 %v14136_v29, %s12127_s23  ;;  %5813 = vrot.lane.b32.xlu0 %v14136_v29, %s12143_s1  ;;  %v4125_v41 = vmax.f32 %v14042_v10, %v4093_v16 }
 0x3f3   :  { %v11736_v14 = vunpack.i.h.bf16 %v11734_v61  ;;  %v11735_v39 = vunpack.i.l.bf16 %v11734_v61 }
 0x3f4   :  { %v11309_v45 = vpack.c.bf16 %v4124_v55, %v4123_v0  ;;  %v4094_v60 = vsel %vm485_vm13, %v11726_v51, %v11730_v13  ;;  %v4095_v4 = vsel %vm485_vm13, %v11730_v13, %v11731_v56 }
 0x3f5   :  { %v4126_v1 = vmax.f32 %v14047_v34, %v4094_v60  ;;  %v4127_v8 = vmax.f32 %v14056_v28, %v4095_v4  ;;  %v4098_v46 = vsel %vm485_vm13, %v11736_v14, %v13916_v18  ;;  %v4096_v54 = vsel %vm485_vm13, %v11731_v56, %v11735_v39 }
 0x3f6   :  { %4199 = vst [vmem:[#allocation5 + $0x20] sm:$0x77] %v11309_v45  ;;  %v4130_v58 = vmax.f32 %v14058_v42, %v4098_v46  ;;  %v4097_v27 = vsel %vm485_vm13, %v11735_v39, %v11736_v14  ;;  %v4128_v10 = vmax.f32 %v14061_v47, %v4096_v54  ;;  %4316 = vrot.lane.b32.xlu1 %v14136_v29, %s12129_s15  ;;  %v14187_v42 = vld [vmem:[#allocation5 + $0x14] sm:$0xff] }
 0x3f7   :  { %5890 = vrot.lane.b32.xlu0 %v14136_v29, %s12142_s0  ;;  %v11310_v34 = vpack.c.bf16 %v4126_v1, %v4125_v41  ;;  %v4129_v28 = vmax.f32 %v14064_v3, %v4097_v27 }
 0x3f8   :  { %v11311_v20 = vpack.c.bf16 %v4128_v10, %v4127_v8 }
 0x3f9   :  { %4200 = vst [vmem:[#allocation5 + $0x28] sm:$0x77] %v11310_v34  ;;  %v11312_v18 = vpack.c.bf16 %v4130_v58, %v4129_v28 }
 0x3fa   :  { %4201 = vst [vmem:[#allocation5 + $0x30] sm:$0x77] %v11311_v20  ;;  %4393 = vrot.lane.b32.xlu1 %v14136_v29, %s12143_s1 }
 0x3fb   :  { %4780 = vrot.lane.b32.xlu0 %v14136_v29, %s12144_s21  ;;  %4202 = vst [vmem:[#allocation5 + $0x38] sm:$0x77] %v11312_v18 }
 0x3fd   :  { %v14207_v3 = vld [vmem:[#allocation5 + $0x1c] sm:$0xff] }
 0x3fe   :  { %4471 = vrot.lane.b32.xlu1 %v14136_v29, %s12142_s0  ;;  %v14251_v9 = vld [vmem:[#allocation5 + $0x20] sm:$0xff] }
 0x3ff   :  { %4858 = vrot.lane.b32.xlu0 %v14136_v29, %s12141_s27 }
 0x400   :  { %v5090_v22 = vld [vmem:[#allocation5 + $0x24] sm:$0xff] }
 0x401   :  { %v14280_v16 = vld [vmem:[#allocation5 + $0x2c] sm:$0xff] }
 0x402   :  { %4549 = vrot.lane.b32.xlu1 %v14136_v29, %s12137_s18 }
 0x403   :  { %4952 = vrot.lane.b32.xlu0 %v14104_v17, %s12127_s23 }
 0x406   :  { %4626 = vrot.lane.b32.xlu1 %v14136_v29, %s12139_s19 }
 0x407   :  { %5029 = vrot.lane.b32.xlu0 %v14104_v17, %s12129_s15 }
 0x40a   :  { %4703 = vrot.lane.b32.xlu1 %v14136_v29, %s12120_s28 }
 0x40b   :  { %5108 = vrot.lane.b32.xlu0 %v14187_v42, %s12143_s1 }
 0x40e   :  { %4950 = vrot.lane.b32.xlu1 %v14085_v49, %s12127_s23 }
 0x40f   :  { %5185 = vrot.lane.b32.xlu0 %v14187_v42, %s12142_s0 }
 0x410   :  { %v14205_v47 = vpop.permute.xlu0 %4237  ;;  %v14231_v59 = vpop.permute.xlu1 %4778 }
 0x411   :  { %17256 = vst [vmem:[#allocation11_spill] sm:$0xff] %v14231_v59 }
 0x412   :  { %5027 = vrot.lane.b32.xlu1 %v14085_v49, %s12129_s15 }
 0x413   :  { %5262 = vrot.lane.b32.xlu0 %v14187_v42, %s12137_s18 }
 0x414   :  { %v14213_v49 = vpop.permute.xlu0 %4314  ;;  %v14243_v52 = vpop.permute.xlu1 %4856 }
 0x416   :  { %4241 = vrot.lane.b32.xlu1 %v14126_v35, %s12127_s23 }
 0x417   :  { %5339 = vrot.lane.b32.xlu0 %v14187_v42, %s12139_s19 }
 0x418   :  { %v14223_v7 = vpop.permute.xlu0 %4391  ;;  %v5105_v31 = vpop.permute.xlu1 %5104 }
 0x419   :  { %v5122_v50 = vrot.slane %v5105_v31, 4 }
 0x41a   :  { %5110 = vrot.lane.b32.xlu1 %v14207_v3, %s12143_s1 }
 0x41b   :  { %5416 = vrot.lane.b32.xlu0 %v14187_v42, %s12120_s28 }
 0x41c   :  { %v14233_v32 = vpop.permute.xlu0 %4469  ;;  %v5182_v26 = vpop.permute.xlu1 %5181 }
 0x41d   :  { %v5199_v25 = vrot.slane %v5182_v26, 4 }
 0x41e   :  { %5187 = vrot.lane.b32.xlu1 %v14207_v3, %s12142_s0 }
 0x41f   :  { %5493 = vrot.lane.b32.xlu0 %v14187_v42, %s12144_s21 }
 0x420   :  { %v14245_v12 = vpop.permute.xlu0 %4547 }
 0x422   :  { %5264 = vrot.lane.b32.xlu1 %v14207_v3, %s12137_s18 }
 0x423   :  { %5570 = vrot.lane.b32.xlu0 %v14187_v42, %s12141_s27 }
 0x424   :  { %v14253_v40 = vpop.permute.xlu0 %4624 }
 0x425   :  { %17257 = vst [vmem:[#allocation12_spill] sm:$0xff] %v14253_v40 }
 0x426   :  { %5341 = vrot.lane.b32.xlu1 %v14207_v3, %s12139_s19 }
 0x427   :  { %5663 = vrot.lane.b32.xlu0 %v14225_v24, %s12127_s23 }
 0x428   :  { %v14262_v38 = vpop.permute.xlu0 %4701 }
 0x429   :  { %17258 = vst [vmem:[#allocation13_spill] sm:$0xff] %v14262_v38 }
 0x42a   :  { %5418 = vrot.lane.b32.xlu1 %v14207_v3, %s12120_s28 }
 0x42b   :  { %5740 = vrot.lane.b32.xlu0 %v14225_v24, %s12129_s15 }
 0x42e   :  { %5495 = vrot.lane.b32.xlu1 %v14207_v3, %s12144_s21 }
 0x42f   :  { %5817 = vrot.lane.b32.xlu0 %v14225_v24, %s12143_s1 }
 0x432   :  { %5572 = vrot.lane.b32.xlu1 %v14207_v3, %s12141_s27 }
 0x433   :  { %5894 = vrot.lane.b32.xlu0 %v14225_v24, %s12142_s0 }
 0x436   :  { %5665 = vrot.lane.b32.xlu1 %v14251_v9, %s12127_s23 }
 0x437   :  { %4243 = vrot.lane.b32.xlu0 %v14225_v24, %s12127_s23 }
 0x43a   :  { %5742 = vrot.lane.b32.xlu1 %v14251_v9, %s12129_s15 }
 0x43b   :  { %5112 = vrot.lane.b32.xlu0 %v5090_v22, %s12143_s1 }
 0x43e   :  { %5819 = vrot.lane.b32.xlu1 %v14251_v9, %s12143_s1 }
 0x43f   :  { %5189 = vrot.lane.b32.xlu0 %v5090_v22, %s12142_s0 }
 0x440   :  { %v14267_v37 = vpop.permute.xlu1 %5260  ;;  %v14269_v17 = vpop.permute.xlu0 %5106 }
 0x441   :  { %v5123_v33 = vrot.slane %v14269_v17, 4  ;;  %v17193_v45 = vrot.slane %v14267_v37, 4 }
 0x442   :  { %5896 = vrot.lane.b32.xlu1 %v14251_v9, %s12142_s0 }
 0x443   :  { %5266 = vrot.lane.b32.xlu0 %v5090_v22, %s12137_s18  ;;  %v5131_v6 = vsel %vm17251_vm0, %v5122_v50, %v5123_v33 }
 0x444   :  { %v14275_v63 = vpop.permute.xlu1 %5337  ;;  %v14277_v51 = vpop.permute.xlu0 %5183  ;;  %v5132_v13 = vsel %vm17255_vm8, %v5105_v31, %v5131_v6 }
 0x445   :  { %v5200_v19 = vrot.slane %v14277_v51, 4  ;;  %v17192_v1 = vrot.slane %v14275_v63, 4 }
 0x446   :  { %5114 = vrot.lane.b32.xlu1 %v14280_v16, %s12143_s1 }
 0x447   :  { %5343 = vrot.lane.b32.xlu0 %v5090_v22, %s12139_s19  ;;  %v5208_v0 = vsel %vm17251_vm0, %v5199_v25, %v5200_v19 }
 0x448   :  { %v14291_v55 = vpop.permute.xlu1 %5414  ;;  %v5259_v56 = vpop.permute.xlu0 %5258  ;;  %v5209_v61 = vsel %vm17250_vm14, %v5182_v26, %v5208_v0 }
 0x449   :  { %v5276_v14 = vrot.slane %v5259_v56, 4  ;;  %v10883_v39 = vcombine.low %v5132_v13, %v5209_v61  ;;  %v10884_v41 = vcombine.high %v5132_v13, %v5209_v61  ;;  %v17191_v31 = vrot.slane %v14291_v55, 4 }
 0x44a   :  { %5191 = vrot.lane.b32.xlu1 %v14280_v16, %s12142_s0 }
 0x44b   :  { %5420 = vrot.lane.b32.xlu0 %v5090_v22, %s12120_s28  ;;  %6649 = vmatprep.subr.bf16.mxu0 %v10884_v41  ;;  %v5285_v8 = vsel %vm17251_vm0, %v5276_v14, %v17193_v45 }
 0x44c   :  { %v14299_v60 = vpop.permute.xlu1 %5491  ;;  %6650 = vmatpush1.bf16.msra.mxu0 %v10883_v39  ;;  %v5336_v4 = vpop.permute.xlu0 %5335  ;;  %v5286_v58 = vsel %vm875_vm4, %v5259_v56, %v5285_v8  ;;  %v14325_v56 = vld [vmem:[#allocation5 + $0x28] sm:$0xff] }
 0x44d   :  { %v5353_v46 = vrot.slane %v5336_v4, 4  ;;  %v17190_v25 = vrot.slane %v14299_v60, 4 }
 0x44e   :  { %5268 = vrot.lane.b32.xlu1 %v14280_v16, %s12137_s18 }
 0x44f   :  { %5497 = vrot.lane.b32.xlu0 %v5090_v22, %s12144_s21  ;;  %v5362_v54 = vsel %vm17251_vm0, %v5353_v46, %v17192_v1 }
 0x450   :  { %v5363_v27 = vsel %vm1031_vm6, %v5336_v4, %v5362_v54  ;;  %v14313_v10 = vpop.permute.xlu1 %5568  ;;  %v5413_v34 = vpop.permute.xlu0 %5412 }
 0x451   :  { %v10899_v28 = vcombine.low %v5286_v58, %v5363_v27  ;;  %v5430_v20 = vrot.slane %v5413_v34, 4  ;;  %v10900_v18 = vcombine.high %v5286_v58, %v5363_v27  ;;  %v17189_v41 = vrot.slane %v14313_v10, 4 }
 0x452   :  { %5345 = vrot.lane.b32.xlu1 %v14280_v16, %s12139_s19 }
 0x453   :  { %5574 = vrot.lane.b32.xlu0 %v5090_v22, %s12141_s27  ;;  %6651 = vmatprep.subr.bf16.mxu0 %v10900_v18  ;;  %v5439_v6 = vsel %vm17251_vm0, %v5430_v20, %v17191_v31 }
 0x454   :  { %v14319_v26 = vpop.permute.xlu1 %5661  ;;  %6652 = vmatpush1.bf16.msra.mxu0 %v10899_v28  ;;  %v5490_v50 = vpop.permute.xlu0 %5489  ;;  %v5440_v13 = vsel %vm1187_vm2, %v5413_v34, %v5439_v6 }
 0x455   :  { %v5507_v0 = vrot.slane %v5490_v50, 4 }
 0x456   :  { %5422 = vrot.lane.b32.xlu1 %v14280_v16, %s12120_s28 }
 0x457   :  { %5667 = vrot.lane.b32.xlu0 %v14325_v56, %s12127_s23  ;;  %v5516_v22 = vsel %vm17251_vm0, %v5507_v0, %v17190_v25 }
 0x458   :  { %v5517_v61 = vsel %vm4806_vm15, %v5490_v50, %v5516_v22  ;;  %v14336_v14 = vpop.permute.xlu1 %5738  ;;  %v5567_v39 = vpop.permute.xlu0 %5566  ;;  %v17188_v50 = vrot.slane %v14319_v26, 4 }
 0x459   :  { %v10915_v4 = vcombine.low %v5440_v13, %v5517_v61  ;;  %v5584_v8 = vrot.slane %v5567_v39, 4  ;;  %v10916_v46 = vcombine.high %v5440_v13, %v5517_v61  ;;  %v17185_v22 = vrot.slane %v14336_v14, 4  ;;  %v14362_v61 = vld [vmem:[#allocation5 + $0x30] sm:$0xff] }
 0x45a   :  { %5499 = vrot.lane.b32.xlu1 %v14280_v16, %s12144_s21 }
 0x45b   :  { %5744 = vrot.lane.b32.xlu0 %v14325_v56, %s12129_s15  ;;  %v5593_v54 = vsel %vm17251_vm0, %v5584_v8, %v17189_v41  ;;  %6653 = vmatprep.subr.bf16.mxu0 %v10916_v46 }
 0x45c   :  { %v5594_v58 = vsel %vm4884_vm1, %v5567_v39, %v5593_v54  ;;  %v14347_v27 = vpop.permute.xlu1 %5815  ;;  %6654 = vmatpush1.bf16.msra.mxu0 %v10915_v4  ;;  %v5660_v34 = vpop.permute.xlu0 %5659 }
 0x45d   :  { %v10931_v28 = vcombine.low %v5594_v58, %v14136_v29  ;;  %v5677_v20 = vrot.slane %v5660_v34, 4  ;;  %v10932_v18 = vcombine.high %v5594_v58, %v14136_v29 }
 0x45e   :  { %5576 = vrot.lane.b32.xlu1 %v14280_v16, %s12141_s27 }
 0x45f   :  { %5821 = vrot.lane.b32.xlu0 %v14325_v56, %s12143_s1  ;;  %6655 = vmatprep.subr.bf16.mxu0 %v10932_v18  ;;  %v5686_v13 = vsel %vm17251_vm0, %v5677_v20, %v17188_v50  ;;  %v17186_v18 = vrot.slane %v14347_v27, 4 }
 0x460   :  { %v14356_v6 = vpop.permute.xlu1 %5892  ;;  %6656 = vmatpush1.bf16.msra.mxu0 %v10931_v28  ;;  %v5737_v0 = vpop.permute.xlu0 %5736  ;;  %v5687_v39 = vsel %vm251_vm9, %v5660_v34, %v5686_v13  ;;  %v5092_v28 = vld [vmem:[#allocation5 + $0x34] sm:$0xff] }
 0x461   :  { %v5754_v29 = vrot.slane %v5737_v0, 4 }
 0x462   :  { %5669 = vrot.lane.b32.xlu1 %v14362_v61, %s12127_s23 }
 0x463   :  { %5898 = vrot.lane.b32.xlu0 %v14325_v56, %s12142_s0  ;;  %v5763_v16 = vsel %vm17251_vm0, %v5754_v29, %v17185_v22 }
 0x464   :  { %v5764_v4 = vsel %vm407_vm11, %v5737_v0, %v5763_v16  ;;  %v14373_v8 = vpop.permute.xlu1 %4239  ;;  %v5814_v46 = vpop.permute.xlu0 %5813  ;;  %v17187_v0 = vrot.slane %v14356_v6, 4 }
 0x465   :  { %v10947_v54 = vcombine.low %v5687_v39, %v5764_v4  ;;  %v5831_v58 = vrot.slane %v5814_v46, 4  ;;  %v10948_v20 = vcombine.high %v5687_v39, %v5764_v4 }
 0x466   :  { %5746 = vrot.lane.b32.xlu1 %v14362_v61, %s12129_s15 }
 0x467   :  { %5116 = vrot.lane.b32.xlu0 %v5092_v28, %s12143_s1  ;;  %6657 = vmatprep.subr.bf16.mxu0 %v10948_v20  ;;  %v5840_v13 = vsel %vm17251_vm0, %v5831_v58, %v17186_v18 }
 0x468   :  { %v14379_v29 = vpop.permute.xlu1 %4316  ;;  %6658 = vmatpush1.bf16.msra.mxu0 %v10947_v54  ;;  %v5841_v4 = vsel %vm17255_vm8, %v5814_v46, %v5840_v13  ;;  %v5093_v46 = vld [vmem:[#allocation5 + $0x3c] sm:$0xff] }
 0x469   :  { %v5891_v34 = vpop.permute.xlu0 %5890 }
 0x46a   :  { %v5908_v16 = vrot.slane %v5891_v34, 4  ;;  %5823 = vrot.lane.b32.xlu1 %v14362_v61, %s12143_s1 }
 0x46b   :  { %5193 = vrot.lane.b32.xlu0 %v5092_v28, %s12142_s0 }
 0x46c   :  { %v5917_v39 = vsel %vm17251_vm0, %v5908_v16, %v17187_v0  ;;  %v14393_v20 = vpop.permute.xlu1 %4393 }
 0x46d   :  { %v5918_v54 = vsel %vm17250_vm14, %v5891_v34, %v5917_v39  ;;  %v14395_v30 = vpop.permute.xlu0 %4780  ;;  %v14407_v34 = vsel %vm2144_vm12, %v13948_v62, %v13924_v48  ;;  %vm9192_vm12 = vcmask 1041384  }
 0x46e   :  { %17259 = vst [vmem:[#allocation14_spill] sm:$0xff] %v14395_v30  ;;  %v10963_v22 = vcombine.low %v5841_v4, %v5918_v54  ;;  %v10964_v58 = vcombine.high %v5841_v4, %v5918_v54  ;;  %5900 = vrot.lane.b32.xlu1 %v14362_v61, %s12142_s0 }
 0x46f   :  { %5270 = vrot.lane.b32.xlu0 %v5092_v28, %s12137_s18 }
 0x470   :  { %6659 = vmatprep.subr.bf16.mxu0 %v10964_v58  ;;  %v14400_v18 = vpop.permute.xlu1 %4471 }
 0x471   :  { %6660 = vmatpush1.bf16.msra.mxu0 %v10963_v22  ;;  %v14402_v16 = vpop.permute.xlu0 %4858  ;;  %v14417_v22 = vld [vmem:[#allocation5 + $0x40] sm:$0xff] }
 0x472   :  { %17260 = vst [vmem:[#allocation15_spill] sm:$0xff] %v14402_v16  ;;  %5118 = vrot.lane.b32.xlu1 %v5093_v46, %s12143_s1 }
 0x473   :  { %5347 = vrot.lane.b32.xlu0 %v5092_v28, %s12139_s19 }
 0x474   :  { %10979 = vmatmul.mubr.msk.bf16.vlgmr.msra.gmra.mrb[32].mxu0 %vm485_vm13, %v14407_v34  ;;  %v14413_v13 = vpop.permute.xlu1 %4549 }
 0x475   :  { %v14415_v39 = vpop.permute.xlu0 %4952  ;;  %6767 = vmatprep.mubr.bf16.mxu0 %v14417_v22 }
 0x476   :  { %17261 = vst [vmem:[#allocation16_spill] sm:$0xff] %v14415_v39  ;;  %5195 = vrot.lane.b32.xlu1 %v5093_v46, %s12142_s0 }
 0x477   :  { %5424 = vrot.lane.b32.xlu0 %v5092_v28, %s12120_s28 }
 0x478   :  { %v14422_v48 = vpop.permute.xlu1 %4626 }
 0x479   :  { %17262 = vst [vmem:[#allocation17_spill] sm:$0xff] %v14422_v48  ;;  %v14424_v62 = vpop.permute.xlu0 %5029 }
 0x47a   :  { %17263 = vst [vmem:[#allocation18_spill] sm:$0xff] %v14424_v62  ;;  %5272 = vrot.lane.b32.xlu1 %v5093_v46, %s12137_s18 }
 0x47b   :  { %5501 = vrot.lane.b32.xlu0 %v5092_v28, %s12144_s21 }
 0x47c   :  { %v14428_v4 = vpop.permute.xlu1 %4703 }
 0x47d   :  { %17264 = vst [vmem:[#allocation19_spill] sm:$0xff] %v14428_v4  ;;  %v5109_v54 = vpop.permute.xlu0 %5108 }
 0x47e   :  { %v5124_v58 = vrot.slane %v5109_v54, 4  ;;  %5349 = vrot.lane.b32.xlu1 %v5093_v46, %s12139_s19 }
 0x47f   :  { %5578 = vrot.lane.b32.xlu0 %v5092_v28, %s12141_s27 }
 0x480   :  { %v14432_v0 = vpop.permute.xlu1 %4950  ;;  %v5133_v25 = vsel %vm17251_vm0, %v5123_v33, %v5124_v58 }
 0x481   :  { %17265 = vst [vmem:[#allocation20_spill] sm:$0xff] %v14432_v0  ;;  %v5186_v50 = vpop.permute.xlu0 %5185  ;;  %v5134_v45 = vsel %vm17255_vm8, %v14269_v17, %v5133_v25  ;;  %v14460_v25 = vld [vmem:[#allocation5 + $0x38] sm:$0xff] }
 0x482   :  { %v5201_v41 = vrot.slane %v5186_v50, 4  ;;  %5426 = vrot.lane.b32.xlu1 %v5093_v46, %s12120_s28 }
 0x483   :  { %4395 = vrot.lane.b32.xlu0 %v14126_v35, %s12143_s1 }
 0x484   :  { %v5210_v31 = vsel %vm17251_vm0, %v5200_v19, %v5201_v41  ;;  %v14443_v1 = vpop.permute.xlu1 %5027 }
 0x485   :  { %17266 = vst [vmem:[#allocation21_spill] sm:$0xff] %v14443_v1  ;;  %v14445_v28 = vpop.permute.xlu0 %5262  ;;  %v5211_v62 = vsel %vm17250_vm14, %v14277_v51, %v5210_v31  ;;  %v17268_v51 = vrot.slane %v14267_v37, 4 }
 0x486   :  { %v5278_v33 = vrot.slane %v14445_v28, 4  ;;  %v10885_v39 = vcombine.low %v5134_v45, %v5211_v62  ;;  %5503 = vrot.lane.b32.xlu1 %v5093_v46, %s12144_s21  ;;  %v10886_v0 = vcombine.high %v5134_v45, %v5211_v62  ;;  %v17269_v45 = vrot.slane %v14275_v63, 4 }
 0x487   :  { %4397 = vrot.lane.b32.xlu0 %v14225_v24, %s12143_s1 }
 0x488   :  { %6692 = vmatprep.subr.bf16.mxu1 %v10886_v0  ;;  %v14455_v19 = vpop.permute.xlu1 %4241  ;;  %v5287_v31 = vsel %vm17251_vm0, %v17268_v51, %v5278_v33 }
 0x489   :  { %17267 = vst [vmem:[#allocation22_spill] sm:$0xff] %v14455_v19  ;;  %v14457_v1 = vpop.permute.xlu0 %5339  ;;  %6693 = vmatpush1.bf16.msra.mxu1 %v10885_v39  ;;  %v5288_v19 = vsel %vm875_vm4, %v14267_v37, %v5287_v31 }
 0x48a   :  { %v5355_v17 = vrot.slane %v14457_v1, 4  ;;  %5580 = vrot.lane.b32.xlu1 %v5093_v46, %s12141_s27 }
 0x48b   :  { %5671 = vrot.lane.b32.xlu0 %v14460_v25, %s12127_s23 }
 0x48c   :  { %v5364_v0 = vsel %vm17251_vm0, %v17269_v45, %v5355_v17  ;;  %v14471_v62 = vpop.permute.xlu1 %5110 }
 0x48d   :  { %v14473_v39 = vpop.permute.xlu0 %5416  ;;  %v5365_v59 = vsel %vm1031_vm6, %v14275_v63, %v5364_v0  ;;  %v17204_v51 = vrot.slane %v14471_v62, 4 }
 0x48e   :  { %v17202_v46 = vrot.slane %v14473_v39, 4  ;;  %v10901_v30 = vcombine.low %v5288_v19, %v5365_v59  ;;  %v10902_v40 = vcombine.high %v5288_v19, %v5365_v59  ;;  %4318 = vrot.lane.b32.xlu1 %v14126_v35, %s12129_s15  ;;  %v17270_v59 = vrot.slane %v14291_v55, 4 }
 0x48f   :  { %5748 = vrot.lane.b32.xlu0 %v14460_v25, %s12129_s15  ;;  %v5135_v0 = vsel %vm17251_vm0, %v5124_v58, %v17204_v51 }
 0x490   :  { %6694 = vmatprep.subr.bf16.mxu1 %v10902_v40  ;;  %v14485_v45 = vpop.permute.xlu1 %5187  ;;  %v5441_v19 = vsel %vm17251_vm0, %v17270_v59, %v17202_v46  ;;  %v5136_v38 = vsel %vm17255_vm8, %v5109_v54, %v5135_v0 }
 0x491   :  { %6695 = vmatpush1.bf16.msra.mxu1 %v10901_v30  ;;  %v14487_v37 = vpop.permute.xlu0 %5493  ;;  %v5202_v63 = vrot.slane %v14485_v45, 4  ;;  %v17271_v30 = vrot.slane %v14299_v60, 4  ;;  %v5442_v58 = vsel %vm1187_vm2, %v14291_v55, %v5441_v19 }
 0x492   :  { %v17207_v31 = vrot.slane %v14487_v37, 4  ;;  %4320 = vrot.lane.b32.xlu1 %v14225_v24, %s12129_s15 }
 0x493   :  { %5825 = vrot.lane.b32.xlu0 %v14460_v25, %s12143_s1  ;;  %v5212_v59 = vsel %vm17251_vm0, %v5201_v41, %v5202_v63 }
 0x494   :  { %v5518_v40 = vsel %vm17251_vm0, %v17271_v30, %v17207_v31  ;;  %v14511_v46 = vpop.permute.xlu1 %5264  ;;  %v5213_v4 = vsel %vm17250_vm14, %v5186_v50, %v5212_v59 }
 0x495   :  { %v14513_v48 = vpop.permute.xlu0 %5570  ;;  %v5519_v51 = vsel %vm4806_vm15, %v14299_v60, %v5518_v40  ;;  %v17212_v30 = vrot.slane %v14511_v46, 4  ;;  %v10887_v55 = vcombine.low %v5136_v38, %v5213_v4  ;;  %v10888_v19 = vcombine.high %v5136_v38, %v5213_v4 }
 0x496   :  { %v5586_v31 = vrot.slane %v14513_v48, 4  ;;  %v10917_v16 = vcombine.low %v5442_v58, %v5519_v51  ;;  %v10918_v41 = vcombine.high %v5442_v58, %v5519_v51  ;;  %4473 = vrot.lane.b32.xlu1 %v14126_v35, %s12142_s0  ;;  %v17272_v60 = vrot.slane %v14313_v10, 4 }
 0x497   :  { %5902 = vrot.lane.b32.xlu0 %v14460_v25, %s12142_s0  ;;  %6735 = vmatprep.subr.bf16.mxu0 %v10888_v19  ;;  %v5289_v38 = vsel %vm17251_vm0, %v5278_v33, %v17212_v30  ;;  %v17273_v19 = vrot.slane %v14319_v26, 4 }
 0x498   :  { %6696 = vmatprep.subr.bf16.mxu1 %v10918_v41  ;;  %v5595_v50 = vsel %vm17251_vm0, %v17272_v60, %v5586_v31  ;;  %v14532_v54 = vpop.permute.xlu1 %5341  ;;  %6736 = vmatpush1.bf16.msra.mxu0 %v10887_v55  ;;  %v5290_v41 = vsel %vm875_vm4, %v14445_v28, %v5289_v38 }
 0x499   :  { %6697 = vmatpush1.bf16.msra.mxu1 %v10917_v16  ;;  %v14534_v51 = vpop.permute.xlu0 %5663  ;;  %v5596_v0 = vsel %vm4884_vm1, %v14313_v10, %v5595_v50  ;;  %v17209_v4 = vrot.slane %v14532_v54, 4 }
 0x49a   :  { %v5679_v40 = vrot.slane %v14534_v51, 4  ;;  %v10933_v59 = vcombine.low %v5596_v0, %v14126_v35  ;;  %v10934_v58 = vcombine.high %v5596_v0, %v14126_v35  ;;  %4475 = vrot.lane.b32.xlu1 %v14225_v24, %s12142_s0 }
 0x49b   :  { %4551 = vrot.lane.b32.xlu0 %v14126_v35, %s12137_s18  ;;  %v5366_v10 = vsel %vm17251_vm0, %v5355_v17, %v17209_v4 }
 0x49c   :  { %6698 = vmatprep.subr.bf16.mxu1 %v10934_v58  ;;  %v14552_v16 = vpop.permute.xlu1 %5418  ;;  %v5367_v55 = vsel %vm1031_vm6, %v14457_v1, %v5366_v10  ;;  %v5688_v60 = vsel %vm17251_vm0, %v17273_v19, %v5679_v40  ;;  %v17274_v1 = vrot.slane %v14336_v14, 4 }
 0x49d   :  { %6699 = vmatpush1.bf16.msra.mxu1 %v10933_v59  ;;  %v14554_v33 = vpop.permute.xlu0 %5740  ;;  %v17210_v50 = vrot.slane %v14552_v16, 4  ;;  %v10903_v0 = vcombine.low %v5290_v41, %v5367_v55  ;;  %v10904_v59 = vcombine.high %v5290_v41, %v5367_v55  ;;  %v5689_v10 = vsel %vm251_vm9, %v14319_v26, %v5688_v60 }
 0x49e   :  { %v5756_v17 = vrot.slane %v14554_v33, 4  ;;  %4628 = vrot.lane.b32.xlu1 %v14126_v35, %s12139_s19  ;;  %v17275_v55 = vrot.slane %v14473_v39, 4  ;;  %v17276_v26 = vrot.slane %v14487_v37, 4 }
 0x49f   :  { %4553 = vrot.lane.b32.xlu0 %v14225_v24, %s12137_s18  ;;  %6737 = vmatprep.subr.bf16.mxu0 %v10904_v59 }
 0x4a0   :  { %v5765_v28 = vsel %vm17251_vm0, %v17274_v1, %v5756_v17  ;;  %v14574_v38 = vpop.permute.xlu1 %5495  ;;  %6738 = vmatpush1.bf16.msra.mxu0 %v10903_v0  ;;  %v5443_v19 = vsel %vm17251_vm0, %v17275_v55, %v17210_v50  ;;  %v17277_v55 = vrot.slane %v14347_v27, 4 }
 0x4a1   :  { %v14576_v58 = vpop.permute.xlu0 %5817  ;;  %v5766_v41 = vsel %vm407_vm11, %v14336_v14, %v5765_v28  ;;  %v17211_v59 = vrot.slane %v14574_v38, 4 }
 0x4a2   :  { %v17213_v1 = vrot.slane %v14576_v58, 4  ;;  %v10949_v4 = vcombine.low %v5689_v10, %v5766_v41  ;;  %v10950_v0 = vcombine.high %v5689_v10, %v5766_v41  ;;  %4630 = vrot.lane.b32.xlu1 %v14225_v24, %s12139_s19  ;;  %v5444_v10 = vsel %vm1187_vm2, %v14473_v39, %v5443_v19 }
 0x4a3   :  { %4705 = vrot.lane.b32.xlu0 %v14126_v35, %s12120_s28  ;;  %v5520_v14 = vsel %vm17251_vm0, %v17276_v26, %v17211_v59  ;;  %v17278_v39 = vrot.slane %v14356_v6, 4 }
 0x4a4   :  { %6700 = vmatprep.subr.bf16.mxu1 %v10950_v0  ;;  %v14598_v60 = vpop.permute.xlu1 %5572  ;;  %v5521_v41 = vsel %vm4806_vm15, %v14487_v37, %v5520_v14  ;;  %v5842_v0 = vsel %vm17251_vm0, %v17277_v55, %v17213_v1 }
 0x4a5   :  { %6701 = vmatpush1.bf16.msra.mxu1 %v10949_v4  ;;  %v14600_v28 = vpop.permute.xlu0 %5894  ;;  %v5587_v50 = vrot.slane %v14598_v60, 4  ;;  %v10919_v59 = vcombine.low %v5444_v10, %v5521_v41  ;;  %v10920_v4 = vcombine.high %v5444_v10, %v5521_v41  ;;  %v5843_v41 = vsel %vm17255_vm8, %v14347_v27, %v5842_v0 }
 0x4a6   :  { %v5910_v26 = vrot.slane %v14600_v28, 4  ;;  %4782 = vrot.lane.b32.xlu1 %v14126_v35, %s12144_s21 }
 0x4a7   :  { %4707 = vrot.lane.b32.xlu0 %v14225_v24, %s12120_s28  ;;  %6739 = vmatprep.subr.bf16.mxu0 %v10920_v4  ;;  %v5597_v19 = vsel %vm17251_vm0, %v5586_v31, %v5587_v50 }
 0x4a8   :  { %v5919_v37 = vsel %vm17251_vm0, %v17278_v39, %v5910_v26  ;;  %v14625_v14 = vpop.permute.xlu1 %5665  ;;  %6740 = vmatpush1.bf16.msra.mxu0 %v10919_v59  ;;  %v5598_v4 = vsel %vm4884_vm1, %v14513_v48, %v5597_v19 }
 0x4a9   :  { %v14627_v10 = vpop.permute.xlu0 %4243  ;;  %v5920_v55 = vsel %vm17250_vm14, %v14356_v6, %v5919_v37  ;;  %v5680_v39 = vrot.slane %v14625_v14, 4  ;;  %v10935_v31 = vcombine.low %v5598_v4, %v14225_v24  ;;  %v10936_v27 = vcombine.high %v5598_v4, %v14225_v24 }
 0x4aa   :  { %v10965_v30 = vcombine.low %v5843_v41, %v5920_v55  ;;  %v10966_v1 = vcombine.high %v5843_v41, %v5920_v55  ;;  %4784 = vrot.lane.b32.xlu1 %v14225_v24, %s12144_s21  ;;  %v17279_v41 = vrot.slane %v14471_v62, 4 }
 0x4ab   :  { %4860 = vrot.lane.b32.xlu0 %v14126_v35, %s12141_s27  ;;  %6741 = vmatprep.subr.bf16.mxu0 %v10936_v27  ;;  %v5690_v35 = vsel %vm17251_vm0, %v5679_v40, %v5680_v39 }
 0x4ac   :  { %6702 = vmatprep.subr.bf16.mxu1 %v10966_v1  ;;  %v14642_v6 = vpop.permute.xlu1 %5742  ;;  %6742 = vmatpush1.bf16.msra.mxu0 %v10935_v31  ;;  %v5691_v19 = vsel %vm251_vm9, %v14534_v51, %v5690_v35 }
 0x4ad   :  { %6703 = vmatpush1.bf16.msra.mxu1 %v10965_v30  ;;  %v14644_v48 = vpop.permute.xlu0 %5112  ;;  %v5757_v59 = vrot.slane %v14642_v6, 4 }
 0x4ae   :  { %v5126_v0 = vrot.slane %v14644_v48, 4  ;;  %4954 = vrot.lane.b32.xlu1 %v14187_v42, %s12127_s23 }
 0x4af   :  { %4862 = vrot.lane.b32.xlu0 %v14225_v24, %s12141_s27  ;;  %v5767_v30 = vsel %vm17251_vm0, %v5756_v17, %v5757_v59 }
 0x4b0   :  { %10980 = vmatmul.mubr.msk.bf16.vlgmr.msra.gmra.mrb[32].mxu1 %vm485_vm13, %v14407_v34  ;;  %v14662_v1 = vpop.permute.xlu1 %5819  ;;  %v5768_v40 = vsel %vm407_vm11, %v14554_v33, %v5767_v30  ;;  %v5137_v24 = vsel %vm17251_vm0, %v17279_v41, %v5126_v0 }
 0x4b1   :  { %v5190_v37 = vpop.permute.xlu0 %5189  ;;  %6810 = vmatprep.mubr.bf16.mxu1 %v14417_v22  ;;  %v17217_v55 = vrot.slane %v14662_v1, 4  ;;  %v10951_v31 = vcombine.low %v5691_v19, %v5768_v40  ;;  %v10952_v17 = vcombine.high %v5691_v19, %v5768_v40  ;;  %v5138_v35 = vsel %vm17255_vm8, %v14471_v62, %v5137_v24 }
 0x4b2   :  { %v5203_v4 = vrot.slane %v5190_v37, 4  ;;  %5031 = vrot.lane.b32.xlu1 %v14187_v42, %s12129_s15  ;;  %v17280_v42 = vrot.slane %v14576_v58, 4 }
 0x4b3   :  { %4956 = vrot.lane.b32.xlu0 %v14207_v3, %s12127_s23  ;;  %6743 = vmatprep.subr.bf16.mxu0 %v10952_v17 }
 0x4b4   :  { %v5214_v51 = vsel %vm17251_vm0, %v5202_v63, %v5203_v4  ;;  %v14680_v33 = vpop.permute.xlu1 %5896  ;;  %6744 = vmatpush1.bf16.msra.mxu0 %v10951_v31  ;;  %v5844_v19 = vsel %vm17251_vm0, %v17280_v42, %v17217_v55 }
 0x4b5   :  { %v14682_v27 = vpop.permute.xlu0 %5266  ;;  %v5215_v30 = vsel %vm17250_vm14, %v14485_v45, %v5214_v51  ;;  %v17214_v40 = vrot.slane %v14680_v33, 4  ;;  %v5845_v17 = vsel %vm17255_vm8, %v14576_v58, %v5844_v19  ;;  %v17282_v58 = vrot.slane %v14532_v54, 4 }
 0x4b6   :  { %v5280_v63 = vrot.slane %v14682_v27, 4  ;;  %v10889_v41 = vcombine.low %v5138_v35, %v5215_v30  ;;  %v10890_v31 = vcombine.high %v5138_v35, %v5215_v30  ;;  %4245 = vrot.lane.b32.xlu1 %v14251_v9, %s12127_s23  ;;  %v17281_v35 = vrot.slane %v14511_v46, 4 }
 0x4b7   :  { %5033 = vrot.lane.b32.xlu0 %v14207_v3, %s12129_s15  ;;  %v5921_v62 = vsel %vm17251_vm0, %v5910_v26, %v17214_v40 }
 0x4b8   :  { %6778 = vmatprep.subr.bf16.mxu1 %v10890_v31  ;;  %v14702_v45 = vpop.permute.xlu1 %5114  ;;  %v5922_v51 = vsel %vm17250_vm14, %v14600_v28, %v5921_v62  ;;  %v5291_v3 = vsel %vm17251_vm0, %v17281_v35, %v5280_v63 }
 0x4b9   :  { %6779 = vmatpush1.bf16.msra.mxu1 %v10889_v41  ;;  %v14704_v24 = vpop.permute.xlu0 %5343  ;;  %v17215_v30 = vrot.slane %v14702_v45, 4  ;;  %v10967_v26 = vcombine.low %v5845_v17, %v5922_v51  ;;  %v10968_v31 = vcombine.high %v5845_v17, %v5922_v51  ;;  %v5292_v62 = vsel %vm875_vm4, %v14511_v46, %v5291_v3 }
 0x4ba   :  { %v5357_v42 = vrot.slane %v14704_v24, 4  ;;  %4322 = vrot.lane.b32.xlu1 %v14251_v9, %s12129_s15 }
 0x4bb   :  { %4399 = vrot.lane.b32.xlu0 %v14251_v9, %s12143_s1  ;;  %6745 = vmatprep.subr.bf16.mxu0 %v10968_v31  ;;  %v5139_v51 = vsel %vm17251_vm0, %v5126_v0, %v17215_v30 }
 0x4bc   :  { %v5368_v28 = vsel %vm17251_vm0, %v17282_v58, %v5357_v42  ;;  %v14722_v19 = vpop.permute.xlu1 %5191  ;;  %6746 = vmatpush1.bf16.msra.mxu0 %v10967_v26  ;;  %v5140_v3 = vsel %vm17255_vm8, %v14644_v48, %v5139_v51  ;;  %v17284_v48 = vrot.slane %v14574_v38, 4 }
 0x4bd   :  { %v14724_v41 = vpop.permute.xlu0 %5420  ;;  %v5369_v17 = vsel %vm1031_vm6, %v14532_v54, %v5368_v28  ;;  %v17216_v35 = vrot.slane %v14722_v19, 4  ;;  %v17283_v28 = vrot.slane %v14552_v16, 4 }
 0x4be   :  { %v5434_v31 = vrot.slane %v14724_v41, 4  ;;  %v10905_v58 = vcombine.low %v5292_v62, %v5369_v17  ;;  %v10906_v40 = vcombine.high %v5292_v62, %v5369_v17  ;;  %4477 = vrot.lane.b32.xlu1 %v14251_v9, %s12142_s0 }
 0x4bf   :  { %4555 = vrot.lane.b32.xlu0 %v14251_v9, %s12137_s18  ;;  %10981 = vmatmul.mubr.msk.bf16.vlgmr.msra.gmra.mrb[36].mxu0 %vm485_vm13, %v14407_v34  ;;  %v5216_v46 = vsel %vm17251_vm0, %v5203_v4, %v17216_v35 }
 0x4c0   :  { %6780 = vmatprep.subr.bf16.mxu1 %v10906_v40  ;;  %v14744_v54 = vpop.permute.xlu1 %5268  ;;  %v5217_v26 = vsel %vm17250_vm14, %v5190_v37, %v5216_v46  ;;  %v5445_v62 = vsel %vm17251_vm0, %v17283_v28, %v5434_v31  ;;  %6853 = vmatprep.mubr.bf16.mxu0 %v14417_v22 }
 0x4c1   :  { %6781 = vmatpush1.bf16.msra.mxu1 %v10905_v58  ;;  %v5498_v0 = vpop.permute.xlu0 %5497  ;;  %v5281_v40 = vrot.slane %v14744_v54, 4  ;;  %v10891_v30 = vcombine.low %v5140_v3, %v5217_v26  ;;  %v10892_v4 = vcombine.high %v5140_v3, %v5217_v26  ;;  %v5446_v46 = vsel %vm1187_vm2, %v14552_v16, %v5445_v62 }
 0x4c2   :  { %v5511_v17 = vrot.slane %v5498_v0, 4  ;;  %4632 = vrot.lane.b32.xlu1 %v14251_v9, %s12139_s19 }
 0x4c3   :  { %4709 = vrot.lane.b32.xlu0 %v14251_v9, %s12120_s28  ;;  %6821 = vmatprep.subr.bf16.mxu0 %v10892_v4  ;;  %v5293_v26 = vsel %vm17251_vm0, %v5280_v63, %v5281_v40 }
 0x4c4   :  { %v5522_v37 = vsel %vm17251_vm0, %v17284_v48, %v5511_v17  ;;  %v14761_v51 = vpop.permute.xlu1 %5345  ;;  %6822 = vmatpush1.bf16.msra.mxu0 %v10891_v30  ;;  %v5294_v48 = vsel %vm875_vm4, %v14682_v27, %v5293_v26 }
 0x4c5   :  { %v5575_v58 = vpop.permute.xlu0 %5574  ;;  %v5523_v3 = vsel %vm4806_vm15, %v14574_v38, %v5522_v37  ;;  %v5358_v28 = vrot.slane %v14761_v51, 4 }
 0x4c6   :  { %v5588_v4 = vrot.slane %v5575_v58, 4  ;;  %v10921_v35 = vcombine.low %v5446_v46, %v5523_v3  ;;  %v10922_v55 = vcombine.high %v5446_v46, %v5523_v3  ;;  %4786 = vrot.lane.b32.xlu1 %v14251_v9, %s12144_s21 }
 0x4c7   :  { %4864 = vrot.lane.b32.xlu0 %v14251_v9, %s12141_s27  ;;  %v5370_v38 = vsel %vm17251_vm0, %v5357_v42, %v5358_v28 }
 0x4c8   :  { %6782 = vmatprep.subr.bf16.mxu1 %v10922_v55  ;;  %v5599_v16 = vsel %vm17251_vm0, %v5587_v50, %v5588_v4  ;;  %v14781_v63 = vpop.permute.xlu1 %5422  ;;  %v5371_v55 = vsel %vm1031_vm6, %v14704_v24, %v5370_v38 }
 0x4c9   :  { %6783 = vmatpush1.bf16.msra.mxu1 %v10921_v35  ;;  %v14783_v30 = vpop.permute.xlu0 %5667  ;;  %v5600_v62 = vsel %vm4884_vm1, %v14598_v60, %v5599_v16  ;;  %v5435_v50 = vrot.slane %v14781_v63, 4  ;;  %v10907_v60 = vcombine.low %v5294_v48, %v5371_v55  ;;  %v10908_v35 = vcombine.high %v5294_v48, %v5371_v55 }
 0x4ca   :  { %v5681_v37 = vrot.slane %v14783_v30, 4  ;;  %v10937_v42 = vcombine.low %v5600_v62, %v14251_v9  ;;  %v10938_v46 = vcombine.high %v5600_v62, %v14251_v9  ;;  %4324 = vrot.lane.b32.xlu1 %v14325_v56, %s12129_s15 }
 0x4cb   :  { %4247 = vrot.lane.b32.xlu0 %v14325_v56, %s12127_s23  ;;  %6823 = vmatprep.subr.bf16.mxu0 %v10908_v35  ;;  %v5447_v16 = vsel %vm17251_vm0, %v5434_v31, %v5435_v50 }
 0x4cc   :  { %6784 = vmatprep.subr.bf16.mxu1 %v10938_v46  ;;  %v14799_v27 = vpop.permute.xlu1 %5499  ;;  %6824 = vmatpush1.bf16.msra.mxu0 %v10907_v60  ;;  %v5692_v9 = vsel %vm17251_vm0, %v5680_v39, %v5681_v37 }
 0x4cd   :  { %6785 = vmatpush1.bf16.msra.mxu1 %v10937_v42  ;;  %v5745_v24 = vpop.permute.xlu0 %5744  ;;  %v5512_v3 = vrot.slane %v14799_v27, 4  ;;  %v5693_v31 = vsel %vm251_vm9, %v14625_v14, %v5692_v9  ;;  %v5448_v42 = vsel %vm1187_vm2, %v14724_v41, %v5447_v16 }
 0x4ce   :  { %v5758_v26 = vrot.slane %v5745_v24, 4  ;;  %4479 = vrot.lane.b32.xlu1 %v14325_v56, %s12142_s0 }
 0x4cf   :  { %4401 = vrot.lane.b32.xlu0 %v14325_v56, %s12143_s1  ;;  %v5524_v62 = vsel %vm17251_vm0, %v5511_v17, %v5512_v3 }
 0x4d0   :  { %v5769_v38 = vsel %vm17251_vm0, %v5757_v59, %v5758_v26  ;;  %v14818_v48 = vpop.permute.xlu1 %5576  ;;  %v5525_v46 = vsel %vm4806_vm15, %v5498_v0, %v5524_v62 }
 0x4d1   :  { %v14820_v39 = vpop.permute.xlu0 %5821  ;;  %v5770_v55 = vsel %vm407_vm11, %v14642_v6, %v5769_v38  ;;  %v17218_v59 = vrot.slane %v14818_v48, 4  ;;  %v10923_v14 = vcombine.low %v5448_v42, %v5525_v46  ;;  %v10924_v9 = vcombine.high %v5448_v42, %v5525_v46 }
 0x4d2   :  { %v5835_v60 = vrot.slane %v14820_v39, 4  ;;  %v10953_v17 = vcombine.low %v5693_v31, %v5770_v55  ;;  %v10954_v35 = vcombine.high %v5693_v31, %v5770_v55  ;;  %4634 = vrot.lane.b32.xlu1 %v14325_v56, %s12139_s19  ;;  %v17285_v38 = vrot.slane %v14662_v1, 4 }
 0x4d3   :  { %4557 = vrot.lane.b32.xlu0 %v14325_v56, %s12137_s18  ;;  %v5601_v6 = vsel %vm17251_vm0, %v5588_v4, %v17218_v59  ;;  %6825 = vmatprep.subr.bf16.mxu0 %v10924_v9 }
 0x4d4   :  { %6786 = vmatprep.subr.bf16.mxu1 %v10954_v35  ;;  %v14838_v41 = vpop.permute.xlu1 %5669  ;;  %v5602_v16 = vsel %vm4884_vm1, %v5575_v58, %v5601_v6  ;;  %v5846_v62 = vsel %vm17251_vm0, %v17285_v38, %v5835_v60  ;;  %6826 = vmatpush1.bf16.msra.mxu0 %v10923_v14  ;;  %v17286_v58 = vrot.slane %v14680_v33, 4 }
 0x4d5   :  { %6787 = vmatpush1.bf16.msra.mxu1 %v10953_v17  ;;  %v14840_v0 = vpop.permute.xlu0 %5898  ;;  %v5682_v31 = vrot.slane %v14838_v41, 4  ;;  %v10939_v42 = vcombine.low %v5602_v16, %v14325_v56  ;;  %v10940_v4 = vcombine.high %v5602_v16, %v14325_v56  ;;  %v5847_v14 = vsel %vm17255_vm8, %v14662_v1, %v5846_v62 }
 0x4d6   :  { %v5912_v55 = vrot.slane %v14840_v0, 4  ;;  %4788 = vrot.lane.b32.xlu1 %v14325_v56, %s12144_s21 }
 0x4d7   :  { %4711 = vrot.lane.b32.xlu0 %v14325_v56, %s12120_s28  ;;  %6827 = vmatprep.subr.bf16.mxu0 %v10940_v4  ;;  %v5694_v6 = vsel %vm17251_vm0, %v5681_v37, %v5682_v31  ;;  %v4936_v4 = vld [vmem:[#allocation5 + $0x24] sm:$0xff] }
 0x4d8   :  { %v5923_v46 = vsel %vm17251_vm0, %v17286_v58, %v5912_v55  ;;  %v14857_v17 = vpop.permute.xlu1 %5746  ;;  %6828 = vmatpush1.bf16.msra.mxu0 %v10939_v42  ;;  %v5695_v62 = vsel %vm251_vm9, %v14783_v30, %v5694_v6  ;;  %v17288_v30 = vrot.slane %v14722_v19, 4 }
 0x4d9   :  { %v14859_v35 = vpop.permute.xlu0 %5116  ;;  %v5924_v9 = vsel %vm17250_vm14, %v14680_v33, %v5923_v46  ;;  %v17219_v16 = vrot.slane %v14857_v17, 4  ;;  %v17287_v46 = vrot.slane %v14702_v45, 4 }
 0x4da   :  { %v5128_v38 = vrot.slane %v14859_v35, 4  ;;  %v10969_v58 = vcombine.low %v5847_v14, %v5924_v9  ;;  %v10970_v59 = vcombine.high %v5847_v14, %v5924_v9  ;;  %4958 = vrot.lane.b32.xlu1 %v4936_v4, %s12127_s23  ;;  %v4937_v9 = vld [vmem:[#allocation5 + $0x2c] sm:$0xff] }
 0x4db   :  { %4866 = vrot.lane.b32.xlu0 %v14325_v56, %s12141_s27  ;;  %v5771_v1 = vsel %vm17251_vm0, %v5758_v26, %v17219_v16 }
 0x4dc   :  { %6788 = vmatprep.subr.bf16.mxu1 %v10970_v59  ;;  %v14876_v33 = vpop.permute.xlu1 %5823  ;;  %v5772_v42 = vsel %vm407_vm11, %v5745_v24, %v5771_v1  ;;  %v5141_v14 = vsel %vm17251_vm0, %v17287_v46, %v5128_v38 }
 0x4dd   :  { %6789 = vmatpush1.bf16.msra.mxu1 %v10969_v58  ;;  %v14878_v37 = vpop.permute.xlu0 %5193  ;;  %v17228_v56 = vrot.slane %v14876_v33, 4  ;;  %v10955_v26 = vcombine.low %v5695_v62, %v5772_v42  ;;  %v10956_v16 = vcombine.high %v5695_v62, %v5772_v42  ;;  %v5142_v1 = vsel %vm17255_vm8, %v14702_v45, %v5141_v14 }
 0x4de   :  { %v5205_v59 = vrot.slane %v14878_v37, 4  ;;  %5035 = vrot.lane.b32.xlu1 %v4936_v4, %s12129_s15 }
 0x4df   :  { %4960 = vrot.lane.b32.xlu0 %v4937_v9, %s12127_s23  ;;  %6829 = vmatprep.subr.bf16.mxu0 %v10956_v16  ;;  %v5848_v62 = vsel %vm17251_vm0, %v5835_v60, %v17228_v56 }
 0x4e0   :  { %10982 = vmatmul.mubr.msk.bf16.vlgmr.msra.gmra.mrb[36].mxu1 %vm485_vm13, %v14407_v34  ;;  %v5218_v24 = vsel %vm17251_vm0, %v17288_v30, %v5205_v59  ;;  %v14895_v6 = vpop.permute.xlu1 %5900  ;;  %6830 = vmatpush1.bf16.msra.mxu0 %v10955_v26  ;;  %v5849_v14 = vsel %vm17255_vm8, %v14820_v39, %v5848_v62 }
 0x4e1   :  { %v14897_v58 = vpop.permute.xlu0 %5270  ;;  %v5219_v4 = vsel %vm17250_vm14, %v14722_v19, %v5218_v24  ;;  %6896 = vmatprep.mubr.bf16.mxu1 %v14417_v22  ;;  %v17223_v16 = vrot.slane %v14895_v6, 4 }
 0x4e2   :  { %v5282_v42 = vrot.slane %v14897_v58, 4  ;;  %v10893_v46 = vcombine.low %v5142_v1, %v5219_v4  ;;  %v10894_v26 = vcombine.high %v5142_v1, %v5219_v4  ;;  %4249 = vrot.lane.b32.xlu1 %v14362_v61, %s12127_s23 }
 0x4e3   :  { %5037 = vrot.lane.b32.xlu0 %v4937_v9, %s12129_s15  ;;  %v5925_v45 = vsel %vm17251_vm0, %v5912_v55, %v17223_v16 }
 0x4e4   :  { %6864 = vmatprep.subr.bf16.mxu1 %v10894_v26  ;;  %v14915_v19 = vpop.permute.xlu1 %5118  ;;  %v5926_v30 = vsel %vm17250_vm14, %v14840_v0, %v5925_v45  ;;  %v5295_v9 = vsel %vm17251_vm0, %v5281_v40, %v5282_v42 }
 0x4e5   :  { %6865 = vmatpush1.bf16.msra.mxu1 %v10893_v46  ;;  %v14917_v60 = vpop.permute.xlu0 %5347  ;;  %v17225_v24 = vrot.slane %v14915_v19, 4  ;;  %v10971_v1 = vcombine.low %v5849_v14, %v5926_v30  ;;  %v10972_v4 = vcombine.high %v5849_v14, %v5926_v30  ;;  %v5296_v62 = vsel %vm875_vm4, %v14744_v54, %v5295_v9 }
 0x4e6   :  { %v5359_v55 = vrot.slane %v14917_v60, 4  ;;  %4326 = vrot.lane.b32.xlu1 %v14362_v61, %s12129_s15 }
 0x4e7   :  { %4251 = vrot.lane.b32.xlu0 %v14460_v25, %s12127_s23  ;;  %6831 = vmatprep.subr.bf16.mxu0 %v10972_v4  ;;  %v5143_v26 = vsel %vm17251_vm0, %v5128_v38, %v17225_v24  ;;  %v14969_v4 = vld [vmem:[#allocation5 + $0x30] sm:$0xff] }
 0x4e8   :  { %v5372_v39 = vsel %vm17251_vm0, %v5358_v28, %v5359_v55  ;;  %v14937_v0 = vpop.permute.xlu1 %5195  ;;  %6832 = vmatpush1.bf16.msra.mxu0 %v10971_v1  ;;  %v5144_v9 = vsel %vm17255_vm8, %v14859_v35, %v5143_v26 }
 0x4e9   :  { %v14939_v40 = vpop.permute.xlu0 %5424  ;;  %v5373_v46 = vsel %vm1031_vm6, %v14761_v51, %v5372_v39  ;;  %v17227_v45 = vrot.slane %v14937_v0, 4 }
 0x4ea   :  { %v5436_v14 = vrot.slane %v14939_v40, 4  ;;  %v10909_v28 = vcombine.low %v5296_v62, %v5373_v46  ;;  %v10910_v30 = vcombine.high %v5296_v62, %v5373_v46  ;;  %4328 = vrot.lane.b32.xlu1 %v14460_v25, %s12129_s15 }
 0x4eb   :  { %4403 = vrot.lane.b32.xlu0 %v14362_v61, %s12143_s1  ;;  %10983 = vmatmul.mubr.msk.bf16.vlgmr.msra.gmra.mrb[40].mxu0 %vm485_vm13, %v14407_v34  ;;  %v5220_v54 = vsel %vm17251_vm0, %v5205_v59, %v17227_v45 }
 0x4ec   :  { %6866 = vmatprep.subr.bf16.mxu1 %v10910_v30  ;;  %v14959_v51 = vpop.permute.xlu1 %5272  ;;  %v5221_v1 = vsel %vm17250_vm14, %v14878_v37, %v5220_v54  ;;  %6939 = vmatprep.mubr.bf16.mxu0 %v14417_v22  ;;  %v5449_v59 = vsel %vm17251_vm0, %v5435_v50, %v5436_v14 }
 0x4ed   :  { %6867 = vmatpush1.bf16.msra.mxu1 %v10909_v28  ;;  %v14961_v38 = vpop.permute.xlu0 %5501  ;;  %v10895_v39 = vcombine.low %v5144_v9, %v5221_v1  ;;  %v17221_v62 = vrot.slane %v14959_v51, 4  ;;  %v10896_v22 = vcombine.high %v5144_v9, %v5221_v1  ;;  %v5450_v50 = vsel %vm1187_vm2, %v14781_v63, %v5449_v59 }
 0x4ee   :  { %v5513_v61 = vrot.slane %v14961_v38, 4  ;;  %4481 = vrot.lane.b32.xlu1 %v14969_v4, %s12142_s0 }
 0x4ef   :  { %4405 = vrot.lane.b32.xlu0 %v14460_v25, %s12143_s1  ;;  %6907 = vmatprep.subr.bf16.mxu0 %v10896_v22  ;;  %v5297_v63 = vsel %vm17251_vm0, %v5282_v42, %v17221_v62 }
 0x4f0   :  { %v5526_v35 = vsel %vm17251_vm0, %v5512_v3, %v5513_v61  ;;  %v14984_v37 = vpop.permute.xlu1 %5349  ;;  %6908 = vmatpush1.bf16.msra.mxu0 %v10895_v39  ;;  %v11641_v39 = vunpack.i.h.bf16 %v13928_v23 }
 0x4f1   :  { %v14986_v46 = vpop.permute.xlu0 %5578  ;;  %v5527_v26 = vsel %vm4806_vm15, %v14799_v27, %v5526_v35  ;;  %v17222_v28 = vrot.slane %v14984_v37, 4  ;;  %v17289_v27 = vrot.slane %v14818_v48, 4 }
 0x4f2   :  { %v5590_v30 = vrot.slane %v14986_v46, 4  ;;  %v10925_v54 = vcombine.low %v5450_v50, %v5527_v26  ;;  %v10926_v9 = vcombine.high %v5450_v50, %v5527_v26  ;;  %4483 = vrot.lane.b32.xlu1 %v14460_v25, %s12142_s0  ;;  %v11640_v50 = vunpack.i.l.bf16 %v13928_v23 }
 0x4f3   :  { %4559 = vrot.lane.b32.xlu0 %v14969_v4, %s12137_s18  ;;  %v5374_v1 = vsel %vm17251_vm0, %v5359_v55, %v17222_v28  ;;  %v5298_v55 = vsel %vm875_vm4, %v14897_v58, %v5297_v63 }
 0x4f4   :  { %6868 = vmatprep.subr.bf16.mxu1 %v10926_v9  ;;  %v5603_v3 = vsel %vm17251_vm0, %v17289_v27, %v5590_v30  ;;  %v15010_v59 = vpop.permute.xlu1 %5426  ;;  %v5375_v42 = vsel %vm1031_vm6, %v14917_v60, %v5374_v1  ;;  %v5684_v1 = vrot.slane %v11640_v50, 4 }
 0x4f5   :  { %6869 = vmatpush1.bf16.msra.mxu1 %v10925_v54  ;;  %v15012_v22 = vpop.permute.xlu0 %4395  ;;  %v5604_v35 = vsel %vm4884_vm1, %v14818_v48, %v5603_v3  ;;  %v17220_v26 = vrot.slane %v15010_v59, 4  ;;  %v10911_v54 = vcombine.low %v5298_v55, %v5375_v42  ;;  %v10912_v27 = vcombine.high %v5298_v55, %v5375_v42 }
 0x4f6   :  { %v10941_v9 = vcombine.low %v5604_v35, %v14969_v4  ;;  %4636 = vrot.lane.b32.xlu1 %v14969_v4, %s12139_s19  ;;  %v10942_v48 = vcombine.high %v5604_v35, %v14969_v4  ;;  %v5685_v3 = vrot.slane %v11641_v39, 4  ;;  %v11646_v35 = vunpack.i.h.bf16 %v13936_v5 }
 0x4f7   :  { %4561 = vrot.lane.b32.xlu0 %v14460_v25, %s12137_s18  ;;  %6909 = vmatprep.subr.bf16.mxu0 %v10912_v27  ;;  %v5451_v63 = vsel %vm17251_vm0, %v5436_v14, %v17220_v26  ;;  %v11645_v42 = vunpack.i.l.bf16 %v13936_v5  ;;  %v5361_v5 = vrot.slane %v13954_v53, 4  ;;  %v17291_v53 = vrot.slane %v14876_v33, 4 }
 0x4f8   :  { %6870 = vmatprep.subr.bf16.mxu1 %v10942_v48  ;;  %v15028_v23 = vpop.permute.xlu1 %5503  ;;  %6910 = vmatpush1.bf16.msra.mxu0 %v10911_v54  ;;  %v5452_v14 = vsel %vm1187_vm2, %v14939_v40, %v5451_v63  ;;  %v5700_v62 = vsel %vm17251_vm0, %v5684_v1, %v5685_v3  ;;  %v5762_v28 = vrot.slane %v11646_v35, 4  ;;  %v11651_v35 = vunpack.i.h.bf16 %v13946_v36 }
 0x4f9   :  { %v15030_v60 = vpop.permute.xlu0 %4397  ;;  %v17224_v58 = vrot.slane %v15028_v23, 4  ;;  %6871 = vmatpush1.bf16.msra.mxu1 %v10941_v9  ;;  %v5761_v16 = vrot.slane %v11645_v42, 4 }
 0x4fa   :  { %4638 = vrot.lane.b32.xlu1 %v14460_v25, %s12139_s19 }
 0x4fb   :  { %4713 = vrot.lane.b32.xlu0 %v14969_v4, %s12120_s28  ;;  %v5528_v39 = vsel %vm17251_vm0, %v5513_v61, %v17224_v58 }
 0x4fc   :  { %v15047_v9 = vpop.permute.xlu1 %5580  ;;  %v5529_v48 = vsel %vm4806_vm15, %v14961_v38, %v5528_v39 }
 0x4fd   :  { %v5672_v55 = vpop.permute.xlu0 %5671  ;;  %v17226_v54 = vrot.slane %v15047_v9, 4  ;;  %v10927_v26 = vcombine.low %v5452_v14, %v5529_v48  ;;  %v10928_v40 = vcombine.high %v5452_v14, %v5529_v48  ;;  %v15074_v48 = vsel %vm251_vm9, %v11640_v50, %v5700_v62 }
 0x4fe   :  { %v5683_v27 = vrot.slane %v5672_v55, 4  ;;  %4790 = vrot.lane.b32.xlu1 %v14969_v4, %s12144_s21  ;;  %v17230_v50 = vunpack.i.l.bf16 %v13950_v43 }
 0x4ff   :  { %4715 = vrot.lane.b32.xlu0 %v14460_v25, %s12120_s28  ;;  %v5605_v3 = vsel %vm17251_vm0, %v5590_v30, %v17226_v54  ;;  %6911 = vmatprep.subr.bf16.mxu0 %v10928_v40  ;;  %v17231_v40 = vunpack.i.l.bf16 %v13946_v36  ;;  %v11656_v54 = vunpack.i.h.bf16 %v13950_v43 }
 0x500   :  { %v15069_v58 = vpop.permute.xlu1 %4318  ;;  %v5606_v14 = vsel %vm4884_vm1, %v14986_v46, %v5605_v3  ;;  %v5698_v63 = vsel %vm17251_vm0, %v5683_v27, %v5684_v1  ;;  %6912 = vmatpush1.bf16.msra.mxu0 %v10927_v26  ;;  %v5696_v39 = vsel %vm17251_vm0, %v5682_v31, %v5683_v27  ;;  %v5777_v46 = vsel %vm17251_vm0, %v5761_v16, %v5762_v28 }
 0x501   :  { %v5749_v24 = vpop.permute.xlu0 %5748  ;;  %v10943_v30 = vcombine.low %v5606_v14, %v14460_v25  ;;  %v10944_v62 = vcombine.high %v5606_v14, %v14460_v25  ;;  %v17229_v26 = vrot.slane %v14373_v8, 4  ;;  %v17290_v1 = vrot.slane %v14857_v17, 4 }
 0x502   :  { %v5760_v38 = vrot.slane %v5749_v24, 4  ;;  %4792 = vrot.lane.b32.xlu1 %v14460_v25, %s12144_s21  ;;  %v5699_v3 = vsel %vm251_vm9, %v5672_v55, %v5698_v63  ;;  %v5697_v28 = vsel %vm251_vm9, %v14838_v41, %v5696_v39  ;;  %v5130_v63 = vrot.slane %v11651_v35, 4 }
 0x503   :  { %4868 = vrot.lane.b32.xlu0 %v14969_v4, %s12141_s27  ;;  %6913 = vmatprep.subr.bf16.mxu0 %v10944_v62  ;;  %v15109_v41 = vsel %vm407_vm11, %v11645_v42, %v5777_v46  ;;  %v5207_v39 = vrot.slane %v11656_v54, 4 }
 0x504   :  { %v5775_v31 = vsel %vm17251_vm0, %v5760_v38, %v5761_v16  ;;  %v5773_v27 = vsel %vm17251_vm0, %v17290_v1, %v5760_v38  ;;  %v15097_v4 = vpop.permute.xlu1 %4320  ;;  %v4255_v16 = vrot.slane %v14205_v47, 4  ;;  %6914 = vmatpush1.bf16.msra.mxu0 %v10943_v30  ;;  %v4938_v38 = vld [vmem:[#allocation5 + $0x34] sm:$0xff]  ;;  %v17233_v30 = vrot.slane %v14379_v29, 4 }
 0x505   :  { %v5776_v61 = vsel %vm407_vm11, %v5749_v24, %v5775_v31  ;;  %v5826_v25 = vpop.permute.xlu0 %5825  ;;  %v5774_v14 = vsel %vm407_vm11, %v14857_v17, %v5773_v27  ;;  %v4845_v1 = vld [vmem:[#allocation5 + $0x38] sm:$0xff]  ;;  %v15113_v17 = vrot.slane %v17231_v40, 4  ;;  %v15121_v31 = vrot.slane %v17230_v50, 4  ;;  %v4227_v50 = vld [vmem:[#allocation5 + $0x40] sm:$0xf] }
 0x506   :  { %v10959_v45 = vcombine.low %v5699_v3, %v5776_v61  ;;  %v5837_v56 = vrot.slane %v5826_v25, 4  ;;  %v10957_v55 = vcombine.low %v5697_v28, %v5774_v14  ;;  %4962 = vrot.lane.b32.xlu1 %v4938_v38, %s12127_s23  ;;  %v10958_v24 = vcombine.high %v5697_v28, %v5774_v14  ;;  %v4939_v14 = vld [vmem:[#allocation5 + $0x3c] sm:$0xff] }
 0x507   :  { %4870 = vrot.lane.b32.xlu0 %v4845_v1, %s12141_s27  ;;  %v10960_v62 = vcombine.high %v5699_v3, %v5776_v61  ;;  %v4264_v35 = vsel %vm17251_vm0, %v4255_v16, %v17229_v26  ;;  %v4332_v61 = vrot.slane %v14213_v49, 4  ;;  %v17232_v27 = vrot.slane %v14393_v20, 4 }
 0x508   :  { %6872 = vmatprep.subr.bf16.mxu1 %v10958_v24  ;;  %v15126_v46 = vpop.permute.xlu1 %4473  ;;  %v5852_v3 = vsel %vm17251_vm0, %v5837_v56, %v15113_v17  ;;  %v5850_v16 = vsel %vm17251_vm0, %v17291_v53, %v5837_v56  ;;  %v4409_v24 = vrot.slane %v14223_v7, 4  ;;  %v17294_v40 = vrot.slane %v14895_v6, 4 }
 0x509   :  { %6915 = vmatprep.subr.bf16.mxu0 %v10960_v62  ;;  %v5903_v54 = vpop.permute.xlu0 %5902  ;;  %6873 = vmatpush1.bf16.msra.mxu1 %v10957_v55  ;;  %v17292_v62 = vrot.slane %v14937_v0, 4  ;;  %v17293_v55 = vrot.slane %v14915_v19, 4 }
 0x50a   :  { %6916 = vmatpush1.bf16.msra.mxu0 %v10959_v45  ;;  %v5914_v28 = vrot.slane %v5903_v54, 4  ;;  %5039 = vrot.lane.b32.xlu1 %v4938_v38, %s12129_s15  ;;  %v15143_v45 = vsel %vm251_vm9, %v14205_v47, %v4264_v35  ;;  %v4341_v38 = vsel %vm17251_vm0, %v4332_v61, %v17233_v30  ;;  %v17234_v61 = vrot.slane %v14413_v13, 4 }
 0x50b   :  { %v5222_v26 = vsel %vm17251_vm0, %v17292_v62, %v5207_v39  ;;  %4964 = vrot.lane.b32.xlu0 %v4939_v14, %s12127_s23  ;;  %v5145_v56 = vsel %vm17251_vm0, %v17293_v55, %v5130_v63  ;;  %v5853_v62 = vsel %vm17255_vm8, %v5826_v25, %v5852_v3  ;;  %v5851_v63 = vsel %vm17255_vm8, %v14876_v33, %v5850_v16  ;;  %v4203_v16 = vld [vmem:[#allocation5] sm:$0xff] }
 0x50c   :  { %v5929_v53 = vsel %vm17251_vm0, %v5914_v28, %v15121_v31  ;;  %v5927_v39 = vsel %vm17251_vm0, %v17294_v40, %v5914_v28  ;;  %v15158_v35 = vpop.permute.xlu1 %4475  ;;  %v5223_v40 = vsel %vm17250_vm14, %v14937_v0, %v5222_v26  ;;  %v4418_v25 = vsel %vm17251_vm0, %v4409_v24, %v17232_v27  ;;  %v17299_v27 = vld [vmem:[#allocation19_spill] sm:$0xff] }
 0x50d   :  { %v5930_v47 = vsel %vm17250_vm14, %v5903_v54, %v5929_v53  ;;  %v15160_v1 = vpop.permute.xlu0 %4551  ;;  %v5928_v55 = vsel %vm17250_vm14, %v14895_v6, %v5927_v39  ;;  %v17295_v54 = vrot.slane %v14984_v37, 4  ;;  %v4874_v0 = vrot.slane %v14243_v52, 4 }
 0x50e   :  { %v10975_v28 = vcombine.low %v5853_v62, %v5930_v47  ;;  %v10973_v42 = vcombine.low %v5851_v63, %v5928_v55  ;;  %4253 = vrot.lane.b32.xlu1 %v4227_v50, %s12127_s23  ;;  %v10974_v33 = vcombine.high %v5851_v63, %v5928_v55  ;;  %v10976_v6 = vcombine.high %v5853_v62, %v5930_v47  ;;  %v4381_v55 = vld [vmem:[#allocation5 + $0x40] sm:$0xf] }
 0x50f   :  { %v5376_v3 = vsel %vm17251_vm0, %v17295_v54, %v5361_v5  ;;  %5041 = vrot.lane.b32.xlu0 %v4939_v14, %s12129_s15  ;;  %v4565_v26 = vrot.slane %v14245_v12, 4  ;;  %v5146_v24 = vsel %vm17255_vm8, %v14915_v19, %v5145_v56  ;;  %v10989_v53 = vcombine.high %v4203_v16, %v15143_v45  ;;  %v4304_v54 = vld [vmem:[#allocation5 + $0x40] sm:$0xf] }
 0x510   :  { %v17296_v5 = vrot.slane %v13952_v21, 4  ;;  %v17297_v50 = vrot.slane %v14959_v51, 4  ;;  %6874 = vmatprep.subr.bf16.mxu1 %v10974_v33  ;;  %6917 = vmatprep.subr.bf16.mxu0 %v10976_v6  ;;  %v15188_v62 = vpop.permute.xlu1 %4628  ;;  %v10898_v63 = vcombine.high %v5146_v24, %v5223_v40  ;;  %v4420_v19 = vsel %vm17255_vm8, %v14223_v7, %v4418_v25 }
 0x511   :  { %v15190_v47 = vpop.permute.xlu0 %4553  ;;  %v4487_v56 = vrot.slane %v14233_v32, 4  ;;  %v5377_v21 = vsel %vm1031_vm6, %v14984_v37, %v5376_v3  ;;  %6875 = vmatpush1.bf16.msra.mxu1 %v10973_v42  ;;  %6918 = vmatpush1.bf16.msra.mxu0 %v10975_v28  ;;  %v10988_v33 = vcombine.low %v4203_v16, %v15143_v45  ;;  %v4342_v6 = vsel %vm407_vm11, %v14213_v49, %v4341_v38  ;;  %v17302_v42 = vld [vmem:[#allocation13_spill] sm:$0xff] }
 0x512   :  { %v5299_v14 = vsel %vm17251_vm0, %v17297_v50, %v17296_v5  ;;  %v17298_v5 = vld [vmem:[#allocation15_spill] sm:$0xff]  ;;  %v17300_v39 = vrot.slane %v13958_v11, 4  ;;  %v17301_v7 = vrot.slane %v15028_v23, 4  ;;  %6950 = vmatprep.subr.bf16.mxu1 %v10898_v63  ;;  %7569 = vmatprep.subr.bf16.mxu0 %v10989_v53  ;;  %v4574_v37 = vsel %vm17251_vm0, %v4565_v26, %v17234_v61  ;;  %v17303_v38 = vld [vmem:[#allocation17_spill] sm:$0xff]  ;;  %v17309_v61 = vld [vmem:[#allocation14_spill] sm:$0xff] }
 0x513   :  { %v4719_v45 = vrot.slane %v17302_v42, 4  ;;  %v10897_v28 = vcombine.low %v5146_v24, %v5223_v40  ;;  %v5300_v49 = vsel %vm875_vm4, %v14959_v51, %v5299_v14  ;;  %4407 = vrot.lane.b32.xlu1 %v4381_v55, %s12143_s1  ;;  %4330 = vrot.lane.b32.xlu0 %v4304_v54, %s12129_s15  ;;  %v11005_v11 = vcombine.high %v4342_v6, %v4420_v19  ;;  %v4537_v24 = vld [vmem:[#allocation5 + $0x40] sm:$0xf] }
 0x514   :  { %v5530_v25 = vsel %vm17251_vm0, %v17301_v7, %v17300_v39  ;;  %v17304_v16 = vrot.slane %v13956_v2, 4  ;;  %v17305_v53 = vrot.slane %v15010_v59, 4  ;;  %10984 = vmatmul.mubr.msk.bf16.vlgmr.msra.gmra.mrb[40].mxu1 %vm485_vm13, %v14407_v34  ;;  %10985 = vmatmul.mubr.msk.bf16.vlgmr.msra.gmra.mrb[44].mxu0 %vm485_vm13, %v14407_v34  ;;  %v15225_v51 = vpop.permute.xlu1 %4630  ;;  %v10914_v26 = vcombine.high %v5300_v49, %v5377_v21  ;;  %v4459_v14 = vld [vmem:[#allocation5 + $0x40] sm:$0xf] }
 0x515   :  { %17306 = vst [vmem:[#allocation15_spill] sm:$0xff] %v15225_v51  ;;  %v15227_v40 = vpop.permute.xlu0 %4705  ;;  %v17307_v63 = vrot.slane %v14400_v18, 4  ;;  %v17308_v55 = vld [vmem:[#allocation12_spill] sm:$0xff]  ;;  %v5531_v7 = vsel %vm4806_vm15, %v15028_v23, %v5530_v25  ;;  %6951 = vmatpush1.bf16.msra.mxu1 %v10897_v28  ;;  %7570 = vmatpush1.bf16.msra.mxu0 %v10988_v33  ;;  %v4797_v3 = vrot.slane %v17309_v61, 4  ;;  %v17310_v50 = vrot.slane %v13960_v57, 4 }
 0x516   :  { %v5453_v39 = vsel %vm17251_vm0, %v17305_v53, %v17304_v16  ;;  %v4642_v54 = vrot.slane %v17308_v55, 4  ;;  %v11004_v16 = vcombine.low %v4342_v6, %v4420_v19  ;;  %v4575_v53 = vsel %vm875_vm4, %v14245_v12, %v4574_v37  ;;  %6952 = vmatprep.subr.bf16.mxu1 %v10914_v26  ;;  %7571 = vmatprep.subr.bf16.mxu0 %v11005_v11  ;;  %v15263_v11 = vld [vmem:[#allocation5 + $0x40] sm:$0xff] }
 0x517   :  { %v4496_v2 = vsel %vm17251_vm0, %v4487_v56, %v17307_v63  ;;  %v17311_v30 = vrot.slane %v15047_v9, 4  ;;  %v17312_v56 = vrot.slane %v17299_v27, 4  ;;  %v17313_v33 = vrot.slane %v17298_v5, 4  ;;  %4563 = vrot.lane.b32.xlu1 %v4537_v24, %s12137_s18  ;;  %4485 = vrot.lane.b32.xlu0 %v4459_v14, %s12142_s0  ;;  %v17317_v26 = vld [vmem:[#allocation20_spill] sm:$0xff]  ;;  %s12147_s0 = smov 50  }
 0x518   :  { %v10913_v6 = vcombine.low %v5300_v49, %v5377_v21  ;;  %v5454_v12 = vsel %vm1187_vm2, %v15010_v59, %v5453_v39  ;;  %v4498_v57 = vsel %vm17250_vm14, %v14233_v32, %v4496_v2  ;;  %v15256_v25 = vpop.permute.xlu1 %4782  ;;  %v4614_v21 = vld [vmem:[#allocation5 + $0x40] sm:$0xf]  ;;  %v17315_v49 = vrot.slane %v17303_v38, 4  ;;  %6982 = vmatprep.mubr.bf16.mxu1 %v15263_v11  ;;  %7601 = vmatprep.mubr.bf16.mxu0 %v15263_v11 }
 0x519   :  { %v5607_v51 = vsel %vm17251_vm0, %v17311_v30, %v17310_v50  ;;  %v4728_v23 = vsel %vm17251_vm0, %v4719_v45, %v17312_v56  ;;  %v4883_v19 = vsel %vm17251_vm0, %v4874_v0, %v17313_v33  ;;  %v17314_v30 = vld [vmem:[#allocation11_spill] sm:$0xff]  ;;  %v15258_v37 = vpop.permute.xlu0 %4707  ;;  %v10930_v45 = vcombine.high %v5454_v12, %v5531_v7  ;;  %v4691_v0 = vld [vmem:[#allocation5 + $0x40] sm:$0xf]  ;;  %7572 = vmatpush1.bf16.msra.mxu0 %v11004_v16 }
 0x51a   :  { %v4796_v50 = vrot.slane %v17314_v30, 4  ;;  %v11021_v28 = vcombine.high %v4498_v57, %v4575_v53  ;;  %v4651_v59 = vsel %vm17251_vm0, %v4642_v54, %v17315_v49  ;;  %v17316_v32 = vrot.slane %v13965_v44, 4  ;;  %6953 = vmatpush1.bf16.msra.mxu1 %v10913_v6 }
 0x51b   :  { %v4968_v24 = vrot.slane %v17317_v26, 4  ;;  %v5608_v14 = vsel %vm4884_vm1, %v15047_v9, %v5607_v51  ;;  %v4729_v63 = vsel %vm1187_vm2, %v17302_v42, %v4728_v23  ;;  %v17318_v2 = vrot.slane %v13962_v15, 4  ;;  %6954 = vmatprep.subr.bf16.mxu1 %v10930_v45  ;;  %v17319_v9 = vld [vmem:[#allocation16_spill] sm:$0xff]  ;;  %4717 = vrot.lane.b32.xlu1 %v4691_v0, %s12120_s28  ;;  %v17321_v23 = vld [vmem:[#allocation22_spill] sm:$0xff]  ;;  %s12153_s28 = smov 97  }
 0x51c   :  { %v5931_v39 = vsel %vm17251_vm0, %v15121_v31, %v17316_v32  ;;  %7573 = vmatprep.subr.bf16.mxu0 %v11021_v28  ;;  %v4805_v44 = vsel %vm17251_vm0, %v4796_v50, %v4797_v3  ;;  %v4885_v31 = vsel %vm4884_vm1, %v14243_v52, %v4883_v19  ;;  %v4969_v51 = vrot.slane %v17319_v9, 4  ;;  %4640 = vrot.lane.b32.xlu0 %v4614_v21, %s12139_s19  ;;  %v15292_v6 = vpop.permute.xlu1 %4784 }
 0x51d   :  { %v5854_v54 = vsel %vm17251_vm0, %v15113_v17, %v17318_v2  ;;  %v10929_v16 = vcombine.low %v5454_v12, %v5531_v7  ;;  %v11020_v56 = vcombine.low %v4498_v57, %v4575_v53  ;;  %v4652_v15 = vsel %vm1031_vm6, %v17308_v55, %v4651_v59  ;;  %v17320_v17 = vld [vmem:[#allocation21_spill] sm:$0xff]  ;;  %v15294_v50 = vpop.permute.xlu0 %4860  ;;  %v4846_v7 = vld [vmem:[#allocation5 + $0x40] sm:$0xf]  ;;  %v17322_v57 = vld [vmem:[#allocation18_spill] sm:$0xff] }
 0x51e   :  { %v5045_v42 = vrot.slane %v17320_v17, 4  ;;  %v4257_v33 = vrot.slane %v17321_v23, 4  ;;  %v10946_v52 = vcombine.high %v5608_v14, %v15263_v11  ;;  %v11037_v19 = vcombine.high %v4652_v15, %v4729_v63  ;;  %v4768_v53 = vld [vmem:[#allocation5 + $0x40] sm:$0xf] }
 0x51f   :  { %v4977_v12 = vsel %vm17251_vm0, %v4968_v24, %v4969_v51  ;;  %6955 = vmatpush1.bf16.msra.mxu1 %v10929_v16  ;;  %7574 = vmatpush1.bf16.msra.mxu0 %v11020_v56  ;;  %v10962_v55 = vcombine.high %v15074_v48, %v15109_v41  ;;  %v5046_v45 = vrot.slane %v17322_v57, 4  ;;  %v4807_v28 = vsel %vm4806_vm15, %v17314_v30, %v4805_v44 }
 0x520   :  { %6956 = vmatprep.subr.bf16.mxu1 %v10946_v52  ;;  %7575 = vmatprep.subr.bf16.mxu0 %v11037_v19  ;;  %v17323_v0 = vunpack.i.l.bf16 %v13946_v36  ;;  %v17324_v49 = vunpack.i.l.bf16 %v13950_v43  ;;  %v10945_v32 = vcombine.low %v5608_v14, %v15263_v11  ;;  %v11036_v24 = vcombine.low %v4652_v15, %v4729_v63  ;;  %v15320_v43 = vpop.permute.xlu1 %4954  ;;  %v5017_v14 = vld [vmem:[#allocation5 + $0x44] sm:$0xf] }
 0x521   :  { %4872 = vrot.lane.b32.xlu1 %v4846_v7, %s12141_s27  ;;  %4794 = vrot.lane.b32.xlu0 %v4768_v53, %s12144_s21  ;;  %v11053_v2 = vcombine.high %v4807_v28, %v4885_v31  ;;  %v4978_v16 = vsel %vm251_vm9, %v17317_v26, %v4977_v12  ;;  %v5054_v36 = vsel %vm17251_vm0, %v5045_v42, %v5046_v45  ;;  %v4258_v30 = vrot.slane %v14627_v10, 4  ;;  %v4940_v63 = vld [vmem:[#allocation5 + $0x44] sm:$0xf]  ;;  %s12152_s21 = smov 22  }
 0x522   :  { %v5855_v21 = vsel %vm17255_vm8, %v17323_v0, %v5854_v54  ;;  %v5932_v59 = vsel %vm17250_vm14, %v17324_v49, %v5931_v39  ;;  %v15322_v39 = vpop.permute.xlu0 %4862  ;;  %v17325_v54 = vrot.slane %v14373_v8, 4  ;;  %v4334_v26 = vrot.slane %v15069_v58, 4  ;;  %v12092_v19 = vld [vmem:[#allocation5 + $0x4] sm:$0xff] }
 0x523   :  { %6957 = vmatpush1.bf16.msra.mxu1 %v10945_v32  ;;  %7576 = vmatpush1.bf16.msra.mxu0 %v11036_v24  ;;  %v10961_v56 = vcombine.low %v15074_v48, %v15109_v41  ;;  %v11052_v15 = vcombine.low %v4807_v28, %v4885_v31  ;;  %v10978_v42 = vcombine.high %v5855_v21, %v5932_v59  ;;  %v4411_v12 = vrot.slane %v15012_v22, 4 }
 0x524   :  { %v4266_v44 = vsel %vm17251_vm0, %v17325_v54, %v4257_v33  ;;  %6958 = vmatprep.subr.bf16.mxu1 %v10962_v55  ;;  %7577 = vmatprep.subr.bf16.mxu0 %v11053_v2  ;;  %v5055_v52 = vsel %vm407_vm11, %v17320_v17, %v5054_v36  ;;  %v11069_v7 = vcombine.high %v12092_v19, %v4978_v16  ;;  %v17236_v48 = vrot.slane %v15030_v60, 4  ;;  %v15339_v31 = vpop.permute.xlu1 %5031  ;;  %v7914_v17 = vld [vmem:[%s17174_s4 + $0x8] sm:$0xff] }
 0x525   :  { %5043 = vrot.lane.b32.xlu1 %v5017_v14, %s12129_s15  ;;  %4966 = vrot.lane.b32.xlu0 %v4940_v63, %s12127_s23  ;;  %v4267_v53 = vsel %vm251_vm9, %v14373_v8, %v4266_v44  ;;  %v4335_v41 = vrot.slane %v15097_v4, 4  ;;  %v4268_v28 = vsel %vm17251_vm0, %v4257_v33, %v4258_v30  ;;  %v7913_v8 = vld [vmem:[%s17174_s4] sm:$0xff]  ;;  %v4567_v0 = vrot.slane %v15160_v1, 4  ;;  %v4204_v2 = vld [vmem:[#allocation5 + $0x8] sm:$0xff]  ;;  %s12157_s15 = smov 69  }
 0x526   :  { %v15341_v55 = vpop.permute.xlu0 %4956  ;;  %v10977_v49 = vcombine.low %v5855_v21, %v5932_v59  ;;  %v11068_v32 = vcombine.low %v12092_v19, %v4978_v16  ;;  %v11084_v24 = vcombine.low %v5055_v52, %v5055_v52  ;;  %v17326_v36 = vrot.slane %v14379_v29, 4 }
 0x527   :  { %6959 = vmatpush1.bf16.msra.mxu1 %v10961_v56  ;;  %7578 = vmatpush1.bf16.msra.mxu0 %v11052_v15  ;;  %v11085_v63 = vcombine.high %v5055_v52, %v5055_v52  ;;  %v10991_v33 = vcombine.high %v4204_v2, %v4267_v53  ;;  %v4269_v54 = vsel %vm251_vm9, %v17321_v23, %v4268_v28  ;;  %v4489_v44 = vrot.slane %v15126_v46, 4 }
 0x528   :  { %6960 = vmatprep.subr.bf16.mxu1 %v10978_v42  ;;  %7579 = vmatprep.subr.bf16.mxu0 %v11069_v7  ;;  %v4343_v14 = vsel %vm17251_vm0, %v17326_v36, %v4334_v26  ;;  %v15359_v56 = vpop.permute.xlu1 %4245  ;;  %v17327_v59 = vrot.slane %v14393_v20, 4  ;;  %v4345_v15 = vsel %vm17251_vm0, %v4334_v26, %v4335_v41  ;;  %v4423_v42 = vsel %vm17251_vm0, %v4411_v12, %v17236_v48  ;;  %v4205_v7 = vld [vmem:[#allocation5 + $0x10] sm:$0xff] }
 0x529   :  { %7922 = vperm.xlu1 %11636, %v7914_v17   ;;  %7917 = vperm.xlu0 %11737, %v7913_v8   ;;  %v17237_v23 = vrot.slane %v15190_v47, 4  ;;  %v4721_v52 = vrot.slane %v15227_v40, 4  ;;  %v4344_v19 = vsel %vm407_vm11, %v14379_v29, %v4343_v14  ;;  %v17328_v17 = vrot.slane %v14413_v13, 4 }
 0x52a   :  { %v15361_v21 = vpop.permute.xlu0 %5033  ;;  %v4421_v16 = vsel %vm17251_vm0, %v17327_v59, %v4411_v12  ;;  %v10990_v26 = vcombine.low %v4204_v2, %v4267_v53  ;;  %v7522_v12 = vsel %vm17251_vm0, %v11084_v24, 0  ;;  %v10993_v8 = vcombine.high %v4205_v7, %v4269_v54  ;;  %v15396_v24 = vld [vmem:[%s17173_s3] ss:$8 sps:$4 sm:$0xff]  }
 0x52b   :  { %6961 = vmatpush1.bf16.msra.mxu1 %v10977_v49  ;;  %7580 = vmatpush1.bf16.msra.mxu0 %v11068_v32  ;;  %v4576_v28 = vsel %vm17251_vm0, %v17328_v17, %v4567_v0  ;;  %v4490_v36 = vrot.slane %v15158_v35, 4  ;;  %v4644_v49 = vrot.slane %v15188_v62, 4  ;;  %v4422_v32 = vsel %vm17255_vm8, %v14393_v20, %v4421_v16 }
 0x52c   :  { %11100 = vmatprep.subr.msk.bf16.mxu0 %vm17251_vm0, %v11085_v63  ;;  %7612 = vmatprep.subr.bf16.mxu1 %v10991_v33  ;;  %v4346_v29 = vsel %vm407_vm11, %v15069_v58, %v4345_v15  ;;  %v15389_v14 = vpop.permute.xlu1 %4322  ;;  %v11007_v2 = vcombine.high %v4344_v19, %v4422_v32  ;;  %v17329_v63 = vrot.slane %v14400_v18, 4  ;;  %v4577_v58 = vsel %vm875_vm4, %v14413_v13, %v4576_v28 }
 0x52d   :  { %v4722_v33 = vrot.slane %v15258_v37, 4  ;;  %v4876_v59 = vrot.slane %v15294_v50, 4  ;;  %v17330_v16 = vrot.slane %v17299_v27, 4  ;;  %v4578_v17 = vsel %vm17251_vm0, %v4567_v0, %v17237_v23 }
 0x52e   :  { %10986 = vmatmul.mubr.msk.bf16.vlgmr.msra.gmra.mrb[44].mxu1 %vm485_vm13, %v14407_v34  ;;  %v15391_v53 = vpop.permute.xlu0 %4399  ;;  %v4499_v20 = vsel %vm17251_vm0, %v17329_v63, %v4489_v44  ;;  %v4424_v34 = vsel %vm17255_vm8, %v15012_v22, %v4423_v42  ;;  %v11006_v63 = vcombine.low %v4344_v19, %v4422_v32  ;;  %v10992_v13 = vcombine.low %v4205_v7, %v4269_v54  ;;  %v17331_v22 = vld [vmem:[#allocation15_spill] sm:$0xff] }
 0x52f   :  { %7613 = vmatpush1.bf16.msra.mxu1 %v10990_v26  ;;  %7582 = vmatpush1.bf16.msra.mxu0 %v7522_v12  ;;  %v4730_v15 = vsel %vm17251_vm0, %v17330_v16, %v4721_v52  ;;  %v11009_v28 = vcombine.high %v4346_v29, %v4424_v34  ;;  %v4645_v42 = vrot.slane %v17331_v22, 4  ;;  %v4500_v48 = vsel %vm17250_vm14, %v14400_v18, %v4499_v20 }
 0x530   :  { %7614 = vmatprep.subr.bf16.mxu1 %v11007_v2  ;;  %7655 = vmatprep.subr.bf16.mxu0 %v10993_v8  ;;  %v17332_v26 = vrot.slane %v17303_v38, 4  ;;  %v4501_v16 = vsel %vm17251_vm0, %v4489_v44, %v4490_v36  ;;  %v4798_v0 = vrot.slane %v15256_v25, 4  ;;  %v15426_v54 = vpop.permute.xlu1 %4477  ;;  %v11023_v18 = vcombine.high %v4500_v48, %v4577_v58 }
 0x531   :  { %7644 = vmatprep.mubr.bf16.mxu1 %v15263_v11  ;;  %v4731_v7 = vsel %vm1187_vm2, %v17299_v27, %v4730_v15  ;;  %v4579_v8 = vsel %vm875_vm4, %v15160_v1, %v4578_v17  ;;  %v4970_v44 = vrot.slane %v15320_v43, 4  ;;  %v4877_v32 = vrot.slane %v15322_v39, 4 }
 0x532   :  { %v4653_v12 = vsel %vm17251_vm0, %v17332_v26, %v4644_v49  ;;  %11101 = vmatmul.mubr.msk.bf16.vlgmr.msra.gmra.mrb[32].mxu0 %vm3478_vm7, %v15396_v24  ;;  %v15428_v19 = vpop.permute.xlu0 %4555  ;;  %v17333_v2 = vrot.slane %v17298_v5, 4  ;;  %v4732_v26 = vsel %vm17251_vm0, %v4721_v52, %v4722_v33  ;;  %v11008_v23 = vcombine.low %v4346_v29, %v4424_v34 }
 0x533   :  { %7615 = vmatpush1.bf16.msra.mxu1 %v11006_v63  ;;  %7656 = vmatpush1.bf16.msra.mxu0 %v10992_v13  ;;  %v4654_v27 = vsel %vm1031_vm6, %v17303_v38, %v4653_v12  ;;  %v4502_v1 = vsel %vm17250_vm14, %v15126_v46, %v4501_v16  ;;  %v11022_v15 = vcombine.low %v4500_v48, %v4577_v58  ;;  %v4799_v52 = vrot.slane %v15292_v6, 4 }
 0x534   :  { %v4886_v20 = vsel %vm17251_vm0, %v17333_v2, %v4876_v59  ;;  %7616 = vmatprep.subr.bf16.mxu1 %v11023_v18  ;;  %7657 = vmatprep.subr.bf16.mxu0 %v11009_v28  ;;  %v11039_v17 = vcombine.high %v4654_v27, %v4731_v7  ;;  %v11025_v63 = vcombine.high %v4502_v1, %v4579_v8  ;;  %v15451_v18 = vpop.permute.xlu1 %4632  ;;  %v4971_v58 = vrot.slane %v15341_v55, 4 }
 0x535   :  { %v4655_v13 = vsel %vm17251_vm0, %v4644_v49, %v4645_v42  ;;  %7687 = vmatprep.mubr.bf16.mxu0 %v15263_v11  ;;  %v4808_v38 = vsel %vm17251_vm0, %v4797_v3, %v4798_v0  ;;  %v4887_v46 = vsel %vm4884_vm1, %v17298_v5, %v4886_v20  ;;  %v4733_v48 = vsel %vm1187_vm2, %v15227_v40, %v4732_v26 }
 0x536   :  { %v15453_v29 = vpop.permute.xlu0 %4709  ;;  %v5047_v49 = vrot.slane %v15339_v31, 4  ;;  %v4979_v34 = vsel %vm17251_vm0, %v4969_v51, %v4970_v44  ;;  %v4888_v3 = vsel %vm17251_vm0, %v4876_v59, %v4877_v32  ;;  %v4656_v5 = vsel %vm1031_vm6, %v15188_v62, %v4655_v13 }
 0x537   :  { %7617 = vmatpush1.bf16.msra.mxu1 %v11022_v15  ;;  %7658 = vmatpush1.bf16.msra.mxu0 %v11008_v23  ;;  %v11038_v40 = vcombine.low %v4654_v27, %v4731_v7  ;;  %v11024_v28 = vcombine.low %v4502_v1, %v4579_v8  ;;  %v4809_v12 = vsel %vm4806_vm15, %v17309_v61, %v4808_v38  ;;  %v4259_v7 = vrot.slane %v15359_v56, 4  ;;  %v4917_v27 = vld [vmem:[#allocation5 + $0xc] sm:$0xff] }
 0x538   :  { %7618 = vmatprep.subr.bf16.mxu1 %v11039_v17  ;;  %7659 = vmatprep.subr.bf16.mxu0 %v11025_v63  ;;  %v11041_v16 = vcombine.high %v4656_v5, %v4733_v48  ;;  %v15474_v23 = vpop.permute.xlu1 %4786  ;;  %v11055_v51 = vcombine.high %v4809_v12, %v4887_v46  ;;  %v4980_v20 = vsel %vm251_vm9, %v17319_v9, %v4979_v34  ;;  %v5048_v8 = vrot.slane %v15361_v21, 4 }
 0x539   :  { %v4810_v59 = vsel %vm17251_vm0, %v4798_v0, %v4799_v52  ;;  %v4889_v62 = vsel %vm4884_vm1, %v15294_v50, %v4888_v3  ;;  %v5056_v61 = vsel %vm17251_vm0, %v5046_v45, %v5047_v49  ;;  %v4981_v9 = vsel %vm17251_vm0, %v4970_v44, %v4971_v58  ;;  %v4918_v3 = vld [vmem:[#allocation5 + $0x14] sm:$0xff] }
 0x53a   :  { %v15476_v2 = vpop.permute.xlu0 %4864  ;;  %v11054_v0 = vcombine.low %v4809_v12, %v4887_v46  ;;  %v11040_v26 = vcombine.low %v4656_v5, %v4733_v48  ;;  %v4811_v50 = vsel %vm4806_vm15, %v15256_v25, %v4810_v59  ;;  %v11071_v15 = vcombine.high %v4917_v27, %v4980_v20 }
 0x53b   :  { %7619 = vmatpush1.bf16.msra.mxu1 %v11038_v40  ;;  %7660 = vmatpush1.bf16.msra.mxu0 %v11024_v28  ;;  %v11057_v17 = vcombine.high %v4811_v50, %v4889_v62  ;;  %v5057_v63 = vsel %vm407_vm11, %v17322_v57, %v5056_v61  ;;  %v4982_v44 = vsel %vm251_vm9, %v15320_v43, %v4981_v9  ;;  %v4336_v38 = vrot.slane %v15389_v14, 4  ;;  %v4206_v9 = vld [vmem:[#allocation5 + $0x18] sm:$0xff] }
 0x53c   :  { %7620 = vmatprep.subr.bf16.mxu1 %v11055_v51  ;;  %7661 = vmatprep.subr.bf16.mxu0 %v11041_v16  ;;  %v15495_v1 = vpop.permute.xlu1 %4324  ;;  %v5058_v13 = vsel %vm17251_vm0, %v5047_v49, %v5048_v8  ;;  %v4413_v25 = vrot.slane %v15391_v53, 4  ;;  %v4270_v46 = vsel %vm17251_vm0, %v4258_v30, %v4259_v7  ;;  %v11070_v57 = vcombine.low %v4917_v27, %v4980_v20 }
 0x53d   :  { %v11056_v43 = vcombine.low %v4811_v50, %v4889_v62  ;;  %v11087_v34 = vcombine.high %v5057_v63, %v5057_v63  ;;  %v11086_v5 = vcombine.low %v5057_v63, %v5057_v63  ;;  %v4491_v49 = vrot.slane %v15426_v54, 4 }
 0x53e   :  { %v15497_v45 = vpop.permute.xlu0 %4247  ;;  %v11073_v12 = vcombine.high %v4918_v3, %v4982_v44  ;;  %v5059_v16 = vsel %vm407_vm11, %v15339_v31, %v5058_v13  ;;  %v4271_v30 = vsel %vm251_vm9, %v14627_v10, %v4270_v46  ;;  %v4569_v51 = vrot.slane %v15428_v19, 4 }
 0x53f   :  { %7621 = vmatpush1.bf16.msra.mxu1 %v11054_v0  ;;  %7662 = vmatpush1.bf16.msra.mxu0 %v11040_v26  ;;  %v4260_v48 = vrot.slane %v15497_v45, 4  ;;  %v4347_v20 = vsel %vm17251_vm0, %v4335_v41, %v4336_v38  ;;  %v17334_v59 = vrot.slane %v15030_v60, 4  ;;  %v11072_v31 = vcombine.low %v4918_v3, %v4982_v44 }
 0x540   :  { %7622 = vmatprep.subr.bf16.mxu1 %v11071_v15  ;;  %7663 = vmatprep.subr.bf16.mxu0 %v11057_v17  ;;  %v15513_v40 = vpop.permute.xlu1 %4479  ;;  %v7528_v0 = vsel %vm17251_vm0, %v11086_v5, 0  ;;  %v11089_v26 = vcombine.high %v5059_v16, %v5059_v16  ;;  %v10995_v27 = vcombine.high %v4206_v9, %v4271_v30  ;;  %v11088_v41 = vcombine.low %v5059_v16, %v5059_v16 }
 0x541   :  { %v4425_v62 = vsel %vm17251_vm0, %v17334_v59, %v4413_v25  ;;  %v4272_v10 = vsel %vm17251_vm0, %v4259_v7, %v4260_v48  ;;  %v4337_v50 = vrot.slane %v15495_v1, 4  ;;  %v4348_v63 = vsel %vm407_vm11, %v15097_v4, %v4347_v20 }
 0x542   :  { %v15515_v28 = vpop.permute.xlu0 %4401  ;;  %v4426_v44 = vsel %vm17255_vm8, %v15030_v60, %v4425_v62  ;;  %v4503_v7 = vsel %vm17251_vm0, %v4490_v36, %v4491_v49  ;;  %v4646_v13 = vrot.slane %v15451_v18, 4  ;;  %v4273_v46 = vsel %vm251_vm9, %v15359_v56, %v4272_v10  ;;  %v4207_v56 = vld [vmem:[#allocation5 + $0x20] sm:$0xff] }
 0x543   :  { %7623 = vmatpush1.bf16.msra.mxu1 %v11070_v57  ;;  %7664 = vmatpush1.bf16.msra.mxu0 %v11056_v43  ;;  %v4414_v61 = vrot.slane %v15515_v28, 4  ;;  %v17335_v57 = vrot.slane %v15190_v47, 4  ;;  %v4723_v43 = vrot.slane %v15453_v29, 4  ;;  %v7534_v3 = vsel %vm17251_vm0, %v11088_v41, 0 }
 0x544   :  { %11102 = vmatprep.subr.msk.bf16.mxu1 %vm17251_vm0, %v11087_v34  ;;  %7665 = vmatprep.subr.bf16.mxu0 %v11073_v12  ;;  %v15535_v15 = vpop.permute.xlu1 %4634  ;;  %v10994_v34 = vcombine.low %v4206_v9, %v4271_v30  ;;  %v11011_v5 = vcombine.high %v4348_v63, %v4426_v44  ;;  %v4504_v12 = vsel %vm17250_vm14, %v15158_v35, %v4503_v7  ;;  %v4492_v16 = vrot.slane %v15513_v40, 4 }
 0x545   :  { %v4580_v4 = vsel %vm17251_vm0, %v17335_v57, %v4569_v51  ;;  %v4427_v36 = vsel %vm17251_vm0, %v4413_v25, %v4414_v61  ;;  %v10997_v62 = vcombine.high %v4207_v56, %v4273_v46  ;;  %v4349_v30 = vsel %vm17251_vm0, %v4336_v38, %v4337_v50 }
 0x546   :  { %v15537_v17 = vpop.permute.xlu0 %4557  ;;  %v4581_v25 = vsel %vm875_vm4, %v15190_v47, %v4580_v4  ;;  %v4428_v35 = vsel %vm17255_vm8, %v15391_v53, %v4427_v36  ;;  %v4657_v9 = vsel %vm17251_vm0, %v4645_v42, %v4646_v13  ;;  %v4878_v10 = vrot.slane %v15476_v2, 4 }
 0x547   :  { %7625 = vmatpush1.bf16.msra.mxu1 %v7528_v0  ;;  %7666 = vmatpush1.bf16.msra.mxu0 %v11072_v31  ;;  %v4570_v60 = vrot.slane %v15537_v17, 4  ;;  %v4800_v31 = vrot.slane %v15474_v23, 4  ;;  %v4734_v38 = vsel %vm17251_vm0, %v4722_v33, %v4723_v43  ;;  %v11010_v0 = vcombine.low %v4348_v63, %v4426_v44 }
 0x548   :  { %11104 = vmatprep.subr.msk.bf16.mxu0 %vm17251_vm0, %v11089_v26  ;;  %7698 = vmatprep.subr.bf16.mxu1 %v10995_v27  ;;  %v15566_v20 = vpop.permute.xlu1 %4788  ;;  %v10996_v26 = vcombine.low %v4207_v56, %v4273_v46  ;;  %v11027_v27 = vcombine.high %v4504_v12, %v4581_v25  ;;  %v4350_v42 = vsel %vm407_vm11, %v15389_v14, %v4349_v30  ;;  %v4647_v41 = vrot.slane %v15535_v15, 4 }
 0x549   :  { %v4582_v53 = vsel %vm17251_vm0, %v4569_v51, %v4570_v60  ;;  %v11013_v57 = vcombine.high %v4350_v42, %v4428_v35  ;;  %v4658_v51 = vsel %vm1031_vm6, %v17331_v22, %v4657_v9  ;;  %v4505_v14 = vsel %vm17251_vm0, %v4491_v49, %v4492_v16 }
 0x54a   :  { %11103 = vmatmul.mubr.msk.bf16.vlgmr.msra.gmra.mrb[32].mxu1 %vm3478_vm7, %v15396_v24  ;;  %v15568_v59 = vpop.permute.xlu0 %4711  ;;  %v4735_v63 = vsel %vm1187_vm2, %v15258_v37, %v4734_v38  ;;  %v4583_v44 = vsel %vm875_vm4, %v15428_v19, %v4582_v53  ;;  %v4812_v22 = vsel %vm17251_vm0, %v4799_v52, %v4800_v31  ;;  %v4890_v49 = vsel %vm17251_vm0, %v4877_v32, %v4878_v10 }
 0x54b   :  { %7699 = vmatpush1.bf16.msra.mxu1 %v10994_v34  ;;  %7668 = vmatpush1.bf16.msra.mxu0 %v7534_v3  ;;  %v4724_v47 = vrot.slane %v15568_v59, 4  ;;  %v11026_v19 = vcombine.low %v4504_v12, %v4581_v25  ;;  %v11012_v36 = vcombine.low %v4350_v42, %v4428_v35  ;;  %v4506_v34 = vsel %vm17250_vm14, %v15426_v54, %v4505_v14 }
 0x54c   :  { %7700 = vmatprep.subr.bf16.mxu1 %v11011_v5  ;;  %7741 = vmatprep.subr.bf16.mxu0 %v10997_v62  ;;  %v15597_v7 = vpop.permute.xlu1 %4958  ;;  %v4801_v52 = vrot.slane %v15566_v20, 4  ;;  %v11043_v56 = vcombine.high %v4658_v51, %v4735_v63  ;;  %v11029_v62 = vcombine.high %v4506_v34, %v4583_v44  ;;  %v4659_v32 = vsel %vm17251_vm0, %v4646_v13, %v4647_v41 }
 0x54d   :  { %7730 = vmatprep.mubr.bf16.mxu1 %v15263_v11  ;;  %v4972_v46 = vrot.slane %v15597_v7, 4  ;;  %v4736_v37 = vsel %vm17251_vm0, %v4723_v43, %v4724_v47  ;;  %v4813_v54 = vsel %vm4806_vm15, %v15292_v6, %v4812_v22  ;;  %v4891_v12 = vsel %vm4884_vm1, %v15322_v39, %v4890_v49 }
 0x54e   :  { %11105 = vmatmul.mubr.msk.bf16.vlgmr.msra.gmra.mrb[36].mxu0 %vm3478_vm7, %v15396_v24  ;;  %v15599_v33 = vpop.permute.xlu0 %4866  ;;  %v4737_v25 = vsel %vm1187_vm2, %v15453_v29, %v4736_v37  ;;  %v11042_v9 = vcombine.low %v4658_v51, %v4735_v63  ;;  %v11028_v6 = vcombine.low %v4506_v34, %v4583_v44  ;;  %v4660_v39 = vsel %vm1031_vm6, %v15451_v18, %v4659_v32  ;;  %v4919_v51 = vld [vmem:[#allocation5 + $0x1c] sm:$0xff] }
 0x54f   :  { %7701 = vmatpush1.bf16.msra.mxu1 %v11010_v0  ;;  %7742 = vmatpush1.bf16.msra.mxu0 %v10996_v26  ;;  %v4879_v4 = vrot.slane %v15599_v33, 4  ;;  %v4983_v13 = vsel %vm17251_vm0, %v4971_v58, %v4972_v46  ;;  %v11059_v53 = vcombine.high %v4813_v54, %v4891_v12  ;;  %v11045_v0 = vcombine.high %v4660_v39, %v4737_v25 }
 0x550   :  { %7702 = vmatprep.subr.bf16.mxu1 %v11027_v27  ;;  %7743 = vmatprep.subr.bf16.mxu0 %v11013_v57  ;;  %v5036_v3 = vpop.permute.xlu1 %5035  ;;  %v4814_v58 = vsel %vm17251_vm0, %v4800_v31, %v4801_v52  ;;  %v4984_v18 = vsel %vm251_vm9, %v15341_v55, %v4983_v13  ;;  %v11058_v57 = vcombine.low %v4813_v54, %v4891_v12  ;;  %vm9193_vm13 = vcmask 174082  }
 0x551   :  { %7773 = vmatprep.mubr.bf16.mxu0 %v15263_v11  ;;  %v5049_v43 = vrot.slane %v5036_v3, 4  ;;  %v4892_v35 = vsel %vm17251_vm0, %v4878_v10, %v4879_v4  ;;  %v4815_v14 = vsel %vm4806_vm15, %v15474_v23, %v4814_v58  ;;  %v11075_v44 = vcombine.high %v4919_v51, %v4984_v18  ;;  %vm16924_vm5 = vmor %vm9193_vm13, %vm9192_vm12 }
 0x552   :  { %v15629_v5 = vpop.permute.xlu0 %4960  ;;  %v4893_v27 = vsel %vm4884_vm1, %v15476_v2, %v4892_v35  ;;  %vm17254_vm12 = vcmask 992008  }
 0x553   :  { %7703 = vmatpush1.bf16.msra.mxu1 %v11026_v19  ;;  %7744 = vmatpush1.bf16.msra.mxu0 %v11012_v36  ;;  %v4973_v30 = vrot.slane %v15629_v5, 4  ;;  %v5060_v10 = vsel %vm17251_vm0, %v5048_v8, %v5049_v43  ;;  %v11044_v8 = vcombine.low %v4660_v39, %v4737_v25  ;;  %v11061_v2 = vcombine.high %v4815_v14, %v4893_v27 }
 0x554   :  { %7704 = vmatprep.subr.bf16.mxu1 %v11043_v56  ;;  %7745 = vmatprep.subr.bf16.mxu0 %v11029_v62  ;;  %v15651_v38 = vpop.permute.xlu1 %4249  ;;  %v5061_v22 = vsel %vm407_vm11, %v15361_v21, %v5060_v10  ;;  %v11074_v19 = vcombine.low %v4919_v51, %v4984_v18  ;;  %v11060_v36 = vcombine.low %v4815_v14, %v4893_v27  ;;  %v4920_v21 = vld [vmem:[#allocation5 + $0x24] sm:$0xff] }
 0x555   :  { %v4261_v42 = vrot.slane %v15651_v38, 4  ;;  %v4985_v31 = vsel %vm17251_vm0, %v4972_v46, %v4973_v30  ;;  %v11090_v34 = vcombine.low %v5061_v22, %v5061_v22 }
 0x556   :  { %v15653_v29 = vpop.permute.xlu0 %5037  ;;  %v4986_v46 = vsel %vm251_vm9, %v15597_v7, %v4985_v31 }
 0x557   :  { %7705 = vmatpush1.bf16.msra.mxu1 %v11042_v9  ;;  %v5050_v26 = vrot.slane %v15653_v29, 4  ;;  %7746 = vmatpush1.bf16.msra.mxu0 %v11028_v6  ;;  %v4274_v37 = vsel %vm17251_vm0, %v4260_v48, %v4261_v42  ;;  %v11077_v54 = vcombine.high %v4920_v21, %v4986_v46  ;;  %v11076_v35 = vcombine.low %v4920_v21, %v4986_v46  ;;  %v4208_v6 = vld [vmem:[#allocation5 + $0x28] sm:$0xff] }
 0x558   :  { %7706 = vmatprep.subr.bf16.mxu1 %v11059_v53  ;;  %7747 = vmatprep.subr.bf16.mxu0 %v11045_v0  ;;  %v15674_v63 = vpop.permute.xlu1 %4326  ;;  %v4275_v25 = vsel %vm251_vm9, %v15497_v45, %v4274_v37 }
 0x559   :  { %v5062_v49 = vsel %vm17251_vm0, %v5049_v43, %v5050_v26  ;;  %v4338_v56 = vrot.slane %v15674_v63, 4  ;;  %v11091_v43 = vcombine.high %v5061_v22, %v5061_v22  ;;  %v10999_v58 = vcombine.high %v4208_v6, %v4275_v25 }
 0x55a   :  { %v15676_v55 = vpop.permute.xlu0 %4251  ;;  %v5063_v7 = vsel %vm407_vm11, %v5036_v3, %v5062_v49  ;;  %v7540_v3 = vsel %vm17251_vm0, %v11090_v34, 0  ;;  %v10998_v31 = vcombine.low %v4208_v6, %v4275_v25 }
 0x55b   :  { %7707 = vmatpush1.bf16.msra.mxu1 %v11058_v57  ;;  %7748 = vmatpush1.bf16.msra.mxu0 %v11044_v8  ;;  %v4262_v23 = vrot.slane %v15676_v55, 4  ;;  %v11093_v9 = vcombine.high %v5063_v7, %v5063_v7  ;;  %v4351_v45 = vsel %vm17251_vm0, %v4337_v50, %v4338_v56  ;;  %v11092_v10 = vcombine.low %v5063_v7, %v5063_v7  ;;  %v4209_v8 = vld [vmem:[#allocation5 + $0x30] sm:$0xff] }
 0x55c   :  { %7708 = vmatprep.subr.bf16.mxu1 %v11075_v44  ;;  %7749 = vmatprep.subr.bf16.mxu0 %v11061_v2  ;;  %v15690_v62 = vpop.permute.xlu1 %4328  ;;  %v4352_v57 = vsel %vm407_vm11, %v15495_v1, %v4351_v45 }
 0x55d   :  { %v4276_v48 = vsel %vm17251_vm0, %v4261_v42, %v4262_v23  ;;  %v4339_v39 = vrot.slane %v15690_v62, 4  ;;  %v7546_v14 = vsel %vm17251_vm0, %v11092_v10, 0 }
 0x55e   :  { %v4404_v32 = vpop.permute.xlu0 %4403  ;;  %v4277_v42 = vsel %vm251_vm9, %v15651_v38, %v4276_v48 }
 0x55f   :  { %7709 = vmatpush1.bf16.msra.mxu1 %v11074_v19  ;;  %v4415_v12 = vrot.slane %v4404_v32, 4  ;;  %7750 = vmatpush1.bf16.msra.mxu0 %v11060_v36  ;;  %v4353_v51 = vsel %vm17251_vm0, %v4338_v56, %v4339_v39  ;;  %v11001_v2 = vcombine.high %v4209_v8, %v4277_v42  ;;  %v11000_v36 = vcombine.low %v4209_v8, %v4277_v42 }
 0x560   :  { %11106 = vmatprep.subr.msk.bf16.mxu1 %vm17251_vm0, %v11091_v43  ;;  %7751 = vmatprep.subr.bf16.mxu0 %v11077_v54  ;;  %v4482_v53 = vpop.permute.xlu1 %4481  ;;  %v4354_v21 = vsel %vm407_vm11, %v15674_v63, %v4353_v51 }
 0x561   :  { %v4429_v13 = vsel %vm17251_vm0, %v4414_v61, %v4415_v12  ;;  %v4493_v18 = vrot.slane %v4482_v53, 4 }
 0x562   :  { %v15707_v0 = vpop.permute.xlu0 %4405  ;;  %v4430_v27 = vsel %vm17255_vm8, %v15515_v28, %v4429_v13 }
 0x563   :  { %7711 = vmatpush1.bf16.msra.mxu1 %v7540_v3  ;;  %v4416_v61 = vrot.slane %v15707_v0, 4  ;;  %7752 = vmatpush1.bf16.msra.mxu0 %v11076_v35  ;;  %v11015_v44 = vcombine.high %v4352_v57, %v4430_v27  ;;  %v4507_v22 = vsel %vm17251_vm0, %v4492_v16, %v4493_v18  ;;  %v11014_v19 = vcombine.low %v4352_v57, %v4430_v27 }
 0x564   :  { %11108 = vmatprep.subr.msk.bf16.mxu0 %vm17251_vm0, %v11093_v9  ;;  %7784 = vmatprep.subr.bf16.mxu1 %v10999_v58  ;;  %v15725_v28 = vpop.permute.xlu1 %4483 }
 0x565   :  { %v4431_v50 = vsel %vm17251_vm0, %v4415_v12, %v4416_v61  ;;  %v4494_v1 = vrot.slane %v15725_v28, 4 }
 0x566   :  { %11107 = vmatmul.mubr.msk.bf16.vlgmr.msra.gmra.mrb[36].mxu1 %vm3478_vm7, %v15396_v24  ;;  %v4560_v38 = vpop.permute.xlu0 %4559  ;;  %v4432_v46 = vsel %vm17255_vm8, %v4404_v32, %v4431_v50 }
 0x567   :  { %7785 = vmatpush1.bf16.msra.mxu1 %v10998_v31  ;;  %v4571_v49 = vrot.slane %v4560_v38, 4  ;;  %7754 = vmatpush1.bf16.msra.mxu0 %v7546_v14  ;;  %v4509_v16 = vsel %vm17251_vm0, %v4493_v18, %v4494_v1  ;;  %v11017_v32 = vcombine.high %v4354_v21, %v4432_v46  ;;  %v11016_v48 = vcombine.low %v4354_v21, %v4432_v46 }
 0x568   :  { %7786 = vmatprep.subr.bf16.mxu1 %v11015_v44  ;;  %7827 = vmatprep.subr.bf16.mxu0 %v11001_v2  ;;  %v4637_v34 = vpop.permute.xlu1 %4636  ;;  %v4510_v35 = vsel %vm17250_vm14, %v4482_v53, %v4509_v16 }
 0x569   :  { %v4584_v37 = vsel %vm17251_vm0, %v4570_v60, %v4571_v49  ;;  %7816 = vmatprep.mubr.bf16.mxu1 %v15263_v11  ;;  %v4508_v60 = vsel %vm17250_vm14, %v15513_v40, %v4507_v22  ;;  %v4648_v63 = vrot.slane %v4637_v34, 4 }
 0x56a   :  { %11109 = vmatmul.mubr.msk.bf16.vlgmr.msra.gmra.mrb[40].mxu0 %vm3478_vm7, %v15396_v24  ;;  %v15744_v56 = vpop.permute.xlu0 %4561  ;;  %v4585_v43 = vsel %vm875_vm4, %v15537_v17, %v4584_v37 }
 0x56b   :  { %7787 = vmatpush1.bf16.msra.mxu1 %v11014_v19  ;;  %v4572_v54 = vrot.slane %v15744_v56, 4  ;;  %7828 = vmatpush1.bf16.msra.mxu0 %v11000_v36  ;;  %v11030_v7 = vcombine.low %v4508_v60, %v4585_v43  ;;  %v11031_v12 = vcombine.high %v4508_v60, %v4585_v43  ;;  %v4661_v40 = vsel %vm17251_vm0, %v4647_v41, %v4648_v63 }
 0x56c   :  { %7829 = vmatprep.subr.bf16.mxu0 %v11017_v32  ;;  %7859 = vmatprep.mubr.bf16.mxu0 %v15263_v11  ;;  %v15758_v17 = vpop.permute.xlu1 %4638  ;;  %v4662_v18 = vsel %vm1031_vm6, %v15535_v15, %v4661_v40 }
 0x56d   :  { %v4586_v25 = vsel %vm17251_vm0, %v4571_v49, %v4572_v54  ;;  %7788 = vmatprep.subr.bf16.mxu1 %v11031_v12  ;;  %v4649_v9 = vrot.slane %v15758_v17, 4 }
 0x56e   :  { %v4714_v13 = vpop.permute.xlu0 %4713  ;;  %v4587_v3 = vsel %vm875_vm4, %v4560_v38, %v4586_v25 }
 0x56f   :  { %7789 = vmatpush1.bf16.msra.mxu1 %v11030_v7  ;;  %v4725_v11 = vrot.slane %v4714_v13, 4  ;;  %7830 = vmatpush1.bf16.msra.mxu0 %v11016_v48  ;;  %v11032_v6 = vcombine.low %v4510_v35, %v4587_v3  ;;  %v11033_v45 = vcombine.high %v4510_v35, %v4587_v3  ;;  %v4663_v41 = vsel %vm17251_vm0, %v4648_v63, %v4649_v9  ;;  %v4921_v63 = vld [vmem:[#allocation5 + $0x2c] sm:$0xff] }
 0x570   :  { %v4791_v10 = vpop.permute.xlu1 %4790 }
 0x571   :  { %v4738_v58 = vsel %vm17251_vm0, %v4724_v47, %v4725_v11  ;;  %7831 = vmatprep.subr.bf16.mxu0 %v11033_v45  ;;  %v4802_v42 = vrot.slane %v4791_v10, 4 }
 0x572   :  { %v15769_v53 = vpop.permute.xlu0 %4715  ;;  %v4739_v27 = vsel %vm1187_vm2, %v15568_v59, %v4738_v58  ;;  %v4664_v59 = vsel %vm1031_vm6, %v4637_v34, %v4663_v41  ;;  %v4922_v58 = vld [vmem:[#allocation5 + $0x34] sm:$0xff] }
 0x573   :  { %v4726_v50 = vrot.slane %v15769_v53, 4  ;;  %7832 = vmatpush1.bf16.msra.mxu0 %v11032_v6  ;;  %v11046_v31 = vcombine.low %v4662_v18, %v4739_v27  ;;  %v11047_v47 = vcombine.high %v4662_v18, %v4739_v27  ;;  %v4816_v8 = vsel %vm17251_vm0, %v4801_v52, %v4802_v42 }
 0x574   :  { %v15782_v51 = vpop.permute.xlu1 %4792  ;;  %v4817_v19 = vsel %vm4806_vm15, %v15566_v20, %v4816_v8 }
 0x575   :  { %v4740_v57 = vsel %vm17251_vm0, %v4725_v11, %v4726_v50  ;;  %7790 = vmatprep.subr.bf16.mxu1 %v11047_v47  ;;  %v4803_v14 = vrot.slane %v15782_v51, 4 }
 0x576   :  { %7791 = vmatpush1.bf16.msra.mxu1 %v11046_v31  ;;  %v4869_v15 = vpop.permute.xlu0 %4868  ;;  %v4741_v38 = vsel %vm1187_vm2, %v4714_v13, %v4740_v57 }
 0x577   :  { %v4880_v44 = vrot.slane %v4869_v15, 4  ;;  %v11048_v2 = vcombine.low %v4664_v59, %v4741_v38  ;;  %v11049_v22 = vcombine.high %v4664_v59, %v4741_v38  ;;  %v4818_v52 = vsel %vm17251_vm0, %v4802_v42, %v4803_v14 }
 0x578   :  { %v4963_v46 = vpop.permute.xlu1 %4962  ;;  %v4819_v7 = vsel %vm4806_vm15, %v4791_v10, %v4818_v52 }
 0x579   :  { %v4894_v49 = vsel %vm17251_vm0, %v4879_v4, %v4880_v44  ;;  %7833 = vmatprep.subr.bf16.mxu0 %v11049_v22  ;;  %v4974_v21 = vrot.slane %v4963_v46, 4 }
 0x57a   :  { %v15793_v37 = vpop.permute.xlu0 %4870  ;;  %7834 = vmatpush1.bf16.msra.mxu0 %v11048_v2  ;;  %v4895_v36 = vsel %vm4884_vm1, %v15599_v33, %v4894_v49 }
 0x57b   :  { %v4881_v16 = vrot.slane %v15793_v37, 4  ;;  %v11062_v34 = vcombine.low %v4817_v19, %v4895_v36  ;;  %v11063_v4 = vcombine.high %v4817_v19, %v4895_v36  ;;  %v4987_v32 = vsel %vm17251_vm0, %v4973_v30, %v4974_v21 }
 0x57c   :  { %v5040_v43 = vpop.permute.xlu1 %5039  ;;  %v4988_v33 = vsel %vm251_vm9, %v15629_v5, %v4987_v32 }
 0x57d   :  { %v4896_v60 = vsel %vm17251_vm0, %v4880_v44, %v4881_v16  ;;  %7792 = vmatprep.subr.bf16.mxu1 %v11063_v4  ;;  %v5051_v25 = vrot.slane %v5040_v43, 4  ;;  %v11078_v48 = vcombine.low %v4921_v63, %v4988_v33  ;;  %v11079_v40 = vcombine.high %v4921_v63, %v4988_v33 }
 0x57e   :  { %7793 = vmatpush1.bf16.msra.mxu1 %v11062_v34  ;;  %v15806_v20 = vpop.permute.xlu0 %4964  ;;  %v4897_v12 = vsel %vm4884_vm1, %v4869_v15, %v4896_v60  ;;  %v4210_v15 = vld [vmem:[#allocation5 + $0x38] sm:$0xff] }
 0x57f   :  { %v4975_v30 = vrot.slane %v15806_v20, 4  ;;  %v11064_v13 = vcombine.low %v4819_v7, %v4897_v12  ;;  %v11065_v35 = vcombine.high %v4819_v7, %v4897_v12  ;;  %v5064_v3 = vsel %vm17251_vm0, %v5050_v26, %v5051_v25  ;;  %7794 = vmatprep.subr.bf16.mxu1 %v11079_v40 }
 0x580   :  { %v4254_v5 = vpop.permute.xlu1 %4253  ;;  %v5065_v45 = vsel %vm407_vm11, %v15653_v29, %v5064_v3 }
 0x581   :  { %v4989_v11 = vsel %vm17251_vm0, %v4974_v21, %v4975_v30  ;;  %7835 = vmatprep.subr.bf16.mxu0 %v11065_v35  ;;  %v4263_v10 = vrot.slane %v4254_v5, 4  ;;  %v11095_v26 = vcombine.high %v5065_v45, %v5065_v45  ;;  %v11094_v31 = vcombine.low %v5065_v45, %v5065_v45 }
 0x582   :  { %7795 = vmatpush1.bf16.msra.mxu1 %v11078_v48  ;;  %v15819_v6 = vpop.permute.xlu0 %5041  ;;  %v4990_v41 = vsel %vm251_vm9, %v4963_v46, %v4989_v11  ;;  %7836 = vmatpush1.bf16.msra.mxu0 %v11064_v13 }
 0x583   :  { %v5052_v18 = vrot.slane %v15819_v6, 4  ;;  %v11080_v27 = vcombine.low %v4922_v58, %v4990_v41  ;;  %v11081_v42 = vcombine.high %v4922_v58, %v4990_v41  ;;  %v4278_v47 = vsel %vm17251_vm0, %v4262_v23, %v4263_v10  ;;  %11110 = vmatprep.subr.msk.bf16.mxu1 %vm17251_vm0, %v11095_v26 }
 0x584   :  { %v7552_v29 = vsel %vm17251_vm0, %v11094_v31, 0  ;;  %v4279_v59 = vsel %vm251_vm9, %v15676_v55, %v4278_v47 }
 0x585   :  { %v5066_v57 = vsel %vm17251_vm0, %v5051_v25, %v5052_v18  ;;  %7837 = vmatprep.subr.bf16.mxu0 %v11081_v42  ;;  %v4408_v38 = vpop.permute.xlu1 %4407  ;;  %v11002_v2 = vcombine.low %v4210_v15, %v4279_v59  ;;  %v11003_v22 = vcombine.high %v4210_v15, %v4279_v59 }
 0x586   :  { %v5067_v8 = vsel %vm407_vm11, %v5040_v43, %v5066_v57  ;;  %7797 = vmatpush1.bf16.msra.mxu1 %v7552_v29  ;;  %v4331_v44 = vpop.permute.xlu0 %4330  ;;  %7838 = vmatpush1.bf16.msra.mxu0 %v11080_v27  ;;  %v4417_v49 = vrot.slane %v4408_v38, 4 }
 0x587   :  { %v11097_v23 = vcombine.high %v5067_v8, %v5067_v8  ;;  %v4340_v52 = vrot.slane %v4331_v44, 4  ;;  %v11096_v46 = vcombine.low %v5067_v8, %v5067_v8  ;;  %7870 = vmatprep.subr.bf16.mxu1 %v11003_v22 }
 0x588   :  { %v4433_v19 = vsel %vm17251_vm0, %v4416_v61, %v4417_v49 }
 0x589   :  { %11112 = vmatprep.subr.msk.bf16.mxu0 %vm17251_vm0, %v11097_v23  ;;  %v4355_v55 = vsel %vm17251_vm0, %v4339_v39, %v4340_v52  ;;  %11111 = vmatmul.mubr.msk.bf16.vlgmr.msra.gmra.mrb[40].mxu1 %vm3478_vm7, %v15396_v24  ;;  %v7558_v36 = vsel %vm17251_vm0, %v11096_v46, 0  ;;  %v4564_v21 = vpop.permute.xlu1 %4563  ;;  %v4434_v32 = vsel %vm17255_vm8, %v15707_v0, %v4433_v19  ;;  %v12093_v39 = vld [vmem:[#allocation5 + $0x40] sm:$0xff] }
 0x58a   :  { %7871 = vmatpush1.bf16.msra.mxu1 %v11002_v2  ;;  %v4486_v34 = vpop.permute.xlu0 %4485  ;;  %7840 = vmatpush1.bf16.msra.mxu0 %v7558_v36  ;;  %v4356_v4 = vsel %vm407_vm11, %v15690_v62, %v4355_v55  ;;  %v4573_v61 = vrot.slane %v4564_v21, 4 }
 0x58b   :  { %v4495_v60 = vrot.slane %v4486_v34, 4  ;;  %v11018_v43 = vcombine.low %v4356_v4, %v4434_v32  ;;  %v11019_v63 = vcombine.high %v4356_v4, %v4434_v32  ;;  %7902 = vmatprep.mubr.bf16.mxu1 %v12093_v39 }
 0x58c   :  { %v4588_v33 = vsel %vm17251_vm0, %v4572_v54, %v4573_v61 }
 0x58d   :  { %v4511_v7 = vsel %vm17251_vm0, %v4494_v1, %v4495_v60  ;;  %11113 = vmatmul.mubr.msk.bf16.vlgmr.msra.gmra.mrb[44].mxu0 %vm3478_vm7, %v15396_v24  ;;  %7872 = vmatprep.subr.bf16.mxu1 %v11019_v63  ;;  %v4718_v62 = vpop.permute.xlu1 %4717  ;;  %v4589_v25 = vsel %vm875_vm4, %v15744_v56, %v4588_v33 }
 0x58e   :  { %7873 = vmatpush1.bf16.msra.mxu1 %v11018_v43  ;;  %v4641_v0 = vpop.permute.xlu0 %4640  ;;  %v4512_v12 = vsel %vm17250_vm14, %v15725_v28, %v4511_v7  ;;  %v4727_v48 = vrot.slane %v4718_v62, 4  ;;  %vm17253_vm14 = vcmask 352408  }
 0x58f   :  { %v4650_v40 = vrot.slane %v4641_v0, 4  ;;  %v11034_v54 = vcombine.low %v4512_v12, %v4589_v25  ;;  %v11035_v13 = vcombine.high %v4512_v12, %v4589_v25 }
 0x590   :  { %v4742_v1 = vsel %vm17251_vm0, %v4726_v50, %v4727_v48 }
 0x591   :  { %v4665_v35 = vsel %vm17251_vm0, %v4649_v9, %v4650_v40  ;;  %7874 = vmatprep.subr.bf16.mxu1 %v11035_v13  ;;  %v4743_v56 = vsel %vm1187_vm2, %v15769_v53, %v4742_v1  ;;  %vm9141_vm2 = vcmask 196608  }
 0x592   :  { %7875 = vmatpush1.bf16.msra.mxu1 %v11034_v54  ;;  %v4666_v28 = vsel %vm1031_vm6, %v15758_v17, %v4665_v35  ;;  %vm9200_vm6 = vcmask 377008  }
 0x593   :  { %v4873_v3 = vpop.permute.xlu1 %4872  ;;  %v4795_v11 = vpop.permute.xlu0 %4794  ;;  %v11050_v58 = vcombine.low %v4666_v28, %v4743_v56  ;;  %v11051_v41 = vcombine.high %v4666_v28, %v4743_v56 }
 0x594   :  { %v4882_v5 = vrot.slane %v4873_v3, 4  ;;  %v4804_v45 = vrot.slane %v4795_v11, 4 }
 0x595   :  { %7876 = vmatprep.subr.bf16.mxu1 %v11051_v41 }
 0x596   :  { %v4898_v50 = vsel %vm17251_vm0, %v4881_v16, %v4882_v5  ;;  %v4820_v9 = vsel %vm17251_vm0, %v4803_v14, %v4804_v45  ;;  %7877 = vmatpush1.bf16.msra.mxu1 %v11050_v58 }
 0x597   :  { %v5044_v10 = vpop.permute.xlu1 %5043  ;;  %v4967_v26 = vpop.permute.xlu0 %4966  ;;  %v4821_v17 = vsel %vm4806_vm15, %v15782_v51, %v4820_v9  ;;  %v4899_v53 = vsel %vm4884_vm1, %v15793_v37, %v4898_v50  ;;  %v4923_v51 = vld [vmem:[#allocation5 + $0x3c] sm:$0xff]  ;;  %vm9236_vm15 = vcmask 1041360   ;;  %vm9237_vm1 = vcmask 149506  }
 0x598   :  { %v5053_v27 = vrot.slane %v5044_v10, 4  ;;  %v4976_v42 = vrot.slane %v4967_v26, 4  ;;  %v11066_v31 = vcombine.low %v4821_v17, %v4899_v53  ;;  %v11067_v47 = vcombine.high %v4821_v17, %v4899_v53  ;;  %vm16966_vm13 = vmor %vm9237_vm1, %vm9236_vm15 }
 0x599   :  { %vm17252_vm15 = vcmask 557408   ;;  %vm9265_vm1 = vcmask 762408  }
 0x59a   :  { %v5068_v16 = vsel %vm17251_vm0, %v5052_v18, %v5053_v27  ;;  %v4991_v14 = vsel %vm17251_vm0, %v4975_v30, %v4976_v42  ;;  %7878 = vmatprep.subr.bf16.mxu1 %v11067_v47 }
 0x59b   :  { %v5069_v57 = vsel %vm407_vm11, %v15819_v6, %v5068_v16  ;;  %7879 = vmatpush1.bf16.msra.mxu1 %v11066_v31  ;;  %v4992_v37 = vsel %vm251_vm9, %v15806_v20, %v4991_v14  ;;  %vm9162_vm11 = vcmask 606608  }
 0x59c   :  { %v11082_v29 = vcombine.low %v4923_v51, %v4992_v37  ;;  %v11083_v8 = vcombine.high %v4923_v51, %v4992_v37  ;;  %v11099_v15 = vcombine.high %v5069_v57, %v5069_v57  ;;  %v11098_v59 = vcombine.low %v5069_v57, %v5069_v57 }
 0x59e   :  { %7880 = vmatprep.subr.bf16.mxu1 %v11083_v8  ;;  %v7564_v18 = vsel %vm17251_vm0, %v11098_v59, 0 }
 0x59f   :  { %7881 = vmatpush1.bf16.msra.mxu1 %v11082_v29 }
 0x5a0   :  { %11114 = vmatprep.subr.msk.bf16.mxu1 %vm17251_vm0, %v11099_v15  ;;  %vm9281_vm0 = vcmask 1041336  }
 0x5a3   :  { %7883 = vmatpush1.bf16.msra.mxu1 %v7564_v18 }
 0x5a6   :  { %11115 = vmatmul.mubr.msk.bf16.vlgmr.msra.gmra.mrb[44].mxu1 %vm3478_vm7, %v15396_v24  ;;  %vm9207_vm7 = vcmask 582008  }
 0x5a8   :  { %v15896_v30 = vpop.permute.xlu0 %7917  ;;  %v15901_v44 = vpop.permute.xlu1 %7922 }
 0x605   :  { %v7603_v6 = vpop.f32.mrb[32].mxu0 }
 0x606   :  { %v15899_v38 = vadd.f32 %v15896_v30, %v7603_v6  ;;  %v7605_v20 = vpop.f32.mrb[33].mxu0 }
 0x607   :  { %v7607_v23 = vpop.f32.mrb[34].mxu0  ;;  %v15914_v46 = vadd.f32 %v15896_v30, %v7605_v20 }
 0x608   :  { %v15904_v2 = vadd.f32 %v15901_v44, %v7607_v23  ;;  %v7609_v22 = vpop.f32.mrb[35].mxu0  ;;  %v7957_v49 = vmax.f32 %v15899_v38, 0.0  ;;  %v11941_v38 = vld [vmem:[%s17175_s5 + $0xf0] sm:$0xff]  }
 0x609   :  { %v15917_v19 = vadd.f32 %v15901_v44, %v7609_v22  ;;  %v7958_v32 = vmax.f32 %v15914_v46, 0.0 }
 0x60a   :  { %v7973_v52 = vmax.f32 %v15904_v2, 0.0 }
 0x60b   :  { %v7974_v63 = vmax.f32 %v15917_v19, 0.0 }
 0x60c   :  { %v11738_v24 = vpack.i.bf16 %v7973_v52, %v7957_v49 }
 0x60e   :  { %11739 = vrot.lane.b32.xlu0 %v11738_v24, %s12127_s23 }
 0x61d   :  { %v7646_v55 = vpop.f32.mrb[32].mxu1 }
 0x61e   :  { %v15920_v36 = vadd.f32 %v15896_v30, %v7646_v55  ;;  %v7648_v21 = vpop.f32.mrb[33].mxu1 }
 0x61f   :  { %v15923_v34 = vadd.f32 %v15896_v30, %v7648_v21  ;;  %v7650_v4 = vpop.f32.mrb[34].mxu1 }
 0x620   :  { %v7959_v61 = vmax.f32 %v15920_v36, 0.0  ;;  %v15928_v60 = vadd.f32 %v15901_v44, %v7650_v4  ;;  %v7652_v43 = vpop.f32.mrb[35].mxu1 }
 0x621   :  { %v7960_v39 = vmax.f32 %v15923_v34, 0.0  ;;  %v15933_v33 = vadd.f32 %v15901_v44, %v7652_v43  ;;  %v7689_v7 = vpop.f32.mrb[36].mxu0  ;;  %v11949_v34 = vld [vmem:[%s17175_s5 + $0x1c0] sm:$0xff]  }
 0x622   :  { %v11743_v62 = vpack.i.bf16 %v7959_v61, %v7958_v32  ;;  %v7975_v0 = vmax.f32 %v15928_v60, 0.0  ;;  %v15941_v12 = vadd.f32 %v15896_v30, %v7689_v7  ;;  %v7691_v25 = vpop.f32.mrb[37].mxu0  ;;  %v11944_v60 = vld [vmem:[%s17175_s5 + $0xf8] sm:$0xff]  }
 0x623   :  { %v11748_v48 = vpack.i.bf16 %v7974_v63, %v7960_v39  ;;  %v7976_v40 = vmax.f32 %v15933_v33, 0.0  ;;  %v15949_v54 = vadd.f32 %v15896_v30, %v7691_v25  ;;  %v7693_v13 = vpop.f32.mrb[38].mxu0 }
 0x624   :  { %v15952_v1 = vadd.f32 %v15901_v44, %v7693_v13  ;;  %11744 = vrot.lane.b32.xlu1 %v11743_v62, %s12127_s23  ;;  %v7695_v35 = vpop.f32.mrb[39].mxu0  ;;  %v7961_v28 = vmax.f32 %v15941_v12, 0.0 }
 0x625   :  { %v11753_v3 = vpack.i.bf16 %v7976_v40, %v7975_v0  ;;  %v15960_v11 = vadd.f32 %v15901_v44, %v7695_v35  ;;  %11749 = vrot.lane.b32.xlu0 %v11748_v48, %s12127_s23  ;;  %v7962_v56 = vmax.f32 %v15949_v54, 0.0 }
 0x626   :  { %v7977_v5 = vmax.f32 %v15952_v1, 0.0 }
 0x627   :  { %v17249_v45 = vmax.f32 %v15960_v11, 0.0  ;;  %v11758_v41 = vpack.i.bf16 %v7962_v56, %v7961_v28 }
 0x628   :  { %11754 = vrot.lane.b32.xlu1 %v11753_v3, %s12127_s23 }
 0x629   :  { %v11763_v58 = vpack.i.bf16 %v17249_v45, %v7977_v5 }
 0x62b   :  { %11764 = vrot.lane.b32.xlu0 %v11763_v58, %s12127_s23 }
 0x62c   :  { %11759 = vrot.lane.b32.xlu1 %v11758_v41, %s12127_s23 }
 0x639   :  { %v7732_v50 = vpop.f32.mrb[36].mxu1 }
 0x63a   :  { %v15979_v9 = vadd.f32 %v15896_v30, %v7732_v50  ;;  %v7734_v10 = vpop.f32.mrb[37].mxu1 }
 0x63b   :  { %v15982_v26 = vadd.f32 %v15896_v30, %v7734_v10  ;;  %v7736_v17 = vpop.f32.mrb[38].mxu1  ;;  %v11914_v10 = vld [vmem:[%s17175_s5 + $0x40] sm:$0xff]  }
 0x63c   :  { %v7963_v53 = vmax.f32 %v15979_v9, 0.0  ;;  %v15986_v27 = vadd.f32 %v15901_v44, %v7736_v17  ;;  %v7738_v42 = vpop.f32.mrb[39].mxu1  ;;  %v11915_v17 = vld [vmem:[%s17175_s5] sm:$0xff]   ;;  %11313 = vmatprep.subr.bf16.mxu0 %v11914_v10  ;;  %v11923_v10 = vld [vmem:[%s17175_s5 + $0x88] sm:$0xff]  }
 0x63d   :  { %v17247_v31 = vmax.f32 %v15982_v26, 0.0  ;;  %v15990_v47 = vadd.f32 %v15901_v44, %v7738_v42  ;;  %v7775_v16 = vpop.f32.mrb[40].mxu0  ;;  %v11916_v42 = vld [vmem:[%s17175_s5 + $0x48] sm:$0xff]   ;;  %11314 = vmatpush3.bf16.msra.mxu0 %v11915_v17  ;;  %v11925_v17 = vld [vmem:[%s17175_s5 + $0xd0] sm:$0xff]  }
 0x63e   :  { %v17248_v14 = vmax.f32 %v15986_v27, 0.0  ;;  %v15994_v57 = vadd.f32 %v15896_v30, %v7775_v16  ;;  %v7777_v51 = vpop.f32.mrb[41].mxu0  ;;  %11315 = vmatprep.subr.bf16.mxu0 %v11916_v42  ;;  %v11922_v42 = vld [vmem:[%s17175_s5 + $0x10] sm:$0xff]   ;;  %v17337_v54 = vmax.f32 %v15986_v27, 0.0 }
 0x63f   :  { %v11768_v37 = vpack.i.bf16 %v17247_v31, %v7963_v53  ;;  %v17245_v29 = vmax.f32 %v15990_v47, 0.0  ;;  %v16002_v8 = vadd.f32 %v15896_v30, %v7777_v51  ;;  %v7779_v15 = vpop.f32.mrb[42].mxu0 }
 0x640   :  { %v17246_v59 = vmax.f32 %v15994_v57, 0.0  ;;  %v16006_v18 = vadd.f32 %v15901_v44, %v7779_v15  ;;  %v7781_v6 = vpop.f32.mrb[43].mxu0  ;;  %v11919_v15 = vld [vmem:[%s17175_s5 + $0x80] sm:$0xff]  }
 0x641   :  { %v11773_v20 = vpack.i.bf16 %v17245_v29, %v17248_v14  ;;  %v17243_v23 = vmax.f32 %v16002_v8, 0.0  ;;  %v16014_v22 = vadd.f32 %v15901_v44, %v7781_v6  ;;  %11769 = vrot.lane.b32.xlu1 %v11768_v37, %s12127_s23  ;;  %v11917_v37 = vld [vmem:[%s17175_s5 + $0xc0] sm:$0xff]  }
 0x642   :  { %v17244_v24 = vmax.f32 %v16006_v18, 0.0  ;;  %11335 = vmatprep.subr.bf16.mxu1 %v11917_v37  ;;  %v11924_v37 = vld [vmem:[%s17175_s5 + $0x58] sm:$0xff]  }
 0x643   :  { %v11778_v55 = vpack.i.bf16 %v17243_v23, %v17246_v59  ;;  %v17241_v21 = vmax.f32 %v16014_v22, 0.0  ;;  %11774 = vrot.lane.b32.xlu0 %v11773_v20, %s12127_s23  ;;  %11336 = vmatpush3.bf16.msra.mxu1 %v11919_v15  ;;  %v11927_v15 = vld [vmem:[%s17175_s5 + $0x90] sm:$0xff]  }
 0x645   :  { %v11783_v4 = vpack.i.bf16 %v17241_v21, %v17244_v24  ;;  %11779 = vrot.lane.b32.xlu1 %v11778_v55, %s12127_s23  ;;  %v11937_v21 = vld [vmem:[%s17175_s5 + $0xe8] sm:$0xff]  }
 0x647   :  { %11784 = vrot.lane.b32.xlu0 %v11783_v4, %s12127_s23  ;;  %v11921_v4 = vld [vmem:[%s17175_s5 + $0xc8] sm:$0xff]  }
 0x648   :  { %11337 = vmatprep.subr.bf16.mxu1 %v11921_v4  ;;  %v11926_v4 = vld [vmem:[%s17175_s5 + $0x18] sm:$0xff]  }
 0x649   :  { %11338 = vmatpush3.bf16.msra.mxu1 %v11923_v10  ;;  %v11930_v10 = vld [vmem:[%s17175_s5 + $0x20] sm:$0xff]  }
 0x64a   :  { %11339 = vmatprep.subr.bf16.mxu1 %v11925_v17  ;;  %v11932_v17 = vld [vmem:[%s17175_s5 + $0x68] sm:$0xff]  }
 0x64d   :  { %11340 = vmatpush3.bf16.msra.mxu1 %v11927_v15 }
 0x65c   :  { %v7818_v43 = vpop.f32.mrb[40].mxu1 }
 0x65d   :  { %v16031_v7 = vadd.f32 %v15896_v30, %v7818_v43  ;;  %v7820_v62 = vpop.f32.mrb[41].mxu1 }
 0x65e   :  { %v16034_v25 = vadd.f32 %v15896_v30, %v7820_v62  ;;  %v7822_v48 = vpop.f32.mrb[42].mxu1  ;;  %v11918_v62 = vld [vmem:[%s17175_s5 + $0x8] sm:$0xff]  }
 0x65f   :  { %v17242_v13 = vmax.f32 %v16031_v7, 0.0  ;;  %v16038_v35 = vadd.f32 %v15901_v44, %v7822_v48  ;;  %v7824_v3 = vpop.f32.mrb[43].mxu1  ;;  %11316 = vmatpush3.bf16.msra.mxu0 %v11918_v62  ;;  %v11928_v62 = vld [vmem:[%s17175_s5 + $0x60] sm:$0xff]  }
 0x660   :  { %v17239_v58 = vmax.f32 %v16034_v25, 0.0  ;;  %v16042_v41 = vadd.f32 %v15901_v44, %v7824_v3  ;;  %v16044_v50 = vpop.f32.mrb[44].mxu0  ;;  %v11920_v3 = vld [vmem:[%s17175_s5 + $0x50] sm:$0xff]  }
 0x661   :  { %v17240_v16 = vmax.f32 %v16038_v35, 0.0  ;;  %v16056_v51 = vpop.f32.mrb[45].mxu0  ;;  %11317 = vmatprep.subr.bf16.mxu0 %v11920_v3  ;;  %v11933_v3 = vld [vmem:[%s17175_s5 + $0xe0] sm:$0xff]  }
 0x662   :  { %v11788_v6 = vpack.i.bf16 %v17239_v58, %v17242_v13  ;;  %v17238_v20 = vmax.f32 %v16042_v41, 0.0  ;;  %v16069_v55 = vpop.f32.mrb[46].mxu0 }
 0x663   :  { %v16074_v43 = vpop.f32.mrb[47].mxu0  ;;  %11318 = vmatpush3.bf16.msra.mxu0 %v11922_v42 }
 0x664   :  { %v11793_v48 = vpack.i.bf16 %v17238_v20, %v17240_v16  ;;  %11789 = vrot.lane.b32.xlu0 %v11788_v6, %s12127_s23  ;;  %v11929_v6 = vld [vmem:[%s17175_s5 + $0xd8] sm:$0xff]   ;;  %11319 = vmatprep.subr.bf16.mxu0 %v11924_v37  ;;  %v11936_v16 = vld [vmem:[%s17175_s5 + $0x70] sm:$0xff]   ;;  %v16212_v19 = vadd.f32 %v15901_v44, %v16074_v43 }
 0x665   :  { %11341 = vmatprep.subr.bf16.mxu1 %v11929_v6 }
 0x666   :  { %11794 = vrot.lane.b32.xlu1 %v11793_v48, %s12127_s23  ;;  %v11931_v48 = vld [vmem:[%s17175_s5 + $0x98] sm:$0xff]  }
 0x667   :  { %11320 = vmatpush3.bf16.msra.mxu0 %v11926_v4  ;;  %11342 = vmatpush3.bf16.msra.mxu1 %v11931_v48  ;;  %v11934_v4 = vld [vmem:[%s17175_s5 + $0x28] sm:$0xff]  }
 0x668   :  { %11321 = vmatprep.subr.bf16.mxu0 %v11928_v62  ;;  %11343 = vmatprep.subr.bf16.mxu1 %v11933_v3  ;;  %v11935_v62 = vld [vmem:[%s17175_s5 + $0xa0] sm:$0xff]  }
 0x66b   :  { %11322 = vmatpush3.bf16.msra.mxu0 %v11930_v10  ;;  %11344 = vmatpush3.bf16.msra.mxu1 %v11935_v62  ;;  %v11939_v62 = vld [vmem:[%s17175_s5 + $0xa8] sm:$0xff]  }
 0x66c   :  { %11323 = vmatprep.subr.bf16.mxu0 %v11932_v17  ;;  %11345 = vmatprep.subr.bf16.mxu1 %v11937_v21  ;;  %v11940_v21 = vld [vmem:[%s17175_s5 + $0x78] sm:$0xff]  }
 0x66f   :  { %11324 = vmatpush3.bf16.msra.mxu0 %v11934_v4  ;;  %v11938_v4 = vld [vmem:[%s17175_s5 + $0x30] sm:$0xff]   ;;  %11346 = vmatpush3.bf16.msra.mxu1 %v11939_v62 }
 0x670   :  { %11325 = vmatprep.subr.bf16.mxu0 %v11936_v16  ;;  %11347 = vmatprep.subr.bf16.mxu1 %v11941_v38 }
 0x673   :  { %11326 = vmatpush3.bf16.msra.mxu0 %v11938_v4 }
 0x674   :  { %11327 = vmatprep.subr.bf16.mxu0 %v11940_v21 }
 0x679   :  { %v16124_v42 = vpop.f32.mrb[44].mxu1 }
 0x67a   :  { %v16126_v37 = vpop.f32.mrb[45].mxu1  ;;  %v16260_v12 = vadd.f32 %v15896_v30, %v16124_v42 }
 0x67b   :  { %v16128_v15 = vpop.f32.mrb[46].mxu1  ;;  %v16264_v1 = vadd.f32 %v15896_v30, %v16126_v37 }
 0x67c   :  { %v16130_v6 = vpop.f32.mrb[47].mxu1  ;;  %v7971_v37 = vmax.f32 %v16260_v12, 0.0  ;;  %v11957_v12 = vld [vmem:[%s17175_s5 + $0x1d0] sm:$0xff]  }
 0x680   :  { %v11740_v48 = vpop.permute.xlu0 %11739 }
 0x681   :  { %v11741_v10 = vunpack.i.l.bf16 %v11740_v48  ;;  %v11742_v13 = vunpack.i.h.bf16 %v11740_v48 }
 0x696   :  { %v11745_v3 = vpop.permute.xlu1 %11744 }
 0x697   :  { %v11747_v17 = vunpack.i.h.bf16 %v11745_v3  ;;  %v11746_v20 = vunpack.i.l.bf16 %v11745_v3  ;;  %v11750_v58 = vpop.permute.xlu0 %11749 }
 0x698   :  { %v11752_v23 = vunpack.i.h.bf16 %v11750_v58  ;;  %v11751_v24 = vunpack.i.l.bf16 %v11750_v58 }
 0x699   :  { %v8158_v3 = vsel %vm251_vm9, %v11741_v10, %v11746_v20  ;;  %v8159_v29 = vsel %vm251_vm9, %v11746_v20, %v11747_v17 }
 0x69a   :  { %v16154_v59 = vmax.f32 %v7957_v49, %v8158_v3  ;;  %v8174_v58 = vsel %vm251_vm9, %v11742_v13, %v11752_v23  ;;  %v8160_v48 = vsel %vm251_vm9, %v11747_v17, %v11751_v24  ;;  %v11755_v31 = vpop.permute.xlu1 %11754  ;;  %v16170_v49 = vadd.f32 %v15896_v30, %v16044_v50  ;;  %v11943_v13 = vld [vmem:[%s17175_s5 + $0xb0] sm:$0xff]  }
 0x69b   :  { %v16160_v14 = vmax.f32 %v7973_v52, %v8174_v58  ;;  %v11757_v45 = vunpack.i.h.bf16 %v11755_v31  ;;  %v11756_v10 = vunpack.i.l.bf16 %v11755_v31  ;;  %v16174_v2 = vmax.f32 %v7958_v32, %v8159_v29  ;;  %v11942_v31 = vld [vmem:[%s17175_s5 + $0x38] sm:$0xff]   ;;  %11348 = vmatpush3.bf16.msra.mxu1 %v11943_v13 }
 0x69c   :  { %v16178_v52 = vmax.f32 %v7959_v61, %v8160_v48  ;;  %v16188_v50 = vadd.f32 %v15896_v30, %v16056_v51  ;;  %11328 = vmatpush3.bf16.msra.mxu0 %v11942_v31  ;;  %v16208_v17 = vadd.f32 %v15901_v44, %v16069_v55  ;;  %v11946_v58 = vld [vmem:[%s17175_s5 + $0xb8] sm:$0xff]   ;;  %11349 = vmatprep.subr.bf16.mxu1 %v11944_v60  ;;  %v7969_v33 = vmax.f32 %v16170_v49, 0.0 }
 0x69d   :  { %v8175_v46 = vsel %vm251_vm9, %v11752_v23, %v11756_v10  ;;  %v8176_v32 = vsel %vm251_vm9, %v11756_v10, %v11757_v45  ;;  %v16192_v29 = vpop.permute.xlu0 %11764  ;;  %v11798_v36 = vpack.i.bf16 %v16160_v14, %v16154_v59  ;;  %v16275_v13 = vadd.f32 %v15901_v44, %v16130_v6 }
 0x69e   :  { %v16198_v61 = vmax.f32 %v7974_v63, %v8175_v46  ;;  %v16202_v16 = vmax.f32 %v7975_v0, %v8176_v32  ;;  %v11767_v51 = vunpack.i.h.bf16 %v16192_v29  ;;  %v11766_v23 = vunpack.i.l.bf16 %v16192_v29  ;;  %v11760_v20 = vpop.permute.xlu1 %11759  ;;  %v11945_v0 = vld [vmem:[%s17175_s5 + $0x140] sm:$0xff]  }
 0x69f   :  { %v11762_v63 = vunpack.i.h.bf16 %v11760_v20  ;;  %v11761_v4 = vunpack.i.l.bf16 %v11760_v20  ;;  %11799 = vrot.lane.b32.xlu1 %v11798_v36, %s12137_s18  ;;  %v11803_v3 = vpack.i.bf16 %v16178_v52, %v16174_v2  ;;  %11357 = vmatprep.subr.bf16.mxu0 %v11945_v0  ;;  %v7988_v46 = vmax.f32 %v16275_v13, 0.0  ;;  %v11978_v13 = vld [vmem:[%s17175_s5 + $0x1b8] sm:$0xff]  }
 0x6a0   :  { %v8177_v55 = vsel %vm251_vm9, %v11757_v45, %v11766_v23  ;;  %v8178_v43 = vsel %vm251_vm9, %v11766_v23, %v11767_v51  ;;  %v11808_v62 = vpack.i.bf16 %v16202_v16, %v16198_v61  ;;  %11350 = vmatpush3.bf16.msra.mxu1 %v11946_v58 }
 0x6a1   :  { %v16234_v48 = vmax.f32 %v7976_v40, %v8177_v55  ;;  %v16238_v45 = vmax.f32 %v7977_v5, %v8178_v43  ;;  %v8161_v10 = vsel %vm251_vm9, %v11751_v24, %v11761_v4  ;;  %v8162_v21 = vsel %vm251_vm9, %v11761_v4, %v11762_v63  ;;  %11379 = vmatprep.subr.bf16.mxu1 %v11949_v34 }
 0x6a2   :  { %v16244_v38 = vmax.f32 %v7960_v39, %v8161_v10  ;;  %v16248_v31 = vmax.f32 %v7961_v28, %v8162_v21  ;;  %11809 = vrot.lane.b32.xlu0 %v11808_v62, %s12137_s18  ;;  %v7970_v40 = vmax.f32 %v16188_v50, 0.0  ;;  %v7985_v39 = vmax.f32 %v16208_v17, 0.0 }
 0x6a3   :  { %11804 = vrot.lane.b32.xlu1 %v11803_v3, %s12137_s18  ;;  %v7986_v5 = vmax.f32 %v16212_v19, 0.0  ;;  %v16271_v24 = vadd.f32 %v15901_v44, %v16128_v15  ;;  %v11823_v42 = vpack.i.bf16 %v16238_v45, %v16234_v48  ;;  %v7972_v15 = vmax.f32 %v16264_v1, 0.0 }
 0x6a4   :  { %v11813_v28 = vpack.i.bf16 %v16248_v31, %v16244_v38  ;;  %v11818_v30 = vpack.i.bf16 %v7970_v40, %v7969_v33 }
 0x6a5   :  { %v11828_v44 = vpack.i.bf16 %v7986_v5, %v7985_v39  ;;  %v7987_v6 = vmax.f32 %v16271_v24, 0.0  ;;  %v11833_v32 = vpack.i.bf16 %v7972_v15, %v7971_v37  ;;  %v11959_v24 = vld [vmem:[%s17175_s5 + $0x190] sm:$0xff]  }
 0x6a6   :  { %11814 = vrot.lane.b32.xlu0 %v11813_v28, %s12137_s18 }
 0x6a7   :  { %11824 = vrot.lane.b32.xlu1 %v11823_v42, %s12137_s18  ;;  %v11838_v36 = vpack.i.bf16 %v7988_v46, %v7987_v6  ;;  %v17336_v42 = vmax.f32 %v15960_v11, 0.0  ;;  %v17339_v11 = vmax.f32 %v15994_v57, 0.0 }
 0x6aa   :  { %11819 = vrot.lane.b32.xlu0 %v11818_v30, %s12127_s23 }
 0x6ab   :  { %11829 = vrot.lane.b32.xlu1 %v11828_v44, %s12127_s23 }
 0x6ae   :  { %11834 = vrot.lane.b32.xlu0 %v11833_v32, %s12127_s23 }
 0x6af   :  { %11839 = vrot.lane.b32.xlu1 %v11838_v36, %s12127_s23  ;;  %v17338_v36 = vmax.f32 %v15982_v26, 0.0  ;;  %v17341_v26 = vmax.f32 %v16006_v18, 0.0 }
 0x6b3   :  { %v11770_v23 = vpop.permute.xlu1 %11769 }
 0x6b4   :  { %v11772_v20 = vunpack.i.h.bf16 %v11770_v23  ;;  %v11771_v4 = vunpack.i.l.bf16 %v11770_v23 }
 0x6b5   :  { %v11775_v60 = vpop.permute.xlu0 %11774 }
 0x6b6   :  { %v8163_v0 = vsel %vm251_vm9, %v11762_v63, %v11771_v4  ;;  %v8164_v55 = vsel %vm251_vm9, %v11771_v4, %v11772_v20  ;;  %v11777_v43 = vunpack.i.h.bf16 %v11775_v60  ;;  %v11776_v62 = vunpack.i.l.bf16 %v11775_v60 }
 0x6b7   :  { %v16309_v3 = vmax.f32 %v7962_v56, %v8163_v0  ;;  %v16313_v58 = vmax.f32 %v7963_v53, %v8164_v55  ;;  %v11780_v10 = vpop.permute.xlu1 %11779  ;;  %v17340_v0 = vmax.f32 %v15990_v47, 0.0  ;;  %v17342_v47 = vmov 0.0  }
 0x6b8   :  { %v8179_v21 = vsel %vm251_vm9, %v11767_v51, %v11776_v62  ;;  %v8180_v34 = vsel %vm251_vm9, %v11776_v62, %v11777_v43  ;;  %v11782_v63 = vunpack.i.h.bf16 %v11780_v10  ;;  %v11781_v28 = vunpack.i.l.bf16 %v11780_v10 }
 0x6b9   :  { %v16321_v30 = vmax.f32 %v17336_v42, %v8179_v21  ;;  %v16325_v56 = vmax.f32 %v17337_v54, %v8180_v34  ;;  %v11785_v9 = vpop.permute.xlu0 %11784  ;;  %v11843_v53 = vpack.i.bf16 %v16313_v58, %v16309_v3 }
 0x6ba   :  { %v8165_v29 = vsel %vm251_vm9, %v11772_v20, %v11781_v28  ;;  %v8166_v51 = vsel %vm251_vm9, %v11781_v28, %v11782_v63  ;;  %v11787_v44 = vunpack.i.h.bf16 %v11785_v9  ;;  %v11786_v32 = vunpack.i.l.bf16 %v11785_v9 }
 0x6bb   :  { %v16333_v23 = vmax.f32 %v17338_v36, %v8165_v29  ;;  %v16337_v4 = vmax.f32 %v17339_v11, %v8166_v51  ;;  %11844 = vrot.lane.b32.xlu0 %v11843_v53, %s12137_s18  ;;  %v11848_v27 = vpack.i.bf16 %v16325_v56, %v16321_v30  ;;  %v17343_v53 = vmax.f32 %v16002_v8, 0.0 }
 0x6bc   :  { %v8181_v60 = vsel %vm251_vm9, %v11777_v43, %v11786_v32  ;;  %v8182_v20 = vsel %vm251_vm9, %v11786_v32, %v11787_v44  ;;  %v17344_v51 = vmax.f32 %v16031_v7, 0.0  ;;  %v17345_v11 = vmax.f32 %v16014_v22, 0.0 }
 0x6bd   :  { %v16346_v55 = vmax.f32 %v17340_v0, %v8181_v60  ;;  %v16350_v62 = vmax.f32 %v17341_v26, %v8182_v20  ;;  %11849 = vrot.lane.b32.xlu1 %v11848_v27, %s12137_s18  ;;  %v11853_v57 = vpack.i.bf16 %v16337_v4, %v16333_v23  ;;  %v17346_v60 = vmax.f32 %v16038_v35, 0.0 }
 0x6bf   :  { %11854 = vrot.lane.b32.xlu0 %v11853_v57, %s12137_s18  ;;  %v11858_v43 = vpack.i.bf16 %v16350_v62, %v16346_v55 }
 0x6c1   :  { %11859 = vrot.lane.b32.xlu1 %v11858_v43, %s12137_s18 }
 0x6c3   :  { %11864 = vrot.lane.b32.xlu0 %v17342_v47, %s12127_s23  ;;  %s12156_s23 = smov 19  }
 0x6d6   :  { %v16361_v10 = vpop.permute.xlu0 %11789 }
 0x6d7   :  { %v11792_v18 = vunpack.i.h.bf16 %v16361_v10  ;;  %v11791_v21 = vunpack.i.l.bf16 %v16361_v10 }
 0x6d8   :  { %v16365_v34 = vpop.permute.xlu1 %11794 }
 0x6d9   :  { %v8167_v28 = vsel %vm251_vm9, %v11782_v63, %v11791_v21  ;;  %v8168_v42 = vsel %vm251_vm9, %v11791_v21, %v11792_v18  ;;  %v11797_v54 = vunpack.i.h.bf16 %v16365_v34  ;;  %v11796_v9 = vunpack.i.l.bf16 %v16365_v34 }
 0x6da   :  { %v16373_v29 = vmax.f32 %v17343_v53, %v8167_v28  ;;  %v16377_v32 = vmax.f32 %v17344_v51, %v8168_v42 }
 0x6db   :  { %v8183_v36 = vsel %vm251_vm9, %v11787_v44, %v11796_v9  ;;  %v8184_v63 = vsel %vm251_vm9, %v11796_v9, %v11797_v54 }
 0x6dc   :  { %v16385_v27 = vmax.f32 %v17345_v11, %v8183_v36  ;;  %v16389_v20 = vmax.f32 %v17346_v60, %v8184_v63  ;;  %v11868_v8 = vpack.i.bf16 %v16377_v32, %v16373_v29 }
 0x6de   :  { %11869 = vrot.lane.b32.xlu1 %v11868_v8, %s12137_s18  ;;  %v11873_v7 = vpack.i.bf16 %v16389_v20, %v16385_v27 }
 0x6e0   :  { %11874 = vrot.lane.b32.xlu0 %v11873_v7, %s12137_s18 }
 0x711   :  { %v11800_v44 = vpop.permute.xlu1 %11799 }
 0x712   :  { %v11802_v26 = vunpack.i.h.bf16 %v11800_v44  ;;  %v11801_v10 = vunpack.i.l.bf16 %v11800_v44 }
 0x714   :  { %v11810_v0 = vpop.permute.xlu0 %11809 }
 0x715   :  { %v11812_v22 = vunpack.i.h.bf16 %v11810_v0  ;;  %v11811_v57 = vunpack.i.l.bf16 %v11810_v0  ;;  %v11805_v43 = vpop.permute.xlu1 %11804 }
 0x716   :  { %v11807_v35 = vunpack.i.h.bf16 %v11805_v43  ;;  %v11806_v21 = vunpack.i.l.bf16 %v11805_v43  ;;  %v11947_v43 = vld [vmem:[%s17175_s5 + $0x100] sm:$0xff]  }
 0x717   :  { %v8377_v28 = vsel %vm875_vm4, %v11802_v26, %v11811_v57  ;;  %v8378_v42 = vsel %vm875_vm4, %v11811_v57, %v11812_v22 }
 0x718   :  { %v8441_v9 = vmax.f32 %v16160_v14, %v8377_v28  ;;  %v8361_v53 = vsel %vm875_vm4, %v11801_v10, %v11806_v21  ;;  %v8362_v51 = vsel %vm875_vm4, %v11806_v21, %v11807_v35  ;;  %v16402_v36 = vpop.permute.xlu0 %11814  ;;  %v8442_v63 = vmax.f32 %v16198_v61, %v8378_v42  ;;  %v11948_v42 = vld [vmem:[%s17175_s5 + $0x148] sm:$0xff]  }
 0x719   :  { %v8425_v11 = vmax.f32 %v16154_v59, %v8361_v53  ;;  %v11817_v60 = vunpack.i.h.bf16 %v16402_v36  ;;  %v11816_v8 = vunpack.i.l.bf16 %v16402_v36  ;;  %v16408_v7 = vpop.permute.xlu1 %11824  ;;  %v8426_v44 = vmax.f32 %v16174_v2, %v8362_v51  ;;  %v11975_v36 = vld [vmem:[%s17175_s5 + $0x1b0] sm:$0xff]  }
 0x71a   :  { %v11827_v14 = vunpack.i.h.bf16 %v16408_v7  ;;  %v11826_v0 = vunpack.i.l.bf16 %v16408_v7  ;;  %v11973_v7 = vld [vmem:[%s17175_s5 + $0x1f0] sm:$0xff]  }
 0x71b   :  { %v8363_v26 = vsel %vm875_vm4, %v11807_v35, %v11816_v8  ;;  %v8364_v61 = vsel %vm875_vm4, %v11816_v8, %v11817_v60  ;;  %v8458_v57 = vpack.c.bf16 %v8442_v63, %v8426_v44  ;;  %v8457_v59 = vpack.c.bf16 %v8441_v9, %v8425_v11 }
 0x71c   :  { %v8427_v10 = vmax.f32 %v16178_v52, %v8363_v26  ;;  %v8379_v2 = vsel %vm875_vm4, %v11812_v22, %v11826_v0  ;;  %v8380_v21 = vsel %vm875_vm4, %v11826_v0, %v11827_v14  ;;  %v11820_v28 = vpop.permute.xlu0 %11819  ;;  %v8428_v35 = vmax.f32 %v16244_v38, %v8364_v61  ;;  %v11951_v26 = vld [vmem:[%s17175_s5 + $0x180] sm:$0xff]  }
 0x71d   :  { %v8443_v9 = vmax.f32 %v16202_v16, %v8379_v2  ;;  %v11822_v53 = vunpack.i.h.bf16 %v11820_v28  ;;  %v11821_v51 = vunpack.i.l.bf16 %v11820_v28  ;;  %9009 = vmatprep.mubr.bf16.mxu0 %v8458_v57  ;;  %v11830_v63 = vpop.permute.xlu1 %11829  ;;  %v8444_v52 = vmax.f32 %v16234_v48, %v8380_v21  ;;  %v11950_v16 = vld [vmem:[%s17175_s5 + $0x108] sm:$0xff]  }
 0x71e   :  { %v11832_v22 = vunpack.i.h.bf16 %v11830_v63  ;;  %v11831_v11 = vunpack.i.l.bf16 %v11830_v63  ;;  %9010 = vmatmul.mubr.bf16.vlgmr.msra.gmra.mrb[48].mxu0 %v8457_v59  ;;  %v17347_v48 = vmax.f32 %v16034_v25, 0.0 }
 0x71f   :  { %v8169_v8 = vsel %vm251_vm9, %v11792_v18, %v11821_v51  ;;  %v8170_v44 = vsel %vm251_vm9, %v11821_v51, %v11822_v53  ;;  %11358 = vmatpush3.bf16.msra.mxu0 %v11947_v43  ;;  %v8460_v38 = vpack.c.bf16 %v8444_v52, %v8428_v35  ;;  %v8459_v0 = vpack.c.bf16 %v8443_v9, %v8427_v10  ;;  %v11954_v9 = vld [vmem:[%s17175_s5 + $0x110] sm:$0xff]   ;;  %v11955_v51 = vld [vmem:[%s17175_s5 + $0x188] sm:$0xff]  }
 0x720   :  { %v16441_v61 = vmax.f32 %v17347_v48, %v8169_v8  ;;  %v16445_v18 = vmax.f32 %v7969_v33, %v8170_v44  ;;  %v8185_v57 = vsel %vm251_vm9, %v11797_v54, %v11831_v11  ;;  %v8186_v59 = vsel %vm251_vm9, %v11831_v11, %v11832_v22  ;;  %v16451_v43 = vpop.permute.xlu0 %11834  ;;  %11359 = vmatprep.subr.bf16.mxu0 %v11948_v42  ;;  %v11952_v54 = vld [vmem:[%s17175_s5 + $0x150] sm:$0xff]   ;;  %v11956_v8 = vld [vmem:[%s17175_s5 + $0x158] sm:$0xff]   ;;  %v11962_v44 = vld [vmem:[%s17175_s5 + $0x120] sm:$0xff]  }
 0x721   :  { %v17348_v10 = vmax.f32 %v16042_v41, 0.0  ;;  %v16459_v25 = vmax.f32 %v7985_v39, %v8186_v59  ;;  %v11837_v49 = vunpack.i.h.bf16 %v16451_v43  ;;  %v11836_v33 = vunpack.i.l.bf16 %v16451_v43  ;;  %9050 = vmatprep.mubr.bf16.mxu1 %v8460_v38  ;;  %v16463_v34 = vpop.permute.xlu1 %11839  ;;  %v11953_v41 = vld [vmem:[%s17175_s5 + $0x1c8] sm:$0xff]   ;;  %v11963_v38 = vld [vmem:[%s17175_s5 + $0x198] sm:$0xff]  }
 0x722   :  { %v11842_v21 = vunpack.i.h.bf16 %v16463_v34  ;;  %v11841_v17 = vunpack.i.l.bf16 %v16463_v34  ;;  %9051 = vmatmul.mubr.bf16.vlgmr.msra.gmra.mrb[48].mxu1 %v8459_v0  ;;  %v11878_v39 = vpack.i.bf16 %v16445_v18, %v16441_v61  ;;  %v11964_v0 = vld [vmem:[%s17175_s5 + $0x168] sm:$0xff]   ;;  %v11977_v34 = vld [vmem:[%s17175_s5 + $0x40] sm:$0xff]  }
 0x723   :  { %v16455_v2 = vmax.f32 %v17348_v10, %v8185_v57  ;;  %v8171_v28 = vsel %vm251_vm9, %v11822_v53, %v11836_v33  ;;  %v8172_v35 = vsel %vm251_vm9, %v11836_v33, %v11837_v49  ;;  %11360 = vmatpush3.bf16.msra.mxu0 %v11950_v16  ;;  %11380 = vmatpush3.bf16.msra.mxu1 %v11951_v26  ;;  %v11965_v16 = vld [vmem:[%s17175_s5 + $0x1e0] sm:$0xff]   ;;  %v11966_v10 = vld [vmem:[%s17175_s5 + $0x128] sm:$0xff]  }
 0x724   :  { %v16489_v53 = vmax.f32 %v7970_v40, %v8171_v28  ;;  %v16493_v63 = vmax.f32 %v7971_v37, %v8172_v35  ;;  %v8187_v52 = vsel %vm251_vm9, %v11832_v22, %v11841_v17  ;;  %v8188_v11 = vsel %vm251_vm9, %v11841_v17, %v11842_v21  ;;  %11879 = vrot.lane.b32.xlu1 %v11878_v39, %s12137_s18  ;;  %v11961_v22 = vld [vmem:[%s17175_s5 + $0x1d8] sm:$0xff]   ;;  %v11967_v33 = vld [vmem:[%s17175_s5 + $0x1a0] sm:$0xff]   ;;  %v11968_v39 = vld [vmem:[%s17175_s5 + $0x170] sm:$0xff]  }
 0x725   :  { %v11883_v42 = vpack.i.bf16 %v16459_v25, %v16455_v2  ;;  %v16505_v50 = vmax.f32 %v7986_v5, %v8187_v52  ;;  %v16509_v40 = vmax.f32 %v7987_v6, %v8188_v11  ;;  %11361 = vmatprep.subr.bf16.mxu0 %v11952_v54  ;;  %11381 = vmatprep.subr.bf16.mxu1 %v11953_v41  ;;  %v11958_v5 = vld [vmem:[%s17175_s5 + $0x118] sm:$0xff]   ;;  %v11960_v6 = vld [vmem:[%s17175_s5 + $0x160] sm:$0xff]   ;;  %v11969_v28 = vld [vmem:[%s17175_s5 + $0x1e8] sm:$0xff]  }
 0x726   :  { %v11888_v37 = vpack.i.bf16 %v16493_v63, %v16489_v53  ;;  %v11970_v11 = vld [vmem:[%s17175_s5 + $0x130] sm:$0xff]  }
 0x727   :  { %11884 = vrot.lane.b32.xlu0 %v11883_v42, %s12137_s18  ;;  %11362 = vmatpush3.bf16.msra.mxu0 %v11954_v9  ;;  %v11898_v19 = vpack.i.bf16 %v16509_v40, %v16505_v50 }
 0x728   :  { %11382 = vmatpush3.bf16.msra.mxu1 %v11955_v51  ;;  %11889 = vrot.lane.b32.xlu1 %v11888_v37, %s12137_s18 }
 0x729   :  { %11363 = vmatprep.subr.bf16.mxu0 %v11956_v8  ;;  %11383 = vmatprep.subr.bf16.mxu1 %v11957_v12  ;;  %v11971_v8 = vld [vmem:[%s17175_s5 + $0x1a8] sm:$0xff]  }
 0x72b   :  { %11899 = vrot.lane.b32.xlu0 %v11898_v19, %s12137_s18  ;;  %11364 = vmatpush3.bf16.msra.mxu0 %v11958_v5 }
 0x72c   :  { %11384 = vmatpush3.bf16.msra.mxu1 %v11959_v24  ;;  %11365 = vmatprep.subr.bf16.mxu0 %v11960_v6 }
 0x72d   :  { %11385 = vmatprep.subr.bf16.mxu1 %v11961_v22  ;;  %v16545_v26 = vpop.permute.xlu0 %11844 }
 0x72e   :  { %v11847_v48 = vunpack.i.h.bf16 %v16545_v26  ;;  %v11846_v57 = vunpack.i.l.bf16 %v16545_v26  ;;  %v11974_v26 = vld [vmem:[%s17175_s5 + $0x138] sm:$0xff]  }
 0x72f   :  { %11366 = vmatpush3.bf16.msra.mxu0 %v11962_v44  ;;  %v11850_v59 = vpop.permute.xlu1 %11849 }
 0x730   :  { %11386 = vmatpush3.bf16.msra.mxu1 %v11963_v38  ;;  %v8366_v54 = vsel %vm875_vm4, %v11846_v57, %v11847_v48  ;;  %v11852_v41 = vunpack.i.h.bf16 %v11850_v59  ;;  %v11851_v17 = vunpack.i.l.bf16 %v11850_v59  ;;  %11367 = vmatprep.subr.bf16.mxu0 %v11964_v0 }
 0x731   :  { %11387 = vmatprep.subr.bf16.mxu1 %v11965_v16  ;;  %v16562_v35 = vpop.permute.xlu0 %11854  ;;  %v8430_v12 = vmax.f32 %v16309_v3, %v8366_v54  ;;  %v11972_v3 = vld [vmem:[%s17175_s5 + $0x178] sm:$0xff]  }
 0x732   :  { %v8382_v42 = vsel %vm875_vm4, %v11851_v17, %v11852_v41  ;;  %v11857_v9 = vunpack.i.h.bf16 %v16562_v35  ;;  %v11856_v51 = vunpack.i.l.bf16 %v16562_v35  ;;  %v8381_v19 = vsel %vm875_vm4, %v11827_v14, %v11851_v17  ;;  %v11976_v54 = vld [vmem:[%s17175_s5 + $0x1f8] sm:$0xff]   ;;  %v12017_v35 = vld [vmem:[%s17175_s5 + $0xb0] sm:$0xff]  }
 0x733   :  { %11368 = vmatpush3.bf16.msra.mxu0 %v11966_v10  ;;  %v16567_v52 = vpop.permute.xlu1 %11859  ;;  %v8446_v37 = vmax.f32 %v16321_v30, %v8382_v42  ;;  %v8365_v14 = vsel %vm875_vm4, %v11817_v60, %v11846_v57  ;;  %v8445_v16 = vmax.f32 %v16238_v45, %v8381_v19  ;;  %v11995_v42 = vld [vmem:[%s17175_s5 + $0x80] sm:$0xff]   ;;  %v12000_v19 = vld [vmem:[%s17175_s5 + $0xd0] sm:$0xff]  }
 0x734   :  { %11388 = vmatpush3.bf16.msra.mxu1 %v11967_v33  ;;  %v8368_v5 = vsel %vm875_vm4, %v11856_v51, %v11857_v9  ;;  %v11862_v24 = vunpack.i.h.bf16 %v16567_v52  ;;  %v11861_v6 = vunpack.i.l.bf16 %v16567_v52  ;;  %11369 = vmatprep.subr.bf16.mxu0 %v11968_v39  ;;  %v8367_v17 = vsel %vm875_vm4, %v11847_v48, %v11856_v51  ;;  %v11980_v48 = vld [vmem:[%s17175_s5 + $0x48] sm:$0xff]   ;;  %v11994_v39 = vld [vmem:[%s17175_s5 + $0xc0] sm:$0xff]  }
 0x735   :  { %11389 = vmatprep.subr.bf16.mxu1 %v11969_v28  ;;  %v11865_v22 = vpop.permute.xlu0 %11864  ;;  %v8462_v30 = vpack.c.bf16 %v8446_v37, %v8430_v12  ;;  %v8432_v60 = vmax.f32 %v16333_v23, %v8368_v5  ;;  %v8431_v28 = vmax.f32 %v16313_v58, %v8367_v17  ;;  %v11996_v58 = vld [vmem:[%s17175_s5 + $0xc8] sm:$0xff]   ;;  %v11984_v37 = vld [vmem:[%s17175_s5 + $0x58] sm:$0xff]  }
 0x736   :  { %v8384_v44 = vsel %vm875_vm4, %v11861_v6, %v11862_v24  ;;  %v11867_v38 = vunpack.i.h.bf16 %v11865_v22  ;;  %v11866_v0 = vunpack.i.l.bf16 %v11865_v22  ;;  %v8383_v23 = vsel %vm875_vm4, %v11852_v41, %v11861_v6  ;;  %v11997_v12 = vld [vmem:[%s17175_s5 + $0x88] sm:$0xff]   ;;  %v11985_v5 = vld [vmem:[%s17175_s5 + $0x18] sm:$0xff]   ;;  %v12001_v6 = vld [vmem:[%s17175_s5 + $0x90] sm:$0xff]  }
 0x737   :  { %11370 = vmatpush3.bf16.msra.mxu0 %v11970_v11  ;;  %v8448_v57 = vmax.f32 %v16346_v55, %v8384_v44  ;;  %9091 = vmatprep.mubr.bf16.mxu0 %v8462_v30  ;;  %v11982_v11 = vld [vmem:[%s17175_s5 + $0x50] sm:$0xff]   ;;  %v12004_v22 = vld [vmem:[%s17175_s5 + $0xd8] sm:$0xff]   ;;  %v11987_v30 = vld [vmem:[%s17175_s5 + $0x20] sm:$0xff]  }
 0x738   :  { %11390 = vmatpush3.bf16.msra.mxu1 %v11971_v8  ;;  %v8257_v59 = vmax.f32 %v11867_v38, 0.0  ;;  %v8173_v10 = vsel %vm251_vm9, %v11837_v49, %v11866_v0  ;;  %v8256_v45 = vmax.f32 %v11866_v0, 0.0  ;;  %v8189_v33 = vsel %vm251_vm9, %v11842_v21, %v11867_v38  ;;  %11371 = vmatprep.subr.bf16.mxu0 %v11972_v3  ;;  %v11983_v8 = vld [vmem:[%s17175_s5 + $0x10] sm:$0xff]   ;;  %v11986_v3 = vld [vmem:[%s17175_s5 + $0x60] sm:$0xff]   ;;  %v11989_v38 = vld [vmem:[%s17175_s5 + $0x28] sm:$0xff]  }
 0x739   :  { %v16618_v55 = vmax.f32 %v7972_v15, %v8173_v10  ;;  %v16622_v43 = vmax.f32 %v7988_v46, %v8189_v33  ;;  %11391 = vmatprep.subr.bf16.mxu1 %v11973_v7  ;;  %v8464_v49 = vpack.c.bf16 %v8448_v57, %v8432_v60  ;;  %v8429_v21 = vmax.f32 %v16248_v31, %v8365_v14  ;;  %v11979_v15 = vld [vmem:[%s17175_s5] sm:$0xff]   ;;  %v12005_v7 = vld [vmem:[%s17175_s5 + $0x98] sm:$0xff]   ;;  %v11988_v14 = vld [vmem:[%s17175_s5 + $0x68] sm:$0xff]  }
 0x73a   :  { %v8447_v46 = vmax.f32 %v16325_v56, %v8383_v23  ;;  %v11981_v56 = vld [vmem:[%s17175_s5 + $0x8] sm:$0xff]   ;;  %v12008_v44 = vld [vmem:[%s17175_s5 + $0xe0] sm:$0xff]   ;;  %v11991_v10 = vld [vmem:[%s17175_s5 + $0x30] sm:$0xff]   ;;  %vm9156_vm9 = vcmask 401608  }
 0x73b   :  { %v11893_v41 = vpack.i.bf16 %v8256_v45, %v16618_v55  ;;  %v11903_v1 = vpack.i.bf16 %v8257_v59, %v16622_v43  ;;  %11372 = vmatpush3.bf16.msra.mxu0 %v11974_v26  ;;  %9132 = vmatprep.mubr.bf16.mxu1 %v8464_v49  ;;  %v8461_v31 = vpack.c.bf16 %v8445_v16, %v8429_v21  ;;  %v12009_v0 = vld [vmem:[%s17175_s5 + $0xa0] sm:$0xff]   ;;  %v11990_v16 = vld [vmem:[%s17175_s5 + $0x70] sm:$0xff]   ;;  %v12012_v26 = vld [vmem:[%s17175_s5 + $0xe8] sm:$0xff]  }
 0x73c   :  { %11392 = vmatpush3.bf16.msra.mxu1 %v11975_v36  ;;  %11401 = vmatprep.subr.bf16.mxu0 %v11977_v34  ;;  %v8463_v51 = vpack.c.bf16 %v8447_v46, %v8431_v28  ;;  %v12013_v45 = vld [vmem:[%s17175_s5 + $0xa8] sm:$0xff]   ;;  %v11992_v49 = vld [vmem:[%s17175_s5 + $0x78] sm:$0xff]   ;;  %v12016_v34 = vld [vmem:[%s17175_s5 + $0xf0] sm:$0xff]  }
 0x73d   :  { %11393 = vmatprep.subr.bf16.mxu1 %v11976_v54  ;;  %11894 = vrot.lane.b32.xlu1 %v11893_v41, %s12137_s18  ;;  %v12006_v28 = vld [vmem:[%s17175_s5 + $0x150] sm:$0xff]  }
 0x73e   :  { %9092 = vmatmul.mubr.bf16.vlgmr.msra.gmra.mrb[52].mxu0 %v8461_v31  ;;  %11904 = vrot.lane.b32.xlu0 %v11903_v1, %s12137_s18  ;;  %v11993_v1 = vld [vmem:[%s17175_s5 + $0x38] sm:$0xff]   ;;  %v12002_v31 = vld [vmem:[%s17175_s5 + $0x148] sm:$0xff]   ;;  %s12155_s18 = smov 47  }
 0x73f   :  { %11402 = vmatpush3.bf16.msra.mxu0 %v11979_v15 }
 0x740   :  { %11394 = vmatpush3.bf16.msra.mxu1 %v11978_v13  ;;  %11403 = vmatprep.subr.bf16.mxu0 %v11980_v48  ;;  %v12021_v48 = vld [vmem:[%s17175_s5 + $0xb8] sm:$0xff]  }
 0x741   :  { %11423 = vmatprep.subr.bf16.mxu1 %v11994_v39  ;;  %v12003_v39 = vld [vmem:[%s17175_s5 + $0x108] sm:$0xff]  }
 0x743   :  { %9133 = vmatmul.mubr.bf16.vlgmr.msra.gmra.mrb[52].mxu1 %v8463_v51  ;;  %11404 = vmatpush3.bf16.msra.mxu0 %v11981_v56  ;;  %v12007_v56 = vld [vmem:[%s17175_s5 + $0x110] sm:$0xff]   ;;  %v12011_v51 = vld [vmem:[%s17175_s5 + $0x118] sm:$0xff]  }
 0x744   :  { %11424 = vmatpush3.bf16.msra.mxu1 %v11995_v42  ;;  %11405 = vmatprep.subr.bf16.mxu0 %v11982_v11  ;;  %v12010_v42 = vld [vmem:[%s17175_s5 + $0x158] sm:$0xff]   ;;  %v12014_v11 = vld [vmem:[%s17175_s5 + $0x160] sm:$0xff]  }
 0x745   :  { %11425 = vmatprep.subr.bf16.mxu1 %v11996_v58  ;;  %v12015_v58 = vld [vmem:[%s17175_s5 + $0x120] sm:$0xff]  }
 0x747   :  { %11406 = vmatpush3.bf16.msra.mxu0 %v11983_v8  ;;  %v12018_v8 = vld [vmem:[%s17175_s5 + $0x168] sm:$0xff]  }
 0x748   :  { %11426 = vmatpush3.bf16.msra.mxu1 %v11997_v12  ;;  %11407 = vmatprep.subr.bf16.mxu0 %v11984_v37  ;;  %v12019_v12 = vld [vmem:[%s17175_s5 + $0x128] sm:$0xff]   ;;  %v12022_v37 = vld [vmem:[%s17175_s5 + $0x170] sm:$0xff]  }
 0x749   :  { %11427 = vmatprep.subr.bf16.mxu1 %v12000_v19  ;;  %v12023_v19 = vld [vmem:[%s17175_s5 + $0x130] sm:$0xff]  }
 0x74b   :  { %11408 = vmatpush3.bf16.msra.mxu0 %v11985_v5  ;;  %v12025_v5 = vld [vmem:[%s17175_s5 + $0x178] sm:$0xff]  }
 0x74c   :  { %11428 = vmatpush3.bf16.msra.mxu1 %v12001_v6  ;;  %11409 = vmatprep.subr.bf16.mxu0 %v11986_v3  ;;  %v12027_v6 = vld [vmem:[%s17175_s5 + $0x138] sm:$0xff]  }
 0x74d   :  { %11429 = vmatprep.subr.bf16.mxu1 %v12004_v22 }
 0x74f   :  { %11410 = vmatpush3.bf16.msra.mxu0 %v11987_v30 }
 0x750   :  { %11430 = vmatpush3.bf16.msra.mxu1 %v12005_v7  ;;  %11411 = vmatprep.subr.bf16.mxu0 %v11988_v14  ;;  %v16707_v36 = vpop.permute.xlu1 %11869 }
 0x751   :  { %11431 = vmatprep.subr.bf16.mxu1 %v12008_v44  ;;  %v11872_v60 = vunpack.i.h.bf16 %v16707_v36  ;;  %v11871_v57 = vunpack.i.l.bf16 %v16707_v36 }
 0x752   :  { %v16711_v59 = vpop.permute.xlu0 %11874 }
 0x753   :  { %11412 = vmatpush3.bf16.msra.mxu0 %v11989_v38  ;;  %v8370_v33 = vsel %vm875_vm4, %v11871_v57, %v11872_v60  ;;  %v11877_v54 = vunpack.i.h.bf16 %v16711_v59  ;;  %v11876_v23 = vunpack.i.l.bf16 %v16711_v59  ;;  %v8369_v41 = vsel %vm875_vm4, %v11857_v9, %v11871_v57 }
 0x754   :  { %11432 = vmatpush3.bf16.msra.mxu1 %v12009_v0  ;;  %11413 = vmatprep.subr.bf16.mxu0 %v11990_v16  ;;  %v8434_v13 = vmax.f32 %v16373_v29, %v8370_v33  ;;  %v12020_v29 = vld [vmem:[%s17175_s5 + $0xf8] sm:$0xff]  }
 0x755   :  { %11433 = vmatprep.subr.bf16.mxu1 %v12012_v26  ;;  %v8385_v21 = vsel %vm875_vm4, %v11862_v24, %v11876_v23  ;;  %v8386_v17 = vsel %vm875_vm4, %v11876_v23, %v11877_v54  ;;  %v11998_v24 = vld [vmem:[%s17175_s5 + $0x140] sm:$0xff]  }
 0x756   :  { %v8450_v15 = vmax.f32 %v16385_v27, %v8386_v17  ;;  %v8449_v52 = vmax.f32 %v16350_v62, %v8385_v21  ;;  %v8433_v27 = vmax.f32 %v16337_v4, %v8369_v41  ;;  %v11999_v62 = vld [vmem:[%s17175_s5 + $0x100] sm:$0xff]  }
 0x757   :  { %11414 = vmatpush3.bf16.msra.mxu0 %v11991_v10  ;;  %v12024_v4 = vld [vmem:[%s17175_s5 + $0x1c0] sm:$0xff]  }
 0x758   :  { %11434 = vmatpush3.bf16.msra.mxu1 %v12013_v45  ;;  %11415 = vmatprep.subr.bf16.mxu0 %v11992_v49  ;;  %v9286_v9 = vpack.c.bf16 %v8450_v15, %v8434_v13  ;;  %v9285_v46 = vpack.c.bf16 %v8449_v52, %v8433_v27  ;;  %v12026_v41 = vld [vmem:[%s17175_s5 + $0x180] sm:$0xff]   ;;  %v12028_v13 = vld [vmem:[%s17175_s5 + $0x1c8] sm:$0xff]  }
 0x759   :  { %11435 = vmatprep.subr.bf16.mxu1 %v12016_v34  ;;  %v12035_v27 = vld [vmem:[%s17175_s5 + $0x1a0] sm:$0xff]  }
 0x75a   :  { %9837 = vmatprep.mubr.bf16.mxu0 %v9286_v9  ;;  %v12033_v9 = vld [vmem:[%s17175_s5 + $0x198] sm:$0xff]  }
 0x75b   :  { %11416 = vmatpush3.bf16.msra.mxu0 %v11993_v1 }
 0x75c   :  { %11445 = vmatprep.subr.bf16.mxu0 %v11998_v24  ;;  %11436 = vmatpush3.bf16.msra.mxu1 %v12017_v35  ;;  %v12030_v35 = vld [vmem:[%s17175_s5 + $0x1d0] sm:$0xff]  }
 0x75d   :  { %11437 = vmatprep.subr.bf16.mxu1 %v12020_v29  ;;  %v12034_v29 = vld [vmem:[%s17175_s5 + $0x1e0] sm:$0xff]  }
 0x75e   :  { %9838 = vmatmul.mubr.bf16.vlgmr.msra.gmra.mrb[56].mxu0 %v9285_v46  ;;  %v12036_v46 = vld [vmem:[%s17175_s5 + $0x1e8] sm:$0xff]  }
 0x75f   :  { %11446 = vmatpush3.bf16.msra.mxu0 %v11999_v62 }
 0x760   :  { %11447 = vmatprep.subr.bf16.mxu0 %v12002_v31  ;;  %11438 = vmatpush3.bf16.msra.mxu1 %v12021_v48 }
 0x761   :  { %11467 = vmatprep.subr.bf16.mxu1 %v12024_v4 }
 0x763   :  { %11448 = vmatpush3.bf16.msra.mxu0 %v12003_v39 }
 0x764   :  { %11449 = vmatprep.subr.bf16.mxu0 %v12006_v28 }
 0x767   :  { %11450 = vmatpush3.bf16.msra.mxu0 %v12007_v56 }
 0x768   :  { %11451 = vmatprep.subr.bf16.mxu0 %v12010_v42  ;;  %v12037_v42 = vld [vmem:[%s17175_s5 + $0x1a8] sm:$0xff]  }
 0x76b   :  { %11452 = vmatpush3.bf16.msra.mxu0 %v12011_v51 }
 0x76c   :  { %11453 = vmatprep.subr.bf16.mxu0 %v12014_v11  ;;  %v12038_v11 = vld [vmem:[%s17175_s5 + $0x1f0] sm:$0xff]  }
 0x76f   :  { %11454 = vmatpush3.bf16.msra.mxu0 %v12015_v58 }
 0x770   :  { %11455 = vmatprep.subr.bf16.mxu0 %v12018_v8 }
 0x773   :  { %11456 = vmatpush3.bf16.msra.mxu0 %v12019_v12 }
 0x774   :  { %11457 = vmatprep.subr.bf16.mxu0 %v12022_v37  ;;  %v12039_v37 = vld [vmem:[%s17175_s5 + $0x1b0] sm:$0xff]  }
 0x777   :  { %11458 = vmatpush3.bf16.msra.mxu0 %v12023_v19  ;;  %v12040_v19 = vld [vmem:[%s17175_s5 + $0x1f8] sm:$0xff]  }
 0x778   :  { %11459 = vmatprep.subr.bf16.mxu0 %v12025_v5 }
 0x77b   :  { %11460 = vmatpush3.bf16.msra.mxu0 %v12027_v6 }
 0x796   :  { %v11880_v3 = vpop.permute.xlu1 %11879 }
 0x797   :  { %v11882_v22 = vunpack.i.h.bf16 %v11880_v3  ;;  %v11881_v30 = vunpack.i.l.bf16 %v11880_v3 }
 0x799   :  { %v11885_v7 = vpop.permute.xlu0 %11884  ;;  %v8371_v14 = vsel %vm875_vm4, %v11872_v60, %v11881_v30  ;;  %v8372_v44 = vsel %vm875_vm4, %v11881_v30, %v11882_v22  ;;  %v16883_v30 = vld [vmem:[#allocation5 + $0x40] sm:$0xff] }
 0x79a   :  { %v11887_v38 = vunpack.i.h.bf16 %v11885_v7  ;;  %v11886_v0 = vunpack.i.l.bf16 %v11885_v7  ;;  %v8435_v16 = vmax.f32 %v16377_v32, %v8371_v14  ;;  %v16811_v26 = vpop.permute.xlu1 %11889  ;;  %v8436_v57 = vmax.f32 %v16441_v61, %v8372_v44 }
 0x79b   :  { %v11892_v36 = vunpack.i.h.bf16 %v16811_v26  ;;  %v11891_v60 = vunpack.i.l.bf16 %v16811_v26 }
 0x79c   :  { %v8387_v10 = vsel %vm875_vm4, %v11877_v54, %v11886_v0  ;;  %v8388_v45 = vsel %vm875_vm4, %v11886_v0, %v11887_v38 }
 0x79d   :  { %v8451_v33 = vmax.f32 %v16389_v20, %v8387_v10  ;;  %v11900_v23 = vpop.permute.xlu0 %11899  ;;  %v8452_v49 = vmax.f32 %v16455_v2, %v8388_v45  ;;  %v8373_v32 = vsel %vm875_vm4, %v11882_v22, %v11891_v60  ;;  %v8374_v34 = vsel %vm875_vm4, %v11891_v60, %v11892_v36 }
 0x79e   :  { %v11902_v61 = vunpack.i.h.bf16 %v11900_v23  ;;  %v11901_v21 = vunpack.i.l.bf16 %v11900_v23  ;;  %v8437_v59 = vmax.f32 %v16445_v18, %v8373_v32  ;;  %v8438_v1 = vmax.f32 %v16489_v53, %v8374_v34  ;;  %v12029_v53 = vld [vmem:[%s17175_s5 + $0x188] sm:$0xff]  }
 0x79f   :  { %v9288_v54 = vpack.c.bf16 %v8452_v49, %v8436_v57  ;;  %v9287_v17 = vpack.c.bf16 %v8451_v33, %v8435_v16  ;;  %v12145_v33 = vmov 1983009808   ;;  %v9147_v49 = vlaneseq }
 0x7a0   :  { %v8389_v20 = vsel %vm875_vm4, %v11887_v38, %v11901_v21  ;;  %v8390_v2 = vsel %vm875_vm4, %v11901_v21, %v11902_v61  ;;  %v9145_v23 = vunpack.c.l.s4 %v12145_v33 }
 0x7a1   :  { %v8453_v15 = vmax.f32 %v16459_v25, %v8389_v20  ;;  %9878 = vmatprep.mubr.bf16.mxu1 %v9288_v54  ;;  %v8454_v18 = vmax.f32 %v16505_v50, %v8390_v2  ;;  %v12031_v25 = vld [vmem:[%s17175_s5 + $0x190] sm:$0xff]   ;;  %v12032_v50 = vld [vmem:[%s17175_s5 + $0x1d8] sm:$0xff]   ;;  %v9148_v54 = vshrl.u32 %v9147_v49, 7 }
 0x7a2   :  { %9879 = vmatmul.mubr.bf16.vlgmr.msra.gmra.mrb[56].mxu1 %v9287_v17 }
 0x7a3   :  { %11468 = vmatpush3.bf16.msra.mxu1 %v12026_v41  ;;  %v9290_v52 = vpack.c.bf16 %v8454_v18, %v8438_v1  ;;  %v9289_v24 = vpack.c.bf16 %v8453_v15, %v8437_v59  ;;  %v9146_v59 = vunpack.c.0.s8 %v9145_v23 }
 0x7a4   :  { %11469 = vmatprep.subr.bf16.mxu1 %v12028_v13 }
 0x7a5   :  { %9919 = vmatprep.mubr.bf16.mxu0 %v9290_v52  ;;  %v16886_v18 = vsub.s32 %v9146_v59, %v9148_v54 }
 0x7a6   :  { %9920 = vmatmul.mubr.bf16.vlgmr.msra.gmra.mrb[60].mxu0 %v9289_v24 }
 0x7a7   :  { %11470 = vmatpush3.bf16.msra.mxu1 %v12029_v53 }
 0x7a8   :  { %11471 = vmatprep.subr.bf16.mxu1 %v12030_v35 }
 0x7ab   :  { %11472 = vmatpush3.bf16.msra.mxu1 %v12031_v25 }
 0x7ac   :  { %11473 = vmatprep.subr.bf16.mxu1 %v12032_v50 }
 0x7af   :  { %11474 = vmatpush3.bf16.msra.mxu1 %v12033_v9  ;;  %v11895_v62 = vpop.permute.xlu1 %11894 }
 0x7b0   :  { %11475 = vmatprep.subr.bf16.mxu1 %v12034_v29  ;;  %v11897_v31 = vunpack.i.h.bf16 %v11895_v62  ;;  %v11896_v48 = vunpack.i.l.bf16 %v11895_v62  ;;  %v11905_v4 = vpop.permute.xlu0 %11904 }
 0x7b1   :  { %v11907_v39 = vunpack.i.h.bf16 %v11905_v4  ;;  %v11906_v28 = vunpack.i.l.bf16 %v11905_v4 }
 0x7b2   :  { %v8376_v56 = vsel %vm875_vm4, %v11896_v48, %v11897_v31  ;;  %v8375_v5 = vsel %vm875_vm4, %v11892_v36, %v11896_v48 }
 0x7b3   :  { %11476 = vmatpush3.bf16.msra.mxu1 %v12035_v27  ;;  %v8392_v51 = vsel %vm875_vm4, %v11906_v28, %v11907_v39  ;;  %v8440_v58 = vmax.f32 %v16618_v55, %v8376_v56  ;;  %v8391_v6 = vsel %vm875_vm4, %v11902_v61, %v11906_v28  ;;  %v12041_v55 = vld [vmem:[%s17175_s5 + $0x1b8] sm:$0xff]   ;;  %s12146_s5 = smov 25   ;;  %vm9182_vm4 = vcmask 1016608  }
 0x7b4   :  { %11477 = vmatprep.subr.bf16.mxu1 %v12036_v46  ;;  %v8456_v8 = vmax.f32 %v16622_v43, %v8392_v51  ;;  %v8439_v43 = vmax.f32 %v16493_v63, %v8375_v5  ;;  %v8455_v3 = vmax.f32 %v16509_v40, %v8391_v6 }
 0x7b6   :  { %v9292_v12 = vpack.c.bf16 %v8456_v8, %v8440_v58  ;;  %v9291_v22 = vpack.c.bf16 %v8455_v3, %v8439_v43 }
 0x7b7   :  { %11478 = vmatpush3.bf16.msra.mxu1 %v12037_v42 }
 0x7b8   :  { %11479 = vmatprep.subr.bf16.mxu1 %v12038_v11  ;;  %9960 = vmatprep.mubr.bf16.mxu1 %v9292_v12 }
 0x7bb   :  { %11480 = vmatpush3.bf16.msra.mxu1 %v12039_v37 }
 0x7bc   :  { %11481 = vmatprep.subr.bf16.mxu1 %v12040_v19 }
 0x7bf   :  { %11482 = vmatpush3.bf16.msra.mxu1 %v12041_v55 }
 0x7c0   :  { %10366 = vmatprep.subr.bf16.mxu1 %v16883_v30 }
 0x7c2   :  { %9961 = vmatmul.mubr.bf16.vlgmr.msra.gmra.mrb[60].mxu1 %v9291_v22 }
 0x7f1   :  { %v11329_v7 = vpop.f32.mrb[48].mxu0 }
 0x7f2   :  { %v11330_v14 = vpop.f32.mrb[49].mxu0 }
 0x7f3   :  { %v11331_v44 = vadd.f32 %v11330_v14, %v11329_v7  ;;  %v11332_v38 = vpop.f32.mrb[50].mxu0 }
 0x7f4   :  { %v11333_v0 = vpop.f32.mrb[51].mxu0 }
 0x7f5   :  { %v11334_v16 = vadd.f32 %v11333_v0, %v11332_v38  ;;  %v11351_v26 = vpop.f32.mrb[48].mxu1 }
 0x7f6   :  { %v11352_v57 = vpop.f32.mrb[49].mxu1 }
 0x7f7   :  { %v11353_v10 = vadd.f32 %v11352_v57, %v11351_v26  ;;  %v11354_v63 = vpop.f32.mrb[50].mxu1 }
 0x7f8   :  { %v11355_v45 = vpop.f32.mrb[51].mxu1 }
 0x7f9   :  { %v9053_v40 = vadd.f32 %v11353_v10, %v11331_v44  ;;  %v11356_v36 = vadd.f32 %v11355_v45, %v11354_v63 }
 0x7fb   :  { %v9056_v60 = vadd.f32 %v11356_v36, %v11334_v16 }
 0x811   :  { %v11373_v32 = vpop.f32.mrb[52].mxu0 }
 0x812   :  { %v11374_v34 = vpop.f32.mrb[53].mxu0 }
 0x813   :  { %v11375_v61 = vadd.f32 %v11374_v34, %v11373_v32  ;;  %v11376_v21 = vpop.f32.mrb[54].mxu0 }
 0x814   :  { %v11377_v17 = vpop.f32.mrb[55].mxu0 }
 0x815   :  { %v9094_v41 = vadd.f32 %v11375_v61, %v9053_v40  ;;  %v11378_v1 = vadd.f32 %v11377_v17, %v11376_v21 }
 0x816   :  { %v11395_v20 = vpop.f32.mrb[52].mxu1 }
 0x817   :  { %v11396_v2 = vpop.f32.mrb[53].mxu1  ;;  %v9097_v13 = vadd.f32 %v11378_v1, %v9056_v60 }
 0x818   :  { %v11397_v15 = vadd.f32 %v11396_v2, %v11395_v20  ;;  %v11398_v52 = vpop.f32.mrb[54].mxu1 }
 0x819   :  { %v11399_v24 = vpop.f32.mrb[55].mxu1 }
 0x81a   :  { %v9135_v53 = vadd.f32 %v11397_v15, %v9094_v41  ;;  %v11400_v35 = vadd.f32 %v11399_v24, %v11398_v52 }
 0x81c   :  { %v9150_v25 = vrot.slane %v9135_v53, %v16886_v18  ;;  %v9171_v50 = vcombine.high %v9135_v53, %v9135_v53  ;;  %v9138_v9 = vadd.f32 %v11400_v35, %v9097_v13  ;;  %9142 = vst.msk [vmem:[#allocation7] sm:$0x1] %vm9141_vm2, %v9135_v53 }
 0x81e   :  { %v9178_v29 = vrot.slane %v9171_v50, %v16886_v18  ;;  %v9247_v27 = vcombine.high %v9138_v9, %v9138_v9  ;;  %v11180_v62 = vrot.slane %v9150_v25, 9  ;;  %v9216_v46 = vrot.slane %v9138_v9, %v16886_v18 }
 0x81f   :  { %v9158_v4 = vcombine.high %v9150_v25, %v9150_v25 }
 0x820   :  { %v16893_v31 = vrot.slane %v9247_v27, %v16886_v18  ;;  %9153 = vrot.lane.b32.xlu1 %v11180_v62, %s12146_s5  ;;  %v11182_v48 = vrot.slane %v9178_v29, 9  ;;  %v9229_v39 = vcombine.high %v9216_v46, %v9216_v46  ;;  %v9196_v11 = vcombine.high %v9178_v29, %v9178_v29 }
 0x821   :  { %v11181_v42 = vrot.slane %v9158_v4, 9  ;;  %v11184_v5 = vrot.slane %v9216_v46, 9 }
 0x822   :  { %9186 = vrot.lane.b32.xlu0 %v11182_v48, %s12128_s24  ;;  %v16900_v28 = vcombine.high %v16893_v31, %v16893_v31  ;;  %v11183_v6 = vrot.slane %v9196_v11, 9  ;;  %v11185_v55 = vrot.slane %v9229_v39, 9  ;;  %v11186_v48 = vrot.slane %v16893_v31, 9 }
 0x824   :  { %9159 = vrot.lane.b32.xlu1 %v9158_v4, %s12147_s0  ;;  %v11187_v56 = vrot.slane %v16900_v28, 9 }
 0x826   :  { %9230 = vrot.lane.b32.xlu0 %v9229_v39, %s12143_s1 }
 0x828   :  { %9179 = vrot.lane.b32.xlu1 %v9178_v29, %s12148_s2 }
 0x82a   :  { %9275 = vrot.lane.b32.xlu0 %v11187_v56, %s12149_s30  ;;  %v12042_v56 = vld [vmem:[%s17176_s6 + $0x80] sm:$0xff]  }
 0x82b   :  { %10367 = vmatpush1.bf16.msra.mxu1 %v12042_v56 }
 0x82c   :  { %9217 = vrot.lane.b32.xlu1 %v9216_v46, %s12150_s29  ;;  %10368 = vmatprep.subr.bf16.mxu1 %v16883_v30 }
 0x830   :  { %9166 = vrot.lane.b32.xlu1 %v11181_v42, %s12151_s17 }
 0x831   :  { %v11417_v51 = vpop.f32.mrb[56].mxu0 }
 0x832   :  { %v11418_v58 = vpop.f32.mrb[57].mxu0 }
 0x833   :  { %v11419_v8 = vadd.f32 %v11418_v58, %v11417_v51  ;;  %v11420_v12 = vpop.f32.mrb[58].mxu0  ;;  %v12043_v58 = vld [vmem:[%s17176_s6 + $0x40] sm:$0xff]  }
 0x834   :  { %9197 = vrot.lane.b32.xlu1 %v9196_v11, %s12152_s21  ;;  %v11421_v37 = vpop.f32.mrb[59].mxu0  ;;  %11489 = vmatprep.subr.bf16.mxu0 %v12043_v58 }
 0x835   :  { %v11422_v19 = vadd.f32 %v11421_v37, %v11420_v12  ;;  %v12046_v37 = vld [vmem:[%s17176_s6 + $0x48] sm:$0xff]  }
 0x838   :  { %9224 = vrot.lane.b32.xlu1 %v11184_v5, %s12153_s28  ;;  %v12047_v5 = vld [vmem:[%s17176_s6 + $0x8] sm:$0xff]  }
 0x83c   :  { %9255 = vrot.lane.b32.xlu1 %v16893_v31, %s12154_s22  ;;  %v12044_v31 = vld [vmem:[%s17176_s6] sm:$0xff]  }
 0x83d   :  { %11490 = vmatpush3.bf16.msra.mxu0 %v12044_v31 }
 0x83e   :  { %11491 = vmatprep.subr.bf16.mxu0 %v12046_v37 }
 0x840   :  { %9204 = vrot.lane.b32.xlu1 %v11183_v6, %s12155_s18  ;;  %v12048_v6 = vld [vmem:[%s17176_s6 + $0x90] sm:$0xff]  }
 0x841   :  { %11492 = vmatpush3.bf16.msra.mxu0 %v12047_v5  ;;  %v12068_v5 = vld [vmem:[%s17178_s8] sm:$0xff]  }
 0x844   :  { %9242 = vrot.lane.b32.xlu1 %v11185_v55, %s12156_s23 }
 0x875   :  { %v11439_v43 = vpop.f32.mrb[56].mxu1 }
 0x876   :  { %v11440_v3 = vpop.f32.mrb[57].mxu1 }
 0x877   :  { %v11441_v22 = vadd.f32 %v11440_v3, %v11439_v43  ;;  %v11442_v7 = vpop.f32.mrb[58].mxu1 }
 0x878   :  { %v11443_v14 = vpop.f32.mrb[59].mxu1 }
 0x879   :  { %v9881_v44 = vadd.f32 %v11441_v22, %v11419_v8  ;;  %v11444_v38 = vadd.f32 %v11443_v14, %v11442_v7  ;;  %v11461_v0 = vpop.f32.mrb[60].mxu0  ;;  %v12045_v8 = vld [vmem:[%s17176_s6 + $0x88] sm:$0xff]   ;;  %v12049_v22 = vld [vmem:[%s17176_s6 + $0x50] sm:$0xff]   ;;  %v12051_v14 = vld [vmem:[%s17176_s6 + $0x98] sm:$0xff]  }
 0x87a   :  { %v11462_v16 = vpop.f32.mrb[61].mxu0  ;;  %10369 = vmatpush1.bf16.msra.mxu1 %v12045_v8  ;;  %v12050_v7 = vld [vmem:[%s17176_s6 + $0x10] sm:$0xff]   ;;  %11493 = vmatprep.subr.bf16.mxu0 %v12049_v22  ;;  %v12071_v22 = vld [vmem:[%s17178_s8 + $0x18] sm:$0xff]  }
 0x87b   :  { %v9884_v26 = vadd.f32 %v11444_v38, %v11422_v19  ;;  %v11463_v57 = vadd.f32 %v11462_v16, %v11461_v0  ;;  %v11464_v10 = vpop.f32.mrb[62].mxu0  ;;  %10370 = vmatprep.subr.bf16.mxu1 %v16883_v30  ;;  %11494 = vmatpush3.bf16.msra.mxu0 %v12050_v7  ;;  %v12052_v38 = vld [vmem:[%s17176_s6 + $0x58] sm:$0xff]   ;;  %v12054_v16 = vld [vmem:[%s17176_s6 + $0xa0] sm:$0xff]  }
 0x87c   :  { %v11465_v63 = vpop.f32.mrb[63].mxu0  ;;  %v12053_v0 = vld [vmem:[%s17176_s6 + $0x18] sm:$0xff]   ;;  %11495 = vmatprep.subr.bf16.mxu0 %v12052_v38  ;;  %v12072_v7 = vld [vmem:[%s17178_s8 + $0x20] sm:$0xff]  }
 0x87d   :  { %v9922_v45 = vadd.f32 %v11463_v57, %v9881_v44  ;;  %v11466_v40 = vadd.f32 %v11465_v63, %v11464_v10  ;;  %v12055_v57 = vld [vmem:[%s17176_s6 + $0x60] sm:$0xff]   ;;  %v12057_v63 = vld [vmem:[%s17176_s6 + $0xa8] sm:$0xff]   ;;  %v12075_v38 = vld [vmem:[%s17178_s8 + $0x38] ss:$0 sps:$4 sm:$0xff]  }
 0x87e   :  { %10371 = vmatpush1.bf16.msra.mxu1 %v12048_v6  ;;  %v12056_v10 = vld [vmem:[%s17176_s6 + $0x20] sm:$0xff]  }
 0x87f   :  { %v9925_v36 = vadd.f32 %v11466_v40, %v9884_v26  ;;  %10372 = vmatprep.subr.bf16.mxu1 %v16883_v30  ;;  %11496 = vmatpush3.bf16.msra.mxu0 %v12053_v0  ;;  %v12059_v40 = vld [vmem:[%s17176_s6 + $0x28] sm:$0xff]  }
 0x880   :  { %11497 = vmatprep.subr.bf16.mxu0 %v12055_v57  ;;  %v12078_v57 = vld [vmem:[%s17180_s10 + $0x10] sm:$0xff]  }
 0x882   :  { %10373 = vmatpush1.bf16.msra.mxu1 %v12051_v14  ;;  %v12073_v14 = vld [vmem:[%s17178_s8 + $0x28] sm:$0xff]  }
 0x883   :  { %10374 = vmatprep.subr.bf16.mxu1 %v16883_v30  ;;  %11498 = vmatpush3.bf16.msra.mxu0 %v12056_v10  ;;  %v12079_v10 = vld [vmem:[%s17180_s10 + $0x18] sm:$0xff]  }
 0x886   :  { %10375 = vmatpush1.bf16.msra.mxu1 %v12054_v16  ;;  %v12076_v16 = vld [vmem:[%s17180_s10] sm:$0xff]  }
 0x887   :  { %10376 = vmatprep.subr.bf16.mxu1 %v16883_v30 }
 0x88a   :  { %10377 = vmatpush1.bf16.msra.mxu1 %v12057_v63 }
 0x88b   :  { %10378 = vmatprep.subr.bf16.mxu1 %v16883_v30 }
 0x892   :  { %v9154_v60 = vpop.permute.xlu1 %9153 }
 0x893   :  { %9157 = vst.msk [vmem:[#allocation7] sm:$0x1] %vm9156_vm9, %v9154_v60 }
 0x894   :  { %v9187_v20 = vpop.permute.xlu0 %9186 }
 0x895   :  { %v11483_v33 = vpop.f32.mrb[60].mxu1  ;;  %v9188_v53 = vrot.slane %v9187_v20, 6 }
 0x896   :  { %v11484_v23 = vpop.f32.mrb[61].mxu1  ;;  %v9160_v49 = vpop.permute.xlu1 %9159 }
 0x897   :  { %v11485_v32 = vadd.f32 %v11484_v23, %v11483_v33  ;;  %9163 = vst.msk [vmem:[#allocation7] sm:$0x1] %vm9162_vm11, %v9160_v49  ;;  %v11486_v34 = vpop.f32.mrb[62].mxu1  ;;  %v9190_v29 = vsel %vm329_vm10, %v9188_v53, %v9187_v20  ;;  %v12061_v33 = vld [vmem:[%s17176_s6 + $0x70] sm:$0xff]  }
 0x898   :  { %v11487_v61 = vpop.f32.mrb[63].mxu1  ;;  %v9231_v42 = vpop.permute.xlu0 %9230  ;;  %v12060_v23 = vld [vmem:[%s17176_s6 + $0xb0] sm:$0xff]  }
 0x899   :  { %v9963_v21 = vadd.f32 %v11485_v32, %v9922_v45  ;;  %v11488_v59 = vadd.f32 %v11487_v61, %v11486_v34  ;;  %v9232_v12 = vrot.slane %v9231_v42, 6  ;;  %v12058_v45 = vld [vmem:[%s17176_s6 + $0x68] sm:$0xff]   ;;  %v12062_v49 = vld [vmem:[%s17176_s6 + $0x30] sm:$0xff]   ;;  %v12064_v34 = vld [vmem:[%s17176_s6 + $0x78] sm:$0xff]   ;;  %10379 = vmatpush1.bf16.msra.mxu1 %v12060_v23 }
 0x89a   :  { %v9180_v54 = vpop.permute.xlu1 %9179  ;;  %11499 = vmatprep.subr.bf16.mxu0 %v12058_v45  ;;  %v12063_v61 = vld [vmem:[%s17176_s6 + $0xb8] sm:$0xff]   ;;  %10380 = vmatprep.subr.bf16.mxu1 %v16883_v30 }
 0x89b   :  { %v9977_v17 = vrot.slane %v9963_v21, %v16886_v18  ;;  %v9995_v41 = vcombine.high %v9963_v21, %v9963_v21  ;;  %9969 = vst.msk [vmem:[#allocation7 + $0x1] sm:$0x1] %vm9141_vm2, %v9963_v21  ;;  %v9966_v1 = vadd.f32 %v11488_v59, %v9925_v36  ;;  %vm9220_vm2 = vcmask 787008   ;;  %11500 = vmatpush3.bf16.msra.mxu0 %v12059_v40  ;;  %v12065_v21 = vld [vmem:[%s17176_s6 + $0x38] sm:$0xff]   ;;  %v12067_v59 = vld [vmem:[%s17176_s6 + $0xc0] sm:$0xff]  }
 0x89c   :  { %v9234_v55 = vsel %vm17255_vm8, %v9232_v12, %v9231_v42  ;;  %11501 = vmatprep.subr.bf16.mxu0 %v12061_v33  ;;  %v11260_v40 = vld [vmem:[%s17177_s7] ss:$0 sm:$0xff] }
 0x89d   :  { %v10057_v2 = vcombine.high %v9966_v1, %v9966_v1  ;;  %v9984_v13 = vcombine.high %v9977_v17, %v9977_v17  ;;  %v11252_v52 = vrot.slane %v9977_v17, 9  ;;  %v10002_v24 = vrot.slane %v9995_v41, %v16886_v18  ;;  %10381 = vmatpush1.bf16.msra.mxu1 %v12063_v61 }
 0x89e   :  { %v9218_v15 = vpop.permute.xlu1 %9217  ;;  %v16937_v62 = vrot.slane %v9966_v1, %v16886_v18  ;;  %10382 = vmatprep.subr.bf16.mxu1 %v16883_v30 }
 0x89f   :  { %9985 = vrot.lane.b32.xlu1 %v9984_v13, %s12147_s0  ;;  %9980 = vrot.lane.b32.xlu0 %v11252_v52, %s12146_s5  ;;  %v16922_v35 = vrot.slane %v10057_v2, %v16886_v18  ;;  %v10015_v25 = vcombine.high %v10002_v24, %v10002_v24  ;;  %v11254_v39 = vrot.slane %v10002_v24, 9  ;;  %v11253_v11 = vrot.slane %v9984_v13, 9 }
 0x8a0   :  { %v10044_v3 = vcombine.high %v16937_v62, %v16937_v62  ;;  %v11256_v44 = vrot.slane %v16937_v62, 9  ;;  %11502 = vmatpush3.bf16.msra.mxu0 %v12062_v49 }
 0x8a1   :  { %v11255_v27 = vrot.slane %v10015_v25, 9  ;;  %v11258_v36 = vrot.slane %v16922_v35, 9  ;;  %v10075_v60 = vcombine.high %v16922_v35, %v16922_v35  ;;  %11503 = vmatprep.subr.bf16.mxu0 %v12064_v34  ;;  %10383 = vmatpush1.bf16.msra.mxu1 %v12067_v59 }
 0x8a2   :  { %v9167_v50 = vpop.permute.xlu1 %9166  ;;  %v11257_v26 = vrot.slane %v10044_v3, 9  ;;  %11547 = vmatprep.subr.bf16.mxu1 %v17342_v47 }
 0x8a3   :  { %9170 = vst.msk [vmem:[#allocation7] sm:$0x1] %vm9169_vm3, %v9167_v50  ;;  %10065 = vrot.lane.b32.xlu1 %v16922_v35, %s12154_s22  ;;  %10003 = vrot.lane.b32.xlu0 %v10002_v24, %s12148_s2  ;;  %v11259_v32 = vrot.slane %v10075_v60, 9 }
 0x8a4   :  { %9183 = vst.msk [vmem:[#allocation7] sm:$0x1] %vm9182_vm4, %v9180_v54  ;;  %11504 = vmatpush3.bf16.msra.mxu0 %v12065_v21  ;;  %v9276_v54 = vpop.permute.xlu0 %9275 }
 0x8a5   :  { %9195 = vst.msk [vmem:[#allocation7] sm:$0x5] %vm16924_vm5, %v9190_v29  ;;  %11527 = vmatprep.subr.bf16.mxu0 %v17342_v47 }
 0x8a6   :  { %v9198_v46 = vpop.permute.xlu1 %9197 }
 0x8a7   :  { %9201 = vst.msk [vmem:[#allocation7 + $0x2] sm:$0x1] %vm9200_vm6, %v9198_v46  ;;  %10022 = vrot.lane.b32.xlu1 %v11255_v27, %s12155_s18  ;;  %10034 = vrot.lane.b32.xlu0 %v16937_v62, %s12150_s29 }
 0x8aa   :  { %v9225_v4 = vpop.permute.xlu1 %9224 }
 0x8ab   :  { %9262 = vrot.lane.b32.xlu1 %v11186_v48, %s12157_s15  ;;  %10009 = vrot.lane.b32.xlu0 %v11254_v39, %s12128_s24 }
 0x8ae   :  { %v9256_v51 = vpop.permute.xlu1 %9255 }
 0x8af   :  { %9268 = vrot.lane.b32.xlu1 %v16900_v28, %s12134_s14  ;;  %9991 = vrot.lane.b32.xlu0 %v11253_v11, %s12151_s17 }
 0x8b2   :  { %v9205_v28 = vpop.permute.xlu1 %9204 }
 0x8b3   :  { %9208 = vst.msk [vmem:[#allocation7 + $0x2] sm:$0x1] %vm9207_vm7, %v9205_v28  ;;  %10016 = vrot.lane.b32.xlu0 %v10015_v25, %s12152_s21 }
 0x8b4   :  { %9221 = vst.msk [vmem:[#allocation7 + $0x2] sm:$0x1] %vm9220_vm2, %v9218_v15  ;;  %v9277_v15 = vrot.slane %v9276_v54, 6 }
 0x8b5   :  { %9228 = vst.msk [vmem:[#allocation7 + $0x2] sm:$0x1] %vm17254_vm12, %v9225_v4  ;;  %vm9271_vm12 = vcmask 967408  }
 0x8b6   :  { %v9243_v43 = vpop.permute.xlu1 %9242  ;;  %9239 = vst.msk [vmem:[#allocation7 + $0x2] sm:$0x5] %vm16966_vm13, %v9234_v55 }
 0x8b7   :  { %9246 = vst.msk [vmem:[#allocation7 + $0x4] sm:$0x1] %vm17253_vm14, %v9243_v43  ;;  %10045 = vrot.lane.b32.xlu0 %v10044_v3, %s12143_s1  ;;  %vm9278_vm14 = vcmask 973824   ;;  %v12069_v3 = vld [vmem:[%s17178_s8 + $0x8] sm:$0xff]  }
 0x8b8   :  { %9259 = vst.msk [vmem:[#allocation7 + $0x4] sm:$0x1] %vm17252_vm15, %v9256_v51  ;;  %vm9282_vm15 = vcmask 124930   ;;  %v9279_v25 = vsel %vm9278_vm14, %v9277_v15, %v9276_v54 }
 0x8b9   :  { %vm17062_vm8 = vmor %vm9282_vm15, %vm9281_vm0  ;;  %vm17355_vm0 = vcmask 998400  }
 0x8bb   :  { %10040 = vrot.lane.b32.xlu0 %v11256_v44, %s12153_s28  ;;  %v12074_v44 = vld [vmem:[%s17178_s8 + $0x30] sm:$0xff]  }
 0x8bf   :  { %10053 = vrot.lane.b32.xlu0 %v11257_v26, %s12156_s23  ;;  %v12077_v26 = vld [vmem:[%s17180_s10 + $0x8] sm:$0xff]  }
 0x8c3   :  { %10071 = vrot.lane.b32.xlu0 %v11258_v36, %s12157_s15 }
 0x8c7   :  { %10082 = vrot.lane.b32.xlu0 %v11259_v32, %s12149_s30 }
 0x8cb   :  { %10076 = vrot.lane.b32.xlu0 %v10075_v60, %s12134_s14 }
 0x911   :  { %v9986_v17 = vpop.permute.xlu1 %9985  ;;  %v9981_v41 = vpop.permute.xlu0 %9980 }
 0x912   :  { %9983 = vst.msk [vmem:[#allocation7 + $0x1] sm:$0x1] %vm9156_vm9, %v9981_v41  ;;  %vm17356_vm9 = vcmask 992008   ;;  %v12081_v41 = vld [vmem:[%s17180_s10 + $0x28] ss:$0 sps:$4 sm:$0x33]  }
 0x913   :  { %9988 = vst.msk [vmem:[#allocation7 + $0x1] sm:$0x1] %vm9162_vm11, %v9986_v17  ;;  %vm17358_vm11 = vcmask 557408   ;;  %v12080_v17 = vld [vmem:[%s17180_s10 + $0x20] sm:$0xff]   ;;  %s12159_s10 = smov [#allocation8]  }
 0x914   :  { %s10631_s2 = sshll.u32 %s12159_s10, 4  ;;  %s10632_s2 = int_to_ptr.vmem [resolvable:$true] %s10631_s2 }
 0x915   :  { %v10066_v1 = vpop.permute.xlu1 %10065  ;;  %v10004_v20 = vpop.permute.xlu0 %10003  ;;  %p12100_p1 = scmp.lt.s32.totalorder %s10632_s2, %s10632_s2 }
 0x919   :  { %v10023_v30 = vpop.permute.xlu1 %10022  ;;  %v10035_v2 = vpop.permute.xlu0 %10034 }
 0x91d   :  { %v9263_v13 = vpop.permute.xlu1 %9262  ;;  %v10010_v52 = vpop.permute.xlu0 %10009 }
 0x91e   :  { %9266 = vst.msk [vmem:[#allocation7 + $0x4] sm:$0x1] %vm9265_vm1, %v9263_v13  ;;  %v10011_v24 = vrot.slane %v10010_v52, 6 }
 0x920   :  { %v10012_v29 = vsel %vm329_vm10, %v10011_v24, %v10010_v52  ;;  %vm17357_vm10 = vcmask 352408  }
 0x921   :  { %v9269_v35 = vpop.permute.xlu1 %9268  ;;  %v9992_v50 = vpop.permute.xlu0 %9991 }
 0x922   :  { %9272 = vst.msk [vmem:[#allocation7 + $0x4] sm:$0x1] %vm9271_vm12, %v9269_v35 }
 0x923   :  { %9284 = vst.msk [vmem:[#allocation7 + $0x4] sm:$0x5] %vm17062_vm8, %v9279_v25 }
 0x924   :  { %9994 = vst.msk [vmem:[#allocation7 + $0x1] sm:$0x1] %vm9169_vm3, %v9992_v50  ;;  %vm12158_vm3 = vmmov 0  }
 0x925   :  { %10006 = vst.msk [vmem:[#allocation7 + $0x1] sm:$0x1] %vm9182_vm4, %v10004_v20  ;;  %v10017_v27 = vpop.permute.xlu0 %10016  ;;  %vm17360_vm4 = vcmask 982016   ;;  %v11287_v20 = vld [vmem:[%s17179_s9] ss:$0 sm:$0xff]  ;;  %s12095_s9 = scalar_lea.vmem %s10632_s2, 32 }
 0x926   :  { %10014 = vst.msk [vmem:[#allocation7 + $0x1] sm:$0x5] %vm16924_vm5, %v10012_v29  ;;  %vm10579_vm5 = vcmask 1041408   ;;  %p12096_p0 = scmp.ne.s32.totalorder %s10632_s2, %s12095_s9  ;;  %p12101_p2 = scmp.lt.s32.totalorder %s12095_s9, %s12095_s9 }
 0x927   :  { %10019 = vst.msk [vmem:[#allocation7 + $0x3] sm:$0x1] %vm9200_vm6, %v10017_v27  ;;  %vm10575_vm6 = vcmask 687104  }
 0x928   :  { %10025 = vst.msk [vmem:[#allocation7 + $0x3] sm:$0x1] %vm9207_vm7, %v10023_v30  ;;  %vm10623_vm7 = vcmask 74752   ;;  %p12102_p3 = por %p12101_p2, %p12100_p1 }
 0x929   :  { %10037 = vst.msk [vmem:[#allocation7 + $0x3] sm:$0x1] %vm9220_vm2, %v10035_v2  ;;  %v10046_v62 = vpop.permute.xlu0 %10045 }
 0x92a   :  { %v10047_v46 = vrot.slane %v10046_v62, 6  ;;  %p12103_p4 = pnand %p12102_p3, %p12096_p0 }
 0x92c   :  { %v10048_v4 = vsel %vm17355_vm0, %v10047_v46, %v10046_v62 }
 0x92d   :  { %v10041_v48 = vpop.permute.xlu0 %10040 }
 0x92e   :  { %10043 = vst.msk [vmem:[#allocation7 + $0x3] sm:$0x1] %vm17356_vm9, %v10041_v48 }
 0x92f   :  { %10050 = vst.msk [vmem:[#allocation7 + $0x3] sm:$0x5] %vm16966_vm13, %v10048_v4 }
 0x931   :  { %v10054_v39 = vpop.permute.xlu0 %10053 }
 0x932   :  { %10056 = vst.msk [vmem:[#allocation7 + $0x5] sm:$0x1] %vm17357_vm10, %v10054_v39 }
 0x933   :  { %10068 = vst.msk [vmem:[#allocation7 + $0x5] sm:$0x1] %vm17358_vm11, %v10066_v1  ;;  %v10581_v1 = vsel %vm10579_vm5, %v12081_v41, 0 }
 0x935   :  { %v10072_v9 = vpop.permute.xlu0 %10071 }
 0x936   :  { %10074 = vst.msk [vmem:[#allocation7 + $0x5] sm:$0x1] %vm9265_vm1, %v10072_v9 }
 0x939   :  { %v10083_v56 = vpop.permute.xlu0 %10082 }
 0x93a   :  { %v10084_v42 = vrot.slane %v10083_v56, 6 }
 0x93c   :  { %v10085_v11 = vsel %vm9278_vm14, %v10084_v42, %v10083_v56  ;;  %vm10322_vm14 = vcmask 130048  }
 0x93d   :  { %v10077_v51 = vpop.permute.xlu0 %10076 }
 0x93e   :  { %10079 = vst.msk [vmem:[#allocation7 + $0x5] sm:$0x1] %vm9271_vm12, %v10077_v51 }
 0x93f   :  { %10087 = vst.msk [vmem:[#allocation7 + $0x5] sm:$0x5] %vm17062_vm8, %v10085_v11  ;;  %vm17359_vm8 = vcmask 1043456  }
 0x940   :  { %v10480_v0 = vsel %vm17359_vm8, %v12075_v38, 0 }
 0x946   :  { %v10088_v58 = vld [vmem:[#allocation7] sm:$0xff] }
 0x947   :  { %v10090_v31 = vcombine.high %v10088_v58, %v10088_v58  ;;  %v10097_v8 = vrot.slane %v10088_v58, %v16886_v18 }
 0x949   :  { %v10105_v12 = vcombine.high %v10097_v8, %v10097_v8  ;;  %v10104_v28 = vrot.slane %v10090_v31, %v16886_v18  ;;  %v10111_v6 = vpack.c.bf16 %v10097_v8, %v10097_v8  ;;  %v12070_v18 = vld [vmem:[%s17178_s8 + $0x10] sm:$0xff]  }
 0x94b   :  { %v10112_v37 = vpack.c.bf16 %v10105_v12, %v10105_v12  ;;  %v10106_v19 = vcombine.high %v10104_v28, %v10104_v28  ;;  %v10113_v43 = vpack.c.bf16 %v10104_v28, %v10104_v28 }
 0x94d   :  { %10358 = vmatprep.mubr.bf16.mxu0 %v10112_v37  ;;  %v10114_v55 = vpack.c.bf16 %v10106_v19, %v10106_v19 }
 0x94e   :  { %10359 = vmatmul.mubr.bf16.vlgmr.msra.gmra.mrb[64].mxu0 %v10111_v6 }
 0x94f   :  { %11286 = vmatprep.mubr.msk.bf16.mxu1 %vm10322_vm14, %v10114_v55  ;;  %11528 = vmatpush3.bf16.msra.mxu0 %v12068_v5 }
 0x950   :  { %10399 = vmatmul.mubr.bf16.vlgmr.msra.gmra.mrb[64].mxu1 %v10113_v43  ;;  %11529 = vmatprep.subr.bf16.mxu0 %v17342_v47 }
 0x951   :  { %11543 = vmatprep.mubr.msk.bf16.mxu0 %vm12158_vm3, %v17342_v47  ;;  %11559 = vmatprep.mubr.msk.bf16.mxu1 %vm12158_vm3, %v17342_v47 }
 0x952   :  { %11548 = vmatpush3.bf16.msra.mxu1 %v12076_v16 }
 0x953   :  { %11530 = vmatpush3.bf16.msra.mxu0 %v12069_v3  ;;  %11549 = vmatprep.subr.bf16.mxu1 %v17342_v47 }
 0x954   :  { %11531 = vmatprep.subr.bf16.mxu0 %v17342_v47 }
 0x956   :  { %11550 = vmatpush3.bf16.msra.mxu1 %v12077_v26 }
 0x957   :  { %11532 = vmatpush3.bf16.msra.mxu0 %v12070_v18  ;;  %11551 = vmatprep.subr.bf16.mxu1 %v17342_v47 }
 0x958   :  { %11533 = vmatprep.subr.bf16.mxu0 %v17342_v47 }
 0x95a   :  { %11552 = vmatpush3.bf16.msra.mxu1 %v12078_v57 }
 0x95b   :  { %11534 = vmatpush3.bf16.msra.mxu0 %v12071_v22  ;;  %11553 = vmatprep.subr.bf16.mxu1 %v17342_v47 }
 0x95c   :  { %11535 = vmatprep.subr.bf16.mxu0 %v17342_v47 }
 0x95e   :  { %11554 = vmatpush3.bf16.msra.mxu1 %v12079_v10 }
 0x95f   :  { %11536 = vmatpush3.bf16.msra.mxu0 %v12072_v7  ;;  %11555 = vmatprep.subr.bf16.mxu1 %v17342_v47 }
 0x960   :  { %11537 = vmatprep.subr.bf16.mxu0 %v17342_v47 }
 0x962   :  { %11556 = vmatpush3.bf16.msra.mxu1 %v12080_v17 }
 0x963   :  { %11538 = vmatpush3.bf16.msra.mxu0 %v12073_v14  ;;  %11557 = vmatprep.subr.bf16.mxu1 %v17342_v47 }
 0x964   :  { %11539 = vmatprep.subr.bf16.mxu0 %v17342_v47 }
 0x966   :  { %11558 = vmatpush3.bf16.msra.mxu1 %v10581_v1 }
 0x967   :  { %11540 = vmatpush3.bf16.msra.mxu0 %v12074_v44 }
 0x968   :  { %11541 = vmatprep.subr.bf16.mxu0 %v17342_v47  ;;  %v11297_v47 = vld [vmem:[%s17181_s11] ss:$0 sm:$0xff] }
 0x96b   :  { %11542 = vmatpush3.bf16.msra.mxu0 %v10480_v0 }
 0xa21   :  { %v11505_v63 = vpop.f32.mrb[64].mxu0 }
 0xa22   :  { %v11506_v45 = vpop.f32.mrb[65].mxu0 }
 0xa23   :  { %v11507_v36 = vadd.f32 %v11506_v45, %v11505_v63  ;;  %v11508_v60 = vpop.f32.mrb[66].mxu0  ;;  %v10400_v33 = vpop.f32.mrb[64].mxu1 }
 0xa24   :  { %v11509_v23 = vpop.f32.mrb[67].mxu0  ;;  %v10402_v49 = vpop.f32.mrb[65].mxu1 }
 0xa25   :  { %v10361_v32 = vadd.f32 %v11507_v36, %v11260_v40  ;;  %v10403_v34 = vpop.f32.mrb[66].mxu1 }
 0xa26   :  { %v10404_v61 = vpop.f32.mrb[67].mxu1 }
 0xa27   :  { %v10401_v21 = vadd.f32 %v10400_v33, %v10361_v32 }
 0xa29   :  { %v10406_v59 = vmax.f32 %v10401_v21, 0.0 }
 0xa2b   :  { %v10407_v54 = vpack.c.bf16 %v10406_v59, %v10406_v59 }
 0xa2d   :  { %11544 = vmatmul.mubr.msk.bf16.vlgmr.msra.gmra.mrb[68].mxu0 %vm17360_vm4, %v10407_v54 }
 0xb00   :  { %v10516_v30 = vpop.f32.mrb[68].mxu0 }
 0xb01   :  { %v10517_v2 = vadd.f32 %v11287_v20, %v10516_v30  ;;  %v11545_v13 = vpop.f32.mrb[69].mxu0 }
 0xb02   :  { %v10519_v15 = vpop.f32.mrb[70].mxu0 }
 0xb03   :  { %v10522_v52 = vmax.f32 %v10517_v2, 0.0  ;;  %v11546_v24 = vpop.f32.mrb[71].mxu0 }
 0xb05   :  { %v10523_v53 = vpack.c.bf16 %v10522_v52, %v10522_v52 }
 0xb07   :  { %11560 = vmatmul.mubr.msk.bf16.vlgmr.msra.gmra.mrb[68].mxu1 %vm10575_vm6, %v10523_v53 }
 0xbda   :  { %v10617_v35 = vpop.f32.mrb[68].mxu1 }
 0xbdb   :  { %v10618_v25 = vadd.f32 %v11297_v47, %v10617_v35  ;;  %v11561_v50 = vpop.f32.mrb[69].mxu1 }
 0xbdc   :  { %v10620_v29 = vpop.f32.mrb[70].mxu1 }
 0xbdd   :  { %v11562_v27 = vpop.f32.mrb[71].mxu1  ;;  %10624 = vst.msk [vmem:[#allocation8] sm:$0x3] %vm10623_vm7, %v10618_v25 }
 0xbde   :  { %12106 = shalt.err (!%p12103_p4)
}
 0xbdf   :  { %s12107_s11 = scalar_lea.hbm %s17182_s12, 32 }
 0xbe0   :  { %p12108_p5 = scmp.ne.s32.totalorder %s17182_s12, %s12107_s11  ;;  %p12111_p6 = scmp.lt.u32.totalorder %s12107_s11, %s17182_s12 }
 0xbe2   :  { %p12113_p7 = pnand %p12111_p6, %p12108_p5 }
 0xbe4   :  { %12116 = shalt.err (!%p12113_p7)
}
 0xbe5   :  { %10634 = dma.vmem_to_hbm [thread:$0]  %s10632_s2, 32, %s17182_s12, [#allocation9]  }
 0xbe6   :  { %12117 = dma.done.wait [#allocation9], 32  }
 0xbe7   :  { %12118 = vsyncadd [#allocation9], 4294967264 }
 0xbe8   :  { %10638 = vsyncpa [#allocation9], 1 }

</bundles_post_ra>
